<compile_context>
chip_gen: v7x
topology: tpu7x:2x2x1
jax: 0.10.0
libtpu: 0.0.40
codegen_flags: <defaults>
</compile_context>

<pallas_src>
import functools

import jax
import jax.numpy as jnp
from jax.experimental import pallas as pl
from jax.experimental.pallas import tpu as pltpu

BN_EPS = 1e-5


# ----------------------------- BlockSpec helpers ----------------------------

def _row_map(nrest):
    def im(i):
        return (i,) + (0,) * nrest
    return im


def _rep_map(ndim):
    def im(i):
        return (0,) * ndim
    return im


def _row_spec(tile, shape):
    rest = tuple(int(s) for s in shape[1:])
    return pl.BlockSpec((tile,) + rest, _row_map(len(rest)))


def _rep_spec(shape):
    shape = tuple(int(s) for s in shape)
    return pl.BlockSpec(shape, _rep_map(len(shape)))


def choose_tile(n, nsample, c, budget_bytes=24 << 20, cap=1024):
    """Pick a row-tile that keeps the double-buffered grouped working set under budget
    (24 MiB default so the same choice is safe on v7x's 64 MiB VMEM)."""
    per_row_bytes = 4 * 2 * (nsample * (2 * c + 3) + 5 * c)
    t = max(8, min(n, cap, budget_bytes // max(per_row_bytes, 1)))
    t -= t % 8
    while t > 8 and n % t:
        t -= 8
    return max(t, 8)


# ----------------------------- small-K VPU helpers ---------------------------

def _fma_small_k(z, w, b):
    """y = z @ w + b with tiny contraction dim (K=3/4): explicit broadcast-FMA (VPU),
    keeping the MXU free and avoiding ~1% MXU utilization passes."""
    k_dim, cout = w.shape
    lead = (1,) * (z.ndim - 1)
    acc = jnp.zeros(z.shape[:-1] + (cout,), jnp.float32)
    for k in range(k_dim):
        acc = acc + z[..., k:k + 1] * w[k].reshape(lead + (cout,))
    return acc + b.reshape(lead + (cout,))


def _w0_core(p_r, x_kg, x_q, wp1, bp1, a_p, b_p, wp2, bp2):
    """Recompute linear_p branch (3->3 -> BN -> ReLU -> 3->C) and w0 per tile in VMEM."""
    pe_h = _fma_small_k(p_r, wp1, bp1)                                   # (T, ns, 3)
    z = jnp.maximum(pe_h * a_p.reshape(1, 1, -1) + b_p.reshape(1, 1, -1), 0.0)
    pe = _fma_small_k(z, wp2, bp2)                                       # (T, ns, C)
    w0 = x_kg - x_q[:, None, :] + pe                                     # (T, ns, C)
    return w0, pe


# ------------------------------- Pallas kernels ------------------------------

def _qkv_kernel(x_ref, w1_ref, a1_ref, b1_ref, wqkv_ref, bqkv_ref, qkv_ref):
    xb = x_ref[...].astype(jnp.bfloat16)
    y1 = jnp.dot(xb, w1_ref[...], preferred_element_type=jnp.float32)    # linear1 (no bias)
    h = jnp.maximum(y1 * a1_ref[...] + b1_ref[...], 0.0)                 # bn1 + relu
    qkv_ref[...] = jnp.dot(h.astype(jnp.bfloat16), wqkv_ref[...],
                           preferred_element_type=jnp.float32) + bqkv_ref[...]


def _w0_stats_kernel(pr_ref, xkg_ref, xq_ref,
                     wp1_ref, bp1_ref, ap_ref, bp_ref, wp2_ref, bp2_ref,
                     stats_ref, acc_ref):
    @pl.when(pl.program_id(0) == 0)
    def _init():
        acc_ref[...] = jnp.zeros_like(acc_ref)

    w0, _ = _w0_core(pr_ref[...], xkg_ref[...], xq_ref[...],
                     wp1_ref[...], bp1_ref[...], ap_ref[...], bp_ref[...],
                     wp2_ref[...], bp2_ref[...])
    w2d = w0.reshape(-1, w0.shape[-1])
    acc_ref[0:1, :] += jnp.sum(w2d, axis=0, keepdims=True)
    acc_ref[1:2, :] += jnp.sum(w2d * w2d, axis=0, keepdims=True)
    stats_ref[...] = acc_ref[...]


def _w1_stats_kernel(pr_ref, xkg_ref, xq_ref,
                     wp1_ref, bp1_ref, ap_ref, bp_ref, wp2_ref, bp2_ref,
                     aw1_ref, bw1_ref, ww1_ref, bw1l_ref,
                     stats_ref, acc_ref):
    @pl.when(pl.program_id(0) == 0)
    def _init():
        acc_ref[...] = jnp.zeros_like(acc_ref)

    w0, _ = _w0_core(pr_ref[...], xkg_ref[...], xq_ref[...],
                     wp1_ref[...], bp1_ref[...], ap_ref[...], bp_ref[...],
                     wp2_ref[...], bp2_ref[...])
    t, ns, c = w0.shape
    zw = jnp.maximum(w0 * aw1_ref[...].reshape(1, 1, c)
                     + bw1_ref[...].reshape(1, 1, c), 0.0)               # bn_w1 + relu
    w1 = jnp.dot(zw.reshape(t * ns, c).astype(jnp.bfloat16), ww1_ref[...],
                 preferred_element_type=jnp.float32) + bw1l_ref[...]     # (T*ns, C//s)
    acc_ref[0:1, :] += jnp.sum(w1, axis=0, keepdims=True)
    acc_ref[1:2, :] += jnp.sum(w1 * w1, axis=0, keepdims=True)
    stats_ref[...] = acc_ref[...]


def _attn_kernel(pr_ref, xkg_ref, xvg_ref, xq_ref,
                 wp1_ref, bp1_ref, ap_ref, bp_ref, wp2_ref, bp2_ref,
                 aw1_ref, bw1_ref, ww1_ref, bw1l_ref,
                 aw2_ref, bw2_ref, ww2_ref, bw2l_ref,
                 o_ref, *, share_planes):
    w0, pe = _w0_core(pr_ref[...], xkg_ref[...], xq_ref[...],
                      wp1_ref[...], bp1_ref[...], ap_ref[...], bp_ref[...],
                      wp2_ref[...], bp2_ref[...])
    t, ns, c = w0.shape
    s = share_planes
    cs = c // s

    zw = jnp.maximum(w0 * aw1_ref[...].reshape(1, 1, c)
                     + bw1_ref[...].reshape(1, 1, c), 0.0)
    w1 = jnp.dot(zw.reshape(t * ns, c).astype(jnp.bfloat16), ww1_ref[...],
                 preferred_element_type=jnp.float32) + bw1l_ref[...]     # (T*ns, cs)
    zw2 = jnp.maximum(w1 * aw2_ref[...] + bw2_ref[...], 0.0)             # bn_w2 + relu
    w2 = _fma_small_k(zw2, ww2_ref[...], bw2l_ref[...]).reshape(t, ns, cs)

    # softmax over the nsample axis (EUP exp + approx reciprocal, keeps VALU free)
    m = jnp.max(w2, axis=1, keepdims=True)
    e = jnp.exp(w2 - m)
    sm = e * pl.reciprocal(jnp.sum(e, axis=1, keepdims=True), approx=True)

    # broadcast the (cs)-wide weights across the s share groups in VMEM only
    sm_full = jnp.concatenate([sm] * s, axis=-1)                         # (T, ns, C)
    values = xvg_ref[...] + pe                                           # (T, ns, C)
    o_ref[...] = jnp.sum(values * sm_full, axis=1)                       # (T, C)


def _tail_kernel(h2_ref, idn_ref, w3_ref, a3_ref, b3_ref, o_ref):
    y3 = jnp.dot(h2_ref[...].astype(jnp.bfloat16), w3_ref[...],
                 preferred_element_type=jnp.float32)                     # linear3 (no bias)
    o_ref[...] = jnp.maximum(y3 * a3_ref[...] + b3_ref[...] + idn_ref[...], 0.0)


# ------------------------------ kernel wrappers ------------------------------

def qkv_pallas(x, w1_bf, a1, b1, wqkv_bf, bqkv, tile):
    n = x.shape[0]
    c3 = wqkv_bf.shape[1]
    return pl.pallas_call(
        _qkv_kernel,
        out_shape=jax.ShapeDtypeStruct((n, c3), jnp.float32),
        grid_spec=pltpu.PrefetchScalarGridSpec(
            num_scalar_prefetch=0, grid=(n // tile,),
            in_specs=[_row_spec(tile, x.shape),
                      _rep_spec(w1_bf.shape), _rep_spec(a1.shape), _rep_spec(b1.shape),
                      _rep_spec(wqkv_bf.shape), _rep_spec(bqkv.shape)],
            out_specs=_row_spec(tile, (n, c3))),
        compiler_params=pltpu.CompilerParams(dimension_semantics=("parallel",)),
    )(x, w1_bf, a1, b1, wqkv_bf, bqkv)


def w0_stats_pallas(p_r, x_kg, x_q, common, tile):
    n, _, c = x_kg.shape
    return pl.pallas_call(
        _w0_stats_kernel,
        out_shape=jax.ShapeDtypeStruct((2, c), jnp.float32),
        grid_spec=pltpu.PrefetchScalarGridSpec(
            num_scalar_prefetch=0, grid=(n // tile,),
            in_specs=[_row_spec(tile, p_r.shape), _row_spec(tile, x_kg.shape),
                      _row_spec(tile, x_q.shape)]
                     + [_rep_spec(a.shape) for a in common],
            out_specs=_rep_spec((2, c)),
            scratch_shapes=[pltpu.VMEM((2, c), jnp.float32)]),
        compiler_params=pltpu.CompilerParams(dimension_semantics=("arbitrary",)),
    )(p_r, x_kg, x_q, *common)


def w1_stats_pallas(p_r, x_kg, x_q, common, wbranch1, tile):
    n, _, _ = x_kg.shape
    cs = wbranch1[2].shape[1]
    return pl.pallas_call(
        _w1_stats_kernel,
        out_shape=jax.ShapeDtypeStruct((2, cs), jnp.float32),
        grid_spec=pltpu.PrefetchScalarGridSpec(
            num_scalar_prefetch=0, grid=(n // tile,),
            in_specs=[_row_spec(tile, p_r.shape), _row_spec(tile, x_kg.shape),
                      _row_spec(tile, x_q.shape)]
                     + [_rep_spec(a.shape) for a in common]
                     + [_rep_spec(a.shape) for a in wbranch1],
            out_specs=_rep_spec((2, cs)),
            scratch_shapes=[pltpu.VMEM((2, cs), jnp.float32)]),
        compiler_params=pltpu.CompilerParams(dimension_semantics=("arbitrary",)),
    )(p_r, x_kg, x_q, *common, *wbranch1)


def attn_pallas(p_r, x_kg, x_vg, x_q, common, wbranch1, wbranch2, share_planes, tile):
    n, _, c = x_kg.shape
    return pl.pallas_call(
        functools.partial(_attn_kernel, share_planes=share_planes),
        out_shape=jax.ShapeDtypeStruct((n, c), jnp.float32),
        grid_spec=pltpu.PrefetchScalarGridSpec(
            num_scalar_prefetch=0, grid=(n // tile,),
            in_specs=[_row_spec(tile, p_r.shape), _row_spec(tile, x_kg.shape),
                      _row_spec(tile, x_vg.shape), _row_spec(tile, x_q.shape)]
                     + [_rep_spec(a.shape) for a in common]
                     + [_rep_spec(a.shape) for a in wbranch1]
                     + [_rep_spec(a.shape) for a in wbranch2],
            out_specs=_row_spec(tile, (n, c))),
        compiler_params=pltpu.CompilerParams(dimension_semantics=("parallel",)),
    )(p_r, x_kg, x_vg, x_q, *common, *wbranch1, *wbranch2)


def tail_pallas(h2, identity, w3_bf, a3, b3, tile):
    n, c = h2.shape
    return pl.pallas_call(
        _tail_kernel,
        out_shape=jax.ShapeDtypeStruct((n, c), jnp.float32),
        grid_spec=pltpu.PrefetchScalarGridSpec(
            num_scalar_prefetch=0, grid=(n // tile,),
            in_specs=[_row_spec(tile, h2.shape), _row_spec(tile, identity.shape),
                      _rep_spec(w3_bf.shape), _rep_spec(a3.shape), _rep_spec(b3.shape)],
            out_specs=_row_spec(tile, (n, c))),
        compiler_params=pltpu.CompilerParams(dimension_semantics=("parallel",)),
    )(h2, identity, w3_bf, a3, b3)


# ------------------------------ BN stats (XLA) -------------------------------

def _bn_affine(mean, var, gamma, beta, eps=BN_EPS):
    a = gamma * jax.lax.rsqrt(jnp.maximum(var, 0.0) + eps)
    return a, beta - mean * a


def _linear_bn_affine(x, w_cin_cout, gamma, beta, eps=BN_EPS):
    """Exact training-mode BN stats of y = x @ w (bias-free) without materializing y:
    mean = mean(x) @ w ; E[y^2]_j = w_j^T (x^T x / n) w_j."""
    n = x.shape[0]
    mean_x = jnp.mean(x, axis=0)
    gram = (x.T @ x) / n
    mean_y = mean_x @ w_cin_cout
    ey2 = jnp.einsum("ij,ik,kj->j", w_cin_cout, gram, w_cin_cout)
    var_y = ey2 - mean_y ** 2
    return _bn_affine(mean_y, var_y, gamma, beta, eps)


# --------------------------------- JAX glue ----------------------------------

def knn_indices(p, o, nsample):
    """kNN (incl. self) within batches defined by offsets `o` (pointops.knnquery)."""
    # TODO(synk): replace the dense N x N distance matrix with a row-tiled top-k kernel
    # for production point counts.
    n = p.shape[0]
    batch_id = jnp.searchsorted(o, jnp.arange(n), side="right")
    d2 = jnp.sum((p[:, None, :] - p[None, :, :]) ** 2, axis=-1)
    same = batch_id[:, None] == batch_id[None, :]
    d2 = jnp.where(same, d2, jnp.inf)
    _, idx = jax.lax.top_k(-d2, nsample)
    return idx


def point_transformer_block(p, x, o, prep, *, share_planes, nsample, tile):
    n, c = x.shape
    assert n % tile == 0 and tile % 8 == 0
    identity = x

    # --- linear1 -> bn1 -> relu -> fused q/k/v (one parallel, tiled kernel) ---
    a1, b1 = _linear_bn_affine(x, prep["lin1_f32"], prep["bn1_g"], prep["bn1_b"])
    qkv = qkv_pallas(x, prep["lin1_bf"], a1[None, :], b1[None, :],
                     prep["wqkv_bf"], prep["bqkv"], tile)
    x_q, x_k, x_v = qkv[:, :c], qkv[:, c:2 * c], qkv[:, 2 * c:]

    # --- neighborhood search + gathers (pointops.queryandgroup) kept in XLA ---
    # TODO(synk): fuse the gathers into the kernels via scalar-prefetch + manual DMA.
    idx = knn_indices(p, o, nsample)
    p_r = p[idx] - p[:, None, :]                        # (N, ns, 3)  relative xyz
    x_kg = x_k[idx]                                      # (N, ns, C)
    x_vg = x_v[idx]                                      # (N, ns, C)

    # --- BN(3) inside linear_p: exact stats of Linear(3,3)(p_r), tiny, in XLA ---
    pe_h = p_r.reshape(-1, 3) @ prep["wp1"] + prep["bp1"]
    a_p, b_p = _bn_affine(jnp.mean(pe_h, 0), jnp.var(pe_h, 0),
                          prep["bnp_g"], prep["bnp_b"])

    common = (prep["wp1"], prep["bp1"], a_p[None, :], b_p[None, :],
              prep["wp2"], prep["bp2"])
    m_rows = n * nsample

    # --- w-branch BN stats: in-kernel sum/sumsq accumulation over the grid ---
    st0 = w0_stats_pallas(p_r, x_kg, x_q, common, tile)                  # (2, C)
    mean0 = st0[0] / m_rows
    var0 = st0[1] / m_rows - mean0 ** 2
    a_w1, b_w1 = _bn_affine(mean0, var0, prep["bnw1_g"], prep["bnw1_b"])

    wbranch1 = (a_w1[None, :], b_w1[None, :], prep["ww1_bf"], prep["bw1l"])
    st1 = w1_stats_pallas(p_r, x_kg, x_q, common, wbranch1, tile)        # (2, C//s)
    mean1 = st1[0] / m_rows
    var1 = st1[1] / m_rows - mean1 ** 2
    a_w2, b_w2 = _bn_affine(mean1, var1, prep["bnw2_g"], prep["bnw2_b"])

    wbranch2 = (a_w2[None, :], b_w2[None, :], prep["ww2"], prep["bw2l"])

    # --- fused attention: position branch, w-branch, softmax, share-group agg ---
    y_attn = attn_pallas(p_r, x_kg, x_vg, x_q, common, wbranch1, wbranch2,
                         share_planes, tile)                             # (N, C)

    # --- bn2 -> relu (stats on small (N, C), fused scale/shift), then tail kernel ---
    a2, b2 = _bn_affine(jnp.mean(y_attn, 0), jnp.var(y_attn, 0),
                        prep["bn2_g"], prep["bn2_b"])
    h2 = jnp.maximum(y_attn * a2 + b2, 0.0)
    a3, b3 = _linear_bn_affine(h2, prep["lin3_f32"], prep["bn3_g"], prep["bn3_b"])
    out = tail_pallas(h2, identity, prep["lin3_bf"], a3[None, :], b3[None, :], tile)
    return [p, out, o]


# --------------------------- parameter init / prep ---------------------------

def init_params(key, in_planes, planes, share_planes):
    mid = out = planes
    ks = jax.random.split(key, 16)

    def lin(k, cout, cin, bias=True):
        kw, kb = jax.random.split(k)
        w = 0.1 * jax.random.normal(kw, (cout, cin), jnp.float32)
        b = 0.1 * jax.random.normal(kb, (cout,), jnp.float32) if bias else None
        return w, b

    def bn(k, c):
        kg, kb = jax.random.split(k)
        g = 1.0 + 0.1 * jax.random.normal(kg, (c,), jnp.float32)
        b = 0.1 * jax.random.normal(kb, (c,), jnp.float32)
        return g, b

    params = {}
    params["lin1_w"], _ = lin(ks[0], planes, in_planes, bias=False)
    params["bn1"] = bn(ks[1], planes)
    params["q"] = lin(ks[2], mid, planes)
    params["k"] = lin(ks[3], mid, planes)
    params["v"] = lin(ks[4], out, planes)
    params["p1"] = lin(ks[5], 3, 3)
    params["p_bn"] = bn(ks[6], 3)
    params["p2"] = lin(ks[7], out, 3)
    params["w_bn1"] = bn(ks[8], mid)
    params["w1"] = lin(ks[9], mid // share_planes, mid)
    params["w_bn2"] = bn(ks[10], mid // share_planes)
    params["w2"] = lin(ks[11], out // share_planes, out // share_planes)
    params["bn2"] = bn(ks[12], planes)
    params["lin3_w"], _ = lin(ks[13], planes, planes, bias=False)
    params["bn3"] = bn(ks[14], planes)
    return params


def prepare_params(params):
    """Pre-transpose to (Cin, Cout) and pre-cast MXU weights to bf16 once."""
    prep = {}
    w1 = params["lin1_w"].T
    prep["lin1_f32"] = w1
    prep["lin1_bf"] = w1.astype(jnp.bfloat16)
    prep["bn1_g"], prep["bn1_b"] = params["bn1"]

    wq, bq = params["q"]
    wk, bk = params["k"]
    wv, bv = params["v"]
    prep["wqkv_bf"] = jnp.concatenate([wq.T, wk.T, wv.T], axis=1).astype(jnp.bfloat16)
    prep["bqkv"] = jnp.concatenate([bq, bk, bv])[None, :]

    wp1, bp1 = params["p1"]
    prep["wp1"] = wp1.T            # (3, 3)   VPU-FMA path
    prep["bp1"] = bp1[None, :]
    prep["bnp_g"], prep["bnp_b"] = params["p_bn"]
    wp2, bp2 = params["p2"]
    prep["wp2"] = wp2.T            # (3, C)   VPU-FMA path
    prep["bp2"] = bp2[None, :]

    prep["bnw1_g"], prep["bnw1_b"] = params["w_bn1"]
    ww1, bw1 = params["w1"]
    prep["ww1_bf"] = ww1.T.astype(jnp.bfloat16)    # (C, C//s)
    prep["bw1l"] = bw1[None, :]
    prep["bnw2_g"], prep["bnw2_b"] = params["w_bn2"]
    ww2, bw2 = params["w2"]
    prep["ww2"] = ww2.T            # (C//s, C//s)  VPU-FMA path (K=4)
    prep["bw2l"] = bw2[None, :]

    prep["bn2_g"], prep["bn2_b"] = params["bn2"]
    w3 = params["lin3_w"].T
    prep["lin3_f32"] = w3
    prep["lin3_bf"] = w3.astype(jnp.bfloat16)
    prep["bn3_g"], prep["bn3_b"] = params["bn3"]
    return prep


# ----------------------------------- main ------------------------------------

if __name__ == "__main__":
    N, planes, share_planes, nsample = 64, 32, 8, 8   # in_planes == planes (residual add)
    # Small tile so the demo actually exercises a multi-step grid; choose_tile() gives
    # the VMEM-budgeted production value (sized for v7x's 64 MiB VMEM).
    tile = min(16, choose_tile(N, nsample, planes))

    key = jax.random.PRNGKey(0)
    kp, kx, kparam = jax.random.split(key, 3)
    p = jax.random.uniform(kp, (N, 3), jnp.float32)        # point coordinates
    x = jax.random.normal(kx, (N, planes), jnp.float32)    # point features
    o = jnp.array([N], jnp.int32)                          # batch offsets (single batch)

    params = init_params(kparam, planes, planes, share_planes)
    prep = prepare_params(params)

    fwd = jax.jit(functools.partial(point_transformer_block,
                                    share_planes=share_planes,
                                    nsample=nsample, tile=tile))
    p_out, x_out, o_out = fwd(p, x, o, prep)
    jax.block_until_ready(x_out)

    assert x_out.shape == (N, planes)
    assert bool(jnp.all(jnp.isfinite(x_out)))
    print("KERNEL_OK")
</pallas_src>

<mosaic_0001>
module attributes {stable_mosaic.version = 11 : i64} {
  func.func @_qkv_kernel(%arg0: i32, %arg1: memref<16x32xf32, #tpu.memory_space<vmem>>, %arg2: memref<32x32xbf16, #tpu.memory_space<vmem>>, %arg3: memref<1x32xf32, #tpu.memory_space<vmem>>, %arg4: memref<1x32xf32, #tpu.memory_space<vmem>>, %arg5: memref<32x96xbf16, #tpu.memory_space<vmem>>, %arg6: memref<1x96xf32, #tpu.memory_space<vmem>>, %arg7: memref<16x96xf32, #tpu.memory_space<vmem>>) attributes {dimension_semantics = [#tpu.dimension_semantics<parallel>], iteration_bounds = array<i64: 4>, scalar_prefetch = 0 : i64, scratch_operands = 0 : i64, tpu.core_type = #tpu.core_type<tc>, window_params = [{transform_indices = @transform_0, window_bounds = array<i64: 16, 32>}, {pipeline_mode = #tpu.pipeline_mode<synchronous>, transform_indices = @transform_1, window_bounds = array<i64: 32, 32>}, {pipeline_mode = #tpu.pipeline_mode<synchronous>, transform_indices = @transform_2, window_bounds = array<i64: 1, 32>}, {pipeline_mode = #tpu.pipeline_mode<synchronous>, transform_indices = @transform_3, window_bounds = array<i64: 1, 32>}, {pipeline_mode = #tpu.pipeline_mode<synchronous>, transform_indices = @transform_4, window_bounds = array<i64: 32, 96>}, {pipeline_mode = #tpu.pipeline_mode<synchronous>, transform_indices = @transform_5, window_bounds = array<i64: 1, 96>}, {transform_indices = @transform_6, window_bounds = array<i64: 16, 96>}]} {
    %c0 = arith.constant 0 : index
    %c0_0 = arith.constant 0 : index
    %0 = vector.load %arg1[%c0, %c0_0] : memref<16x32xf32, #tpu.memory_space<vmem>>, vector<16x32xf32>
    %1 = arith.truncf %0 : vector<16x32xf32> to vector<16x32xbf16>
    %c0_1 = arith.constant 0 : index
    %c0_2 = arith.constant 0 : index
    %2 = vector.load %arg2[%c0_1, %c0_2] : memref<32x32xbf16, #tpu.memory_space<vmem>>, vector<32x32xbf16>
    %cst = arith.constant dense<0.000000e+00> : vector<16x32xf32>
    %3 = tpu.matmul %1, %2, %cst {dimension_numbers = #tpu.dot_dimension_numbers<[1], [0], [0], [1], [0, 0, 1, 1], [], []>} : vector<16x32xbf16>, vector<32x32xbf16>, vector<16x32xf32> -> vector<16x32xf32>
    %c0_3 = arith.constant 0 : index
    %c0_4 = arith.constant 0 : index
    %4 = vector.load %arg3[%c0_3, %c0_4] : memref<1x32xf32, #tpu.memory_space<vmem>>, vector<1x32xf32>
    %5 = vector.broadcast %4 : vector<1x32xf32> to vector<16x32xf32>
    %6 = arith.mulf %3, %5 : vector<16x32xf32>
    %c0_5 = arith.constant 0 : index
    %c0_6 = arith.constant 0 : index
    %7 = vector.load %arg4[%c0_5, %c0_6] : memref<1x32xf32, #tpu.memory_space<vmem>>, vector<1x32xf32>
    %8 = vector.broadcast %7 : vector<1x32xf32> to vector<16x32xf32>
    %9 = arith.addf %6, %8 : vector<16x32xf32>
    %cst_7 = arith.constant 0.000000e+00 : f32
    %10 = vector.broadcast %cst_7 : f32 to vector<16x32xf32>
    %11 = arith.maximumf %9, %10 : vector<16x32xf32>
    %12 = arith.truncf %11 : vector<16x32xf32> to vector<16x32xbf16>
    %c0_8 = arith.constant 0 : index
    %c0_9 = arith.constant 0 : index
    %13 = vector.load %arg5[%c0_8, %c0_9] : memref<32x96xbf16, #tpu.memory_space<vmem>>, vector<32x96xbf16>
    %cst_10 = arith.constant dense<0.000000e+00> : vector<16x96xf32>
    %14 = tpu.matmul %12, %13, %cst_10 {dimension_numbers = #tpu.dot_dimension_numbers<[1], [0], [0], [1], [0, 0, 1, 1], [], []>} : vector<16x32xbf16>, vector<32x96xbf16>, vector<16x96xf32> -> vector<16x96xf32>
    %c0_11 = arith.constant 0 : index
    %c0_12 = arith.constant 0 : index
    %15 = vector.load %arg6[%c0_11, %c0_12] : memref<1x96xf32, #tpu.memory_space<vmem>>, vector<1x96xf32>
    %16 = vector.broadcast %15 : vector<1x96xf32> to vector<16x96xf32>
    %17 = arith.addf %14, %16 : vector<16x96xf32>
    %c0_13 = arith.constant 0 : index
    %c0_14 = arith.constant 0 : index
    %18 = vector.load %arg7[%c0_13, %c0_14] : memref<16x96xf32, #tpu.memory_space<vmem>>, vector<16x96xf32>
    tpu.vector_store %arg7[%c0_13, %c0_14], %17 {strides = array<i32>} : memref<16x96xf32, #tpu.memory_space<vmem>>, vector<16x96xf32>,
    return
  }
  func.func @transform_0(%arg0: i32) -> (i32, i32) {
    %c0_i32 = arith.constant 0 : i32
    %c0_i32_0 = arith.constant 0 : i32
    return %arg0, %c0_i32 : i32, i32
  }
  func.func @transform_1(%arg0: i32) -> (i32, i32) {
    %c0_i32 = arith.constant 0 : i32
    %c0_i32_0 = arith.constant 0 : i32
    %c0_i32_1 = arith.constant 0 : i32
    return %c0_i32, %c0_i32_0 : i32, i32
  }
  func.func @transform_2(%arg0: i32) -> (i32, i32) {
    %c0_i32 = arith.constant 0 : i32
    %c0_i32_0 = arith.constant 0 : i32
    %c0_i32_1 = arith.constant 0 : i32
    return %c0_i32, %c0_i32_0 : i32, i32
  }
  func.func @transform_3(%arg0: i32) -> (i32, i32) {
    %c0_i32 = arith.constant 0 : i32
    %c0_i32_0 = arith.constant 0 : i32
    %c0_i32_1 = arith.constant 0 : i32
    return %c0_i32, %c0_i32_0 : i32, i32
  }
  func.func @transform_4(%arg0: i32) -> (i32, i32) {
    %c0_i32 = arith.constant 0 : i32
    %c0_i32_0 = arith.constant 0 : i32
    %c0_i32_1 = arith.constant 0 : i32
    return %c0_i32, %c0_i32_0 : i32, i32
  }
  func.func @transform_5(%arg0: i32) -> (i32, i32) {
    %c0_i32 = arith.constant 0 : i32
    %c0_i32_0 = arith.constant 0 : i32
    %c0_i32_1 = arith.constant 0 : i32
    return %c0_i32, %c0_i32_0 : i32, i32
  }
  func.func @transform_6(%arg0: i32) -> (i32, i32) {
    %c0_i32 = arith.constant 0 : i32
    %c0_i32_0 = arith.constant 0 : i32
    return %arg0, %c0_i32 : i32, i32
  }
}

module attributes {stable_mosaic.version = 11 : i64} {
  func.func @_w0_stats_kernel(%arg0: i32, %arg1: memref<16x8x3xf32, #tpu.memory_space<vmem>>, %arg2: memref<16x8x32xf32, #tpu.memory_space<vmem>>, %arg3: memref<16x32xf32, #tpu.memory_space<vmem>>, %arg4: memref<3x3xf32, #tpu.memory_space<vmem>>, %arg5: memref<1x3xf32, #tpu.memory_space<vmem>>, %arg6: memref<1x3xf32, #tpu.memory_space<vmem>>, %arg7: memref<1x3xf32, #tpu.memory_space<vmem>>, %arg8: memref<3x32xf32, #tpu.memory_space<vmem>>, %arg9: memref<1x32xf32, #tpu.memory_space<vmem>>, %arg10: memref<2x32xf32, #tpu.memory_space<vmem>>, %arg11: memref<2x32xf32, #tpu.memory_space<vmem>>) attributes {dimension_semantics = [#tpu.dimension_semantics<arbitrary>], iteration_bounds = array<i64: 4>, scalar_prefetch = 0 : i64, scratch_operands = 1 : i64, tpu.core_type = #tpu.core_type<tc>, window_params = [{transform_indices = @transform_0, window_bounds = array<i64: 16, 8, 3>}, {transform_indices = @transform_1, window_bounds = array<i64: 16, 8, 32>}, {transform_indices = @transform_2, window_bounds = array<i64: 16, 32>}, {pipeline_mode = #tpu.pipeline_mode<synchronous>, transform_indices = @transform_3, window_bounds = array<i64: 3, 3>}, {pipeline_mode = #tpu.pipeline_mode<synchronous>, transform_indices = @transform_4, window_bounds = array<i64: 1, 3>}, {pipeline_mode = #tpu.pipeline_mode<synchronous>, transform_indices = @transform_5, window_bounds = array<i64: 1, 3>}, {pipeline_mode = #tpu.pipeline_mode<synchronous>, transform_indices = @transform_6, window_bounds = array<i64: 1, 3>}, {pipeline_mode = #tpu.pipeline_mode<synchronous>, transform_indices = @transform_7, window_bounds = array<i64: 3, 32>}, {pipeline_mode = #tpu.pipeline_mode<synchronous>, transform_indices = @transform_8, window_bounds = array<i64: 1, 32>}, {pipeline_mode = #tpu.pipeline_mode<synchronous>, transform_indices = @transform_9, window_bounds = array<i64: 2, 32>}]} {
    %c0_i32 = arith.constant 0 : i32
    %0 = arith.cmpi eq, %arg0, %c0_i32 : i32
    %1 = arith.extui %0 : i1 to i32
    %c0_i32_0 = arith.constant 0 : i32
    %2 = arith.cmpi ne, %1, %c0_i32_0 : i32
    scf.if %2 {
      %cst_35 = arith.constant 0.000000e+00 : f32
      %94 = vector.broadcast %cst_35 : f32 to vector<2x32xf32>
      %c0_36 = arith.constant 0 : index
      %c0_37 = arith.constant 0 : index
      %95 = vector.load %arg11[%c0_36, %c0_37] : memref<2x32xf32, #tpu.memory_space<vmem>>, vector<2x32xf32>
      tpu.vector_store %arg11[%c0_36, %c0_37], %94 {strides = array<i32>} : memref<2x32xf32, #tpu.memory_space<vmem>>, vector<2x32xf32>,
    } else {
    }
    %c0 = arith.constant 0 : index
    %c0_1 = arith.constant 0 : index
    %c0_2 = arith.constant 0 : index
    %3 = vector.load %arg1[%c0, %c0_1, %c0_2] : memref<16x8x3xf32, #tpu.memory_space<vmem>>, vector<16x8x3xf32>
    %c0_3 = arith.constant 0 : index
    %c0_4 = arith.constant 0 : index
    %c0_5 = arith.constant 0 : index
    %4 = vector.load %arg2[%c0_3, %c0_4, %c0_5] : memref<16x8x32xf32, #tpu.memory_space<vmem>>, vector<16x8x32xf32>
    %c0_6 = arith.constant 0 : index
    %c0_7 = arith.constant 0 : index
    %5 = vector.load %arg3[%c0_6, %c0_7] : memref<16x32xf32, #tpu.memory_space<vmem>>, vector<16x32xf32>
    %c0_8 = arith.constant 0 : index
    %c0_9 = arith.constant 0 : index
    %6 = vector.load %arg4[%c0_8, %c0_9] : memref<3x3xf32, #tpu.memory_space<vmem>>, vector<3x3xf32>
    %c0_10 = arith.constant 0 : index
    %c0_11 = arith.constant 0 : index
    %7 = vector.load %arg5[%c0_10, %c0_11] : memref<1x3xf32, #tpu.memory_space<vmem>>, vector<1x3xf32>
    %c0_12 = arith.constant 0 : index
    %c0_13 = arith.constant 0 : index
    %8 = vector.load %arg6[%c0_12, %c0_13] : memref<1x3xf32, #tpu.memory_space<vmem>>, vector<1x3xf32>
    %c0_14 = arith.constant 0 : index
    %c0_15 = arith.constant 0 : index
    %9 = vector.load %arg7[%c0_14, %c0_15] : memref<1x3xf32, #tpu.memory_space<vmem>>, vector<1x3xf32>
    %c0_16 = arith.constant 0 : index
    %c0_17 = arith.constant 0 : index
    %10 = vector.load %arg8[%c0_16, %c0_17] : memref<3x32xf32, #tpu.memory_space<vmem>>, vector<3x32xf32>
    %c0_18 = arith.constant 0 : index
    %c0_19 = arith.constant 0 : index
    %11 = vector.load %arg9[%c0_18, %c0_19] : memref<1x32xf32, #tpu.memory_space<vmem>>, vector<1x32xf32>
    %cst = arith.constant 0.000000e+00 : f32
    %12 = vector.broadcast %cst : f32 to vector<16x8x3xf32>
    %13 = vector.extract_strided_slice %3 {offsets = [0, 0, 0], sizes = [16, 8, 1], strides = [1, 1, 1]} : vector<16x8x3xf32> to vector<16x8x1xf32>
    %14 = vector.extract_strided_slice %6 {offsets = [0, 0], sizes = [1, 3], strides = [1, 1]} : vector<3x3xf32> to vector<1x3xf32>
    %15 = vector.shape_cast %14 : vector<1x3xf32> to vector<3xf32>
    %16 = vector.shape_cast %15 : vector<3xf32> to vector<1x1x3xf32>
    %17 = vector.broadcast %13 : vector<16x8x1xf32> to vector<16x8x3xf32>
    %18 = vector.broadcast %16 : vector<1x1x3xf32> to vector<16x8x3xf32>
    %19 = arith.mulf %17, %18 : vector<16x8x3xf32>
    %20 = arith.addf %12, %19 : vector<16x8x3xf32>
    %21 = vector.extract_strided_slice %3 {offsets = [0, 0, 1], sizes = [16, 8, 1], strides = [1, 1, 1]} : vector<16x8x3xf32> to vector<16x8x1xf32>
    %22 = vector.extract_strided_slice %6 {offsets = [1, 0], sizes = [1, 3], strides = [1, 1]} : vector<3x3xf32> to vector<1x3xf32>
    %23 = vector.shape_cast %22 : vector<1x3xf32> to vector<3xf32>
    %24 = vector.shape_cast %23 : vector<3xf32> to vector<1x1x3xf32>
    %25 = vector.broadcast %21 : vector<16x8x1xf32> to vector<16x8x3xf32>
    %26 = vector.broadcast %24 : vector<1x1x3xf32> to vector<16x8x3xf32>
    %27 = arith.mulf %25, %26 : vector<16x8x3xf32>
    %28 = arith.addf %20, %27 : vector<16x8x3xf32>
    %29 = vector.extract_strided_slice %3 {offsets = [0, 0, 2], sizes = [16, 8, 1], strides = [1, 1, 1]} : vector<16x8x3xf32> to vector<16x8x1xf32>
    %30 = vector.extract_strided_slice %6 {offsets = [2, 0], sizes = [1, 3], strides = [1, 1]} : vector<3x3xf32> to vector<1x3xf32>
    %31 = vector.shape_cast %30 : vector<1x3xf32> to vector<3xf32>
    %32 = vector.shape_cast %31 : vector<3xf32> to vector<1x1x3xf32>
    %33 = vector.broadcast %29 : vector<16x8x1xf32> to vector<16x8x3xf32>
    %34 = vector.broadcast %32 : vector<1x1x3xf32> to vector<16x8x3xf32>
    %35 = arith.mulf %33, %34 : vector<16x8x3xf32>
    %36 = arith.addf %28, %35 : vector<16x8x3xf32>
    %37 = vector.shape_cast %7 : vector<1x3xf32> to vector<1x1x3xf32>
    %38 = vector.broadcast %37 : vector<1x1x3xf32> to vector<16x8x3xf32>
    %39 = arith.addf %36, %38 : vector<16x8x3xf32>
    %40 = vector.shape_cast %8 : vector<1x3xf32> to vector<1x1x3xf32>
    %41 = vector.broadcast %40 : vector<1x1x3xf32> to vector<16x8x3xf32>
    %42 = arith.mulf %39, %41 : vector<16x8x3xf32>
    %43 = vector.shape_cast %9 : vector<1x3xf32> to vector<1x1x3xf32>
    %44 = vector.broadcast %43 : vector<1x1x3xf32> to vector<16x8x3xf32>
    %45 = arith.addf %42, %44 : vector<16x8x3xf32>
    %cst_20 = arith.constant 0.000000e+00 : f32
    %46 = vector.broadcast %cst_20 : f32 to vector<16x8x3xf32>
    %47 = arith.maximumf %45, %46 : vector<16x8x3xf32>
    %cst_21 = arith.constant 0.000000e+00 : f32
    %48 = vector.broadcast %cst_21 : f32 to vector<16x8x32xf32>
    %49 = vector.extract_strided_slice %47 {offsets = [0, 0, 0], sizes = [16, 8, 1], strides = [1, 1, 1]} : vector<16x8x3xf32> to vector<16x8x1xf32>
    %50 = vector.extract_strided_slice %10 {offsets = [0, 0], sizes = [1, 32], strides = [1, 1]} : vector<3x32xf32> to vector<1x32xf32>
    %51 = vector.shape_cast %50 : vector<1x32xf32> to vector<32xf32>
    %52 = vector.shape_cast %51 : vector<32xf32> to vector<1x1x32xf32>
    %53 = vector.broadcast %49 : vector<16x8x1xf32> to vector<16x8x32xf32>
    %54 = vector.broadcast %52 : vector<1x1x32xf32> to vector<16x8x32xf32>
    %55 = arith.mulf %53, %54 : vector<16x8x32xf32>
    %56 = arith.addf %48, %55 : vector<16x8x32xf32>
    %57 = vector.extract_strided_slice %47 {offsets = [0, 0, 1], sizes = [16, 8, 1], strides = [1, 1, 1]} : vector<16x8x3xf32> to vector<16x8x1xf32>
    %58 = vector.extract_strided_slice %10 {offsets = [1, 0], sizes = [1, 32], strides = [1, 1]} : vector<3x32xf32> to vector<1x32xf32>
    %59 = vector.shape_cast %58 : vector<1x32xf32> to vector<32xf32>
    %60 = vector.shape_cast %59 : vector<32xf32> to vector<1x1x32xf32>
    %61 = vector.broadcast %57 : vector<16x8x1xf32> to vector<16x8x32xf32>
    %62 = vector.broadcast %60 : vector<1x1x32xf32> to vector<16x8x32xf32>
    %63 = arith.mulf %61, %62 : vector<16x8x32xf32>
    %64 = arith.addf %56, %63 : vector<16x8x32xf32>
    %65 = vector.extract_strided_slice %47 {offsets = [0, 0, 2], sizes = [16, 8, 1], strides = [1, 1, 1]} : vector<16x8x3xf32> to vector<16x8x1xf32>
    %66 = vector.extract_strided_slice %10 {offsets = [2, 0], sizes = [1, 32], strides = [1, 1]} : vector<3x32xf32> to vector<1x32xf32>
    %67 = vector.shape_cast %66 : vector<1x32xf32> to vector<32xf32>
    %68 = vector.shape_cast %67 : vector<32xf32> to vector<1x1x32xf32>
    %69 = vector.broadcast %65 : vector<16x8x1xf32> to vector<16x8x32xf32>
    %70 = vector.broadcast %68 : vector<1x1x32xf32> to vector<16x8x32xf32>
    %71 = arith.mulf %69, %70 : vector<16x8x32xf32>
    %72 = arith.addf %64, %71 : vector<16x8x32xf32>
    %73 = vector.shape_cast %11 : vector<1x32xf32> to vector<1x1x32xf32>
    %74 = vector.broadcast %73 : vector<1x1x32xf32> to vector<16x8x32xf32>
    %75 = arith.addf %72, %74 : vector<16x8x32xf32>
    %76 = vector.shape_cast %5 : vector<16x32xf32> to vector<16x1x32xf32>
    %77 = vector.broadcast %76 : vector<16x1x32xf32> to vector<16x8x32xf32>
    %78 = arith.subf %4, %77 : vector<16x8x32xf32>
    %79 = arith.addf %78, %75 : vector<16x8x32xf32>
    %80 = vector.shape_cast %79 : vector<16x8x32xf32> to vector<128x32xf32>
    %c0_22 = arith.constant 0 : index
    %c0_23 = arith.constant 0 : index
    %81 = vector.load %arg11[%c0_22, %c0_23] : memref<2x32xf32, #tpu.memory_space<vmem>>, vector<1x32xf32>
    %cst_24 = arith.constant dense<0.000000e+00> : vector<32xf32>
    %82 = vector.multi_reduction <add>, %80, %cst_24 [0] : vector<128x32xf32> to vector<32xf32>
    %83 = vector.shape_cast %82 : vector<32xf32> to vector<1x32xf32>
    %84 = arith.addf %81, %83 : vector<1x32xf32>
    %c0_25 = arith.constant 0 : index
    %c0_26 = arith.constant 0 : index
    %85 = vector.load %arg11[%c0_25, %c0_26] : memref<2x32xf32, #tpu.memory_space<vmem>>, vector<1x32xf32>
    tpu.vector_store %arg11[%c0_25, %c0_26], %84 {strides = array<i32>} : memref<2x32xf32, #tpu.memory_space<vmem>>, vector<1x32xf32>,
    %c1 = arith.constant 1 : index
    %c0_27 = arith.constant 0 : index
    %86 = vector.load %arg11[%c1, %c0_27] : memref<2x32xf32, #tpu.memory_space<vmem>>, vector<1x32xf32>
    %87 = arith.mulf %80, %80 : vector<128x32xf32>
    %cst_28 = arith.constant dense<0.000000e+00> : vector<32xf32>
    %88 = vector.multi_reduction <add>, %87, %cst_28 [0] : vector<128x32xf32> to vector<32xf32>
    %89 = vector.shape_cast %88 : vector<32xf32> to vector<1x32xf32>
    %90 = arith.addf %86, %89 : vector<1x32xf32>
    %c1_29 = arith.constant 1 : index
    %c0_30 = arith.constant 0 : index
    %91 = vector.load %arg11[%c1_29, %c0_30] : memref<2x32xf32, #tpu.memory_space<vmem>>, vector<1x32xf32>
    tpu.vector_store %arg11[%c1_29, %c0_30], %90 {strides = array<i32>} : memref<2x32xf32, #tpu.memory_space<vmem>>, vector<1x32xf32>,
    %c0_31 = arith.constant 0 : index
    %c0_32 = arith.constant 0 : index
    %92 = vector.load %arg11[%c0_31, %c0_32] : memref<2x32xf32, #tpu.memory_space<vmem>>, vector<2x32xf32>
    %c0_33 = arith.constant 0 : index
    %c0_34 = arith.constant 0 : index
    %93 = vector.load %arg10[%c0_33, %c0_34] : memref<2x32xf32, #tpu.memory_space<vmem>>, vector<2x32xf32>
    tpu.vector_store %arg10[%c0_33, %c0_34], %92 {strides = array<i32>} : memref<2x32xf32, #tpu.memory_space<vmem>>, vector<2x32xf32>,
    return
  }
  func.func @transform_0(%arg0: i32) -> (i32, i32, i32) {
    %c0_i32 = arith.constant 0 : i32
    %c0_i32_0 = arith.constant 0 : i32
    %c0_i32_1 = arith.constant 0 : i32
    return %arg0, %c0_i32, %c0_i32_0 : i32, i32, i32
  }
  func.func @transform_1(%arg0: i32) -> (i32, i32, i32) {
    %c0_i32 = arith.constant 0 : i32
    %c0_i32_0 = arith.constant 0 : i32
    %c0_i32_1 = arith.constant 0 : i32
    return %arg0, %c0_i32, %c0_i32_0 : i32, i32, i32
  }
  func.func @transform_2(%arg0: i32) -> (i32, i32) {
    %c0_i32 = arith.constant 0 : i32
    %c0_i32_0 = arith.constant 0 : i32
    return %arg0, %c0_i32 : i32, i32
  }
  func.func @transform_3(%arg0: i32) -> (i32, i32) {
    %c0_i32 = arith.constant 0 : i32
    %c0_i32_0 = arith.constant 0 : i32
    %c0_i32_1 = arith.constant 0 : i32
    return %c0_i32, %c0_i32_0 : i32, i32
  }
  func.func @transform_4(%arg0: i32) -> (i32, i32) {
    %c0_i32 = arith.constant 0 : i32
    %c0_i32_0 = arith.constant 0 : i32
    %c0_i32_1 = arith.constant 0 : i32
    return %c0_i32, %c0_i32_0 : i32, i32
  }
  func.func @transform_5(%arg0: i32) -> (i32, i32) {
    %c0_i32 = arith.constant 0 : i32
    %c0_i32_0 = arith.constant 0 : i32
    %c0_i32_1 = arith.constant 0 : i32
    return %c0_i32, %c0_i32_0 : i32, i32
  }
  func.func @transform_6(%arg0: i32) -> (i32, i32) {
    %c0_i32 = arith.constant 0 : i32
    %c0_i32_0 = arith.constant 0 : i32
    %c0_i32_1 = arith.constant 0 : i32
    return %c0_i32, %c0_i32_0 : i32, i32
  }
  func.func @transform_7(%arg0: i32) -> (i32, i32) {
    %c0_i32 = arith.constant 0 : i32
    %c0_i32_0 = arith.constant 0 : i32
    %c0_i32_1 = arith.constant 0 : i32
    return %c0_i32, %c0_i32_0 : i32, i32
  }
  func.func @transform_8(%arg0: i32) -> (i32, i32) {
    %c0_i32 = arith.constant 0 : i32
    %c0_i32_0 = arith.constant 0 : i32
    %c0_i32_1 = arith.constant 0 : i32
    return %c0_i32, %c0_i32_0 : i32, i32
  }
  func.func @transform_9(%arg0: i32) -> (i32, i32) {
    %c0_i32 = arith.constant 0 : i32
    %c0_i32_0 = arith.constant 0 : i32
    %c0_i32_1 = arith.constant 0 : i32
    return %c0_i32, %c0_i32_0 : i32, i32
  }
}

module attributes {stable_mosaic.version = 11 : i64} {
  func.func @_w1_stats_kernel(%arg0: i32, %arg1: memref<16x8x3xf32, #tpu.memory_space<vmem>>, %arg2: memref<16x8x32xf32, #tpu.memory_space<vmem>>, %arg3: memref<16x32xf32, #tpu.memory_space<vmem>>, %arg4: memref<3x3xf32, #tpu.memory_space<vmem>>, %arg5: memref<1x3xf32, #tpu.memory_space<vmem>>, %arg6: memref<1x3xf32, #tpu.memory_space<vmem>>, %arg7: memref<1x3xf32, #tpu.memory_space<vmem>>, %arg8: memref<3x32xf32, #tpu.memory_space<vmem>>, %arg9: memref<1x32xf32, #tpu.memory_space<vmem>>, %arg10: memref<1x32xf32, #tpu.memory_space<vmem>>, %arg11: memref<1x32xf32, #tpu.memory_space<vmem>>, %arg12: memref<32x4xbf16, #tpu.memory_space<vmem>>, %arg13: memref<1x4xf32, #tpu.memory_space<vmem>>, %arg14: memref<2x4xf32, #tpu.memory_space<vmem>>, %arg15: memref<2x4xf32, #tpu.memory_space<vmem>>) attributes {dimension_semantics = [#tpu.dimension_semantics<arbitrary>], iteration_bounds = array<i64: 4>, scalar_prefetch = 0 : i64, scratch_operands = 1 : i64, tpu.core_type = #tpu.core_type<tc>, window_params = [{transform_indices = @transform_0, window_bounds = array<i64: 16, 8, 3>}, {transform_indices = @transform_1, window_bounds = array<i64: 16, 8, 32>}, {transform_indices = @transform_2, window_bounds = array<i64: 16, 32>}, {pipeline_mode = #tpu.pipeline_mode<synchronous>, transform_indices = @transform_3, window_bounds = array<i64: 3, 3>}, {pipeline_mode = #tpu.pipeline_mode<synchronous>, transform_indices = @transform_4, window_bounds = array<i64: 1, 3>}, {pipeline_mode = #tpu.pipeline_mode<synchronous>, transform_indices = @transform_5, window_bounds = array<i64: 1, 3>}, {pipeline_mode = #tpu.pipeline_mode<synchronous>, transform_indices = @transform_6, window_bounds = array<i64: 1, 3>}, {pipeline_mode = #tpu.pipeline_mode<synchronous>, transform_indices = @transform_7, window_bounds = array<i64: 3, 32>}, {pipeline_mode = #tpu.pipeline_mode<synchronous>, transform_indices = @transform_8, window_bounds = array<i64: 1, 32>}, {pipeline_mode = #tpu.pipeline_mode<synchronous>, transform_indices = @transform_9, window_bounds = array<i64: 1, 32>}, {pipeline_mode = #tpu.pipeline_mode<synchronous>, transform_indices = @transform_10, window_bounds = array<i64: 1, 32>}, {pipeline_mode = #tpu.pipeline_mode<synchronous>, transform_indices = @transform_11, window_bounds = array<i64: 32, 4>}, {pipeline_mode = #tpu.pipeline_mode<synchronous>, transform_indices = @transform_12, window_bounds = array<i64: 1, 4>}, {pipeline_mode = #tpu.pipeline_mode<synchronous>, transform_indices = @transform_13, window_bounds = array<i64: 2, 4>}]} {
    %c0_i32 = arith.constant 0 : i32
    %0 = arith.cmpi eq, %arg0, %c0_i32 : i32
    %1 = arith.extui %0 : i1 to i32
    %c0_i32_0 = arith.constant 0 : i32
    %2 = arith.cmpi ne, %1, %c0_i32_0 : i32
    scf.if %2 {
      %cst_45 = arith.constant 0.000000e+00 : f32
      %110 = vector.broadcast %cst_45 : f32 to vector<2x4xf32>
      %c0_46 = arith.constant 0 : index
      %c0_47 = arith.constant 0 : index
      %111 = vector.load %arg15[%c0_46, %c0_47] : memref<2x4xf32, #tpu.memory_space<vmem>>, vector<2x4xf32>
      tpu.vector_store %arg15[%c0_46, %c0_47], %110 {strides = array<i32>} : memref<2x4xf32, #tpu.memory_space<vmem>>, vector<2x4xf32>,
    } else {
    }
    %c0 = arith.constant 0 : index
    %c0_1 = arith.constant 0 : index
    %c0_2 = arith.constant 0 : index
    %3 = vector.load %arg1[%c0, %c0_1, %c0_2] : memref<16x8x3xf32, #tpu.memory_space<vmem>>, vector<16x8x3xf32>
    %c0_3 = arith.constant 0 : index
    %c0_4 = arith.constant 0 : index
    %c0_5 = arith.constant 0 : index
    %4 = vector.load %arg2[%c0_3, %c0_4, %c0_5] : memref<16x8x32xf32, #tpu.memory_space<vmem>>, vector<16x8x32xf32>
    %c0_6 = arith.constant 0 : index
    %c0_7 = arith.constant 0 : index
    %5 = vector.load %arg3[%c0_6, %c0_7] : memref<16x32xf32, #tpu.memory_space<vmem>>, vector<16x32xf32>
    %c0_8 = arith.constant 0 : index
    %c0_9 = arith.constant 0 : index
    %6 = vector.load %arg4[%c0_8, %c0_9] : memref<3x3xf32, #tpu.memory_space<vmem>>, vector<3x3xf32>
    %c0_10 = arith.constant 0 : index
    %c0_11 = arith.constant 0 : index
    %7 = vector.load %arg5[%c0_10, %c0_11] : memref<1x3xf32, #tpu.memory_space<vmem>>, vector<1x3xf32>
    %c0_12 = arith.constant 0 : index
    %c0_13 = arith.constant 0 : index
    %8 = vector.load %arg6[%c0_12, %c0_13] : memref<1x3xf32, #tpu.memory_space<vmem>>, vector<1x3xf32>
    %c0_14 = arith.constant 0 : index
    %c0_15 = arith.constant 0 : index
    %9 = vector.load %arg7[%c0_14, %c0_15] : memref<1x3xf32, #tpu.memory_space<vmem>>, vector<1x3xf32>
    %c0_16 = arith.constant 0 : index
    %c0_17 = arith.constant 0 : index
    %10 = vector.load %arg8[%c0_16, %c0_17] : memref<3x32xf32, #tpu.memory_space<vmem>>, vector<3x32xf32>
    %c0_18 = arith.constant 0 : index
    %c0_19 = arith.constant 0 : index
    %11 = vector.load %arg9[%c0_18, %c0_19] : memref<1x32xf32, #tpu.memory_space<vmem>>, vector<1x32xf32>
    %cst = arith.constant 0.000000e+00 : f32
    %12 = vector.broadcast %cst : f32 to vector<16x8x3xf32>
    %13 = vector.extract_strided_slice %3 {offsets = [0, 0, 0], sizes = [16, 8, 1], strides = [1, 1, 1]} : vector<16x8x3xf32> to vector<16x8x1xf32>
    %14 = vector.extract_strided_slice %6 {offsets = [0, 0], sizes = [1, 3], strides = [1, 1]} : vector<3x3xf32> to vector<1x3xf32>
    %15 = vector.shape_cast %14 : vector<1x3xf32> to vector<3xf32>
    %16 = vector.shape_cast %15 : vector<3xf32> to vector<1x1x3xf32>
    %17 = vector.broadcast %13 : vector<16x8x1xf32> to vector<16x8x3xf32>
    %18 = vector.broadcast %16 : vector<1x1x3xf32> to vector<16x8x3xf32>
    %19 = arith.mulf %17, %18 : vector<16x8x3xf32>
    %20 = arith.addf %12, %19 : vector<16x8x3xf32>
    %21 = vector.extract_strided_slice %3 {offsets = [0, 0, 1], sizes = [16, 8, 1], strides = [1, 1, 1]} : vector<16x8x3xf32> to vector<16x8x1xf32>
    %22 = vector.extract_strided_slice %6 {offsets = [1, 0], sizes = [1, 3], strides = [1, 1]} : vector<3x3xf32> to vector<1x3xf32>
    %23 = vector.shape_cast %22 : vector<1x3xf32> to vector<3xf32>
    %24 = vector.shape_cast %23 : vector<3xf32> to vector<1x1x3xf32>
    %25 = vector.broadcast %21 : vector<16x8x1xf32> to vector<16x8x3xf32>
    %26 = vector.broadcast %24 : vector<1x1x3xf32> to vector<16x8x3xf32>
    %27 = arith.mulf %25, %26 : vector<16x8x3xf32>
    %28 = arith.addf %20, %27 : vector<16x8x3xf32>
    %29 = vector.extract_strided_slice %3 {offsets = [0, 0, 2], sizes = [16, 8, 1], strides = [1, 1, 1]} : vector<16x8x3xf32> to vector<16x8x1xf32>
    %30 = vector.extract_strided_slice %6 {offsets = [2, 0], sizes = [1, 3], strides = [1, 1]} : vector<3x3xf32> to vector<1x3xf32>
    %31 = vector.shape_cast %30 : vector<1x3xf32> to vector<3xf32>
    %32 = vector.shape_cast %31 : vector<3xf32> to vector<1x1x3xf32>
    %33 = vector.broadcast %29 : vector<16x8x1xf32> to vector<16x8x3xf32>
    %34 = vector.broadcast %32 : vector<1x1x3xf32> to vector<16x8x3xf32>
    %35 = arith.mulf %33, %34 : vector<16x8x3xf32>
    %36 = arith.addf %28, %35 : vector<16x8x3xf32>
    %37 = vector.shape_cast %7 : vector<1x3xf32> to vector<1x1x3xf32>
    %38 = vector.broadcast %37 : vector<1x1x3xf32> to vector<16x8x3xf32>
    %39 = arith.addf %36, %38 : vector<16x8x3xf32>
    %40 = vector.shape_cast %8 : vector<1x3xf32> to vector<1x1x3xf32>
    %41 = vector.broadcast %40 : vector<1x1x3xf32> to vector<16x8x3xf32>
    %42 = arith.mulf %39, %41 : vector<16x8x3xf32>
    %43 = vector.shape_cast %9 : vector<1x3xf32> to vector<1x1x3xf32>
    %44 = vector.broadcast %43 : vector<1x1x3xf32> to vector<16x8x3xf32>
    %45 = arith.addf %42, %44 : vector<16x8x3xf32>
    %cst_20 = arith.constant 0.000000e+00 : f32
    %46 = vector.broadcast %cst_20 : f32 to vector<16x8x3xf32>
    %47 = arith.maximumf %45, %46 : vector<16x8x3xf32>
    %cst_21 = arith.constant 0.000000e+00 : f32
    %48 = vector.broadcast %cst_21 : f32 to vector<16x8x32xf32>
    %49 = vector.extract_strided_slice %47 {offsets = [0, 0, 0], sizes = [16, 8, 1], strides = [1, 1, 1]} : vector<16x8x3xf32> to vector<16x8x1xf32>
    %50 = vector.extract_strided_slice %10 {offsets = [0, 0], sizes = [1, 32], strides = [1, 1]} : vector<3x32xf32> to vector<1x32xf32>
    %51 = vector.shape_cast %50 : vector<1x32xf32> to vector<32xf32>
    %52 = vector.shape_cast %51 : vector<32xf32> to vector<1x1x32xf32>
    %53 = vector.broadcast %49 : vector<16x8x1xf32> to vector<16x8x32xf32>
    %54 = vector.broadcast %52 : vector<1x1x32xf32> to vector<16x8x32xf32>
    %55 = arith.mulf %53, %54 : vector<16x8x32xf32>
    %56 = arith.addf %48, %55 : vector<16x8x32xf32>
    %57 = vector.extract_strided_slice %47 {offsets = [0, 0, 1], sizes = [16, 8, 1], strides = [1, 1, 1]} : vector<16x8x3xf32> to vector<16x8x1xf32>
    %58 = vector.extract_strided_slice %10 {offsets = [1, 0], sizes = [1, 32], strides = [1, 1]} : vector<3x32xf32> to vector<1x32xf32>
    %59 = vector.shape_cast %58 : vector<1x32xf32> to vector<32xf32>
    %60 = vector.shape_cast %59 : vector<32xf32> to vector<1x1x32xf32>
    %61 = vector.broadcast %57 : vector<16x8x1xf32> to vector<16x8x32xf32>
    %62 = vector.broadcast %60 : vector<1x1x32xf32> to vector<16x8x32xf32>
    %63 = arith.mulf %61, %62 : vector<16x8x32xf32>
    %64 = arith.addf %56, %63 : vector<16x8x32xf32>
    %65 = vector.extract_strided_slice %47 {offsets = [0, 0, 2], sizes = [16, 8, 1], strides = [1, 1, 1]} : vector<16x8x3xf32> to vector<16x8x1xf32>
    %66 = vector.extract_strided_slice %10 {offsets = [2, 0], sizes = [1, 32], strides = [1, 1]} : vector<3x32xf32> to vector<1x32xf32>
    %67 = vector.shape_cast %66 : vector<1x32xf32> to vector<32xf32>
    %68 = vector.shape_cast %67 : vector<32xf32> to vector<1x1x32xf32>
    %69 = vector.broadcast %65 : vector<16x8x1xf32> to vector<16x8x32xf32>
    %70 = vector.broadcast %68 : vector<1x1x32xf32> to vector<16x8x32xf32>
    %71 = arith.mulf %69, %70 : vector<16x8x32xf32>
    %72 = arith.addf %64, %71 : vector<16x8x32xf32>
    %73 = vector.shape_cast %11 : vector<1x32xf32> to vector<1x1x32xf32>
    %74 = vector.broadcast %73 : vector<1x1x32xf32> to vector<16x8x32xf32>
    %75 = arith.addf %72, %74 : vector<16x8x32xf32>
    %76 = vector.shape_cast %5 : vector<16x32xf32> to vector<16x1x32xf32>
    %77 = vector.broadcast %76 : vector<16x1x32xf32> to vector<16x8x32xf32>
    %78 = arith.subf %4, %77 : vector<16x8x32xf32>
    %79 = arith.addf %78, %75 : vector<16x8x32xf32>
    %c0_22 = arith.constant 0 : index
    %c0_23 = arith.constant 0 : index
    %80 = vector.load %arg10[%c0_22, %c0_23] : memref<1x32xf32, #tpu.memory_space<vmem>>, vector<1x32xf32>
    %81 = vector.shape_cast %80 : vector<1x32xf32> to vector<1x1x32xf32>
    %82 = vector.broadcast %81 : vector<1x1x32xf32> to vector<16x8x32xf32>
    %83 = arith.mulf %79, %82 : vector<16x8x32xf32>
    %c0_24 = arith.constant 0 : index
    %c0_25 = arith.constant 0 : index
    %84 = vector.load %arg11[%c0_24, %c0_25] : memref<1x32xf32, #tpu.memory_space<vmem>>, vector<1x32xf32>
    %85 = vector.shape_cast %84 : vector<1x32xf32> to vector<1x1x32xf32>
    %86 = vector.broadcast %85 : vector<1x1x32xf32> to vector<16x8x32xf32>
    %87 = arith.addf %83, %86 : vector<16x8x32xf32>
    %cst_26 = arith.constant 0.000000e+00 : f32
    %88 = vector.broadcast %cst_26 : f32 to vector<16x8x32xf32>
    %89 = arith.maximumf %87, %88 : vector<16x8x32xf32>
    %90 = vector.shape_cast %89 : vector<16x8x32xf32> to vector<128x32xf32>
    %91 = arith.truncf %90 : vector<128x32xf32> to vector<128x32xbf16>
    %c0_27 = arith.constant 0 : index
    %c0_28 = arith.constant 0 : index
    %92 = vector.load %arg12[%c0_27, %c0_28] : memref<32x4xbf16, #tpu.memory_space<vmem>>, vector<32x4xbf16>
    %cst_29 = arith.constant dense<0.000000e+00> : vector<128x4xf32>
    %93 = tpu.matmul %91, %92, %cst_29 {dimension_numbers = #tpu.dot_dimension_numbers<[1], [0], [0], [1], [0, 0, 1, 1], [], []>} : vector<128x32xbf16>, vector<32x4xbf16>, vector<128x4xf32> -> vector<128x4xf32>
    %c0_30 = arith.constant 0 : index
    %c0_31 = arith.constant 0 : index
    %94 = vector.load %arg13[%c0_30, %c0_31] : memref<1x4xf32, #tpu.memory_space<vmem>>, vector<1x4xf32>
    %95 = vector.broadcast %94 : vector<1x4xf32> to vector<128x4xf32>
    %96 = arith.addf %93, %95 : vector<128x4xf32>
    %c0_32 = arith.constant 0 : index
    %c0_33 = arith.constant 0 : index
    %97 = vector.load %arg15[%c0_32, %c0_33] : memref<2x4xf32, #tpu.memory_space<vmem>>, vector<1x4xf32>
    %cst_34 = arith.constant dense<0.000000e+00> : vector<4xf32>
    %98 = vector.multi_reduction <add>, %96, %cst_34 [0] : vector<128x4xf32> to vector<4xf32>
    %99 = vector.shape_cast %98 : vector<4xf32> to vector<1x4xf32>
    %100 = arith.addf %97, %99 : vector<1x4xf32>
    %c0_35 = arith.constant 0 : index
    %c0_36 = arith.constant 0 : index
    %101 = vector.load %arg15[%c0_35, %c0_36] : memref<2x4xf32, #tpu.memory_space<vmem>>, vector<1x4xf32>
    tpu.vector_store %arg15[%c0_35, %c0_36], %100 {strides = array<i32>} : memref<2x4xf32, #tpu.memory_space<vmem>>, vector<1x4xf32>,
    %c1 = arith.constant 1 : index
    %c0_37 = arith.constant 0 : index
    %102 = vector.load %arg15[%c1, %c0_37] : memref<2x4xf32, #tpu.memory_space<vmem>>, vector<1x4xf32>
    %103 = arith.mulf %96, %96 : vector<128x4xf32>
    %cst_38 = arith.constant dense<0.000000e+00> : vector<4xf32>
    %104 = vector.multi_reduction <add>, %103, %cst_38 [0] : vector<128x4xf32> to vector<4xf32>
    %105 = vector.shape_cast %104 : vector<4xf32> to vector<1x4xf32>
    %106 = arith.addf %102, %105 : vector<1x4xf32>
    %c1_39 = arith.constant 1 : index
    %c0_40 = arith.constant 0 : index
    %107 = vector.load %arg15[%c1_39, %c0_40] : memref<2x4xf32, #tpu.memory_space<vmem>>, vector<1x4xf32>
    tpu.vector_store %arg15[%c1_39, %c0_40], %106 {strides = array<i32>} : memref<2x4xf32, #tpu.memory_space<vmem>>, vector<1x4xf32>,
    %c0_41 = arith.constant 0 : index
    %c0_42 = arith.constant 0 : index
    %108 = vector.load %arg15[%c0_41, %c0_42] : memref<2x4xf32, #tpu.memory_space<vmem>>, vector<2x4xf32>
    %c0_43 = arith.constant 0 : index
    %c0_44 = arith.constant 0 : index
    %109 = vector.load %arg14[%c0_43, %c0_44] : memref<2x4xf32, #tpu.memory_space<vmem>>, vector<2x4xf32>
    tpu.vector_store %arg14[%c0_43, %c0_44], %108 {strides = array<i32>} : memref<2x4xf32, #tpu.memory_space<vmem>>, vector<2x4xf32>,
    return
  }
  func.func @transform_0(%arg0: i32) -> (i32, i32, i32) {
    %c0_i32 = arith.constant 0 : i32
    %c0_i32_0 = arith.constant 0 : i32
    %c0_i32_1 = arith.constant 0 : i32
    return %arg0, %c0_i32, %c0_i32_0 : i32, i32, i32
  }
  func.func @transform_1(%arg0: i32) -> (i32, i32, i32) {
    %c0_i32 = arith.constant 0 : i32
    %c0_i32_0 = arith.constant 0 : i32
    %c0_i32_1 = arith.constant 0 : i32
    return %arg0, %c0_i32, %c0_i32_0 : i32, i32, i32
  }
  func.func @transform_2(%arg0: i32) -> (i32, i32) {
    %c0_i32 = arith.constant 0 : i32
    %c0_i32_0 = arith.constant 0 : i32
    return %arg0, %c0_i32 : i32, i32
  }
  func.func @transform_3(%arg0: i32) -> (i32, i32) {
    %c0_i32 = arith.constant 0 : i32
    %c0_i32_0 = arith.constant 0 : i32
    %c0_i32_1 = arith.constant 0 : i32
    return %c0_i32, %c0_i32_0 : i32, i32
  }
  func.func @transform_4(%arg0: i32) -> (i32, i32) {
    %c0_i32 = arith.constant 0 : i32
    %c0_i32_0 = arith.constant 0 : i32
    %c0_i32_1 = arith.constant 0 : i32
    return %c0_i32, %c0_i32_0 : i32, i32
  }
  func.func @transform_5(%arg0: i32) -> (i32, i32) {
    %c0_i32 = arith.constant 0 : i32
    %c0_i32_0 = arith.constant 0 : i32
    %c0_i32_1 = arith.constant 0 : i32
    return %c0_i32, %c0_i32_0 : i32, i32
  }
  func.func @transform_6(%arg0: i32) -> (i32, i32) {
    %c0_i32 = arith.constant 0 : i32
    %c0_i32_0 = arith.constant 0 : i32
    %c0_i32_1 = arith.constant 0 : i32
    return %c0_i32, %c0_i32_0 : i32, i32
  }
  func.func @transform_7(%arg0: i32) -> (i32, i32) {
    %c0_i32 = arith.constant 0 : i32
    %c0_i32_0 = arith.constant 0 : i32
    %c0_i32_1 = arith.constant 0 : i32
    return %c0_i32, %c0_i32_0 : i32, i32
  }
  func.func @transform_8(%arg0: i32) -> (i32, i32) {
    %c0_i32 = arith.constant 0 : i32
    %c0_i32_0 = arith.constant 0 : i32
    %c0_i32_1 = arith.constant 0 : i32
    return %c0_i32, %c0_i32_0 : i32, i32
  }
  func.func @transform_9(%arg0: i32) -> (i32, i32) {
    %c0_i32 = arith.constant 0 : i32
    %c0_i32_0 = arith.constant 0 : i32
    %c0_i32_1 = arith.constant 0 : i32
    return %c0_i32, %c0_i32_0 : i32, i32
  }
  func.func @transform_10(%arg0: i32) -> (i32, i32) {
    %c0_i32 = arith.constant 0 : i32
    %c0_i32_0 = arith.constant 0 : i32
    %c0_i32_1 = arith.constant 0 : i32
    return %c0_i32, %c0_i32_0 : i32, i32
  }
  func.func @transform_11(%arg0: i32) -> (i32, i32) {
    %c0_i32 = arith.constant 0 : i32
    %c0_i32_0 = arith.constant 0 : i32
    %c0_i32_1 = arith.constant 0 : i32
    return %c0_i32, %c0_i32_0 : i32, i32
  }
  func.func @transform_12(%arg0: i32) -> (i32, i32) {
    %c0_i32 = arith.constant 0 : i32
    %c0_i32_0 = arith.constant 0 : i32
    %c0_i32_1 = arith.constant 0 : i32
    return %c0_i32, %c0_i32_0 : i32, i32
  }
  func.func @transform_13(%arg0: i32) -> (i32, i32) {
    %c0_i32 = arith.constant 0 : i32
    %c0_i32_0 = arith.constant 0 : i32
    %c0_i32_1 = arith.constant 0 : i32
    return %c0_i32, %c0_i32_0 : i32, i32
  }
}

module attributes {stable_mosaic.version = 11 : i64} {
  func.func @_attn_kernel(%arg0: i32, %arg1: memref<16x8x3xf32, #tpu.memory_space<vmem>>, %arg2: memref<16x8x32xf32, #tpu.memory_space<vmem>>, %arg3: memref<16x8x32xf32, #tpu.memory_space<vmem>>, %arg4: memref<16x32xf32, #tpu.memory_space<vmem>>, %arg5: memref<3x3xf32, #tpu.memory_space<vmem>>, %arg6: memref<1x3xf32, #tpu.memory_space<vmem>>, %arg7: memref<1x3xf32, #tpu.memory_space<vmem>>, %arg8: memref<1x3xf32, #tpu.memory_space<vmem>>, %arg9: memref<3x32xf32, #tpu.memory_space<vmem>>, %arg10: memref<1x32xf32, #tpu.memory_space<vmem>>, %arg11: memref<1x32xf32, #tpu.memory_space<vmem>>, %arg12: memref<1x32xf32, #tpu.memory_space<vmem>>, %arg13: memref<32x4xbf16, #tpu.memory_space<vmem>>, %arg14: memref<1x4xf32, #tpu.memory_space<vmem>>, %arg15: memref<1x4xf32, #tpu.memory_space<vmem>>, %arg16: memref<1x4xf32, #tpu.memory_space<vmem>>, %arg17: memref<4x4xf32, #tpu.memory_space<vmem>>, %arg18: memref<1x4xf32, #tpu.memory_space<vmem>>, %arg19: memref<16x32xf32, #tpu.memory_space<vmem>>) attributes {dimension_semantics = [#tpu.dimension_semantics<parallel>], iteration_bounds = array<i64: 4>, scalar_prefetch = 0 : i64, scratch_operands = 0 : i64, tpu.core_type = #tpu.core_type<tc>, window_params = [{transform_indices = @transform_0, window_bounds = array<i64: 16, 8, 3>}, {transform_indices = @transform_1, window_bounds = array<i64: 16, 8, 32>}, {transform_indices = @transform_2, window_bounds = array<i64: 16, 8, 32>}, {transform_indices = @transform_3, window_bounds = array<i64: 16, 32>}, {pipeline_mode = #tpu.pipeline_mode<synchronous>, transform_indices = @transform_4, window_bounds = array<i64: 3, 3>}, {pipeline_mode = #tpu.pipeline_mode<synchronous>, transform_indices = @transform_5, window_bounds = array<i64: 1, 3>}, {pipeline_mode = #tpu.pipeline_mode<synchronous>, transform_indices = @transform_6, window_bounds = array<i64: 1, 3>}, {pipeline_mode = #tpu.pipeline_mode<synchronous>, transform_indices = @transform_7, window_bounds = array<i64: 1, 3>}, {pipeline_mode = #tpu.pipeline_mode<synchronous>, transform_indices = @transform_8, window_bounds = array<i64: 3, 32>}, {pipeline_mode = #tpu.pipeline_mode<synchronous>, transform_indices = @transform_9, window_bounds = array<i64: 1, 32>}, {pipeline_mode = #tpu.pipeline_mode<synchronous>, transform_indices = @transform_10, window_bounds = array<i64: 1, 32>}, {pipeline_mode = #tpu.pipeline_mode<synchronous>, transform_indices = @transform_11, window_bounds = array<i64: 1, 32>}, {pipeline_mode = #tpu.pipeline_mode<synchronous>, transform_indices = @transform_12, window_bounds = array<i64: 32, 4>}, {pipeline_mode = #tpu.pipeline_mode<synchronous>, transform_indices = @transform_13, window_bounds = array<i64: 1, 4>}, {pipeline_mode = #tpu.pipeline_mode<synchronous>, transform_indices = @transform_14, window_bounds = array<i64: 1, 4>}, {pipeline_mode = #tpu.pipeline_mode<synchronous>, transform_indices = @transform_15, window_bounds = array<i64: 1, 4>}, {pipeline_mode = #tpu.pipeline_mode<synchronous>, transform_indices = @transform_16, window_bounds = array<i64: 4, 4>}, {pipeline_mode = #tpu.pipeline_mode<synchronous>, transform_indices = @transform_17, window_bounds = array<i64: 1, 4>}, {transform_indices = @transform_18, window_bounds = array<i64: 16, 32>}]} {
    %c0 = arith.constant 0 : index
    %c0_0 = arith.constant 0 : index
    %c0_1 = arith.constant 0 : index
    %0 = vector.load %arg1[%c0, %c0_0, %c0_1] : memref<16x8x3xf32, #tpu.memory_space<vmem>>, vector<16x8x3xf32>
    %c0_2 = arith.constant 0 : index
    %c0_3 = arith.constant 0 : index
    %c0_4 = arith.constant 0 : index
    %1 = vector.load %arg2[%c0_2, %c0_3, %c0_4] : memref<16x8x32xf32, #tpu.memory_space<vmem>>, vector<16x8x32xf32>
    %c0_5 = arith.constant 0 : index
    %c0_6 = arith.constant 0 : index
    %2 = vector.load %arg4[%c0_5, %c0_6] : memref<16x32xf32, #tpu.memory_space<vmem>>, vector<16x32xf32>
    %c0_7 = arith.constant 0 : index
    %c0_8 = arith.constant 0 : index
    %3 = vector.load %arg5[%c0_7, %c0_8] : memref<3x3xf32, #tpu.memory_space<vmem>>, vector<3x3xf32>
    %c0_9 = arith.constant 0 : index
    %c0_10 = arith.constant 0 : index
    %4 = vector.load %arg6[%c0_9, %c0_10] : memref<1x3xf32, #tpu.memory_space<vmem>>, vector<1x3xf32>
    %c0_11 = arith.constant 0 : index
    %c0_12 = arith.constant 0 : index
    %5 = vector.load %arg7[%c0_11, %c0_12] : memref<1x3xf32, #tpu.memory_space<vmem>>, vector<1x3xf32>
    %c0_13 = arith.constant 0 : index
    %c0_14 = arith.constant 0 : index
    %6 = vector.load %arg8[%c0_13, %c0_14] : memref<1x3xf32, #tpu.memory_space<vmem>>, vector<1x3xf32>
    %c0_15 = arith.constant 0 : index
    %c0_16 = arith.constant 0 : index
    %7 = vector.load %arg9[%c0_15, %c0_16] : memref<3x32xf32, #tpu.memory_space<vmem>>, vector<3x32xf32>
    %c0_17 = arith.constant 0 : index
    %c0_18 = arith.constant 0 : index
    %8 = vector.load %arg10[%c0_17, %c0_18] : memref<1x32xf32, #tpu.memory_space<vmem>>, vector<1x32xf32>
    %cst = arith.constant 0.000000e+00 : f32
    %9 = vector.broadcast %cst : f32 to vector<16x8x3xf32>
    %10 = vector.extract_strided_slice %0 {offsets = [0, 0, 0], sizes = [16, 8, 1], strides = [1, 1, 1]} : vector<16x8x3xf32> to vector<16x8x1xf32>
    %11 = vector.extract_strided_slice %3 {offsets = [0, 0], sizes = [1, 3], strides = [1, 1]} : vector<3x3xf32> to vector<1x3xf32>
    %12 = vector.shape_cast %11 : vector<1x3xf32> to vector<3xf32>
    %13 = vector.shape_cast %12 : vector<3xf32> to vector<1x1x3xf32>
    %14 = vector.broadcast %10 : vector<16x8x1xf32> to vector<16x8x3xf32>
    %15 = vector.broadcast %13 : vector<1x1x3xf32> to vector<16x8x3xf32>
    %16 = arith.mulf %14, %15 : vector<16x8x3xf32>
    %17 = arith.addf %9, %16 : vector<16x8x3xf32>
    %18 = vector.extract_strided_slice %0 {offsets = [0, 0, 1], sizes = [16, 8, 1], strides = [1, 1, 1]} : vector<16x8x3xf32> to vector<16x8x1xf32>
    %19 = vector.extract_strided_slice %3 {offsets = [1, 0], sizes = [1, 3], strides = [1, 1]} : vector<3x3xf32> to vector<1x3xf32>
    %20 = vector.shape_cast %19 : vector<1x3xf32> to vector<3xf32>
    %21 = vector.shape_cast %20 : vector<3xf32> to vector<1x1x3xf32>
    %22 = vector.broadcast %18 : vector<16x8x1xf32> to vector<16x8x3xf32>
    %23 = vector.broadcast %21 : vector<1x1x3xf32> to vector<16x8x3xf32>
    %24 = arith.mulf %22, %23 : vector<16x8x3xf32>
    %25 = arith.addf %17, %24 : vector<16x8x3xf32>
    %26 = vector.extract_strided_slice %0 {offsets = [0, 0, 2], sizes = [16, 8, 1], strides = [1, 1, 1]} : vector<16x8x3xf32> to vector<16x8x1xf32>
    %27 = vector.extract_strided_slice %3 {offsets = [2, 0], sizes = [1, 3], strides = [1, 1]} : vector<3x3xf32> to vector<1x3xf32>
    %28 = vector.shape_cast %27 : vector<1x3xf32> to vector<3xf32>
    %29 = vector.shape_cast %28 : vector<3xf32> to vector<1x1x3xf32>
    %30 = vector.broadcast %26 : vector<16x8x1xf32> to vector<16x8x3xf32>
    %31 = vector.broadcast %29 : vector<1x1x3xf32> to vector<16x8x3xf32>
    %32 = arith.mulf %30, %31 : vector<16x8x3xf32>
    %33 = arith.addf %25, %32 : vector<16x8x3xf32>
    %34 = vector.shape_cast %4 : vector<1x3xf32> to vector<1x1x3xf32>
    %35 = vector.broadcast %34 : vector<1x1x3xf32> to vector<16x8x3xf32>
    %36 = arith.addf %33, %35 : vector<16x8x3xf32>
    %37 = vector.shape_cast %5 : vector<1x3xf32> to vector<1x1x3xf32>
    %38 = vector.broadcast %37 : vector<1x1x3xf32> to vector<16x8x3xf32>
    %39 = arith.mulf %36, %38 : vector<16x8x3xf32>
    %40 = vector.shape_cast %6 : vector<1x3xf32> to vector<1x1x3xf32>
    %41 = vector.broadcast %40 : vector<1x1x3xf32> to vector<16x8x3xf32>
    %42 = arith.addf %39, %41 : vector<16x8x3xf32>
    %cst_19 = arith.constant 0.000000e+00 : f32
    %43 = vector.broadcast %cst_19 : f32 to vector<16x8x3xf32>
    %44 = arith.maximumf %42, %43 : vector<16x8x3xf32>
    %cst_20 = arith.constant 0.000000e+00 : f32
    %45 = vector.broadcast %cst_20 : f32 to vector<16x8x32xf32>
    %46 = vector.extract_strided_slice %44 {offsets = [0, 0, 0], sizes = [16, 8, 1], strides = [1, 1, 1]} : vector<16x8x3xf32> to vector<16x8x1xf32>
    %47 = vector.extract_strided_slice %7 {offsets = [0, 0], sizes = [1, 32], strides = [1, 1]} : vector<3x32xf32> to vector<1x32xf32>
    %48 = vector.shape_cast %47 : vector<1x32xf32> to vector<32xf32>
    %49 = vector.shape_cast %48 : vector<32xf32> to vector<1x1x32xf32>
    %50 = vector.broadcast %46 : vector<16x8x1xf32> to vector<16x8x32xf32>
    %51 = vector.broadcast %49 : vector<1x1x32xf32> to vector<16x8x32xf32>
    %52 = arith.mulf %50, %51 : vector<16x8x32xf32>
    %53 = arith.addf %45, %52 : vector<16x8x32xf32>
    %54 = vector.extract_strided_slice %44 {offsets = [0, 0, 1], sizes = [16, 8, 1], strides = [1, 1, 1]} : vector<16x8x3xf32> to vector<16x8x1xf32>
    %55 = vector.extract_strided_slice %7 {offsets = [1, 0], sizes = [1, 32], strides = [1, 1]} : vector<3x32xf32> to vector<1x32xf32>
    %56 = vector.shape_cast %55 : vector<1x32xf32> to vector<32xf32>
    %57 = vector.shape_cast %56 : vector<32xf32> to vector<1x1x32xf32>
    %58 = vector.broadcast %54 : vector<16x8x1xf32> to vector<16x8x32xf32>
    %59 = vector.broadcast %57 : vector<1x1x32xf32> to vector<16x8x32xf32>
    %60 = arith.mulf %58, %59 : vector<16x8x32xf32>
    %61 = arith.addf %53, %60 : vector<16x8x32xf32>
    %62 = vector.extract_strided_slice %44 {offsets = [0, 0, 2], sizes = [16, 8, 1], strides = [1, 1, 1]} : vector<16x8x3xf32> to vector<16x8x1xf32>
    %63 = vector.extract_strided_slice %7 {offsets = [2, 0], sizes = [1, 32], strides = [1, 1]} : vector<3x32xf32> to vector<1x32xf32>
    %64 = vector.shape_cast %63 : vector<1x32xf32> to vector<32xf32>
    %65 = vector.shape_cast %64 : vector<32xf32> to vector<1x1x32xf32>
    %66 = vector.broadcast %62 : vector<16x8x1xf32> to vector<16x8x32xf32>
    %67 = vector.broadcast %65 : vector<1x1x32xf32> to vector<16x8x32xf32>
    %68 = arith.mulf %66, %67 : vector<16x8x32xf32>
    %69 = arith.addf %61, %68 : vector<16x8x32xf32>
    %70 = vector.shape_cast %8 : vector<1x32xf32> to vector<1x1x32xf32>
    %71 = vector.broadcast %70 : vector<1x1x32xf32> to vector<16x8x32xf32>
    %72 = arith.addf %69, %71 : vector<16x8x32xf32>
    %73 = vector.shape_cast %2 : vector<16x32xf32> to vector<16x1x32xf32>
    %74 = vector.broadcast %73 : vector<16x1x32xf32> to vector<16x8x32xf32>
    %75 = arith.subf %1, %74 : vector<16x8x32xf32>
    %76 = arith.addf %75, %72 : vector<16x8x32xf32>
    %c0_21 = arith.constant 0 : index
    %c0_22 = arith.constant 0 : index
    %77 = vector.load %arg11[%c0_21, %c0_22] : memref<1x32xf32, #tpu.memory_space<vmem>>, vector<1x32xf32>
    %78 = vector.shape_cast %77 : vector<1x32xf32> to vector<1x1x32xf32>
    %79 = vector.broadcast %78 : vector<1x1x32xf32> to vector<16x8x32xf32>
    %80 = arith.mulf %76, %79 : vector<16x8x32xf32>
    %c0_23 = arith.constant 0 : index
    %c0_24 = arith.constant 0 : index
    %81 = vector.load %arg12[%c0_23, %c0_24] : memref<1x32xf32, #tpu.memory_space<vmem>>, vector<1x32xf32>
    %82 = vector.shape_cast %81 : vector<1x32xf32> to vector<1x1x32xf32>
    %83 = vector.broadcast %82 : vector<1x1x32xf32> to vector<16x8x32xf32>
    %84 = arith.addf %80, %83 : vector<16x8x32xf32>
    %cst_25 = arith.constant 0.000000e+00 : f32
    %85 = vector.broadcast %cst_25 : f32 to vector<16x8x32xf32>
    %86 = arith.maximumf %84, %85 : vector<16x8x32xf32>
    %87 = vector.shape_cast %86 : vector<16x8x32xf32> to vector<128x32xf32>
    %88 = arith.truncf %87 : vector<128x32xf32> to vector<128x32xbf16>
    %c0_26 = arith.constant 0 : index
    %c0_27 = arith.constant 0 : index
    %89 = vector.load %arg13[%c0_26, %c0_27] : memref<32x4xbf16, #tpu.memory_space<vmem>>, vector<32x4xbf16>
    %cst_28 = arith.constant dense<0.000000e+00> : vector<128x4xf32>
    %90 = tpu.matmul %88, %89, %cst_28 {dimension_numbers = #tpu.dot_dimension_numbers<[1], [0], [0], [1], [0, 0, 1, 1], [], []>} : vector<128x32xbf16>, vector<32x4xbf16>, vector<128x4xf32> -> vector<128x4xf32>
    %c0_29 = arith.constant 0 : index
    %c0_30 = arith.constant 0 : index
    %91 = vector.load %arg14[%c0_29, %c0_30] : memref<1x4xf32, #tpu.memory_space<vmem>>, vector<1x4xf32>
    %92 = vector.broadcast %91 : vector<1x4xf32> to vector<128x4xf32>
    %93 = arith.addf %90, %92 : vector<128x4xf32>
    %c0_31 = arith.constant 0 : index
    %c0_32 = arith.constant 0 : index
    %94 = vector.load %arg15[%c0_31, %c0_32] : memref<1x4xf32, #tpu.memory_space<vmem>>, vector<1x4xf32>
    %95 = vector.broadcast %94 : vector<1x4xf32> to vector<128x4xf32>
    %96 = arith.mulf %93, %95 : vector<128x4xf32>
    %c0_33 = arith.constant 0 : index
    %c0_34 = arith.constant 0 : index
    %97 = vector.load %arg16[%c0_33, %c0_34] : memref<1x4xf32, #tpu.memory_space<vmem>>, vector<1x4xf32>
    %98 = vector.broadcast %97 : vector<1x4xf32> to vector<128x4xf32>
    %99 = arith.addf %96, %98 : vector<128x4xf32>
    %cst_35 = arith.constant 0.000000e+00 : f32
    %100 = vector.broadcast %cst_35 : f32 to vector<128x4xf32>
    %101 = arith.maximumf %99, %100 : vector<128x4xf32>
    %c0_36 = arith.constant 0 : index
    %c0_37 = arith.constant 0 : index
    %102 = vector.load %arg17[%c0_36, %c0_37] : memref<4x4xf32, #tpu.memory_space<vmem>>, vector<4x4xf32>
    %c0_38 = arith.constant 0 : index
    %c0_39 = arith.constant 0 : index
    %103 = vector.load %arg18[%c0_38, %c0_39] : memref<1x4xf32, #tpu.memory_space<vmem>>, vector<1x4xf32>
    %cst_40 = arith.constant 0.000000e+00 : f32
    %104 = vector.broadcast %cst_40 : f32 to vector<128x4xf32>
    %105 = vector.extract_strided_slice %101 {offsets = [0, 0], sizes = [128, 1], strides = [1, 1]} : vector<128x4xf32> to vector<128x1xf32>
    %106 = vector.extract_strided_slice %102 {offsets = [0, 0], sizes = [1, 4], strides = [1, 1]} : vector<4x4xf32> to vector<1x4xf32>
    %107 = vector.shape_cast %106 : vector<1x4xf32> to vector<4xf32>
    %108 = vector.shape_cast %107 : vector<4xf32> to vector<1x4xf32>
    %109 = vector.broadcast %105 : vector<128x1xf32> to vector<128x4xf32>
    %110 = vector.broadcast %108 : vector<1x4xf32> to vector<128x4xf32>
    %111 = arith.mulf %109, %110 : vector<128x4xf32>
    %112 = arith.addf %104, %111 : vector<128x4xf32>
    %113 = vector.extract_strided_slice %101 {offsets = [0, 1], sizes = [128, 1], strides = [1, 1]} : vector<128x4xf32> to vector<128x1xf32>
    %114 = vector.extract_strided_slice %102 {offsets = [1, 0], sizes = [1, 4], strides = [1, 1]} : vector<4x4xf32> to vector<1x4xf32>
    %115 = vector.shape_cast %114 : vector<1x4xf32> to vector<4xf32>
    %116 = vector.shape_cast %115 : vector<4xf32> to vector<1x4xf32>
    %117 = vector.broadcast %113 : vector<128x1xf32> to vector<128x4xf32>
    %118 = vector.broadcast %116 : vector<1x4xf32> to vector<128x4xf32>
    %119 = arith.mulf %117, %118 : vector<128x4xf32>
    %120 = arith.addf %112, %119 : vector<128x4xf32>
    %121 = vector.extract_strided_slice %101 {offsets = [0, 2], sizes = [128, 1], strides = [1, 1]} : vector<128x4xf32> to vector<128x1xf32>
    %122 = vector.extract_strided_slice %102 {offsets = [2, 0], sizes = [1, 4], strides = [1, 1]} : vector<4x4xf32> to vector<1x4xf32>
    %123 = vector.shape_cast %122 : vector<1x4xf32> to vector<4xf32>
    %124 = vector.shape_cast %123 : vector<4xf32> to vector<1x4xf32>
    %125 = vector.broadcast %121 : vector<128x1xf32> to vector<128x4xf32>
    %126 = vector.broadcast %124 : vector<1x4xf32> to vector<128x4xf32>
    %127 = arith.mulf %125, %126 : vector<128x4xf32>
    %128 = arith.addf %120, %127 : vector<128x4xf32>
    %129 = vector.extract_strided_slice %101 {offsets = [0, 3], sizes = [128, 1], strides = [1, 1]} : vector<128x4xf32> to vector<128x1xf32>
    %130 = vector.extract_strided_slice %102 {offsets = [3, 0], sizes = [1, 4], strides = [1, 1]} : vector<4x4xf32> to vector<1x4xf32>
    %131 = vector.shape_cast %130 : vector<1x4xf32> to vector<4xf32>
    %132 = vector.shape_cast %131 : vector<4xf32> to vector<1x4xf32>
    %133 = vector.broadcast %129 : vector<128x1xf32> to vector<128x4xf32>
    %134 = vector.broadcast %132 : vector<1x4xf32> to vector<128x4xf32>
    %135 = arith.mulf %133, %134 : vector<128x4xf32>
    %136 = arith.addf %128, %135 : vector<128x4xf32>
    %137 = vector.broadcast %103 : vector<1x4xf32> to vector<128x4xf32>
    %138 = arith.addf %136, %137 : vector<128x4xf32>
    %139 = vector.shape_cast %138 : vector<128x4xf32> to vector<16x8x4xf32>
    %cst_41 = arith.constant dense<0xFF800000> : vector<16x4xf32>
    %140 = vector.multi_reduction <maximumf>, %139, %cst_41 [1] : vector<16x8x4xf32> to vector<16x4xf32>
    %141 = vector.shape_cast %140 : vector<16x4xf32> to vector<16x1x4xf32>
    %142 = vector.broadcast %141 : vector<16x1x4xf32> to vector<16x8x4xf32>
    %143 = arith.subf %139, %142 : vector<16x8x4xf32>
    %144 = math.exp %143 : vector<16x8x4xf32>
    %cst_42 = arith.constant dense<0.000000e+00> : vector<16x4xf32>
    %145 = vector.multi_reduction <add>, %144, %cst_42 [1] : vector<16x8x4xf32> to vector<16x4xf32>
    %146 = vector.shape_cast %145 : vector<16x4xf32> to vector<16x1x4xf32>
    %147 = tpu.reciprocal %146 {approx = true} : vector<16x1x4xf32> -> vector<16x1x4xf32>
    %148 = vector.broadcast %147 : vector<16x1x4xf32> to vector<16x8x4xf32>
    %149 = arith.mulf %144, %148 : vector<16x8x4xf32>
    %150 = tpu.concatenate %149, %149, %149, %149, %149, %149, %149, %149 in 2 : vector<16x8x4xf32>, vector<16x8x4xf32>, vector<16x8x4xf32>, vector<16x8x4xf32>, vector<16x8x4xf32>, vector<16x8x4xf32>, vector<16x8x4xf32>, vector<16x8x4xf32> -> vector<16x8x32xf32>
    %c0_43 = arith.constant 0 : index
    %c0_44 = arith.constant 0 : index
    %c0_45 = arith.constant 0 : index
    %151 = vector.load %arg3[%c0_43, %c0_44, %c0_45] : memref<16x8x32xf32, #tpu.memory_space<vmem>>, vector<16x8x32xf32>
    %152 = arith.addf %151, %72 : vector<16x8x32xf32>
    %153 = arith.mulf %152, %150 : vector<16x8x32xf32>
    %cst_46 = arith.constant dense<0.000000e+00> : vector<16x32xf32>
    %154 = vector.multi_reduction <add>, %153, %cst_46 [1] : vector<16x8x32xf32> to vector<16x32xf32>
    %c0_47 = arith.constant 0 : index
    %c0_48 = arith.constant 0 : index
    %155 = vector.load %arg19[%c0_47, %c0_48] : memref<16x32xf32, #tpu.memory_space<vmem>>, vector<16x32xf32>
    tpu.vector_store %arg19[%c0_47, %c0_48], %154 {strides = array<i32>} : memref<16x32xf32, #tpu.memory_space<vmem>>, vector<16x32xf32>,
    return
  }
  func.func @transform_0(%arg0: i32) -> (i32, i32, i32) {
    %c0_i32 = arith.constant 0 : i32
    %c0_i32_0 = arith.constant 0 : i32
    %c0_i32_1 = arith.constant 0 : i32
    return %arg0, %c0_i32, %c0_i32_0 : i32, i32, i32
  }
  func.func @transform_1(%arg0: i32) -> (i32, i32, i32) {
    %c0_i32 = arith.constant 0 : i32
    %c0_i32_0 = arith.constant 0 : i32
    %c0_i32_1 = arith.constant 0 : i32
    return %arg0, %c0_i32, %c0_i32_0 : i32, i32, i32
  }
  func.func @transform_2(%arg0: i32) -> (i32, i32, i32) {
    %c0_i32 = arith.constant 0 : i32
    %c0_i32_0 = arith.constant 0 : i32
    %c0_i32_1 = arith.constant 0 : i32
    return %arg0, %c0_i32, %c0_i32_0 : i32, i32, i32
  }
  func.func @transform_3(%arg0: i32) -> (i32, i32) {
    %c0_i32 = arith.constant 0 : i32
    %c0_i32_0 = arith.constant 0 : i32
    return %arg0, %c0_i32 : i32, i32
  }
  func.func @transform_4(%arg0: i32) -> (i32, i32) {
    %c0_i32 = arith.constant 0 : i32
    %c0_i32_0 = arith.constant 0 : i32
    %c0_i32_1 = arith.constant 0 : i32
    return %c0_i32, %c0_i32_0 : i32, i32
  }
  func.func @transform_5(%arg0: i32) -> (i32, i32) {
    %c0_i32 = arith.constant 0 : i32
    %c0_i32_0 = arith.constant 0 : i32
    %c0_i32_1 = arith.constant 0 : i32
    return %c0_i32, %c0_i32_0 : i32, i32
  }
  func.func @transform_6(%arg0: i32) -> (i32, i32) {
    %c0_i32 = arith.constant 0 : i32
    %c0_i32_0 = arith.constant 0 : i32
    %c0_i32_1 = arith.constant 0 : i32
    return %c0_i32, %c0_i32_0 : i32, i32
  }
  func.func @transform_7(%arg0: i32) -> (i32, i32) {
    %c0_i32 = arith.constant 0 : i32
    %c0_i32_0 = arith.constant 0 : i32
    %c0_i32_1 = arith.constant 0 : i32
    return %c0_i32, %c0_i32_0 : i32, i32
  }
  func.func @transform_8(%arg0: i32) -> (i32, i32) {
    %c0_i32 = arith.constant 0 : i32
    %c0_i32_0 = arith.constant 0 : i32
    %c0_i32_1 = arith.constant 0 : i32
    return %c0_i32, %c0_i32_0 : i32, i32
  }
  func.func @transform_9(%arg0: i32) -> (i32, i32) {
    %c0_i32 = arith.constant 0 : i32
    %c0_i32_0 = arith.constant 0 : i32
    %c0_i32_1 = arith.constant 0 : i32
    return %c0_i32, %c0_i32_0 : i32, i32
  }
  func.func @transform_10(%arg0: i32) -> (i32, i32) {
    %c0_i32 = arith.constant 0 : i32
    %c0_i32_0 = arith.constant 0 : i32
    %c0_i32_1 = arith.constant 0 : i32
    return %c0_i32, %c0_i32_0 : i32, i32
  }
  func.func @transform_11(%arg0: i32) -> (i32, i32) {
    %c0_i32 = arith.constant 0 : i32
    %c0_i32_0 = arith.constant 0 : i32
    %c0_i32_1 = arith.constant 0 : i32
    return %c0_i32, %c0_i32_0 : i32, i32
  }
  func.func @transform_12(%arg0: i32) -> (i32, i32) {
    %c0_i32 = arith.constant 0 : i32
    %c0_i32_0 = arith.constant 0 : i32
    %c0_i32_1 = arith.constant 0 : i32
    return %c0_i32, %c0_i32_0 : i32, i32
  }
  func.func @transform_13(%arg0: i32) -> (i32, i32) {
    %c0_i32 = arith.constant 0 : i32
    %c0_i32_0 = arith.constant 0 : i32
    %c0_i32_1 = arith.constant 0 : i32
    return %c0_i32, %c0_i32_0 : i32, i32
  }
  func.func @transform_14(%arg0: i32) -> (i32, i32) {
    %c0_i32 = arith.constant 0 : i32
    %c0_i32_0 = arith.constant 0 : i32
    %c0_i32_1 = arith.constant 0 : i32
    return %c0_i32, %c0_i32_0 : i32, i32
  }
  func.func @transform_15(%arg0: i32) -> (i32, i32) {
    %c0_i32 = arith.constant 0 : i32
    %c0_i32_0 = arith.constant 0 : i32
    %c0_i32_1 = arith.constant 0 : i32
    return %c0_i32, %c0_i32_0 : i32, i32
  }
  func.func @transform_16(%arg0: i32) -> (i32, i32) {
    %c0_i32 = arith.constant 0 : i32
    %c0_i32_0 = arith.constant 0 : i32
    %c0_i32_1 = arith.constant 0 : i32
    return %c0_i32, %c0_i32_0 : i32, i32
  }
  func.func @transform_17(%arg0: i32) -> (i32, i32) {
    %c0_i32 = arith.constant 0 : i32
    %c0_i32_0 = arith.constant 0 : i32
    %c0_i32_1 = arith.constant 0 : i32
    return %c0_i32, %c0_i32_0 : i32, i32
  }
  func.func @transform_18(%arg0: i32) -> (i32, i32) {
    %c0_i32 = arith.constant 0 : i32
    %c0_i32_0 = arith.constant 0 : i32
    return %arg0, %c0_i32 : i32, i32
  }
}

module attributes {stable_mosaic.version = 11 : i64} {
  func.func @_tail_kernel(%arg0: i32, %arg1: memref<16x32xf32, #tpu.memory_space<vmem>>, %arg2: memref<16x32xf32, #tpu.memory_space<vmem>>, %arg3: memref<32x32xbf16, #tpu.memory_space<vmem>>, %arg4: memref<1x32xf32, #tpu.memory_space<vmem>>, %arg5: memref<1x32xf32, #tpu.memory_space<vmem>>, %arg6: memref<16x32xf32, #tpu.memory_space<vmem>>) attributes {dimension_semantics = [#tpu.dimension_semantics<parallel>], iteration_bounds = array<i64: 4>, scalar_prefetch = 0 : i64, scratch_operands = 0 : i64, tpu.core_type = #tpu.core_type<tc>, window_params = [{transform_indices = @transform_0, window_bounds = array<i64: 16, 32>}, {transform_indices = @transform_1, window_bounds = array<i64: 16, 32>}, {pipeline_mode = #tpu.pipeline_mode<synchronous>, transform_indices = @transform_2, window_bounds = array<i64: 32, 32>}, {pipeline_mode = #tpu.pipeline_mode<synchronous>, transform_indices = @transform_3, window_bounds = array<i64: 1, 32>}, {pipeline_mode = #tpu.pipeline_mode<synchronous>, transform_indices = @transform_4, window_bounds = array<i64: 1, 32>}, {transform_indices = @transform_5, window_bounds = array<i64: 16, 32>}]} {
    %c0 = arith.constant 0 : index
    %c0_0 = arith.constant 0 : index
    %0 = vector.load %arg1[%c0, %c0_0] : memref<16x32xf32, #tpu.memory_space<vmem>>, vector<16x32xf32>
    %1 = arith.truncf %0 : vector<16x32xf32> to vector<16x32xbf16>
    %c0_1 = arith.constant 0 : index
    %c0_2 = arith.constant 0 : index
    %2 = vector.load %arg3[%c0_1, %c0_2] : memref<32x32xbf16, #tpu.memory_space<vmem>>, vector<32x32xbf16>
    %cst = arith.constant dense<0.000000e+00> : vector<16x32xf32>
    %3 = tpu.matmul %1, %2, %cst {dimension_numbers = #tpu.dot_dimension_numbers<[1], [0], [0], [1], [0, 0, 1, 1], [], []>} : vector<16x32xbf16>, vector<32x32xbf16>, vector<16x32xf32> -> vector<16x32xf32>
    %c0_3 = arith.constant 0 : index
    %c0_4 = arith.constant 0 : index
    %4 = vector.load %arg4[%c0_3, %c0_4] : memref<1x32xf32, #tpu.memory_space<vmem>>, vector<1x32xf32>
    %5 = vector.broadcast %4 : vector<1x32xf32> to vector<16x32xf32>
    %6 = arith.mulf %3, %5 : vector<16x32xf32>
    %c0_5 = arith.constant 0 : index
    %c0_6 = arith.constant 0 : index
    %7 = vector.load %arg5[%c0_5, %c0_6] : memref<1x32xf32, #tpu.memory_space<vmem>>, vector<1x32xf32>
    %8 = vector.broadcast %7 : vector<1x32xf32> to vector<16x32xf32>
    %9 = arith.addf %6, %8 : vector<16x32xf32>
    %c0_7 = arith.constant 0 : index
    %c0_8 = arith.constant 0 : index
    %10 = vector.load %arg2[%c0_7, %c0_8] : memref<16x32xf32, #tpu.memory_space<vmem>>, vector<16x32xf32>
    %11 = arith.addf %9, %10 : vector<16x32xf32>
    %cst_9 = arith.constant 0.000000e+00 : f32
    %12 = vector.broadcast %cst_9 : f32 to vector<16x32xf32>
    %13 = arith.maximumf %11, %12 : vector<16x32xf32>
    %c0_10 = arith.constant 0 : index
    %c0_11 = arith.constant 0 : index
    %14 = vector.load %arg6[%c0_10, %c0_11] : memref<16x32xf32, #tpu.memory_space<vmem>>, vector<16x32xf32>
    tpu.vector_store %arg6[%c0_10, %c0_11], %13 {strides = array<i32>} : memref<16x32xf32, #tpu.memory_space<vmem>>, vector<16x32xf32>,
    return
  }
  func.func @transform_0(%arg0: i32) -> (i32, i32) {
    %c0_i32 = arith.constant 0 : i32
    %c0_i32_0 = arith.constant 0 : i32
    return %arg0, %c0_i32 : i32, i32
  }
  func.func @transform_1(%arg0: i32) -> (i32, i32) {
    %c0_i32 = arith.constant 0 : i32
    %c0_i32_0 = arith.constant 0 : i32
    return %arg0, %c0_i32 : i32, i32
  }
  func.func @transform_2(%arg0: i32) -> (i32, i32) {
    %c0_i32 = arith.constant 0 : i32
    %c0_i32_0 = arith.constant 0 : i32
    %c0_i32_1 = arith.constant 0 : i32
    return %c0_i32, %c0_i32_0 : i32, i32
  }
  func.func @transform_3(%arg0: i32) -> (i32, i32) {
    %c0_i32 = arith.constant 0 : i32
    %c0_i32_0 = arith.constant 0 : i32
    %c0_i32_1 = arith.constant 0 : i32
    return %c0_i32, %c0_i32_0 : i32, i32
  }
  func.func @transform_4(%arg0: i32) -> (i32, i32) {
    %c0_i32 = arith.constant 0 : i32
    %c0_i32_0 = arith.constant 0 : i32
    %c0_i32_1 = arith.constant 0 : i32
    return %c0_i32, %c0_i32_0 : i32, i32
  }
  func.func @transform_5(%arg0: i32) -> (i32, i32) {
    %c0_i32 = arith.constant 0 : i32
    %c0_i32_0 = arith.constant 0 : i32
    return %arg0, %c0_i32 : i32, i32
  }
}

</mosaic_0001>

<bundles_post_ra>
// kernel: point_transformer_block.5
= control target key start
LH: loop header
LB: loop body
LE: loop exit
PB: predicated region body
PF: predicated region fallthrough
CT: control target
= control target key end

     0   :  { %s568_s21 = smov 0   ;;  %s611_s0 = inlined_call_operand.vmem [shape: f32[64,32], index: 0, kind: input, shape index: {}]   ;;  %s612_s1 = inlined_call_operand.vmem [shape: bf16[32,32], index: 1, kind: input, shape index: {}]   ;;  %s613_s2 = inlined_call_operand.vmem [shape: f32[1,32], index: 2, kind: input, shape index: {}]   ;;  %s614_s3 = inlined_call_operand.vmem [shape: f32[1,32], index: 3, kind: input, shape index: {}]   ;;  %s615_s4 = inlined_call_operand.vmem [shape: bf16[32,96], index: 4, kind: input, shape index: {}]   ;;  %s616_s5 = inlined_call_operand.vmem [shape: f32[1,96], index: 5, kind: input, shape index: {}]   ;;  %s617_s6 = inlined_call_operand.vmem [shape: f32[64,96], index: 6, kind: output, shape index: {}]  }
   0x1 LB: > { %s467_s22 = sadd.s32 4294967295, %s529_s21   ;;  %p471_p0 = scmp.ge.s32.totalorder %s529_s21, 1  ;;  %s529_s21 = sphi %s568_s21, %s16_s21  }
   0x2   : > { %p213_p1 = scmp.lt.s32.totalorder %s529_s21, 5 }
   0x4   : > { %p214_p2 = pnand %p471_p0, %p213_p1 }
   0x5   : > { %v519_v0 = vld [vmem:[%s612_s1] sm:$0xff] (!%p214_p2)   ;;  %v531_v1 = vmov (!%p214_p2), 0.0   ;;  %v520_v2 = vld [vmem:[%s612_s1 + $0x8] sm:$0xff] (!%p214_p2)   ;;  %vm532_vm0 = vmmov (!%p214_p2), 0   ;;  %s472_s27 = sshll.u32 (!%p214_p2), %s467_s22, 1  ;;  %vm275_vm1 = vcmask (!%p214_p2), 261120  }
   0x6   : > { %217 = sbr.rel (%p214_p2) target bundleno = 458 (0x1ca), region = 44  ;;  %493 = vmatprep.subr.bf16.mxu0 (!%p214_p2), %v531_v1  ;;  %501 = vmatprep.subr.bf16.mxu1 (!%p214_p2), %v531_v1  ;;  %p244_p3 = scmp.lt.s32.totalorder (!%p214_p2), %s472_s27, 7  ;;  %v521_v6 = vld [vmem:[%s615_s4] sm:$0xff] (!%p214_p2)   ;;  %v522_v7 = vld [vmem:[%s615_s4 + $0x8] sm:$0xff] (!%p214_p2)   ;;  %vm408_vm2 = vcmask (!%p214_p2), 785408  }
   0x7   : > { %494 = vmatpush3.bf16.msra.mxu0 (!%p214_p2), %v519_v0  ;;  %497 = vmatprep.mubr.msk.bf16.mxu0 (!%p214_p2), %vm532_vm0, %v531_v1  ;;  %v479_v8 = vld [vmem:[%s613_s2] ss:$0 sm:$0xff] (!%p214_p2) }
   0x8   : > { %495 = vmatprep.subr.bf16.mxu0 (!%p214_p2), %v531_v1  ;;  %505 = vmatprep.mubr.msk.bf16.mxu1 (!%p214_p2), %vm532_vm0, %v531_v1  ;;  %v480_v10 = vld [vmem:[%s614_s3] ss:$0 sm:$0xff] (!%p214_p2) }
   0x9   : > { %502 = vmatpush3.bf16.msra.mxu1 (!%p214_p2), %v521_v6  ;;  %v481_v21 = vld [vmem:[%s616_s5] ss:$0 sm:$0xff] (!%p214_p2) }
   0xa   : > { %503 = vmatprep.subr.bf16.mxu1 (!%p214_p2), %v531_v1 }
   0xb   : > { %496 = vmatpush3.bf16.msra.mxu0 (!%p214_p2), %v520_v2 }
   0xd   : > { %s619_s27 = smov (!%p244_p3, %s472_s27), 7  ;;  %504 = vmatpush3.bf16.msra.mxu1 %v522_v7 }
   0xe   : > { %s473_s28 = sshll.u32 %s619_s27, 3 }
   0xf   : > { %s247_s7 = scalar_lea.vmem %s611_s0, %s473_s28  ;;  %s253_s20 = scalar_lea.vmem %s617_s6, %s473_s28 }
  0x10   : > { %v256_v3 = vld [vmem:[%s247_s7] sm:$0xff]  ;;  %v257_v4 = vld [vmem:[%s247_s7 + $0x8] sm:$0xff] }
  0x11   : > { %v258_v5 = vpack.c.bf16 %v257_v4, %v256_v3 }
  0x13   : > { %498 = vmatmul.mubr.msk.bf16.vlgmr.msra.gmra.mrb[0].mxu0 %vm275_vm1, %v258_v5 }
  0xe6   : > { %v313_v9 = vpop.f32.mrb[0].mxu0 }
  0xe7   : > { %v327_v11 = vmul.f32 %v479_v8, %v313_v9  ;;  %v499_v12 = vpop.f32.mrb[1].mxu0 }
  0xe8   : > { %v316_v13 = vpop.f32.mrb[2].mxu0 }
  0xe9   : > { %v336_v14 = vadd.f32 %v480_v10, %v327_v11  ;;  %v328_v15 = vmul.f32 %v479_v8, %v316_v13  ;;  %v500_v16 = vpop.f32.mrb[3].mxu0 }
  0xeb   : > { %v337_v17 = vadd.f32 %v480_v10, %v328_v15  ;;  %v338_v18 = vmax.f32 %v336_v14, 0.0 }
  0xed   : > { %v339_v19 = vmax.f32 %v337_v17, 0.0 }
  0xef   : > { %v340_v20 = vpack.c.bf16 %v339_v19, %v338_v18 }
  0xf1   : > { %506 = vmatmul.mubr.msk.bf16.vlgmr.msra.gmra.mrb[0].mxu1 %vm275_vm1, %v340_v20 }
 0x1c4   : > { %v401_v22 = vpop.f32.mrb[0].mxu1 }
 0x1c5   : > { %v402_v23 = vadd.f32 %v481_v21, %v401_v22  ;;  %v507_v24 = vpop.f32.mrb[1].mxu1 }
 0x1c6   : > { %v404_v25 = vpop.f32.mrb[2].mxu1 }
 0x1c7   : > { %409 = vst.msk [vmem:[%s253_s20] sm:$0xff] %vm408_vm2, %v402_v23  ;;  %v405_v26 = vadd.f32 %v481_v21, %v404_v25  ;;  %v508_v27 = vpop.f32.mrb[3].mxu1 }
 0x1c9   : > { %410 = vst.msk [vmem:[%s253_s20 + $0x8] sm:$0xff] %vm408_vm2, %v405_v26 }
 0x1ca PF: > { %s16_s21 = sadd.s32 1, %s529_s21  }
 0x1cb   : > { %p13_p4 = scmp.ge.s32.totalorder %s16_s21, 6  }
 0x1cd   :  { %15 = sbr.rel (!%p13_p4) target bundleno = 1 (0x1), region = 74 }

// kernel: point_transformer_block.6
= control target key start
LH: loop header
LB: loop body
LE: loop exit
PB: predicated region body
PF: predicated region fallthrough
CT: control target
= control target key end

     0   :  { %s1629_s30 = smov 0   ;;  %s2141_s0 = inlined_call_operand.vmem [shape: f32[64,8,3], index: 0, kind: input, shape index: {}]   ;;  %s2142_s1 = inlined_call_operand.vmem [shape: f32[64,8,32], index: 1, kind: input, shape index: {}]   ;;  %s2143_s2 = inlined_call_operand.vmem [shape: f32[64,32], index: 2, kind: input, shape index: {}]   ;;  %s2144_s3 = inlined_call_operand.vmem [shape: f32[3,3], index: 3, kind: input, shape index: {}]   ;;  %s2145_s4 = inlined_call_operand.vmem [shape: f32[1,3], index: 4, kind: input, shape index: {}]   ;;  %s2146_s5 = inlined_call_operand.vmem [shape: f32[1,3], index: 5, kind: input, shape index: {}]   ;;  %s2147_s6 = inlined_call_operand.vmem [shape: f32[1,3], index: 6, kind: input, shape index: {}]   ;;  %s2148_s7 = inlined_call_operand.vmem [shape: f32[3,32], index: 7, kind: input, shape index: {}]   ;;  %s2149_s8 = inlined_call_operand.vmem [shape: f32[1,32], index: 8, kind: input, shape index: {}]   ;;  %s2150_s9 = inlined_call_operand.vmem [shape: f32[2,32], index: 9, kind: output, shape index: {}]  }
   0x1 LB: > { %s1511_s10 = sadd.s32 4294967295, %s1572_s30   ;;  %p1514_p0 = scmp.ge.s32.totalorder %s1572_s30, 1  ;;  %s1572_s30 = sphi %s1629_s30, %s19_s30  }
   0x2   : > { %p305_p1 = scmp.lt.s32.totalorder %s1572_s30, 5 }
   0x4   : > { %p306_p2 = pnand %p1514_p0, %p305_p1 }
   0x5   : > { %s1515_s11 = sshll.u32 (!%p306_p2), %s1511_s10, 4  ;;  %s1519_s12 = sshll.u32 (!%p306_p2), %s1511_s10, 1 }
   0x6   : > { %309 = sbr.rel (%p306_p2) target bundleno = 524 (0x20c), region = 56  ;;  %p347_p3 = scmp.lt.s32.totalorder (!%p306_p2), %s1515_s11, 63 }
   0x7   : > { %p359_p4 = scmp.lt.s32.totalorder (!%p306_p2), %s1519_s12, 7  ;;  %p1521_p5 = scmp.ne.s32.totalorder (!%p306_p2), %s1511_s10, 0 }
   0xd   : > { %s2152_s11 = smov (!%p347_p3, %s1515_s11), 63  ;;  %s2154_s12 = smov (!%p359_p4, %s1519_s12), 7 }
   0xe   : > { %s1516_s13 = sshll.u32 %s2152_s11, 3  ;;  %s1520_s20 = sshll.u32 %s2154_s12, 3  ;;  %vm368_vm0 = vcmask (!%p1521_p5), 254976   ;;  %v1574_v0 = vmov (!%p1521_p5), 0.0  }
   0xf   : > { %s1640_s16 = scalar_lea.vmem %s2141_s0, %s1516_s13  ;;  %s1645_s19 = scalar_lea.vmem %s2142_s1, %s1516_s13  ;;  %369 = vst.msk [vmem:[#allocation2] sm:$0x3] (!%p1521_p5), %vm368_vm0, %v1574_v0 }
  0x10   : > { %s1650_s23 = scalar_lea.vmem %s2143_s2, %s1520_s20  ;;  %367 = sbr.rel (%p1521_p5) target bundleno = 23 (0x17), region = 60 }
  0x17 PF: > { %v372_v1 = vld [vmem:[%s1640_s16 + $0x10] sm:$0xff]  ;;  %v370_v2 = vld [vmem:[%s1640_s16] sm:$0xff]  ;;  %v1575_v3 = vmov 1   ;;  %v1576_v4 = vmov 0   ;;  %v373_v5 = vld [vmem:[%s1640_s16 + $0x18] sm:$0xff]  ;;  %v1577_v13 = vmov 2   ;;  %v490_v24 = vlaneseq }
  0x18   : > { %1542 = vset.pattern.permute.xlu0 %v1575_v3  ;;  %1541 = vset.pattern.permute.xlu1 %v1576_v4  ;;  %v375_v6 = vld [vmem:[%s1640_s16 + $0x28] sm:$0xff]  ;;  %v377_v7 = vld [vmem:[%s1640_s16 + $0x38] sm:$0xff]  ;;  %v374_v14 = vld [vmem:[%s1640_s16 + $0x20] sm:$0xff]  ;;  %vm1359_vm1 = vcmask 261120   ;;  %vm1398_vm2 = vcmask 253952   ;;  %vm1457_vm3 = vcmask 254976  }
  0x19   : > { %422 = vperm.xlu1 %1541, %v372_v1   ;;  %527 = vperm.xlu0 %1542, %v370_v2   ;;  %v379_v8 = vld [vmem:[%s1640_s16 + $0x48] sm:$0xff]  ;;  %v381_v9 = vld [vmem:[%s1640_s16 + $0x58] sm:$0xff]  ;;  %v376_v15 = vld [vmem:[%s1640_s16 + $0x30] sm:$0xff]  ;;  %v1679_v27 = vshrl.u32 %v490_v24, 7 }
  0x1a   : > { %v383_v10 = vld [vmem:[%s1640_s16 + $0x68] sm:$0xff]  ;;  %v385_v11 = vld [vmem:[%s1640_s16 + $0x78] sm:$0xff]  ;;  %v378_v16 = vld [vmem:[%s1640_s16 + $0x40] sm:$0xff] }
  0x1b   : > { %v371_v12 = vld [vmem:[%s1640_s16 + $0x8] sm:$0xff]  ;;  %v380_v17 = vld [vmem:[%s1640_s16 + $0x50] sm:$0xff]  ;;  %v382_v18 = vld [vmem:[%s1640_s16 + $0x60] sm:$0xff]  ;;  %v1686_v30 = vsub.s32 0, %v1679_v27  ;;  %v592_v31 = vsub.s32 1, %v1679_v27 }
  0x1c   : > { %v384_v19 = vld [vmem:[%s1640_s16 + $0x70] sm:$0xff]  ;;  %v404_v32 = vld [vmem:[%s2144_s3] sm:$0x7] }
  0x1d   : > { %427 = vperm.xlu1 %1541, %v373_v5   ;;  %539 = vperm.xlu0 %1542, %v373_v5   ;;  %v1697_v35 = vrot.slane %v404_v32, %v1686_v30  ;;  %v1701_v36 = vrot.slane %v404_v32, %v592_v31 }
  0x21   : > { %437 = vperm.xlu1 %1541, %v375_v6   ;;  %547 = vperm.xlu0 %1542, %v375_v6  }
  0x25   : > { %447 = vperm.xlu1 %1541, %v377_v7   ;;  %555 = vperm.xlu0 %1542, %v377_v7  }
  0x29   : > { %457 = vperm.xlu1 %1541, %v379_v8   ;;  %563 = vperm.xlu0 %1542, %v379_v8  }
  0x2d   : > { %467 = vperm.xlu1 %1541, %v381_v9   ;;  %571 = vperm.xlu0 %1542, %v381_v9  }
  0x31   : > { %477 = vperm.xlu1 %1541, %v383_v10   ;;  %579 = vperm.xlu0 %1542, %v383_v10  }
  0x35   : > { %487 = vperm.xlu1 %1541, %v385_v11   ;;  %587 = vperm.xlu0 %1542, %v385_v11  }
  0x39   : > { %1543 = vset.pattern.permute.xlu1 %v1575_v3  ;;  %1545 = vset.pattern.permute.xlu0 %v1577_v13 }
  0x3a   : > { %531 = vperm.xlu1 %1543, %v371_v12   ;;  %631 = vperm.xlu0 %1545, %v371_v12  }
  0x3e   : > { %535 = vperm.xlu1 %1543, %v372_v1   ;;  %643 = vperm.xlu0 %1545, %v374_v14  }
  0x42   : > { %543 = vperm.xlu1 %1543, %v374_v14   ;;  %651 = vperm.xlu0 %1545, %v376_v15  }
  0x46   : > { %551 = vperm.xlu1 %1543, %v376_v15   ;;  %659 = vperm.xlu0 %1545, %v378_v16  }
  0x4a   : > { %559 = vperm.xlu1 %1543, %v378_v16   ;;  %667 = vperm.xlu0 %1545, %v380_v17  }
  0x4e   : > { %567 = vperm.xlu1 %1543, %v380_v17   ;;  %675 = vperm.xlu0 %1545, %v382_v18  }
  0x52   : > { %575 = vperm.xlu1 %1543, %v382_v18   ;;  %683 = vperm.xlu0 %1545, %v384_v19  }
  0x56   : > { %583 = vperm.xlu1 %1543, %v384_v19   ;;  %1546 = vset.pattern.permute.xlu0 %v1576_v4 }
  0x57   : > { %412 = vperm.xlu0 %1546, %v370_v2  }
  0x5a   : > { %1544 = vset.pattern.permute.xlu1 %v1577_v13 }
  0x5b   : > { %627 = vperm.xlu1 %1544, %v370_v2   ;;  %417 = vperm.xlu0 %1546, %v371_v12   ;;  %v692_v2 = vsub.s32 2, %v1679_v27 }
  0x5f   : > { %635 = vperm.xlu1 %1544, %v372_v1   ;;  %432 = vperm.xlu0 %1546, %v374_v14  }
  0x63   : > { %639 = vperm.xlu1 %1544, %v373_v5   ;;  %442 = vperm.xlu0 %1546, %v376_v15  }
  0x67   : > { %647 = vperm.xlu1 %1544, %v375_v6   ;;  %452 = vperm.xlu0 %1546, %v378_v16  }
  0x6b   : > { %655 = vperm.xlu1 %1544, %v377_v7   ;;  %462 = vperm.xlu0 %1546, %v380_v17  }
  0x6f   : > { %663 = vperm.xlu1 %1544, %v379_v8   ;;  %472 = vperm.xlu0 %1546, %v382_v18   ;;  %v1734_v8 = vrot.slane %v404_v32, %v692_v2  ;;  %v1744_v18 = vld [vmem:[%s2145_s4] ss:$0 sm:$0xff] }
  0x73   : > { %671 = vperm.xlu1 %1544, %v381_v9   ;;  %482 = vperm.xlu0 %1546, %v384_v19  }
  0x77   : > { %679 = vperm.xlu1 %1544, %v383_v10  }
  0x7b   : > { %687 = vperm.xlu1 %1544, %v385_v11  }
  0x7f   : > { %1547 = vset.pattern.permute.xlu1 %v1576_v4 }
  0x98   : > { %v423_v20 = vpop.permute.xlu1 %422  ;;  %v528_v21 = vpop.permute.xlu0 %527 }
  0x99   : > { %v594_v7 = vmul.f32 %v1701_v36, %v528_v21  ;;  %v496_v17 = vmul.f32 %v1697_v35, %v423_v20  ;;  %v1753_v20 = vld [vmem:[%s2146_s5] ss:$0 sm:$0xff] }
  0x9c   : > { %v428_v22 = vpop.permute.xlu1 %427  ;;  %v540_v23 = vpop.permute.xlu0 %539 }
  0x9d   : > { %v497_v32 = vmul.f32 %v1697_v35, %v428_v22 }
  0xa0   : > { %v1675_v25 = vpop.permute.xlu1 %437  ;;  %v1677_v26 = vpop.permute.xlu0 %547 }
  0xa1   : > { %v499_v22 = vmul.f32 %v1697_v35, %v1675_v25 }
  0xa4   : > { %v1681_v28 = vpop.permute.xlu1 %447  ;;  %v1683_v29 = vpop.permute.xlu0 %555 }
  0xa5   : > { %v501_v25 = vmul.f32 %v1697_v35, %v1681_v28 }
  0xa8   : > { %v1692_v33 = vpop.permute.xlu1 %457  ;;  %v1694_v34 = vpop.permute.xlu0 %563 }
  0xac   : > { %v468_v37 = vpop.permute.xlu1 %467  ;;  %v572_v38 = vpop.permute.xlu0 %571 }
  0xad   : > { %v505_v39 = vmul.f32 %v1697_v35, %v468_v37  ;;  %v605_v40 = vmul.f32 %v1701_v36, %v572_v38  ;;  %v597_v37 = vmul.f32 %v1701_v36, %v540_v23  ;;  %v599_v23 = vmul.f32 %v1701_v36, %v1677_v26 }
  0xae   : > { %v601_v26 = vmul.f32 %v1701_v36, %v1683_v29 }
  0xaf   : > { %v1705_v41 = vadd.f32 %v605_v40, %v505_v39 }
  0xb0   : > { %v478_v42 = vpop.permute.xlu1 %477  ;;  %v580_v43 = vpop.permute.xlu0 %579 }
  0xb1   : > { %v507_v44 = vmul.f32 %v1697_v35, %v478_v42  ;;  %v607_v45 = vmul.f32 %v1701_v36, %v580_v43 }
  0xb3   : > { %v1709_v46 = vadd.f32 %v607_v45, %v507_v44 }
  0xb4   : > { %v488_v47 = vpop.permute.xlu1 %487  ;;  %v588_v48 = vpop.permute.xlu0 %587 }
  0xb5   : > { %v509_v49 = vmul.f32 %v1697_v35, %v488_v47  ;;  %v609_v50 = vmul.f32 %v1701_v36, %v588_v48 }
  0xb7   : > { %v1713_v51 = vadd.f32 %v609_v50, %v509_v49 }
  0xb9   : > { %v532_v52 = vpop.permute.xlu1 %531  ;;  %v632_v53 = vpop.permute.xlu0 %631 }
  0xba   : > { %v595_v12 = vmul.f32 %v1701_v36, %v532_v52  ;;  %v695_v19 = vmul.f32 %v1734_v8, %v632_v53  ;;  %v1767_v53 = vld [vmem:[%s2147_s6] ss:$0 sm:$0xff] }
  0xbd   : > { %v536_v54 = vpop.permute.xlu1 %535  ;;  %v644_v55 = vpop.permute.xlu0 %643 }
  0xbe   : > { %v596_v9 = vmul.f32 %v1701_v36, %v536_v54  ;;  %v698_v48 = vmul.f32 %v1734_v8, %v644_v55 }
  0xc0   : > { %v612_v38 = vadd.f32 %v596_v9, %v496_v17 }
  0xc1   : > { %v544_v56 = vpop.permute.xlu1 %543  ;;  %v652_v57 = vpop.permute.xlu0 %651 }
  0xc2   : > { %v598_v39 = vmul.f32 %v1701_v36, %v544_v56  ;;  %v613_v56 = vadd.f32 %v597_v37, %v497_v32 }
  0xc5   : > { %v552_v58 = vpop.permute.xlu1 %551  ;;  %v1715_v59 = vpop.permute.xlu0 %659 }
  0xc6   : > { %v600_v55 = vmul.f32 %v1701_v36, %v552_v58 }
  0xc9   : > { %v560_v60 = vpop.permute.xlu1 %559  ;;  %v1717_v61 = vpop.permute.xlu0 %667 }
  0xcd   : > { %v1719_v62 = vpop.permute.xlu1 %567  ;;  %v1721_v63 = vpop.permute.xlu0 %675 }
  0xd1   : > { %v1723_v0 = vpop.permute.xlu1 %575  ;;  %v1725_v1 = vpop.permute.xlu0 %683 }
  0xd5   : > { %v1728_v4 = vpop.permute.xlu1 %583 }
  0xd6   : > { %v413_v5 = vpop.permute.xlu0 %412 }
  0xd7   : > { %v494_v6 = vmul.f32 %v1697_v35, %v413_v5 }
  0xd9   : > { %v610_v14 = vadd.f32 %v594_v7, %v494_v6 }
  0xda   : > { %v628_v10 = vpop.permute.xlu1 %627  ;;  %v418_v11 = vpop.permute.xlu0 %417 }
  0xdb   : > { %v694_v15 = vmul.f32 %v1734_v8, %v628_v10  ;;  %v495_v16 = vmul.f32 %v1697_v35, %v418_v11 }
  0xdd   : > { %v710_v21 = vadd.f32 %v694_v15, %v610_v14  ;;  %v611_v24 = vadd.f32 %v595_v12, %v495_v16  ;;  %v615_v12 = vadd.f32 %v599_v23, %v499_v22  ;;  %v700_v14 = vmul.f32 %v1734_v8, %v652_v57 }
  0xde   : > { %v636_v40 = vpop.permute.xlu1 %635  ;;  %v433_v42 = vpop.permute.xlu0 %432 }
  0xdf   : > { %v732_v43 = vadd.f32 %v1744_v18, %v710_v21  ;;  %v711_v44 = vadd.f32 %v695_v19, %v611_v24  ;;  %v696_v45 = vmul.f32 %v1734_v8, %v636_v40  ;;  %v498_v47 = vmul.f32 %v1697_v35, %v433_v42 }
  0xe0   : > { %v617_v19 = vadd.f32 %v601_v26, %v501_v25  ;;  %v602_v21 = vmul.f32 %v1701_v36, %v560_v60 }
  0xe1   : > { %v733_v49 = vadd.f32 %v1744_v18, %v711_v44  ;;  %v712_v50 = vadd.f32 %v696_v45, %v612_v38  ;;  %v614_v52 = vadd.f32 %v598_v39, %v498_v47  ;;  %v754_v54 = vmul.f32 %v1753_v20, %v732_v43 }
  0xe2   : > { %v640_v5 = vpop.permute.xlu1 %639  ;;  %v443_v6 = vpop.permute.xlu0 %442  ;;  %v702_v43 = vmul.f32 %v1734_v8, %v1715_v59  ;;  %v603_v59 = vmul.f32 %v1701_v36, %v1694_v34 }
  0xe3   : > { %v734_v7 = vadd.f32 %v1744_v18, %v712_v50  ;;  %v714_v9 = vadd.f32 %v698_v48, %v614_v52  ;;  %v697_v10 = vmul.f32 %v1734_v8, %v640_v5  ;;  %v500_v11 = vmul.f32 %v1697_v35, %v443_v6 }
  0xe4   : > { %v776_v15 = vadd.f32 %v1767_v53, %v754_v54  ;;  %v755_v28 = vmul.f32 %v1753_v20, %v733_v49  ;;  %v503_v49 = vmul.f32 %v1697_v35, %v1692_v33  ;;  %v704_v50 = vmul.f32 %v1734_v8, %v1717_v61 }
  0xe5   : > { %v736_v29 = vadd.f32 %v1744_v18, %v714_v9  ;;  %v713_v16 = vadd.f32 %v697_v10, %v613_v56  ;;  %v616_v58 = vadd.f32 %v600_v55, %v500_v11  ;;  %v756_v17 = vmul.f32 %v1753_v20, %v734_v7 }
  0xe6   : > { %v648_v24 = vpop.permute.xlu1 %647  ;;  %v453_v32 = vpop.permute.xlu0 %452  ;;  %v1784_v37 = vmax.f32 %v776_v15, 0.0  ;;  %v777_v38 = vadd.f32 %v1767_v53, %v755_v28  ;;  %v604_v52 = vmul.f32 %v1701_v36, %v1719_v62  ;;  %v619_v11 = vadd.f32 %v603_v59, %v503_v49 }
  0xe7   : > { %v735_v57 = vadd.f32 %v1744_v18, %v713_v16  ;;  %v716_v39 = vadd.f32 %v700_v14, %v616_v58  ;;  %v699_v40 = vmul.f32 %v1734_v8, %v648_v24  ;;  %v502_v42 = vmul.f32 %v1697_v35, %v453_v32 }
  0xe8   : > { %810 = vperm.xlu0 %1546, %v1784_v37   ;;  %v1793_v44 = vmax.f32 %v777_v38, 0.0  ;;  %v778_v60 = vadd.f32 %v1767_v53, %v756_v17  ;;  %v758_v45 = vmul.f32 %v1753_v20, %v736_v29  ;;  %v606_v14 = vmul.f32 %v1701_v36, %v1723_v0 }
  0xe9   : > { %v738_v47 = vadd.f32 %v1744_v18, %v716_v39  ;;  %v715_v22 = vadd.f32 %v699_v40, %v615_v12  ;;  %v618_v23 = vadd.f32 %v602_v21, %v502_v42  ;;  %v757_v48 = vmul.f32 %v1753_v20, %v735_v57 }
  0xea   : > { %815 = vperm.xlu1 %1547, %v1793_v44   ;;  %v656_v54 = vpop.permute.xlu1 %655  ;;  %v463_v56 = vpop.permute.xlu0 %462  ;;  %v1811_v5 = vmax.f32 %v778_v60, 0.0  ;;  %v780_v61 = vadd.f32 %v1767_v53, %v758_v45  ;;  %v706_v12 = vmul.f32 %v1734_v8, %v1721_v63  ;;  %v708_v40 = vmul.f32 %v1734_v8, %v1725_v1 }
  0xeb   : > { %v737_v25 = vadd.f32 %v1744_v18, %v715_v22  ;;  %v718_v26 = vadd.f32 %v702_v43, %v618_v23  ;;  %v701_v55 = vmul.f32 %v1734_v8, %v656_v54  ;;  %v504_v33 = vmul.f32 %v1697_v35, %v463_v56 }
  0xec   : > { %v779_v34 = vadd.f32 %v1767_v53, %v757_v48  ;;  %v760_v6 = vmul.f32 %v1753_v20, %v738_v47  ;;  %v1829_v21 = vmax.f32 %v780_v61, 0.0  ;;  %v608_v42 = vmul.f32 %v1701_v36, %v1728_v4 }
  0xed   : > { %v740_v62 = vadd.f32 %v1744_v18, %v718_v26  ;;  %v717_v7 = vadd.f32 %v701_v55, %v617_v19  ;;  %v620_v9 = vadd.f32 %v604_v52, %v504_v33  ;;  %v759_v10 = vmul.f32 %v1753_v20, %v737_v25 }
  0xee   : > { %820 = vperm.xlu1 %1547, %v1811_v5   ;;  %v664_v15 = vpop.permute.xlu1 %663  ;;  %v473_v28 = vpop.permute.xlu0 %472  ;;  %v1823_v29 = vmax.f32 %v779_v34, 0.0  ;;  %v782_v0 = vadd.f32 %v1767_v53, %v760_v6 }
  0xef   : > { %v739_v16 = vadd.f32 %v1744_v18, %v717_v7  ;;  %v720_v58 = vadd.f32 %v704_v50, %v620_v9  ;;  %v703_v17 = vmul.f32 %v1734_v8, %v664_v15  ;;  %v506_v19 = vmul.f32 %v1697_v35, %v473_v28 }
  0xf0   : > { %825 = vperm.xlu0 %1546, %v1823_v29   ;;  %v781_v63 = vadd.f32 %v1767_v53, %v759_v10  ;;  %v762_v24 = vmul.f32 %v1753_v20, %v740_v62  ;;  %v1847_v49 = vmax.f32 %v782_v0, 0.0 }
  0xf1   : > { %v742_v32 = vadd.f32 %v1744_v18, %v720_v58  ;;  %v719_v38 = vadd.f32 %v703_v17, %v619_v11  ;;  %v622_v57 = vadd.f32 %v606_v14, %v506_v19  ;;  %v761_v39 = vmul.f32 %v1753_v20, %v739_v16 }
  0xf2   : > { %830 = vperm.xlu1 %1547, %v1829_v21   ;;  %v672_v43 = vpop.permute.xlu1 %671  ;;  %v483_v60 = vpop.permute.xlu0 %482  ;;  %v1841_v45 = vmax.f32 %v781_v63, 0.0  ;;  %v784_v36 = vadd.f32 %v1767_v53, %v762_v24 }
  0xf3   : > { %v741_v47 = vadd.f32 %v1744_v18, %v719_v38  ;;  %v722_v22 = vadd.f32 %v706_v12, %v622_v57  ;;  %v705_v23 = vmul.f32 %v1734_v8, %v672_v43  ;;  %v508_v48 = vmul.f32 %v1697_v35, %v483_v60 }
  0xf4   : > { %835 = vperm.xlu0 %1546, %v1841_v45   ;;  %v783_v1 = vadd.f32 %v1767_v53, %v761_v39  ;;  %v764_v4 = vmul.f32 %v1753_v20, %v742_v32  ;;  %v1859_v34 = vmax.f32 %v784_v36, 0.0 }
  0xf5   : > { %v744_v59 = vadd.f32 %v1744_v18, %v722_v22  ;;  %v721_v50 = vadd.f32 %v705_v23, %v1705_v41  ;;  %v624_v52 = vadd.f32 %v608_v42, %v508_v48  ;;  %v763_v54 = vmul.f32 %v1753_v20, %v741_v47  ;;  %v402_v48 = vld [vmem:[%s1650_s23] sm:$0xff] }
  0xf6   : > { %840 = vperm.xlu1 %1547, %v1847_v49   ;;  %v680_v35 = vpop.permute.xlu1 %679  ;;  %v799_v56 = vmax.f32 %v783_v1, 0.0  ;;  %v786_v61 = vadd.f32 %v1767_v53, %v764_v4  ;;  %v408_v4 = vld [vmem:[%s2148_s7] sm:$0x7] }
  0xf7   : > { %v743_v25 = vadd.f32 %v1744_v18, %v721_v50  ;;  %v724_v26 = vadd.f32 %v708_v40, %v624_v52  ;;  %v707_v55 = vmul.f32 %v1734_v8, %v680_v35  ;;  %v785_v33 = vadd.f32 %v1767_v53, %v763_v54 }
  0xf8   : > { %845 = vperm.xlu0 %1546, %v799_v56   ;;  %v766_v41 = vmul.f32 %v1753_v20, %v744_v59  ;;  %v802_v15 = vmax.f32 %v786_v61, 0.0  ;;  %v1578_v40 = vmov 1966171168   ;;  %v1952_v59 = vrot.slane %v408_v4, %v592_v31 }
  0xf9   : > { %v746_v6 = vadd.f32 %v1744_v18, %v724_v26  ;;  %v723_v62 = vadd.f32 %v707_v55, %v1709_v46  ;;  %v1865_v7 = vmax.f32 %v785_v33, 0.0  ;;  %v765_v9 = vmul.f32 %v1753_v20, %v743_v25 }
  0xfa   : > { %850 = vperm.xlu1 %1547, %v1859_v34   ;;  %v688_v10 = vpop.permute.xlu1 %687  ;;  %v788_v28 = vadd.f32 %v1767_v53, %v766_v41  ;;  %v1150_v42 = vunpack.c.l.s4 %v1578_v40  ;;  %v1955_v54 = vrot.slane %v408_v4, %v1686_v30  ;;  %v388_v40 = vld [vmem:[%s1645_s19 + $0x10] sm:$0xff] }
  0xfb   : > { %v745_v11 = vadd.f32 %v1744_v18, %v723_v62  ;;  %v709_v12 = vmul.f32 %v1734_v8, %v688_v10  ;;  %v787_v14 = vadd.f32 %v1767_v53, %v765_v9  ;;  %v768_v46 = vmul.f32 %v1753_v20, %v746_v6 }
  0xfc   : > { %855 = vperm.xlu0 %1546, %v1865_v7   ;;  %v804_v8 = vmax.f32 %v788_v28, 0.0 }
  0xfd   : > { %v725_v16 = vadd.f32 %v709_v12, %v1713_v51  ;;  %v803_v58 = vmax.f32 %v787_v14, 0.0  ;;  %v767_v17 = vmul.f32 %v1753_v20, %v745_v11  ;;  %v790_v0 = vadd.f32 %v1767_v53, %v768_v46  ;;  %v386_v11 = vld [vmem:[%s1645_s19] sm:$0xff]  ;;  %v387_v14 = vld [vmem:[%s1645_s19 + $0x8] sm:$0xff] }
  0xfe   : > { %860 = vperm.xlu1 %1547, %v802_v15   ;;  %v1148_v46 = vcombine.high %v402_v48, %v402_v48 }
  0xff   : > { %v747_v19 = vadd.f32 %v1744_v18, %v725_v16  ;;  %v789_v63 = vadd.f32 %v1767_v53, %v767_v17  ;;  %v806_v51 = vmax.f32 %v790_v0, 0.0 }
 0x100   : > { %865 = vperm.xlu0 %1546, %v803_v58  }
 0x101   : > { %v805_v24 = vmax.f32 %v789_v63, 0.0  ;;  %v769_v32 = vmul.f32 %v1753_v20, %v747_v19 }
 0x102   : > { %870 = vperm.xlu1 %1547, %v804_v8  }
 0x103   : > { %v791_v38 = vadd.f32 %v1767_v53, %v769_v32 }
 0x104   : > { %875 = vperm.xlu0 %1546, %v805_v24  }
 0x105   : > { %v807_v57 = vmax.f32 %v791_v38, 0.0 }
 0x106   : > { %880 = vperm.xlu1 %1547, %v806_v51  }
 0x108   : > { %885 = vperm.xlu0 %1546, %v807_v57  }
 0x10a   : > { %1548 = vset.pattern.permute.xlu1 %v1575_v3 }
 0x10b   : > { %925 = vperm.xlu1 %1548, %v1784_v37  }
 0x10c   : > { %1549 = vset.pattern.permute.xlu0 %v1575_v3 }
 0x10d   : > { %929 = vperm.xlu0 %1549, %v1793_v44  }
 0x10f   : > { %933 = vperm.xlu1 %1548, %v1811_v5  }
 0x111   : > { %1551 = vset.pattern.permute.xlu0 %v1577_v13 }
 0x112   : > { %1029 = vperm.xlu0 %1551, %v1793_v44  }
 0x113   : > { %1550 = vset.pattern.permute.xlu1 %v1577_v13 }
 0x114   : > { %1025 = vperm.xlu1 %1550, %v1784_v37  }
 0x116   : > { %1041 = vperm.xlu0 %1551, %v1829_v21  }
 0x118   : > { %1552 = vset.pattern.permute.xlu1 %v1575_v3 }
 0x119   : > { %937 = vperm.xlu1 %1552, %v1823_v29  }
 0x11a   : > { %1053 = vperm.xlu0 %1551, %v799_v56  }
 0x11d   : > { %1553 = vset.pattern.permute.xlu1 %v1577_v13 }
 0x11e   : > { %1065 = vperm.xlu0 %1551, %v802_v15   ;;  %1033 = vperm.xlu1 %1553, %v1811_v5  }
 0x122   : > { %1559 = vset.pattern.permute.xlu0 %v1575_v3  ;;  %1037 = vperm.xlu1 %1553, %v1823_v29  }
 0x123   : > { %941 = vperm.xlu0 %1559, %v1829_v21  }
 0x126   : > { %1554 = vset.pattern.permute.xlu1 %v1575_v3 }
 0x127   : > { %953 = vperm.xlu0 %1559, %v799_v56   ;;  %945 = vperm.xlu1 %1554, %v1841_v45   ;;  %v1959_v56 = vrot.slane %v408_v4, %v692_v2 }
 0x12b   : > { %965 = vperm.xlu0 %1559, %v802_v15   ;;  %949 = vperm.xlu1 %1554, %v1847_v49   ;;  %v1976_v15 = vld [vmem:[%s2149_s8] ss:$0 sm:$0xff] }
 0x12f   : > { %977 = vperm.xlu0 %1559, %v805_v24   ;;  %1555 = vset.pattern.permute.xlu1 %v1577_v13 }
 0x130   : > { %1045 = vperm.xlu1 %1555, %v1841_v45   ;;  %v1151_v45 = vunpack.c.0.s8 %v1150_v42 }
 0x132   : > { %v1941_v23 = vsub.s32 %v1151_v45, %v1679_v27 }
 0x133   : > { %1562 = vset.pattern.permute.xlu0 %v1577_v13 }
 0x134   : > { %1077 = vperm.xlu0 %1562, %v805_v24   ;;  %1049 = vperm.xlu1 %1555, %v1847_v49   ;;  %v1155_v1 = vrot.slane %v402_v48, %v1941_v23  ;;  %v1162_v38 = vrot.slane %v1148_v46, %v1941_v23 }
 0x136   : > { %v1163_v52 = vcombine.high %v1155_v1, %v1155_v1  ;;  %v1171_v55 = vrot.slane %v1155_v1, %v1941_v23 }
 0x138   : > { %1085 = vperm.xlu0 %1562, %v807_v57   ;;  %1556 = vset.pattern.permute.xlu1 %v1575_v3  ;;  %v1185_v33 = vrot.slane %v1163_v52, %v1941_v23  ;;  %v1249_v62 = vrot.slane %v1171_v55, %v1686_v30  ;;  %v1193_v19 = vcombine.high %v1171_v55, %v1171_v55 }
 0x139   : > { %957 = vperm.xlu1 %1556, %v1859_v34  }
 0x13a   : > { %v1253_v9 = vrot.slane %v1185_v33, %v1686_v30  ;;  %v1326_v16 = vsub.f32 %v386_v11, %v1249_v62  ;;  %v1195_v32 = vcombine.high %v1185_v33, %v1185_v33 }
 0x13c   : > { %v1327_v63 = vsub.f32 %v387_v14, %v1253_v9  ;;  %v1261_v4 = vrot.slane %v1195_v32, %v1686_v30  ;;  %v390_v14 = vld [vmem:[%s1645_s19 + $0x20] sm:$0xff] }
 0x13d   : > { %961 = vperm.xlu1 %1556, %v1865_v7  }
 0x141   : > { %1557 = vset.pattern.permute.xlu1 %v1577_v13 }
 0x142   : > { %1057 = vperm.xlu1 %1557, %v1859_v34  }
 0x146   : > { %1061 = vperm.xlu1 %1557, %v1865_v7  }
 0x14a   : > { %1558 = vset.pattern.permute.xlu1 %v1575_v3 }
 0x14b   : > { %969 = vperm.xlu1 %1558, %v803_v58  }
 0x14f   : > { %973 = vperm.xlu1 %1558, %v804_v8  }
 0x153   : > { %1560 = vset.pattern.permute.xlu1 %v1577_v13 }
 0x154   : > { %1069 = vperm.xlu1 %1560, %v803_v58  }
 0x158   : > { %1073 = vperm.xlu1 %1560, %v804_v8  }
 0x15c   : > { %1561 = vset.pattern.permute.xlu1 %v1575_v3 }
 0x15d   : > { %981 = vperm.xlu1 %1561, %v806_v51  }
 0x161   : > { %985 = vperm.xlu1 %1561, %v807_v57  }
 0x165   : > { %1563 = vset.pattern.permute.xlu1 %v1577_v13 }
 0x166   : > { %1081 = vperm.xlu1 %1563, %v806_v51  }
 0x167   : > { %v811_v20 = vpop.permute.xlu0 %810 }
 0x168   : > { %v892_v61 = vmul.f32 %v1955_v54, %v811_v20 }
 0x169   : > { %v816_v18 = vpop.permute.xlu1 %815 }
 0x16a   : > { %v893_v31 = vmul.f32 %v1955_v54, %v816_v18  ;;  %v1257_v18 = vrot.slane %v1193_v19, %v1686_v30 }
 0x16d   : > { %v821_v53 = vpop.permute.xlu1 %820 }
 0x16e   : > { %v894_v51 = vmul.f32 %v1955_v54, %v821_v53 }
 0x16f   : > { %v1916_v37 = vpop.permute.xlu0 %825 }
 0x170   : > { %v895_v53 = vmul.f32 %v1955_v54, %v1916_v37 }
 0x171   : > { %v1918_v44 = vpop.permute.xlu1 %830 }
 0x173   : > { %v1920_v5 = vpop.permute.xlu0 %835 }
 0x175   : > { %v1922_v29 = vpop.permute.xlu1 %840 }
 0x177   : > { %v1924_v21 = vpop.permute.xlu0 %845 }
 0x179   : > { %v1926_v3 = vpop.permute.xlu1 %850 }
 0x17b   : > { %v1928_v39 = vpop.permute.xlu0 %855 }
 0x17d   : > { %v1930_v13 = vpop.permute.xlu1 %860 }
 0x17f   : > { %v1932_v43 = vpop.permute.xlu0 %865 }
 0x181   : > { %v1934_v60 = vpop.permute.xlu1 %870 }
 0x183   : > { %v1936_v47 = vpop.permute.xlu0 %875 }
 0x185   : > { %v1938_v22 = vpop.permute.xlu1 %880 }
 0x187   : > { %v1944_v49 = vpop.permute.xlu0 %885 }
 0x18a   : > { %v926_v36 = vpop.permute.xlu1 %925 }
 0x18b   : > { %v992_v26 = vmul.f32 %v1952_v59, %v926_v36 }
 0x18c   : > { %v930_v50 = vpop.permute.xlu0 %929 }
 0x18d   : > { %v993_v25 = vmul.f32 %v1952_v59, %v930_v50  ;;  %v1008_v6 = vadd.f32 %v992_v26, %v892_v61  ;;  %v1993_v50 = vrot.slane %v1162_v38, %v1941_v23  ;;  %v389_v26 = vld [vmem:[%s1645_s19 + $0x18] sm:$0xff] }
 0x18e   : > { %v934_v35 = vpop.permute.xlu1 %933  ;;  %v1329_v37 = vsub.f32 %v389_v26, %v1261_v4 }
 0x18f   : > { %v1009_v27 = vadd.f32 %v993_v25, %v893_v31  ;;  %v994_v24 = vmul.f32 %v1952_v59, %v934_v35  ;;  %v1328_v35 = vsub.f32 %v388_v40, %v1257_v18 }
 0x191   : > { %v1030_v34 = vpop.permute.xlu0 %1029  ;;  %v1010_v48 = vadd.f32 %v994_v24, %v894_v51 }
 0x192   : > { %v1093_v41 = vmul.f32 %v1959_v56, %v1030_v34 }
 0x193   : > { %v1026_v2 = vpop.permute.xlu1 %1025 }
 0x194   : > { %v1092_v7 = vmul.f32 %v1959_v56, %v1026_v2  ;;  %v1109_v10 = vadd.f32 %v1093_v41, %v1009_v27  ;;  %v896_v2 = vmul.f32 %v1955_v54, %v1918_v44 }
 0x195   : > { %v1042_v12 = vpop.permute.xlu0 %1041 }
 0x196   : > { %v1108_v28 = vadd.f32 %v1092_v7, %v1008_v6  ;;  %v1131_v8 = vadd.f32 %v1976_v15, %v1109_v10  ;;  %v1265_v6 = vrot.slane %v1993_v50, %v1686_v30  ;;  %v1096_v46 = vmul.f32 %v1959_v56, %v1042_v12 }
 0x198   : > { %v1130_v58 = vadd.f32 %v1976_v15, %v1108_v28  ;;  %v938_v17 = vpop.permute.xlu1 %937  ;;  %v1343_v20 = vadd.f32 %v1327_v63, %v1131_v8  ;;  %v1330_v32 = vsub.f32 %v390_v14, %v1265_v6 }
 0x199   : > { %v1980_v0 = vpop.permute.xlu0 %1053  ;;  %v995_v1 = vmul.f32 %v1952_v59, %v938_v17 }
 0x19a   : > { %v1342_v57 = vadd.f32 %v1326_v16, %v1130_v58  ;;  %v1402_v55 = vmul.f32 %v1343_v20, %v1343_v20  ;;  %v1361_v7 = vsel %vm1359_vm1, %v1343_v20, 0.0  ;;  %v1164_v20 = vcombine.high %v1162_v38, %v1162_v38 }
 0x19b   : > { %v1011_v34 = vadd.f32 %v995_v1, %v895_v53 }
 0x19c   : > { %v1401_v52 = vmul.f32 %v1342_v57, %v1342_v57  ;;  %v1360_v33 = vsel %vm1359_vm1, %v1342_v57, 0.0  ;;  %v1418_v58 = vsel %vm1359_vm1, %v1402_v55, 0.0  ;;  %v897_v55 = vmul.f32 %v1955_v54, %v1920_v5 }
 0x19d   : > { %v1034_v42 = vpop.permute.xlu1 %1033  ;;  %v1987_v45 = vpop.permute.xlu0 %1065  ;;  %v1362_v28 = vadd.f32 %v1361_v7, %v1360_v33 }
 0x19e   : > { %v1094_v36 = vmul.f32 %v1959_v56, %v1034_v42  ;;  %v1417_v9 = vsel %vm1359_vm1, %v1401_v52, 0.0 }
 0x19f   : > { %v1419_v8 = vadd.f32 %v1418_v58, %v1417_v9  ;;  %v898_v9 = vmul.f32 %v1955_v54, %v1922_v29 }
 0x1a0   : > { %v1110_v25 = vadd.f32 %v1094_v36, %v1010_v48 }
 0x1a1   : > { %v1038_v31 = vpop.permute.xlu1 %1037 }
 0x1a2   : > { %v1132_v61 = vadd.f32 %v1976_v15, %v1110_v25  ;;  %v1095_v41 = vmul.f32 %v1959_v56, %v1038_v31  ;;  %v942_v27 = vpop.permute.xlu0 %941 }
 0x1a3   : > { %v996_v62 = vmul.f32 %v1952_v59, %v942_v27  ;;  %v391_v27 = vld [vmem:[%s1645_s19 + $0x28] sm:$0xff] }
 0x1a4   : > { %v1344_v10 = vadd.f32 %v1328_v35, %v1132_v61  ;;  %v1111_v11 = vadd.f32 %v1095_v41, %v1011_v34  ;;  %v1192_v35 = vrot.slane %v1164_v20, %v1941_v23  ;;  %v1194_v61 = vcombine.high %v1993_v50, %v1993_v50 }
 0x1a5   : > { %v1012_v16 = vadd.f32 %v996_v62, %v896_v2 }
 0x1a6   : > { %v1363_v44 = vsel %vm1359_vm1, %v1344_v10, 0.0  ;;  %v1403_v17 = vmul.f32 %v1344_v10, %v1344_v10  ;;  %v1133_v19 = vadd.f32 %v1976_v15, %v1111_v11  ;;  %v946_v63 = vpop.permute.xlu1 %945  ;;  %v954_v31 = vpop.permute.xlu0 %953  ;;  %v1269_v33 = vrot.slane %v1192_v35, %v1686_v30  ;;  %v2033_v10 = vld [vmem:[%s1650_s23 + $0x8] sm:$0xff] }
 0x1a7   : > { %v1364_v24 = vadd.f32 %v1363_v44, %v1362_v28  ;;  %v1112_v51 = vadd.f32 %v1096_v46, %v1012_v16  ;;  %v997_v52 = vmul.f32 %v1952_v59, %v946_v63  ;;  %v999_v5 = vmul.f32 %v1952_v59, %v954_v31  ;;  %v392_v16 = vld [vmem:[%s1645_s19 + $0x30] sm:$0xff] }
 0x1a8   : > { %v1420_v57 = vsel %vm1359_vm1, %v1403_v17, 0.0  ;;  %v1345_v18 = vadd.f32 %v1329_v37, %v1133_v19  ;;  %v1331_v11 = vsub.f32 %v391_v27, %v1269_v33  ;;  %v1273_v14 = vrot.slane %v1194_v61, %v1686_v30 }
 0x1a9   : > { %v1421_v40 = vadd.f32 %v1420_v57, %v1419_v8  ;;  %v1134_v12 = vadd.f32 %v1976_v15, %v1112_v51  ;;  %v1013_v37 = vadd.f32 %v997_v52, %v897_v55  ;;  %v899_v28 = vmul.f32 %v1955_v54, %v1924_v21 }
 0x1aa   : > { %v1365_v42 = vsel %vm1359_vm1, %v1345_v18, 0.0  ;;  %v1404_v48 = vmul.f32 %v1345_v18, %v1345_v18  ;;  %v950_v1 = vpop.permute.xlu1 %949  ;;  %v1196_v46 = vcombine.high %v1192_v35, %v1192_v35  ;;  %v1204_v29 = vrot.slane %v2033_v10, %v1941_v23  ;;  %v966_v57 = vpop.permute.xlu0 %965  ;;  %v393_v18 = vld [vmem:[%s1645_s19 + $0x38] sm:$0xff] }
 0x1ab   : > { %v1366_v36 = vadd.f32 %v1365_v42, %v1364_v24  ;;  %v1346_v4 = vadd.f32 %v1330_v32, %v1134_v12  ;;  %v998_v6 = vmul.f32 %v1952_v59, %v950_v1  ;;  %v1015_v63 = vadd.f32 %v999_v5, %v899_v28 }
 0x1ac   : > { %v1422_v53 = vsel %vm1359_vm1, %v1404_v48, 0.0  ;;  %v1332_v24 = vsub.f32 %v392_v16, %v1273_v14  ;;  %v1099_v51 = vmul.f32 %v1959_v56, %v1980_v0  ;;  %v1277_v21 = vrot.slane %v1196_v46, %v1686_v30  ;;  %v396_v14 = vld [vmem:[%s1645_s19 + $0x50] sm:$0xff] }
 0x1ad   : > { %v1423_v25 = vadd.f32 %v1422_v53, %v1421_v40  ;;  %v1367_v26 = vsel %vm1359_vm1, %v1346_v4, 0.0  ;;  %v1405_v38 = vmul.f32 %v1346_v4, %v1346_v4  ;;  %v1014_v44 = vadd.f32 %v998_v6, %v898_v9 }
 0x1ae   : > { %v1368_v34 = vadd.f32 %v1367_v26, %v1366_v36  ;;  %v1115_v48 = vadd.f32 %v1099_v51, %v1015_v63  ;;  %v1220_v1 = vrot.slane %v1204_v29, %v1941_v23  ;;  %v1002_v36 = vmul.f32 %v1952_v59, %v966_v57 }
 0x1af   : > { %v1424_v41 = vsel %vm1359_vm1, %v1405_v38, 0.0  ;;  %v1046_v2 = vpop.permute.xlu1 %1045  ;;  %v1333_v52 = vsub.f32 %v393_v18, %v1277_v21  ;;  %v902_v35 = vmul.f32 %v1955_v54, %v1930_v13  ;;  %v1212_v55 = vcombine.high %v1204_v29, %v1204_v29  ;;  %v395_v29 = vld [vmem:[%s1645_s19 + $0x48] sm:$0xff] }
 0x1b0   : > { %v1097_v62 = vmul.f32 %v1959_v56, %v1046_v2  ;;  %v1425_v7 = vadd.f32 %v1424_v41, %v1423_v25  ;;  %v1137_v31 = vadd.f32 %v1976_v15, %v1115_v48  ;;  %v1242_v33 = vcombine.high %v1220_v1, %v1220_v1 }
 0x1b1   : > { %v1018_v27 = vadd.f32 %v1002_v36, %v902_v35  ;;  %v900_v13 = vmul.f32 %v1955_v54, %v1926_v3  ;;  %v1102_v6 = vmul.f32 %v1959_v56, %v1987_v45  ;;  %v1234_v5 = vrot.slane %v1212_v55, %v1941_v23 }
 0x1b2   : > { %v1113_v50 = vadd.f32 %v1097_v62, %v1013_v37  ;;  %v1281_v62 = vrot.slane %v1220_v1, %v1686_v30  ;;  %v1349_v9 = vadd.f32 %v1333_v52, %v1137_v31  ;;  %v901_v45 = vmul.f32 %v1955_v54, %v1928_v39 }
 0x1b3   : > { %v1050_v58 = vpop.permute.xlu1 %1049  ;;  %v1118_v28 = vadd.f32 %v1102_v6, %v1018_v27 }
 0x1b4   : > { %v1135_v17 = vadd.f32 %v1976_v15, %v1113_v50  ;;  %v1098_v19 = vmul.f32 %v1959_v56, %v1050_v58  ;;  %v1373_v57 = vsel %vm1359_vm1, %v1349_v9, 0.0 }
 0x1b6   : > { %v1347_v8 = vadd.f32 %v1331_v11, %v1135_v17  ;;  %v1114_v32 = vadd.f32 %v1098_v19, %v1014_v44  ;;  %v394_v11 = vld [vmem:[%s1645_s19 + $0x40] sm:$0xff]  ;;  %v1285_v17 = vrot.slane %v1234_v5, %v1686_v30  ;;  %v1408_v19 = vmul.f32 %v1349_v9, %v1349_v9 }
 0x1b7   : > { %v1334_v58 = vsub.f32 %v394_v11, %v1281_v62  ;;  %v903_v9 = vmul.f32 %v1955_v54, %v1932_v43 }
 0x1b8   : > { %v1369_v20 = vsel %vm1359_vm1, %v1347_v8, 0.0  ;;  %v1406_v40 = vmul.f32 %v1347_v8, %v1347_v8  ;;  %v1136_v12 = vadd.f32 %v1976_v15, %v1114_v32  ;;  %v958_v42 = vpop.permute.xlu1 %957 }
 0x1b9   : > { %v1370_v0 = vadd.f32 %v1369_v20, %v1368_v34  ;;  %v1000_v34 = vmul.f32 %v1952_v59, %v958_v42  ;;  %v1335_v20 = vsub.f32 %v395_v29, %v1285_v17  ;;  %v398_v17 = vld [vmem:[%s1645_s19 + $0x60] sm:$0xff] }
 0x1ba   : > { %v1426_v4 = vsel %vm1359_vm1, %v1406_v40, 0.0  ;;  %v1348_v53 = vadd.f32 %v1332_v24, %v1136_v12  ;;  %v1140_v24 = vadd.f32 %v1976_v15, %v1118_v28  ;;  %v1430_v40 = vsel %vm1359_vm1, %v1408_v19, 0.0 }
 0x1bb   : > { %v1427_v61 = vadd.f32 %v1426_v4, %v1425_v7  ;;  %v1289_v7 = vrot.slane %v1242_v33, %v1686_v30  ;;  %v1016_v46 = vadd.f32 %v1000_v34, %v900_v13 }
 0x1bc   : > { %v1371_v25 = vsel %vm1359_vm1, %v1348_v53, 0.0  ;;  %v1407_v26 = vmul.f32 %v1348_v53, %v1348_v53  ;;  %v962_v38 = vpop.permute.xlu1 %961  ;;  %v1197_v53 = vcombine.high %v2033_v10, %v2033_v10 }
 0x1bd   : > { %v1372_v41 = vadd.f32 %v1371_v25, %v1370_v0  ;;  %v1001_v16 = vmul.f32 %v1952_v59, %v962_v38  ;;  %v1336_v63 = vsub.f32 %v396_v14, %v1289_v7 }
 0x1be   : > { %v1428_v2 = vsel %vm1359_vm1, %v1407_v26, 0.0 }
 0x1bf   : > { %v1429_v37 = vadd.f32 %v1428_v2, %v1427_v61  ;;  %v1017_v32 = vadd.f32 %v1001_v16, %v901_v45  ;;  %v1374_v12 = vadd.f32 %v1373_v57, %v1372_v41  ;;  %v1352_v42 = vadd.f32 %v1336_v63, %v1140_v24 }
 0x1c0   : > { %v1244_v61 = vcombine.high %v1234_v5, %v1234_v5  ;;  %v1211_v41 = vrot.slane %v1197_v53, %v1941_v23  ;;  %v905_v57 = vmul.f32 %v1955_v54, %v1936_v47 }
 0x1c1   : > { %v1058_v50 = vpop.permute.xlu1 %1057  ;;  %v1431_v0 = vadd.f32 %v1430_v40, %v1429_v37  ;;  %v1411_v38 = vmul.f32 %v1352_v42, %v1352_v42  ;;  %v1379_v2 = vsel %vm1359_vm1, %v1352_v42, 0.0  ;;  %v978_v37 = vpop.permute.xlu0 %977 }
 0x1c2   : > { %v1100_v3 = vmul.f32 %v1959_v56, %v1058_v50  ;;  %v1227_v62 = vrot.slane %v1211_v41, %v1941_v23  ;;  %v1293_v7 = vrot.slane %v1244_v61, %v1686_v30  ;;  %v1213_v11 = vcombine.high %v1211_v41, %v1211_v41  ;;  %v397_v50 = vld [vmem:[%s1645_s19 + $0x58] sm:$0xff] }
 0x1c3   : > { %v1436_v5 = vsel %vm1359_vm1, %v1411_v38, 0.0 }
 0x1c4   : > { %v1116_v44 = vadd.f32 %v1100_v3, %v1016_v46  ;;  %v1297_v45 = vrot.slane %v1227_v62, %v1686_v30  ;;  %v1241_v19 = vrot.slane %v1213_v11, %v1941_v23 }
 0x1c5   : > { %v1062_v8 = vpop.permute.xlu1 %1061  ;;  %v1078_v63 = vpop.permute.xlu0 %1077 }
 0x1c6   : > { %v1138_v51 = vadd.f32 %v1976_v15, %v1116_v44  ;;  %v1101_v21 = vmul.f32 %v1959_v56, %v1062_v8  ;;  %v1337_v44 = vsub.f32 %v397_v50, %v1293_v7  ;;  %v1005_v8 = vmul.f32 %v1952_v59, %v978_v37  ;;  %v400_v7 = vld [vmem:[%s1645_s19 + $0x70] sm:$0xff] }
 0x1c7   : > { %v1301_v23 = vrot.slane %v1241_v19, %v1686_v30 }
 0x1c8   : > { %v1350_v18 = vadd.f32 %v1334_v58, %v1138_v51  ;;  %v1117_v39 = vadd.f32 %v1101_v21, %v1017_v32  ;;  %v904_v58 = vmul.f32 %v1955_v54, %v1934_v60  ;;  %v1338_v21 = vsub.f32 %v398_v17, %v1297_v45 }
 0x1c9   : > { %v1105_v60 = vmul.f32 %v1959_v56, %v1078_v63 }
 0x1ca   : > { %v1375_v48 = vsel %vm1359_vm1, %v1350_v18, 0.0  ;;  %v1409_v1 = vmul.f32 %v1350_v18, %v1350_v18  ;;  %v1139_v36 = vadd.f32 %v1976_v15, %v1117_v39  ;;  %v970_v4 = vpop.permute.xlu1 %969  ;;  %v1021_v39 = vadd.f32 %v1005_v8, %v905_v57 }
 0x1cb   : > { %v1376_v52 = vadd.f32 %v1375_v48, %v1374_v12  ;;  %v1003_v34 = vmul.f32 %v1952_v59, %v970_v4 }
 0x1cc   : > { %v1432_v35 = vsel %vm1359_vm1, %v1409_v1, 0.0  ;;  %v1351_v25 = vadd.f32 %v1335_v20, %v1139_v36  ;;  %v399_v1 = vld [vmem:[%s1645_s19 + $0x68] sm:$0xff]  ;;  %v1121_v36 = vadd.f32 %v1105_v60, %v1021_v39 }
 0x1cd   : > { %v1433_v26 = vadd.f32 %v1432_v35, %v1431_v0  ;;  %v1019_v46 = vadd.f32 %v1003_v34, %v903_v9  ;;  %v1339_v0 = vsub.f32 %v399_v1, %v1301_v23  ;;  %v1086_v35 = vpop.permute.xlu0 %1085 }
 0x1ce   : > { %v1377_v55 = vsel %vm1359_vm1, %v1351_v25, 0.0  ;;  %v1410_v31 = vmul.f32 %v1351_v25, %v1351_v25  ;;  %v974_v33 = vpop.permute.xlu1 %973  ;;  %v1107_v37 = vmul.f32 %v1959_v56, %v1086_v35 }
 0x1cf   : > { %v1378_v27 = vadd.f32 %v1377_v55, %v1376_v52  ;;  %v1004_v16 = vmul.f32 %v1952_v59, %v974_v33  ;;  %v1245_v52 = vcombine.high %v1241_v19, %v1241_v19  ;;  %v1243_v55 = vcombine.high %v1227_v62, %v1227_v62 }
 0x1d0   : > { %v1434_v10 = vsel %vm1359_vm1, %v1410_v31, 0.0  ;;  %v907_v31 = vmul.f32 %v1955_v54, %v1944_v49  ;;  %v906_v49 = vmul.f32 %v1955_v54, %v1938_v22 }
 0x1d1   : > { %v1435_v13 = vadd.f32 %v1434_v10, %v1433_v26  ;;  %v1380_v6 = vadd.f32 %v1379_v2, %v1378_v27  ;;  %v1020_v24 = vadd.f32 %v1004_v16, %v904_v58  ;;  %v1143_v27 = vadd.f32 %v1976_v15, %v1121_v36 }
 0x1d2   : > { %v1309_v34 = vrot.slane %v1245_v52, %v1686_v30  ;;  %v1305_v9 = vrot.slane %v1243_v55, %v1686_v30 }
 0x1d3   : > { %v1070_v14 = vpop.permute.xlu1 %1069  ;;  %v1437_v28 = vadd.f32 %v1436_v5, %v1435_v13  ;;  %v1355_v50 = vadd.f32 %v1339_v0, %v1143_v27 }
 0x1d4   : > { %v1103_v3 = vmul.f32 %v1959_v56, %v1070_v14  ;;  %v1340_v16 = vsub.f32 %v400_v7, %v1305_v9 }
 0x1d5   : > { %v1414_v45 = vmul.f32 %v1355_v50, %v1355_v50  ;;  %v1385_v22 = vsel %vm1359_vm1, %v1355_v50, 0.0 }
 0x1d6   : > { %v1119_v43 = vadd.f32 %v1103_v3, %v1019_v46 }
 0x1d7   : > { %v1074_v29 = vpop.permute.xlu1 %1073 }
 0x1d8   : > { %v1141_v32 = vadd.f32 %v1976_v15, %v1119_v43  ;;  %v1104_v51 = vmul.f32 %v1959_v56, %v1074_v29  ;;  %v1442_v43 = vsel %vm1359_vm1, %v1414_v45, 0.0 }
 0x1da   : > { %v1353_v18 = vadd.f32 %v1337_v44, %v1141_v32  ;;  %v1120_v20 = vadd.f32 %v1104_v51, %v1020_v24 }
 0x1dc   : > { %v1381_v40 = vsel %vm1359_vm1, %v1353_v18, 0.0  ;;  %v1412_v12 = vmul.f32 %v1353_v18, %v1353_v18  ;;  %v1142_v42 = vadd.f32 %v1976_v15, %v1120_v20  ;;  %v982_v48 = vpop.permute.xlu1 %981 }
 0x1dd   : > { %v1382_v47 = vadd.f32 %v1381_v40, %v1380_v6  ;;  %v1006_v10 = vmul.f32 %v1952_v59, %v982_v48  ;;  %v401_v6 = vld [vmem:[%s1645_s19 + $0x78] sm:$0xff]  ;;  %v1358_v48 = vld [vmem:[#allocation2] sm:$0x1] }
 0x1de   : > { %v1438_v4 = vsel %vm1359_vm1, %v1412_v12, 0.0  ;;  %v1354_v53 = vadd.f32 %v1338_v21, %v1142_v42 }
 0x1df   : > { %v1439_v33 = vadd.f32 %v1438_v4, %v1437_v28  ;;  %v1022_v14 = vadd.f32 %v1006_v10, %v906_v49  ;;  %v1341_v28 = vsub.f32 %v401_v6, %v1309_v34  ;;  %v1400_v4 = vld [vmem:[#allocation2 + $0x1] sm:$0x1] }
 0x1e0   : > { %v1383_v25 = vsel %vm1359_vm1, %v1354_v53, 0.0  ;;  %v1413_v26 = vmul.f32 %v1354_v53, %v1354_v53  ;;  %v986_v38 = vpop.permute.xlu1 %985 }
 0x1e1   : > { %v1384_v61 = vadd.f32 %v1383_v25, %v1382_v47  ;;  %v1007_v41 = vmul.f32 %v1952_v59, %v986_v38 }
 0x1e2   : > { %v1440_v2 = vsel %vm1359_vm1, %v1413_v26, 0.0 }
 0x1e3   : > { %v1441_v13 = vadd.f32 %v1440_v2, %v1439_v33  ;;  %v1023_v62 = vadd.f32 %v1007_v41, %v907_v31  ;;  %v1386_v30 = vadd.f32 %v1385_v22, %v1384_v61 }
 0x1e5   : > { %v1123_v5 = vadd.f32 %v1107_v37, %v1023_v62  ;;  %v1082_v11 = vpop.permute.xlu1 %1081 }
 0x1e6   : > { %v1106_v59 = vmul.f32 %v1959_v56, %v1082_v11  ;;  %v1443_v56 = vadd.f32 %v1442_v43, %v1441_v13 }
 0x1e7   : > { %v1145_v46 = vadd.f32 %v1976_v15, %v1123_v5 }
 0x1e8   : > { %v1122_v3 = vadd.f32 %v1106_v59, %v1022_v14 }
 0x1e9   : > { %v1357_v58 = vadd.f32 %v1341_v28, %v1145_v46 }
 0x1ea   : > { %v1144_v44 = vadd.f32 %v1976_v15, %v1122_v3 }
 0x1eb   : > { %v1416_v17 = vmul.f32 %v1357_v58, %v1357_v58  ;;  %v1389_v8 = vsel %vm1359_vm1, %v1357_v58, 0.0 }
 0x1ec   : > { %v1356_v54 = vadd.f32 %v1340_v16, %v1144_v44 }
 0x1ed   : > { %v1446_v15 = vsel %vm1359_vm1, %v1416_v17, 0.0 }
 0x1ee   : > { %v1387_v19 = vsel %vm1359_vm1, %v1356_v54, 0.0  ;;  %v1415_v63 = vmul.f32 %v1356_v54, %v1356_v54 }
 0x1ef   : > { %v1388_v29 = vadd.f32 %v1387_v19, %v1386_v30 }
 0x1f0   : > { %v1444_v24 = vsel %vm1359_vm1, %v1415_v63, 0.0 }
 0x1f1   : > { %v1390_v32 = vadd.f32 %v1389_v8, %v1388_v29  ;;  %v1445_v51 = vadd.f32 %v1444_v24, %v1443_v56 }
 0x1f3   : > { %v1391_v21 = vrot.slane %v1390_v32, 4  ;;  %v1447_v57 = vadd.f32 %v1446_v15, %v1445_v51 }
 0x1f5   : > { %v1392_v60 = vadd.f32 %v1391_v21, %v1390_v32  ;;  %v1448_v18 = vrot.slane %v1447_v57, 4 }
 0x1f7   : > { %v1393_v20 = vrot.slane %v1392_v60, 2  ;;  %v1449_v23 = vadd.f32 %v1448_v18, %v1447_v57 }
 0x1f9   : > { %v1394_v39 = vadd.f32 %v1393_v20, %v1392_v60  ;;  %v1450_v40 = vrot.slane %v1449_v23, 2 }
 0x1fb   : > { %v1395_v12 = vrot.slane %v1394_v39, 1  ;;  %v1451_v42 = vadd.f32 %v1450_v40, %v1449_v23 }
 0x1fd   : > { %v1396_v1 = vadd.f32 %v1395_v12, %v1394_v39  ;;  %v1452_v36 = vrot.slane %v1451_v42, 1 }
 0x1ff   : > { %v1397_v53 = vadd.f32 %v1396_v1, %v1358_v48  ;;  %v1453_v52 = vadd.f32 %v1452_v36, %v1451_v42 }
 0x201   : > { %1399 = vst.msk [vmem:[#allocation2] sm:$0x1] %vm1398_vm2, %v1397_v53  ;;  %v1454_v47 = vadd.f32 %v1453_v52, %v1400_v4 }
 0x203   : > { %1455 = vst.msk [vmem:[#allocation2 + $0x1] sm:$0x1] %vm1398_vm2, %v1454_v47 }
 0x20a   : > { %v1456_v0 = vld [vmem:[#allocation2] sm:$0x3] }
 0x20b   : > { %1458 = vst.msk [vmem:[%s2150_s9] sm:$0x3] %vm1457_vm3, %v1456_v0 }
 0x20c PF: > { %s19_s30 = sadd.s32 1, %s1572_s30  }
 0x20d   : > { %p16_p6 = scmp.ge.s32.totalorder %s19_s30, 6  }
 0x20f   :  { %18 = sbr.rel (!%p16_p6) target bundleno = 1 (0x1), region = 92 }

// kernel: point_transformer_block.7
= control target key start
LH: loop header
LB: loop body
LE: loop exit
PB: predicated region body
PF: predicated region fallthrough
CT: control target
= control target key end

     0   :  { %s2044_s25 = smov 0   ;;  %s2636_s0 = inlined_call_operand.vmem [shape: f32[64,8,3], index: 0, kind: input, shape index: {}]   ;;  %s2637_s1 = inlined_call_operand.vmem [shape: f32[64,8,32], index: 1, kind: input, shape index: {}]   ;;  %s2638_s2 = inlined_call_operand.vmem [shape: f32[64,32], index: 2, kind: input, shape index: {}]   ;;  %s2639_s3 = inlined_call_operand.vmem [shape: f32[3,3], index: 3, kind: input, shape index: {}]   ;;  %s2640_s4 = inlined_call_operand.vmem [shape: f32[1,3], index: 4, kind: input, shape index: {}]   ;;  %s2641_s5 = inlined_call_operand.vmem [shape: f32[1,3], index: 5, kind: input, shape index: {}]   ;;  %s2642_s6 = inlined_call_operand.vmem [shape: f32[1,3], index: 6, kind: input, shape index: {}]   ;;  %s2643_s7 = inlined_call_operand.vmem [shape: f32[3,32], index: 7, kind: input, shape index: {}]   ;;  %s2644_s8 = inlined_call_operand.vmem [shape: f32[1,32], index: 8, kind: input, shape index: {}]   ;;  %s2645_s9 = inlined_call_operand.vmem [shape: f32[1,32], index: 9, kind: input, shape index: {}]   ;;  %s2646_s10 = inlined_call_operand.vmem [shape: f32[1,32], index: 10, kind: input, shape index: {}]   ;;  %s2647_s11 = inlined_call_operand.vmem [shape: bf16[32,4], index: 11, kind: input, shape index: {}]   ;;  %s2648_s12 = inlined_call_operand.vmem [shape: f32[1,4], index: 12, kind: input, shape index: {}]   ;;  %s2649_s13 = inlined_call_operand.vmem [shape: f32[2,4], index: 13, kind: output, shape index: {}]  }
   0x1 LB: > { %s1835_s26 = sadd.s32 4294967295, %s1967_s25   ;;  %p1838_p0 = scmp.ge.s32.totalorder %s1967_s25, 1  ;;  %s1967_s25 = sphi %s2044_s25, %s23_s25  }
   0x2   : > { %p405_p1 = scmp.lt.s32.totalorder %s1967_s25, 5 }
   0x4   : > { %p406_p2 = pnand %p1838_p0, %p405_p1 }
   0x5   : > { %s1839_s27 = sshll.u32 (!%p406_p2), %s1835_s26, 4  ;;  %s1843_s28 = sshll.u32 (!%p406_p2), %s1835_s26, 1 }
   0x6   : > { %409 = sbr.rel (%p406_p2) target bundleno = 738 (0x2e2), region = 72  ;;  %p455_p3 = scmp.lt.s32.totalorder (!%p406_p2), %s1839_s27, 63 }
   0x7   : > { %p467_p4 = scmp.lt.s32.totalorder (!%p406_p2), %s1843_s28, 7  ;;  %p1845_p5 = scmp.ne.s32.totalorder (!%p406_p2), %s1835_s26, 0 }
   0xd   : > { %s2651_s27 = smov (!%p455_p3, %s1839_s27), 63  ;;  %s2653_s28 = smov (!%p467_p4, %s1843_s28), 7 }
   0xe   : > { %s1840_s29 = sshll.u32 %s2651_s27, 3  ;;  %s1844_s19 = sshll.u32 %s2653_s28, 3  ;;  %vm477_vm0 = vcmask (!%p1845_p5), 25600   ;;  %v1969_v0 = vmov (!%p1845_p5), 0.0  }
   0xf   : > { %s2055_s15 = scalar_lea.vmem %s2636_s0, %s1840_s29  ;;  %s2060_s18 = scalar_lea.vmem %s2637_s1, %s1840_s29  ;;  %478 = vst.msk [vmem:[#allocation2] sm:$0x3] (!%p1845_p5), %vm477_vm0, %v1969_v0 }
  0x10   : > { %s2065_s22 = scalar_lea.vmem %s2638_s2, %s1844_s19  ;;  %476 = sbr.rel (%p1845_p5) target bundleno = 23 (0x17), region = 76 }
  0x17 PF: > { %v479_v1 = vld [vmem:[%s2055_s15] sm:$0xff]  ;;  %v1970_v2 = vmov 1   ;;  %v1971_v3 = vmov 0   ;;  %v480_v4 = vld [vmem:[%s2055_s15 + $0x8] sm:$0xff]  ;;  %v481_v5 = vld [vmem:[%s2055_s15 + $0x10] sm:$0xff]  ;;  %v1972_v10 = vmov 2   ;;  %v599_v20 = vlaneseq }
  0x18   : > { %1913 = vset.pattern.permute.xlu1 %v1970_v2  ;;  %1912 = vset.pattern.permute.xlu0 %v1971_v3  ;;  %v482_v6 = vld [vmem:[%s2055_s15 + $0x18] sm:$0xff]  ;;  %v483_v7 = vld [vmem:[%s2055_s15 + $0x20] sm:$0xff]  ;;  %v488_v8 = vld [vmem:[%s2055_s15 + $0x48] sm:$0xff]  ;;  %vm1560_vm1 = vcmask 261120   ;;  %vm1683_vm2 = vcmask 31744   ;;  %vm1722_vm3 = vcmask 24576  }
  0x19   : > { %636 = vperm.xlu1 %1913, %v479_v1   ;;  %521 = vperm.xlu0 %1912, %v479_v1   ;;  %v489_v9 = vld [vmem:[%s2055_s15 + $0x50] sm:$0xff]  ;;  %v491_v11 = vld [vmem:[%s2055_s15 + $0x60] sm:$0xff]  ;;  %v484_v12 = vld [vmem:[%s2055_s15 + $0x28] sm:$0xff]  ;;  %v2105_v23 = vshrl.u32 %v599_v20, 7  ;;  %vm1781_vm4 = vcmask 25600  }
  0x1a   : > { %v485_v13 = vld [vmem:[%s2055_s15 + $0x30] sm:$0xff]  ;;  %v492_v14 = vld [vmem:[%s2055_s15 + $0x68] sm:$0xff]  ;;  %v486_v15 = vld [vmem:[%s2055_s15 + $0x38] sm:$0xff] }
  0x1b   : > { %v493_v16 = vld [vmem:[%s2055_s15 + $0x70] sm:$0xff]  ;;  %v487_v17 = vld [vmem:[%s2055_s15 + $0x40] sm:$0xff]  ;;  %v494_v18 = vld [vmem:[%s2055_s15 + $0x78] sm:$0xff]  ;;  %v2109_v26 = vsub.s32 0, %v2105_v23  ;;  %v701_v27 = vsub.s32 1, %v2105_v23  ;;  %v801_v34 = vsub.s32 2, %v2105_v23 }
  0x1c   : > { %v490_v19 = vld [vmem:[%s2055_s15 + $0x58] sm:$0xff]  ;;  %v513_v29 = vld [vmem:[%s2639_s3] sm:$0x7] }
  0x1d   : > { %640 = vperm.xlu1 %1913, %v480_v4   ;;  %526 = vperm.xlu0 %1912, %v480_v4   ;;  %v2119_v31 = vrot.slane %v513_v29, %v701_v27  ;;  %v2122_v32 = vrot.slane %v513_v29, %v2109_v26  ;;  %v2131_v39 = vrot.slane %v513_v29, %v801_v34  ;;  %v2139_v44 = vld [vmem:[%s2640_s4] ss:$0 sm:$0xff] }
  0x1e   : > { %v2144_v47 = vld [vmem:[%s2641_s5] ss:$0 sm:$0xff] }
  0x1f   : > { %v2152_v50 = vld [vmem:[%s2642_s6] ss:$0 sm:$0xff] }
  0x21   : > { %1914 = vset.pattern.permute.xlu1 %v1971_v3  ;;  %531 = vperm.xlu0 %1912, %v481_v5  }
  0x22   : > { %536 = vperm.xlu1 %1914, %v482_v6  }
  0x25   : > { %541 = vperm.xlu0 %1912, %v483_v7  }
  0x26   : > { %1915 = vset.pattern.permute.xlu1 %v1970_v2 }
  0x27   : > { %648 = vperm.xlu1 %1915, %v482_v6  }
  0x29   : > { %566 = vperm.xlu0 %1912, %v488_v8  }
  0x2b   : > { %1916 = vset.pattern.permute.xlu1 %v1972_v10 }
  0x2c   : > { %736 = vperm.xlu1 %1916, %v479_v1  }
  0x2d   : > { %571 = vperm.xlu0 %1912, %v489_v9  }
  0x30   : > { %744 = vperm.xlu1 %1916, %v481_v5  }
  0x31   : > { %581 = vperm.xlu0 %1912, %v491_v11  }
  0x34   : > { %748 = vperm.xlu1 %1916, %v482_v6  }
  0x35   : > { %1927 = vset.pattern.permute.xlu0 %v1970_v2 }
  0x36   : > { %644 = vperm.xlu0 %1927, %v481_v5  }
  0x38   : > { %1917 = vset.pattern.permute.xlu1 %v1971_v3 }
  0x39   : > { %546 = vperm.xlu1 %1917, %v484_v12  }
  0x3a   : > { %656 = vperm.xlu0 %1927, %v484_v12  }
  0x3d   : > { %1918 = vset.pattern.permute.xlu1 %v1970_v2 }
  0x3e   : > { %652 = vperm.xlu1 %1918, %v483_v7   ;;  %660 = vperm.xlu0 %1927, %v485_v13  }
  0x42   : > { %1919 = vset.pattern.permute.xlu1 %v1971_v3  ;;  %676 = vperm.xlu0 %1927, %v489_v9  }
  0x43   : > { %551 = vperm.xlu1 %1919, %v485_v13  }
  0x46   : > { %688 = vperm.xlu0 %1927, %v492_v14  }
  0x47   : > { %556 = vperm.xlu1 %1919, %v486_v15  }
  0x4a   : > { %692 = vperm.xlu0 %1927, %v493_v16  }
  0x4b   : > { %1920 = vset.pattern.permute.xlu1 %v1970_v2 }
  0x4c   : > { %664 = vperm.xlu1 %1920, %v486_v15  }
  0x4e   : > { %1931 = vset.pattern.permute.xlu0 %v1972_v10 }
  0x4f   : > { %740 = vperm.xlu0 %1931, %v480_v4  }
  0x50   : > { %1921 = vset.pattern.permute.xlu1 %v1972_v10 }
  0x51   : > { %756 = vperm.xlu1 %1921, %v484_v12  }
  0x53   : > { %752 = vperm.xlu0 %1931, %v483_v7  }
  0x55   : > { %760 = vperm.xlu1 %1921, %v485_v13  }
  0x57   : > { %764 = vperm.xlu0 %1931, %v486_v15  }
  0x59   : > { %1922 = vset.pattern.permute.xlu1 %v1971_v3 }
  0x5a   : > { %561 = vperm.xlu1 %1922, %v487_v17  }
  0x5b   : > { %772 = vperm.xlu0 %1931, %v488_v8  }
  0x5e   : > { %1923 = vset.pattern.permute.xlu1 %v1970_v2 }
  0x5f   : > { %668 = vperm.xlu1 %1923, %v487_v17   ;;  %784 = vperm.xlu0 %1931, %v491_v11  }
  0x63   : > { %672 = vperm.xlu1 %1923, %v488_v8   ;;  %796 = vperm.xlu0 %1931, %v494_v18  }
  0x67   : > { %1924 = vset.pattern.permute.xlu1 %v1971_v3 }
  0x68   : > { %576 = vperm.xlu1 %1924, %v490_v19  }
  0x6c   : > { %1925 = vset.pattern.permute.xlu1 %v1970_v2 }
  0x6d   : > { %680 = vperm.xlu1 %1925, %v490_v19  }
  0x71   : > { %1926 = vset.pattern.permute.xlu1 %v1972_v10 }
  0x72   : > { %768 = vperm.xlu1 %1926, %v487_v17  }
  0x76   : > { %776 = vperm.xlu1 %1926, %v489_v9  }
  0x7a   : > { %780 = vperm.xlu1 %1926, %v490_v19  }
  0x7e   : > { %1928 = vset.pattern.permute.xlu1 %v1971_v3 }
  0x7f   : > { %586 = vperm.xlu1 %1928, %v492_v14  }
  0x83   : > { %1929 = vset.pattern.permute.xlu1 %v1970_v2 }
  0x84   : > { %684 = vperm.xlu1 %1929, %v491_v11  }
  0x88   : > { %1930 = vset.pattern.permute.xlu1 %v1971_v3 }
  0x89   : > { %591 = vperm.xlu1 %1930, %v493_v16  }
  0x8d   : > { %596 = vperm.xlu1 %1930, %v494_v18  }
  0x91   : > { %1932 = vset.pattern.permute.xlu1 %v1970_v2 }
  0x92   : > { %696 = vperm.xlu1 %1932, %v494_v18  }
  0x96   : > { %1933 = vset.pattern.permute.xlu1 %v1972_v10 }
  0x97   : > { %788 = vperm.xlu1 %1933, %v492_v14  }
  0x98   : > { %v637_v21 = vpop.permute.xlu1 %636  ;;  %v522_v22 = vpop.permute.xlu0 %521 }
  0x99   : > { %v703_v36 = vmul.f32 %v2119_v31, %v637_v21  ;;  %v603_v37 = vmul.f32 %v2122_v32, %v522_v22 }
  0x9b   : > { %792 = vperm.xlu1 %1933, %v493_v16   ;;  %v719_v41 = vadd.f32 %v703_v36, %v603_v37 }
  0x9c   : > { %v527_v24 = vpop.permute.xlu0 %526  ;;  %v641_v25 = vpop.permute.xlu1 %640 }
  0x9d   : > { %v704_v7 = vmul.f32 %v2119_v31, %v641_v25  ;;  %v604_v8 = vmul.f32 %v2122_v32, %v527_v24 }
  0x9f   : > { %1934 = vset.pattern.permute.xlu1 %v1971_v3  ;;  %v720_v13 = vadd.f32 %v704_v7, %v604_v8 }
  0xa0   : > { %v2112_v28 = vpop.permute.xlu0 %531 }
  0xa1   : > { %v537_v30 = vpop.permute.xlu1 %536 }
  0xa2   : > { %v606_v63 = vmul.f32 %v2122_v32, %v537_v30 }
  0xa4   : > { %v542_v33 = vpop.permute.xlu0 %541 }
  0xa5   : > { %v607_v17 = vmul.f32 %v2122_v32, %v542_v33 }
  0xa6   : > { %v649_v35 = vpop.permute.xlu1 %648 }
  0xa7   : > { %v706_v0 = vmul.f32 %v2119_v31, %v649_v35 }
  0xa8   : > { %v2127_v38 = vpop.permute.xlu0 %566 }
  0xa9   : > { %v722_v5 = vadd.f32 %v706_v0, %v606_v63 }
  0xab   : > { %v737_v40 = vpop.permute.xlu1 %736 }
  0xac   : > { %v803_v42 = vmul.f32 %v2131_v39, %v737_v40  ;;  %v2134_v43 = vpop.permute.xlu0 %571  ;;  %v605_v40 = vmul.f32 %v2122_v32, %v2112_v28 }
  0xae   : > { %v819_v45 = vadd.f32 %v803_v42, %v719_v41 }
  0xaf   : > { %v745_v46 = vpop.permute.xlu1 %744 }
  0xb0   : > { %v841_v48 = vadd.f32 %v2139_v44, %v819_v45  ;;  %v2147_v49 = vpop.permute.xlu0 %581 }
  0xb2   : > { %v863_v51 = vmul.f32 %v2144_v47, %v841_v48 }
  0xb3   : > { %v749_v52 = vpop.permute.xlu1 %748 }
  0xb4   : > { %v885_v53 = vadd.f32 %v2152_v50, %v863_v51  ;;  %v806_v6 = vmul.f32 %v2131_v39, %v749_v52  ;;  %v805_v52 = vmul.f32 %v2131_v39, %v745_v46 }
  0xb5   : > { %v645_v54 = vpop.permute.xlu0 %644 }
  0xb6   : > { %v2156_v55 = vmax.f32 %v885_v53, 0.0  ;;  %v822_v11 = vadd.f32 %v806_v6, %v722_v5  ;;  %v705_v30 = vmul.f32 %v2119_v31, %v645_v54 }
  0xb8   : > { %919 = vperm.xlu1 %1934, %v2156_v55   ;;  %v547_v56 = vpop.permute.xlu1 %546  ;;  %v844_v21 = vadd.f32 %v2139_v44, %v822_v11  ;;  %v721_v53 = vadd.f32 %v705_v30, %v605_v40 }
  0xb9   : > { %v657_v57 = vpop.permute.xlu0 %656  ;;  %v608_v11 = vmul.f32 %v2122_v32, %v547_v56  ;;  %v612_v56 = vmul.f32 %v2122_v32, %v2127_v38 }
  0xba   : > { %v866_v42 = vmul.f32 %v2144_v47, %v844_v21  ;;  %v821_v6 = vadd.f32 %v805_v52, %v721_v53 }
  0xbc   : > { %1935 = vset.pattern.permute.xlu1 %v1970_v2  ;;  %v888_v28 = vadd.f32 %v2152_v50, %v866_v42 }
  0xbd   : > { %v653_v58 = vpop.permute.xlu1 %652  ;;  %1034 = vperm.xlu1 %1935, %v2156_v55   ;;  %v2161_v59 = vpop.permute.xlu0 %660 }
  0xbe   : > { %v707_v14 = vmul.f32 %v2119_v31, %v653_v58 }
  0xc0   : > { %v723_v24 = vadd.f32 %v707_v14, %v607_v17  ;;  %v843_v14 = vadd.f32 %v2139_v44, %v821_v6 }
  0xc1   : > { %v2163_v60 = vpop.permute.xlu0 %676 }
  0xc2   : > { %v2165_v61 = vpop.permute.xlu1 %551  ;;  %v865_v21 = vmul.f32 %v2144_v47, %v843_v14 }
  0xc3   : > { %v609_v38 = vmul.f32 %v2122_v32, %v2165_v61 }
  0xc4   : > { %v887_v30 = vadd.f32 %v2152_v50, %v865_v21 }
  0xc5   : > { %v2167_v62 = vpop.permute.xlu0 %688 }
  0xc6   : > { %v557_v1 = vpop.permute.xlu1 %556 }
  0xc7   : > { %v610_v18 = vmul.f32 %v2122_v32, %v557_v1 }
  0xc9   : > { %v2171_v4 = vpop.permute.xlu0 %692 }
  0xcb   : > { %v665_v9 = vpop.permute.xlu1 %664 }
  0xcc   : > { %v710_v19 = vmul.f32 %v2119_v31, %v665_v9  ;;  %v904_v9 = vmax.f32 %v888_v28, 0.0 }
  0xce   : > { %v741_v12 = vpop.permute.xlu0 %740  ;;  %v726_v35 = vadd.f32 %v710_v19, %v610_v18 }
  0xcf   : > { %v804_v15 = vmul.f32 %v2131_v39, %v741_v12  ;;  %v708_v12 = vmul.f32 %v2119_v31, %v657_v57 }
  0xd0   : > { %v757_v16 = vpop.permute.xlu1 %756 }
  0xd1   : > { %v820_v20 = vadd.f32 %v804_v15, %v720_v13  ;;  %v808_v15 = vmul.f32 %v2131_v39, %v757_v16 }
  0xd2   : > { %v753_v22 = vpop.permute.xlu0 %752 }
  0xd3   : > { %v842_v25 = vadd.f32 %v2139_v44, %v820_v20  ;;  %v807_v29 = vmul.f32 %v2131_v39, %v753_v22  ;;  %v724_v20 = vadd.f32 %v708_v12, %v608_v11 }
  0xd4   : > { %v761_v37 = vpop.permute.xlu1 %760 }
  0xd5   : > { %v823_v36 = vadd.f32 %v807_v29, %v723_v24  ;;  %v864_v33 = vmul.f32 %v2144_v47, %v842_v25  ;;  %v824_v22 = vadd.f32 %v808_v15, %v724_v20  ;;  %v809_v40 = vmul.f32 %v2131_v39, %v761_v37 }
  0xd6   : > { %v765_v41 = vpop.permute.xlu0 %764  ;;  %v713_v37 = vmul.f32 %v2119_v31, %v2163_v60 }
  0xd7   : > { %v845_v45 = vadd.f32 %v2139_v44, %v823_v36  ;;  %v810_v48 = vmul.f32 %v2131_v39, %v765_v41  ;;  %v886_v51 = vadd.f32 %v2152_v50, %v864_v33  ;;  %v709_v33 = vmul.f32 %v2119_v31, %v2161_v59 }
  0xd9   : > { %v826_v54 = vadd.f32 %v810_v48, %v726_v35  ;;  %v2193_v58 = vpop.permute.xlu1 %561  ;;  %v2195_v63 = vmax.f32 %v886_v51, 0.0  ;;  %v867_v0 = vmul.f32 %v2144_v47, %v845_v45  ;;  %v846_v35 = vadd.f32 %v2139_v44, %v824_v22 }
  0xda   : > { %v773_v18 = vpop.permute.xlu0 %772  ;;  %v2237_v45 = vmax.f32 %v887_v30, 0.0  ;;  %v725_v48 = vadd.f32 %v709_v33, %v609_v38 }
  0xdb   : > { %v848_v1 = vadd.f32 %v2139_v44, %v826_v54  ;;  %1138 = vperm.xlu0 %1931, %v2195_v63   ;;  %1038 = vperm.xlu1 %1935, %v2195_v63   ;;  %v889_v5 = vadd.f32 %v2152_v50, %v867_v0  ;;  %v812_v24 = vmul.f32 %v2131_v39, %v773_v18 }
  0xdc   : > { %v868_v51 = vmul.f32 %v2144_v47, %v846_v35  ;;  %v825_v52 = vadd.f32 %v809_v40, %v725_v48  ;;  %v613_v0 = vmul.f32 %v2122_v32, %v2134_v43 }
  0xdd   : > { %v2203_v46 = vmax.f32 %v889_v5, 0.0  ;;  %v870_v7 = vmul.f32 %v2144_v47, %v848_v1 }
  0xde   : > { %v2206_v8 = vpop.permute.xlu1 %668  ;;  %v890_v59 = vadd.f32 %v2152_v50, %v868_v51  ;;  %v847_v54 = vadd.f32 %v2139_v44, %v825_v52  ;;  %v729_v5 = vadd.f32 %v713_v37, %v613_v0 }
  0xdf   : > { %1936 = vset.pattern.permute.xlu1 %v1971_v3  ;;  %1150 = vperm.xlu0 %1931, %v2203_v46   ;;  %v892_v13 = vadd.f32 %v2152_v50, %v870_v7 }
  0xe0   : > { %934 = vperm.xlu1 %1936, %v904_v9   ;;  %v2252_v1 = vmax.f32 %v890_v59, 0.0  ;;  %v869_v60 = vmul.f32 %v2144_v47, %v847_v54 }
  0xe1   : > { %v2215_v17 = vmax.f32 %v892_v13, 0.0  ;;  %v711_v13 = vmul.f32 %v2119_v31, %v2206_v8  ;;  %v615_v8 = vmul.f32 %v2122_v32, %v2147_v49 }
  0xe2   : > { %v673_v19 = vpop.permute.xlu1 %672  ;;  %v891_v11 = vadd.f32 %v2152_v50, %v869_v60 }
  0xe3   : > { %v712_v57 = vmul.f32 %v2119_v31, %v673_v19  ;;  %1162 = vperm.xlu0 %1931, %v2215_v17  }
  0xe4   : > { %1937 = vset.pattern.permute.xlu1 %v1970_v2  ;;  %v2270_v15 = vmax.f32 %v891_v11, 0.0 }
  0xe5   : > { %v728_v16 = vadd.f32 %v712_v57, %v612_v56  ;;  %1046 = vperm.xlu1 %1937, %v904_v9  }
  0xe7   : > { %v828_v25 = vadd.f32 %v812_v24, %v728_v16  ;;  %v2224_v29 = vpop.permute.xlu1 %576 }
  0xe8   : > { %v614_v38 = vmul.f32 %v2122_v32, %v2224_v29 }
  0xe9   : > { %v850_v36 = vadd.f32 %v2139_v44, %v828_v25  ;;  %1938 = vset.pattern.permute.xlu1 %v1972_v10 }
  0xea   : > { %1134 = vperm.xlu1 %1938, %v2156_v55  }
  0xeb   : > { %v872_v41 = vmul.f32 %v2144_v47, %v850_v36 }
  0xec   : > { %v681_v42 = vpop.permute.xlu1 %680 }
  0xed   : > { %v894_v61 = vadd.f32 %v2152_v50, %v872_v41  ;;  %v714_v35 = vmul.f32 %v2119_v31, %v681_v42 }
  0xee   : > { %1142 = vperm.xlu1 %1938, %v2237_v45  }
  0xef   : > { %v2242_v53 = vmax.f32 %v894_v61, 0.0  ;;  %v730_v48 = vadd.f32 %v714_v35, %v614_v38  ;;  %v511_v35 = vld [vmem:[%s2065_s22] sm:$0xff] }
  0xf1   : > { %v769_v55 = vpop.permute.xlu1 %768  ;;  %1170 = vperm.xlu0 %1931, %v2242_v53  }
  0xf2   : > { %1146 = vperm.xlu1 %1938, %v904_v9   ;;  %v811_v56 = vmul.f32 %v2131_v39, %v769_v55  ;;  %v716_v55 = vmul.f32 %v2119_v31, %v2167_v62 }
  0xf5   : > { %v777_v28 = vpop.permute.xlu1 %776  ;;  %1949 = vset.pattern.permute.xlu0 %v1971_v3 }
  0xf6   : > { %v813_v6 = vmul.f32 %v2131_v39, %v777_v28  ;;  %1939 = vset.pattern.permute.xlu1 %v1971_v3  ;;  %924 = vperm.xlu0 %1949, %v2195_v63   ;;  %v611_v63 = vmul.f32 %v2122_v32, %v2193_v58  ;;  %v785_v58 = vpop.permute.xlu0 %784 }
  0xf7   : > { %944 = vperm.xlu1 %1939, %v2252_v1   ;;  %v815_v21 = vmul.f32 %v2131_v39, %v785_v58 }
  0xf8   : > { %v829_v7 = vadd.f32 %v813_v6, %v729_v5  ;;  %v727_v19 = vadd.f32 %v711_v13, %v611_v63  ;;  %v717_v6 = vmul.f32 %v2119_v31, %v2171_v4 }
  0xf9   : > { %v781_v9 = vpop.permute.xlu1 %780 }
  0xfa   : > { %v851_v43 = vadd.f32 %v2139_v44, %v829_v7  ;;  %929 = vperm.xlu0 %1949, %v2237_v45   ;;  %v827_v22 = vadd.f32 %v811_v56, %v727_v19  ;;  %v814_v61 = vmul.f32 %v2131_v39, %v781_v9  ;;  %v797_v63 = vpop.permute.xlu0 %796 }
  0xfb   : > { %1940 = vset.pattern.permute.xlu1 %v1970_v2 }
  0xfc   : > { %1050 = vperm.xlu1 %1940, %v2203_v46   ;;  %v873_v12 = vmul.f32 %v2144_v47, %v851_v43  ;;  %v849_v30 = vadd.f32 %v2139_v44, %v827_v22  ;;  %v830_v52 = vadd.f32 %v814_v61, %v730_v48 }
  0xfe   : > { %v587_v14 = vpop.permute.xlu1 %586  ;;  %939 = vperm.xlu0 %1949, %v2203_v46   ;;  %v895_v18 = vadd.f32 %v2152_v50, %v873_v12  ;;  %v871_v41 = vmul.f32 %v2144_v47, %v849_v30  ;;  %v852_v5 = vadd.f32 %v2139_v44, %v830_v52 }
  0xff   : > { %v616_v42 = vmul.f32 %v2122_v32, %v587_v14  ;;  %v818_v14 = vmul.f32 %v2131_v39, %v797_v63 }
 0x100   : > { %1941 = vset.pattern.permute.xlu1 %v1971_v3  ;;  %v2280_v57 = vmax.f32 %v895_v18, 0.0  ;;  %v893_v29 = vadd.f32 %v2152_v50, %v871_v41 }
 0x101   : > { %949 = vperm.xlu1 %1941, %v2270_v15   ;;  %v732_v54 = vadd.f32 %v716_v55, %v616_v42 }
 0x102   : > { %964 = vperm.xlu0 %1949, %v2242_v53   ;;  %v909_v37 = vmax.f32 %v893_v29, 0.0 }
 0x103   : > { %v685_v20 = vpop.permute.xlu1 %684 }
 0x104   : > { %v715_v46 = vmul.f32 %v2119_v31, %v685_v20 }
 0x105   : > { %954 = vperm.xlu1 %1941, %v2215_v17  }
 0x106   : > { %v731_v24 = vadd.f32 %v715_v46, %v615_v8  ;;  %969 = vperm.xlu0 %1949, %v2280_v57  }
 0x108   : > { %v831_v16 = vadd.f32 %v815_v21, %v731_v24  ;;  %v592_v25 = vpop.permute.xlu1 %591  ;;  %v1973_v24 = vmov 1966171168  }
 0x109   : > { %1942 = vset.pattern.permute.xlu1 %v1970_v2  ;;  %v617_v0 = vmul.f32 %v2122_v32, %v592_v25 }
 0x10a   : > { %v853_v49 = vadd.f32 %v2139_v44, %v831_v16  ;;  %1062 = vperm.xlu1 %1942, %v2215_v17   ;;  %v1259_v16 = vunpack.c.l.s4 %v1973_v24 }
 0x10b   : > { %v733_v43 = vadd.f32 %v717_v6, %v617_v0 }
 0x10c   : > { %v597_v36 = vpop.permute.xlu1 %596  ;;  %v875_v33 = vmul.f32 %v2144_v47, %v853_v49  ;;  %v1260_v49 = vunpack.c.0.s8 %v1259_v16 }
 0x10d   : > { %v618_v60 = vmul.f32 %v2122_v32, %v597_v36 }
 0x10e   : > { %1943 = vset.pattern.permute.xlu1 %v1972_v10  ;;  %v897_v40 = vadd.f32 %v2152_v50, %v875_v33  ;;  %v2355_v38 = vsub.s32 %v1260_v49, %v2105_v23 }
 0x10f   : > { %1154 = vperm.xlu1 %1943, %v2252_v1  }
 0x110   : > { %v2298_v17 = vmax.f32 %v897_v40, 0.0  ;;  %v1264_v40 = vrot.slane %v511_v35, %v2355_v38 }
 0x111   : > { %v697_v51 = vpop.permute.xlu1 %696 }
 0x112   : > { %979 = vperm.xlu0 %1949, %v2298_v17   ;;  %v718_v7 = vmul.f32 %v2119_v31, %v697_v51 }
 0x113   : > { %1158 = vperm.xlu1 %1943, %v2270_v15  }
 0x114   : > { %v734_v32 = vadd.f32 %v718_v7, %v618_v60 }
 0x116   : > { %v789_v59 = vpop.permute.xlu1 %788  ;;  %1950 = vset.pattern.permute.xlu0 %v1970_v2  ;;  %v834_v58 = vadd.f32 %v818_v14, %v734_v32 }
 0x117   : > { %v816_v28 = vmul.f32 %v2131_v39, %v789_v59  ;;  %1944 = vset.pattern.permute.xlu1 %v1971_v3  ;;  %1042 = vperm.xlu0 %1950, %v2237_v45   ;;  %v874_v45 = vmul.f32 %v2144_v47, %v852_v5 }
 0x118   : > { %959 = vperm.xlu1 %1944, %v909_v37   ;;  %v856_v8 = vadd.f32 %v2139_v44, %v834_v58 }
 0x119   : > { %v832_v62 = vadd.f32 %v816_v28, %v732_v54  ;;  %v896_v18 = vadd.f32 %v2152_v50, %v874_v45  ;;  %v2393_v54 = vld [vmem:[%s2644_s8] ss:$0 sm:$0xff] }
 0x11a   : > { %v793_v9 = vpop.permute.xlu1 %792  ;;  %v878_v21 = vmul.f32 %v2144_v47, %v856_v8 }
 0x11b   : > { %v854_v11 = vadd.f32 %v2139_v44, %v832_v62  ;;  %v817_v12 = vmul.f32 %v2131_v39, %v793_v9  ;;  %1054 = vperm.xlu0 %1950, %v2252_v1   ;;  %v1958_v1 = vld [vmem:[%s2647_s11] sm:$0xff]   ;;  %v1959_v39 = vld [vmem:[%s2647_s11 + $0x8] sm:$0xff]  }
 0x11c   : > { %1945 = vset.pattern.permute.xlu1 %v1970_v2  ;;  %1875 = vmatprep.subr.bf16.mxu0 %v1958_v1  ;;  %v900_v22 = vadd.f32 %v2152_v50, %v878_v21 }
 0x11d   : > { %v833_v13 = vadd.f32 %v817_v12, %v733_v43  ;;  %1066 = vperm.xlu1 %1945, %v909_v37   ;;  %v876_v4 = vmul.f32 %v2144_v47, %v854_v11  ;;  %1895 = vmatprep.subr.bf16.mxu1 %v1958_v1  ;;  %v496_v11 = vld [vmem:[%s2060_s18 + $0x8] sm:$0xff] }
 0x11e   : > { %1876 = vmatpush3.bf16.msra.mxu0 %v1958_v1  ;;  %1897 = vmatpush3.bf16.msra.mxu1 %v1958_v1 }
 0x11f   : > { %v855_v31 = vadd.f32 %v2139_v44, %v833_v13  ;;  %1058 = vperm.xlu0 %1950, %v2270_v15   ;;  %v898_v19 = vadd.f32 %v2152_v50, %v876_v4  ;;  %v912_v15 = vmax.f32 %v896_v18, 0.0  ;;  %1877 = vmatprep.subr.bf16.mxu0 %v1959_v39  ;;  %v916_v44 = vmax.f32 %v900_v22, 0.0  ;;  %v2407_v13 = vld [vmem:[%s2645_s9] ss:$0 sm:$0xff] }
 0x120   : > { %1896 = vmatprep.subr.bf16.mxu1 %v1959_v39  ;;  %v1257_v22 = vcombine.high %v511_v35, %v511_v35 }
 0x121   : > { %1070 = vperm.xlu1 %1945, %v2242_v53   ;;  %v877_v56 = vmul.f32 %v2144_v47, %v855_v31  ;;  %v914_v20 = vmax.f32 %v898_v19, 0.0  ;;  %v2414_v19 = vld [vmem:[%s2646_s10] ss:$0 sm:$0xff] }
 0x122   : > { %1878 = vmatpush3.bf16.msra.mxu0 %v1959_v39  ;;  %1898 = vmatpush3.bf16.msra.mxu1 %v1959_v39 }
 0x123   : > { %1074 = vperm.xlu0 %1950, %v2280_v57   ;;  %v899_v53 = vadd.f32 %v2152_v50, %v877_v56 }
 0x125   : > { %1946 = vset.pattern.permute.xlu1 %v1971_v3  ;;  %v915_v46 = vmax.f32 %v899_v53, 0.0 }
 0x126   : > { %974 = vperm.xlu1 %1946, %v912_v15  }
 0x127   : > { %1086 = vperm.xlu0 %1950, %v914_v20  }
 0x12a   : > { %1947 = vset.pattern.permute.xlu1 %v1970_v2 }
 0x12b   : > { %1078 = vperm.xlu1 %1947, %v912_v15   ;;  %1090 = vperm.xlu0 %1950, %v915_v46  }
 0x12f   : > { %1948 = vset.pattern.permute.xlu1 %v1972_v10  ;;  %1955 = vset.pattern.permute.xlu0 %v1972_v10 }
 0x130   : > { %1166 = vperm.xlu1 %1948, %v909_v37   ;;  %1182 = vperm.xlu0 %1955, %v2298_v17   ;;  %v495_v37 = vld [vmem:[%s2060_s18] sm:$0xff] }
 0x134   : > { %1174 = vperm.xlu1 %1948, %v2280_v57   ;;  %1194 = vperm.xlu0 %1955, %v916_v44  }
 0x137   : > { %v920_v47 = vpop.permute.xlu1 %919 }
 0x138   : > { %1178 = vperm.xlu1 %1948, %v912_v15  }
 0x13c   : > { %1951 = vset.pattern.permute.xlu1 %v1971_v3  ;;  %v1035_v50 = vpop.permute.xlu1 %1034 }
 0x13d   : > { %984 = vperm.xlu1 %1951, %v914_v20  }
 0x141   : > { %1952 = vset.pattern.permute.xlu1 %v1970_v2 }
 0x142   : > { %1082 = vperm.xlu1 %1952, %v2298_v17  }
 0x146   : > { %1953 = vset.pattern.permute.xlu1 %v1971_v3 }
 0x147   : > { %989 = vperm.xlu1 %1953, %v915_v46  }
 0x14b   : > { %994 = vperm.xlu1 %1953, %v916_v44  }
 0x14f   : > { %1954 = vset.pattern.permute.xlu1 %v1970_v2  ;;  %v517_v2 = vld [vmem:[%s2643_s7] sm:$0x7] }
 0x150   : > { %1094 = vperm.xlu1 %1954, %v916_v44   ;;  %v2368_v33 = vrot.slane %v517_v2, %v2109_v26  ;;  %v2374_v61 = vrot.slane %v517_v2, %v801_v34  ;;  %v1272_v34 = vcombine.high %v1264_v40, %v1264_v40 }
 0x152   : > { %v1001_v17 = vmul.f32 %v2368_v33, %v920_v47  ;;  %v1294_v6 = vrot.slane %v1272_v34, %v2355_v38 }
 0x154   : > { %1956 = vset.pattern.permute.xlu1 %v1972_v10  ;;  %v2363_v10 = vrot.slane %v517_v2, %v701_v27  ;;  %v2380_v27 = vrot.slane %v1264_v40, %v2355_v38  ;;  %v1362_v43 = vrot.slane %v1294_v6, %v2109_v26  ;;  %v1304_v35 = vcombine.high %v1294_v6, %v1294_v6 }
 0x155   : > { %1186 = vperm.xlu1 %1956, %v914_v20  }
 0x156   : > { %v1101_v48 = vmul.f32 %v2363_v10, %v1035_v50  ;;  %v1358_v55 = vrot.slane %v2380_v27, %v2109_v26  ;;  %v1436_v32 = vsub.f32 %v496_v11, %v1362_v43  ;;  %v1370_v34 = vrot.slane %v1304_v35, %v2109_v26  ;;  %v499_v11 = vld [vmem:[%s2060_s18 + $0x20] sm:$0xff] }
 0x157   : > { %v1302_v6 = vcombine.high %v2380_v27, %v2380_v27 }
 0x158   : > { %v1117_v52 = vadd.f32 %v1101_v48, %v1001_v17  ;;  %v1435_v28 = vsub.f32 %v495_v37, %v1358_v55 }
 0x159   : > { %1190 = vperm.xlu1 %1956, %v915_v46   ;;  %v1366_v27 = vrot.slane %v1302_v6, %v2109_v26 }
 0x15a   : > { %v1039_v57 = vpop.permute.xlu1 %1038  ;;  %v1139_v30 = vpop.permute.xlu0 %1138 }
 0x15b   : > { %v1102_v60 = vmul.f32 %v2363_v10, %v1039_v57  ;;  %v1202_v12 = vmul.f32 %v2374_v61, %v1139_v30  ;;  %v1271_v57 = vrot.slane %v1257_v22, %v2355_v38 }
 0x15d   : > { %v1273_v30 = vcombine.high %v1271_v57, %v1271_v57  ;;  %v1287_v17 = vrot.slane %v1271_v57, %v2355_v38 }
 0x15e   : > { %v2365_v36 = vpop.permute.xlu0 %1150 }
 0x15f   : > { %v2352_v25 = vpop.permute.xlu1 %934  ;;  %v1303_v22 = vcombine.high %v1287_v17, %v1287_v17 }
 0x160   : > { %v1004_v2 = vmul.f32 %v2368_v33, %v2352_v25  ;;  %v1205_v25 = vmul.f32 %v2374_v61, %v2365_v36 }
 0x162   : > { %v2377_v51 = vpop.permute.xlu0 %1162 }
 0x163   : > { %v1208_v36 = vmul.f32 %v2374_v61, %v2377_v51 }
 0x164   : > { %v1047_v3 = vpop.permute.xlu1 %1046 }
 0x165   : > { %v1104_v24 = vmul.f32 %v2363_v10, %v1047_v3 }
 0x169   : > { %v1135_v41 = vpop.permute.xlu1 %1134 }
 0x16a   : > { %v1201_v29 = vmul.f32 %v2374_v61, %v1135_v41 }
 0x16c   : > { %v1217_v59 = vadd.f32 %v1201_v29, %v1117_v52  ;;  %v1120_v29 = vadd.f32 %v1104_v24, %v1004_v2  ;;  %v1301_v52 = vrot.slane %v1273_v30, %v2355_v38  ;;  %v500_v24 = vld [vmem:[%s2060_s18 + $0x28] sm:$0xff] }
 0x16d   : > { %v2383_v42 = vpop.permute.xlu1 %1142 }
 0x16e   : > { %v1239_v5 = vadd.f32 %v2393_v54, %v1217_v59 }
 0x170   : > { %v2387_v23 = vpop.permute.xlu0 %1170  ;;  %v1451_v45 = vadd.f32 %v1435_v28, %v1239_v5  ;;  %v498_v5 = vld [vmem:[%s2060_s18 + $0x18] sm:$0xff] }
 0x171   : > { %v1147_v0 = vpop.permute.xlu1 %1146 }
 0x172   : > { %v1474_v1 = vmul.f32 %v2407_v13, %v1451_v45  ;;  %v1204_v40 = vmul.f32 %v2374_v61, %v1147_v0 }
 0x174   : > { %v1497_v39 = vadd.f32 %v2414_v19, %v1474_v1  ;;  %v1220_v37 = vadd.f32 %v1204_v40, %v1120_v29 }
 0x175   : > { %v925_v62 = vpop.permute.xlu0 %924 }
 0x176   : > { %v1002_v7 = vmul.f32 %v2368_v33, %v925_v62  ;;  %v2399_v9 = vpop.permute.xlu1 %944  ;;  %v1513_v46 = vmax.f32 %v1497_v39, 0.0  ;;  %v1374_v62 = vrot.slane %v1287_v17, %v2109_v26  ;;  %v1242_v45 = vadd.f32 %v2393_v54, %v1220_v37 }
 0x177   : > { %v1203_v39 = vmul.f32 %v2374_v61, %v2383_v42 }
 0x178   : > { %v1118_v63 = vadd.f32 %v1102_v60, %v1002_v7  ;;  %v1305_v7 = vcombine.high %v1301_v52, %v1301_v52 }
 0x179   : > { %v930_v31 = vpop.permute.xlu0 %929 }
 0x17a   : > { %v1218_v4 = vadd.f32 %v1202_v12, %v1118_v63  ;;  %v1438_v12 = vsub.f32 %v498_v5, %v1370_v34 }
 0x17b   : > { %v1051_v14 = vpop.permute.xlu1 %1050 }
 0x17c   : > { %v1240_v18 = vadd.f32 %v2393_v54, %v1218_v4  ;;  %v1105_v41 = vmul.f32 %v2363_v10, %v1051_v14  ;;  %v1003_v4 = vmul.f32 %v2368_v33, %v930_v31  ;;  %v2462_v31 = vld [vmem:[%s2065_s22 + $0x8] sm:$0xff] }
 0x17d   : > { %v940_v20 = vpop.permute.xlu0 %939  ;;  %v1313_v40 = vrot.slane %v2462_v31, %v2355_v38 }
 0x17e   : > { %v1452_v56 = vadd.f32 %v1436_v32, %v1240_v18  ;;  %v1005_v16 = vmul.f32 %v2368_v33, %v940_v20  ;;  %v1439_v18 = vsub.f32 %v499_v11, %v1374_v62  ;;  %v502_v20 = vld [vmem:[%s2060_s18 + $0x38] sm:$0xff]  ;;  %v501_v62 = vld [vmem:[%s2060_s18 + $0x30] sm:$0xff] }
 0x180   : > { %v2416_v58 = vpop.permute.xlu1 %949  ;;  %v1475_v15 = vmul.f32 %v2407_v13, %v1452_v56  ;;  %v1121_v3 = vadd.f32 %v1105_v41, %v1005_v16  ;;  %v1386_v56 = vrot.slane %v1305_v7, %v2109_v26  ;;  %v1321_v7 = vcombine.high %v1313_v40, %v1313_v40 }
 0x181   : > { %v2421_v47 = vpop.permute.xlu0 %964 }
 0x182   : > { %v1498_v53 = vadd.f32 %v2414_v19, %v1475_v15  ;;  %v1221_v60 = vadd.f32 %v1205_v25, %v1121_v3  ;;  %v497_v15 = vld [vmem:[%s2060_s18 + $0x10] sm:$0xff]  ;;  %v1442_v2 = vsub.f32 %v502_v20, %v1386_v56  ;;  %v1007_v25 = vmul.f32 %v2368_v33, %v2416_v58 }
 0x183   : > { %v1010_v58 = vmul.f32 %v2368_v33, %v2421_v47 }
 0x184   : > { %v955_v8 = vpop.permute.xlu1 %954  ;;  %v1514_v21 = vmax.f32 %v1498_v53, 0.0  ;;  %v1243_v1 = vadd.f32 %v2393_v54, %v1221_v60 }
 0x185   : > { %v2427_v49 = vpop.permute.xlu0 %969  ;;  %v1008_v0 = vmul.f32 %v2368_v33, %v955_v8  ;;  %v1454_v8 = vadd.f32 %v1438_v12, %v1242_v45 }
 0x186   : > { %v1529_v44 = vpack.c.bf16 %v1514_v21, %v1513_v46  ;;  %v1378_v46 = vrot.slane %v1301_v52, %v2109_v26  ;;  %v1455_v30 = vadd.f32 %v1439_v18, %v1243_v1  ;;  %v1382_v52 = vrot.slane %v1303_v22, %v2109_v26 }
 0x187   : > { %v1343_v18 = vrot.slane %v1321_v7, %v2355_v38  ;;  %v1011_v7 = vmul.f32 %v2368_v33, %v2427_v49 }
 0x188   : > { %1879 = vmatprep.mubr.msk.bf16.mxu0 %vm1560_vm1, %v1529_v44  ;;  %v1006_v44 = vmul.f32 %v2368_v33, %v2399_v9  ;;  %v1477_v9 = vmul.f32 %v2407_v13, %v1454_v8  ;;  %v1440_v3 = vsub.f32 %v500_v24, %v1378_v46  ;;  %v1478_v5 = vmul.f32 %v2407_v13, %v1455_v30 }
 0x189   : > { %v1063_v50 = vpop.permute.xlu1 %1062 }
 0x18a   : > { %v1108_v55 = vmul.f32 %v2363_v10, %v1063_v50  ;;  %v1437_v50 = vsub.f32 %v497_v15, %v1366_v27  ;;  %v1500_v45 = vadd.f32 %v2414_v19, %v1477_v9  ;;  %v1501_v47 = vadd.f32 %v2414_v19, %v1478_v5 }
 0x18c   : > { %v1124_v43 = vadd.f32 %v1108_v55, %v1008_v0  ;;  %v1517_v24 = vmax.f32 %v1501_v47, 0.0 }
 0x18e   : > { %v1155_v48 = vpop.permute.xlu1 %1154  ;;  %v1224_v51 = vadd.f32 %v1208_v36, %v1124_v43 }
 0x18f   : > { %v1206_v41 = vmul.f32 %v2374_v61, %v1155_v48 }
 0x190   : > { %v1246_v42 = vadd.f32 %v2393_v54, %v1224_v51 }
 0x191   : > { %v2436_v59 = vpop.permute.xlu0 %979 }
 0x192   : > { %v1159_v28 = vpop.permute.xlu1 %1158  ;;  %v1458_v6 = vadd.f32 %v1442_v2, %v1246_v42  ;;  %v504_v2 = vld [vmem:[%s2060_s18 + $0x48] sm:$0xff] }
 0x193   : > { %v1207_v48 = vmul.f32 %v2374_v61, %v1159_v28 }
 0x194   : > { %v1481_v1 = vmul.f32 %v2407_v13, %v1458_v6 }
 0x196   : > { %v1043_v63 = vpop.permute.xlu0 %1042  ;;  %v1504_v30 = vadd.f32 %v2414_v19, %v1481_v1 }
 0x197   : > { %v1103_v32 = vmul.f32 %v2363_v10, %v1043_v63  ;;  %v2453_v14 = vpop.permute.xlu1 %959 }
 0x199   : > { %v1119_v53 = vadd.f32 %v1103_v32, %v1003_v4  ;;  %v1441_v4 = vsub.f32 %v501_v62, %v1382_v52 }
 0x19a   : > { %v1055_v21 = vpop.permute.xlu0 %1054 }
 0x19b   : > { %v1219_v57 = vadd.f32 %v1203_v39, %v1119_v53  ;;  %v1106_v16 = vmul.f32 %v2363_v10, %v1055_v21  ;;  %v1210_v39 = vmul.f32 %v2374_v61, %v2387_v23  ;;  %v1516_v53 = vmax.f32 %v1500_v45, 0.0 }
 0x19c   : > { %v1067_v35 = vpop.permute.xlu1 %1066 }
 0x19d   : > { %v1241_v17 = vadd.f32 %v2393_v54, %v1219_v57  ;;  %v1122_v29 = vadd.f32 %v1106_v16, %v1006_v44  ;;  %v1329_v44 = vrot.slane %v1313_v40, %v2355_v38 }
 0x19e   : > { %v1059_v55 = vpop.permute.xlu0 %1058 }
 0x19f   : > { %v1453_v34 = vadd.f32 %v1437_v50, %v1241_v17  ;;  %v1222_v37 = vadd.f32 %v1206_v41, %v1122_v29  ;;  %v1107_v0 = vmul.f32 %v2363_v10, %v1059_v55  ;;  %v1394_v50 = vrot.slane %v1343_v18, %v2109_v26 }
 0x1a0   : > { %v1071_v60 = vpop.permute.xlu1 %1070  ;;  %v1109_v17 = vmul.f32 %v2363_v10, %v1067_v35  ;;  %v1520_v55 = vmax.f32 %v1504_v30, 0.0 }
 0x1a1   : > { %v1476_v43 = vmul.f32 %v2407_v13, %v1453_v34  ;;  %v1244_v11 = vadd.f32 %v2393_v54, %v1222_v37  ;;  %v1123_v36 = vadd.f32 %v1107_v0, %v1007_v25  ;;  %v1110_v12 = vmul.f32 %v2363_v10, %v1071_v60  ;;  %v503_v34 = vld [vmem:[%s2060_s18 + $0x40] sm:$0xff] }
 0x1a2   : > { %v1444_v29 = vsub.f32 %v504_v2, %v1394_v50  ;;  %v1075_v9 = vpop.permute.xlu0 %1074  ;;  %v1009_v25 = vmul.f32 %v2368_v33, %v2453_v14  ;;  %v1351_v37 = vcombine.high %v1329_v44, %v1329_v44 }
 0x1a3   : > { %v1456_v63 = vadd.f32 %v1440_v3, %v1244_v11  ;;  %v1223_v27 = vadd.f32 %v1207_v48, %v1123_v36  ;;  %v1126_v32 = vadd.f32 %v1110_v12, %v1010_v58  ;;  %v1499_v28 = vadd.f32 %v2414_v19, %v1476_v43  ;;  %v505_v12 = vld [vmem:[%s2060_s18 + $0x50] sm:$0xff] }
 0x1a4   : > { %v1390_v3 = vrot.slane %v1329_v44, %v2109_v26  ;;  %v1125_v6 = vadd.f32 %v1109_v17, %v1009_v25  ;;  %v1111_v35 = vmul.f32 %v2363_v10, %v1075_v9  ;;  %v1398_v14 = vrot.slane %v1351_v37, %v2109_v26 }
 0x1a5   : > { %v1479_v56 = vmul.f32 %v2407_v13, %v1456_v63  ;;  %v1245_v51 = vadd.f32 %v2393_v54, %v1223_v27  ;;  %v975_v15 = vpop.permute.xlu1 %974  ;;  %v1515_v20 = vmax.f32 %v1499_v28, 0.0  ;;  %v1226_v21 = vadd.f32 %v1210_v39, %v1126_v32 }
 0x1a6   : > { %v1443_v60 = vsub.f32 %v503_v34, %v1390_v3  ;;  %v1353_v11 = vcombine.high %v1343_v18, %v1343_v18  ;;  %v1127_v45 = vadd.f32 %v1111_v35, %v1011_v7  ;;  %v1012_v49 = vmul.f32 %v2368_v33, %v975_v15  ;;  %v506_v18 = vld [vmem:[%s2060_s18 + $0x58] sm:$0xff]  ;;  %v1087_v44 = vpop.permute.xlu0 %1086 }
 0x1a7   : > { %v1457_v8 = vadd.f32 %v1441_v4, %v1245_v51  ;;  %v1502_v46 = vadd.f32 %v2414_v19, %v1479_v56  ;;  %v1530_v22 = vpack.c.bf16 %v1516_v53, %v1515_v20  ;;  %v1248_v40 = vadd.f32 %v2393_v54, %v1226_v21 }
 0x1a8   : > { %v1445_v28 = vsub.f32 %v505_v12, %v1398_v14  ;;  %v1402_v56 = vrot.slane %v1353_v11, %v2109_v26  ;;  %v507_v11 = vld [vmem:[%s2060_s18 + $0x60] sm:$0xff] }
 0x1a9   : > { %v1480_v57 = vmul.f32 %v2407_v13, %v1457_v8  ;;  %v1518_v16 = vmax.f32 %v1502_v46, 0.0  ;;  %1880 = vmatmul.mubr.msk.bf16.vlgmr.msra.gmra.mrb[0].mxu0 %vm1560_vm1, %v1530_v22  ;;  %v1460_v62 = vadd.f32 %v1444_v29, %v1248_v40 }
 0x1aa   : > { %v1079_v23 = vpop.permute.xlu1 %1078  ;;  %v1446_v21 = vsub.f32 %v506_v18, %v1402_v56  ;;  %v1091_v29 = vpop.permute.xlu0 %1090 }
 0x1ab   : > { %v1531_v42 = vpack.c.bf16 %v1518_v16, %v1517_v24  ;;  %v1503_v41 = vadd.f32 %v2414_v19, %v1480_v57  ;;  %v1112_v36 = vmul.f32 %v2363_v10, %v1079_v23  ;;  %v1483_v27 = vmul.f32 %v2407_v13, %v1460_v62 }
 0x1ad   : > { %1883 = vmatprep.mubr.msk.bf16.mxu0 %vm1560_vm1, %v1531_v42  ;;  %v1519_v52 = vmax.f32 %v1503_v41, 0.0  ;;  %v1128_v51 = vadd.f32 %v1112_v36, %v1012_v49  ;;  %v1506_v8 = vadd.f32 %v2414_v19, %v1483_v27  ;;  %v1306_v42 = vcombine.high %v2462_v31, %v2462_v31  ;;  %v510_v49 = vld [vmem:[%s2060_s18 + $0x78] sm:$0xff] }
 0x1af   : > { %v1167_v0 = vpop.permute.xlu1 %1166  ;;  %v1532_v5 = vpack.c.bf16 %v1520_v55, %v1519_v52  ;;  %v1522_v30 = vmax.f32 %v1506_v8, 0.0  ;;  %v1320_v3 = vrot.slane %v1306_v42, %v2355_v38 }
 0x1b0   : > { %v1209_v48 = vmul.f32 %v2374_v61, %v1167_v0  ;;  %v1013_v0 = vmul.f32 %v2368_v33, %v2436_v59 }
 0x1b1   : > { %1884 = vmatmul.mubr.msk.bf16.gmra.mrb[4].mxu0 %vm1560_vm1, %v1532_v5  ;;  %v1322_v34 = vcombine.high %v1320_v3, %v1320_v3  ;;  %v1183_v5 = vpop.permute.xlu0 %1182 }
 0x1b2   : > { %v1225_v43 = vadd.f32 %v1209_v48, %v1125_v6  ;;  %v1336_v6 = vrot.slane %v1320_v3, %v2355_v38 }
 0x1b3   : > { %v1175_v58 = vpop.permute.xlu1 %1174  ;;  %v1350_v48 = vrot.slane %v1322_v34, %v2355_v38 }
 0x1b4   : > { %v1247_v63 = vadd.f32 %v2393_v54, %v1225_v43  ;;  %v1211_v4 = vmul.f32 %v2374_v61, %v1175_v58  ;;  %v1406_v7 = vrot.slane %v1336_v6, %v2109_v26  ;;  %v1352_v56 = vcombine.high %v1336_v6, %v1336_v6 }
 0x1b5   : > { %v1354_v14 = vcombine.high %v1350_v48, %v1350_v48  ;;  %v1195_v36 = vpop.permute.xlu0 %1194 }
 0x1b6   : > { %v1459_v32 = vadd.f32 %v1443_v60, %v1247_v63  ;;  %v1227_v1 = vadd.f32 %v1211_v4, %v1127_v45  ;;  %v1213_v60 = vmul.f32 %v2374_v61, %v1183_v5  ;;  %v1447_v63 = vsub.f32 %v507_v11, %v1406_v7 }
 0x1b7   : > { %v1179_v47 = vpop.permute.xlu1 %1178  ;;  %v1418_v4 = vrot.slane %v1354_v14, %v2109_v26  ;;  %v1216_v27 = vmul.f32 %v2374_v61, %v1195_v36 }
 0x1b8   : > { %v1249_v39 = vadd.f32 %v2393_v54, %v1227_v1  ;;  %v1212_v20 = vmul.f32 %v2374_v61, %v1179_v47  ;;  %v1482_v53 = vmul.f32 %v2407_v13, %v1459_v32  ;;  %v1410_v1 = vrot.slane %v1350_v48, %v2109_v26  ;;  %v508_v47 = vld [vmem:[%s2060_s18 + $0x68] sm:$0xff] }
 0x1b9   : > { %v1450_v8 = vsub.f32 %v510_v49, %v1418_v4 }
 0x1ba   : > { %v1461_v46 = vadd.f32 %v1445_v28, %v1249_v39  ;;  %v1228_v22 = vadd.f32 %v1212_v20, %v1128_v51  ;;  %v1505_v15 = vadd.f32 %v2414_v19, %v1482_v53  ;;  %v1114_v28 = vmul.f32 %v2363_v10, %v1087_v44 }
 0x1bc   : > { %v1484_v50 = vmul.f32 %v2407_v13, %v1461_v46  ;;  %v1250_v57 = vadd.f32 %v2393_v54, %v1228_v22  ;;  %v985_v24 = vpop.permute.xlu1 %984  ;;  %v1521_v16 = vmax.f32 %v1505_v15, 0.0  ;;  %v1448_v15 = vsub.f32 %v508_v47, %v1410_v1 }
 0x1bd   : > { %v1014_v45 = vmul.f32 %v2368_v33, %v985_v24  ;;  %v509_v24 = vld [vmem:[%s2060_s18 + $0x70] sm:$0xff] }
 0x1be   : > { %v1462_v2 = vadd.f32 %v1446_v21, %v1250_v57  ;;  %v1533_v23 = vpack.c.bf16 %v1522_v30, %v1521_v16  ;;  %v1507_v17 = vadd.f32 %v2414_v19, %v1484_v50  ;;  %v1115_v21 = vmul.f32 %v2363_v10, %v1091_v29 }
 0x1bf   : > { %v1130_v20 = vadd.f32 %v1114_v28, %v1014_v45  ;;  %v1414_v50 = vrot.slane %v1352_v56, %v2109_v26 }
 0x1c0   : > { %v1485_v41 = vmul.f32 %v2407_v13, %v1462_v2  ;;  %1887 = vmatprep.mubr.msk.bf16.mxu1 %vm1560_vm1, %v1533_v23  ;;  %v1523_v52 = vmax.f32 %v1507_v17, 0.0 }
 0x1c1   : > { %v1083_v40 = vpop.permute.xlu1 %1082 }
 0x1c2   : > { %v1508_v9 = vadd.f32 %v2414_v19, %v1485_v41  ;;  %v1113_v25 = vmul.f32 %v2363_v10, %v1083_v40  ;;  %v1449_v41 = vsub.f32 %v509_v24, %v1414_v50 }
 0x1c4   : > { %v1524_v55 = vmax.f32 %v1508_v9, 0.0  ;;  %v1129_v35 = vadd.f32 %v1113_v25, %v1013_v0 }
 0x1c6   : > { %v990_v37 = vpop.permute.xlu1 %989  ;;  %v1534_v31 = vpack.c.bf16 %v1524_v55, %v1523_v52  ;;  %v1229_v43 = vadd.f32 %v1213_v60, %v1129_v35 }
 0x1c7   : > { %v1015_v51 = vmul.f32 %v2368_v33, %v990_v37 }
 0x1c8   : > { %1888 = vmatmul.mubr.msk.bf16.vlgmr.msra.gmra.mrb[0].mxu1 %vm1560_vm1, %v1534_v31  ;;  %v1251_v38 = vadd.f32 %v2393_v54, %v1229_v43 }
 0x1c9   : > { %v1131_v57 = vadd.f32 %v1115_v21, %v1015_v51 }
 0x1ca   : > { %v995_v62 = vpop.permute.xlu1 %994  ;;  %v1463_v53 = vadd.f32 %v1447_v63, %v1251_v38 }
 0x1cb   : > { %v1016_v12 = vmul.f32 %v2368_v33, %v995_v62 }
 0x1cc   : > { %v1486_v33 = vmul.f32 %v2407_v13, %v1463_v53 }
 0x1ce   : > { %v1509_v26 = vadd.f32 %v2414_v19, %v1486_v33 }
 0x1cf   : > { %v1095_v59 = vpop.permute.xlu1 %1094 }
 0x1d0   : > { %v1116_v58 = vmul.f32 %v2363_v10, %v1095_v59  ;;  %v1525_v55 = vmax.f32 %v1509_v26, 0.0 }
 0x1d2   : > { %v1132_v32 = vadd.f32 %v1116_v58, %v1016_v12 }
 0x1d4   : > { %v1232_v18 = vadd.f32 %v1216_v27, %v1132_v32  ;;  %v1187_v39 = vpop.permute.xlu1 %1186 }
 0x1d5   : > { %v1214_v46 = vmul.f32 %v2374_v61, %v1187_v39 }
 0x1d6   : > { %v1254_v22 = vadd.f32 %v2393_v54, %v1232_v18 }
 0x1d7   : > { %v1230_v44 = vadd.f32 %v1214_v46, %v1130_v20 }
 0x1d8   : > { %v1191_v16 = vpop.permute.xlu1 %1190  ;;  %v1466_v30 = vadd.f32 %v1450_v8, %v1254_v22 }
 0x1d9   : > { %v1252_v2 = vadd.f32 %v2393_v54, %v1230_v44  ;;  %v1215_v23 = vmul.f32 %v2374_v61, %v1191_v16 }
 0x1da   : > { %v1489_v10 = vmul.f32 %v2407_v13, %v1466_v30 }
 0x1db   : > { %v1464_v42 = vadd.f32 %v1448_v15, %v1252_v2  ;;  %v1231_v17 = vadd.f32 %v1215_v23, %v1131_v57 }
 0x1dc   : > { %v1512_v61 = vadd.f32 %v2414_v19, %v1489_v10 }
 0x1dd   : > { %v1487_v40 = vmul.f32 %v2407_v13, %v1464_v42  ;;  %v1253_v29 = vadd.f32 %v2393_v54, %v1231_v17  ;;  %v2580_v54 = vld [vmem:[%s2648_s12] ss:$0 sm:$0xff] }
 0x1de   : > { %v1528_v0 = vmax.f32 %v1512_v61, 0.0 }
 0x1df   : > { %v1465_v9 = vadd.f32 %v1449_v41, %v1253_v29  ;;  %v1510_v3 = vadd.f32 %v2414_v19, %v1487_v40 }
 0x1e1   : > { %v1488_v52 = vmul.f32 %v2407_v13, %v1465_v9  ;;  %v1526_v25 = vmax.f32 %v1510_v3, 0.0 }
 0x1e3   : > { %v1535_v34 = vpack.c.bf16 %v1526_v25, %v1525_v55  ;;  %v1511_v37 = vadd.f32 %v2414_v19, %v1488_v52 }
 0x1e5   : > { %1891 = vmatprep.mubr.msk.bf16.mxu1 %vm1560_vm1, %v1535_v34  ;;  %v1527_v31 = vmax.f32 %v1511_v37, 0.0 }
 0x1e7   : > { %v1536_v5 = vpack.c.bf16 %v1528_v0, %v1527_v31 }
 0x1e9   : > { %1892 = vmatmul.mubr.msk.bf16.gmra.mrb[4].mxu1 %vm1560_vm1, %v1536_v5 }
 0x27c   : > { %v1881_v13 = vpop.f32.mrb[0].mxu0 }
 0x27d   : > { %v1619_v6 = vpop.f32.mrb[1].mxu0  ;;  %v1628_v35 = vadd.f32 %v1881_v13, %v2580_v54 }
 0x27e   : > { %v1620_v48 = vadd.f32 %v2580_v54, %v1619_v6  ;;  %v1882_v62 = vpop.f32.mrb[2].mxu0 }
 0x27f   : > { %v1622_v19 = vpop.f32.mrb[3].mxu0  ;;  %v1631_v7 = vadd.f32 %v1882_v62, %v2580_v54  ;;  %v1727_v14 = vmul.f32 %v1628_v35, %v1628_v35  ;;  %v1687_v58 = vsel %vm1683_vm2, %v1628_v35, 0.0 }
 0x280   : > { %v1725_v60 = vmul.f32 %v1620_v48, %v1620_v48  ;;  %v1623_v43 = vadd.f32 %v2580_v54, %v1622_v19  ;;  %v1684_v11 = vsel %vm1683_vm2, %v1620_v48, 0.0 }
 0x281   : > { %v1728_v63 = vmul.f32 %v1631_v7, %v1631_v7  ;;  %v1744_v28 = vsel %vm1683_vm2, %v1727_v14, 0.0  ;;  %v1689_v1 = vsel %vm1683_vm2, %v1631_v7, 0.0 }
 0x282   : > { %v1685_v36 = vsel %vm1683_vm2, %v1623_v43, 0.0  ;;  %v1726_v59 = vmul.f32 %v1623_v43, %v1623_v43  ;;  %v1741_v45 = vsel %vm1683_vm2, %v1725_v60, 0.0 }
 0x283   : > { %v1686_v12 = vadd.f32 %v1685_v36, %v1684_v11  ;;  %v1746_v53 = vsel %vm1683_vm2, %v1728_v63, 0.0 }
 0x284   : > { %v1742_v38 = vsel %vm1683_vm2, %v1726_v59, 0.0  ;;  %v1885_v4 = vpop.f32.mrb[4].mxu0 }
 0x285   : > { %v1688_v27 = vadd.f32 %v1687_v58, %v1686_v12  ;;  %v1743_v49 = vadd.f32 %v1742_v38, %v1741_v45  ;;  %v1635_v32 = vpop.f32.mrb[5].mxu0  ;;  %v1644_v47 = vadd.f32 %v1885_v4, %v2580_v54 }
 0x286   : > { %v1636_v56 = vadd.f32 %v2580_v54, %v1635_v32  ;;  %v1886_v51 = vpop.f32.mrb[6].mxu0 }
 0x287   : > { %v1745_v18 = vadd.f32 %v1744_v28, %v1743_v49  ;;  %v1690_v39 = vadd.f32 %v1689_v1, %v1688_v27  ;;  %v1638_v20 = vpop.f32.mrb[7].mxu0  ;;  %v1647_v44 = vadd.f32 %v1886_v51, %v2580_v54  ;;  %v1731_v24 = vmul.f32 %v1644_v47, %v1644_v47 }
 0x288   : > { %v1691_v8 = vsel %vm1683_vm2, %v1636_v56, 0.0  ;;  %v1729_v46 = vmul.f32 %v1636_v56, %v1636_v56  ;;  %v1639_v21 = vadd.f32 %v2580_v54, %v1638_v20  ;;  %v1695_v2 = vsel %vm1683_vm2, %v1644_v47, 0.0 }
 0x289   : > { %v1692_v22 = vadd.f32 %v1691_v8, %v1690_v39  ;;  %v1747_v15 = vadd.f32 %v1746_v53, %v1745_v18  ;;  %v1732_v23 = vmul.f32 %v1647_v44, %v1647_v44  ;;  %v1697_v17 = vsel %vm1683_vm2, %v1647_v44, 0.0 }
 0x28a   : > { %v1748_v50 = vsel %vm1683_vm2, %v1729_v46, 0.0  ;;  %v1693_v57 = vsel %vm1683_vm2, %v1639_v21, 0.0  ;;  %v1730_v30 = vmul.f32 %v1639_v21, %v1639_v21  ;;  %v1752_v40 = vsel %vm1683_vm2, %v1731_v24, 0.0 }
 0x28b   : > { %v1749_v16 = vadd.f32 %v1748_v50, %v1747_v15  ;;  %v1694_v33 = vadd.f32 %v1693_v57, %v1692_v22  ;;  %v1754_v9 = vsel %vm1683_vm2, %v1732_v23, 0.0 }
 0x28c   : > { %v1750_v41 = vsel %vm1683_vm2, %v1730_v30, 0.0 }
 0x28d   : > { %v1696_v42 = vadd.f32 %v1695_v2, %v1694_v33  ;;  %v1751_v10 = vadd.f32 %v1750_v41, %v1749_v16 }
 0x28f   : > { %v1698_v29 = vadd.f32 %v1697_v17, %v1696_v42  ;;  %v1753_v26 = vadd.f32 %v1752_v40, %v1751_v10 }
 0x291   : > { %v1755_v3 = vadd.f32 %v1754_v9, %v1753_v26 }
 0x29b   : > { %v1889_v52 = vpop.f32.mrb[0].mxu1 }
 0x29c   : > { %v1651_v55 = vpop.f32.mrb[1].mxu1  ;;  %v1660_v25 = vadd.f32 %v1889_v52, %v2580_v54 }
 0x29d   : > { %v1652_v61 = vadd.f32 %v2580_v54, %v1651_v55  ;;  %v1890_v34 = vpop.f32.mrb[2].mxu1  ;;  %v1682_v55 = vld [vmem:[#allocation2] sm:$0x1] }
 0x29e   : > { %v1654_v37 = vpop.f32.mrb[3].mxu1  ;;  %v1663_v5 = vadd.f32 %v1890_v34, %v2580_v54  ;;  %v1735_v35 = vmul.f32 %v1660_v25, %v1660_v25  ;;  %v1703_v43 = vsel %vm1683_vm2, %v1660_v25, 0.0  ;;  %v1724_v34 = vld [vmem:[#allocation2 + $0x1] sm:$0x1] }
 0x29f   : > { %v1699_v31 = vsel %vm1683_vm2, %v1652_v61, 0.0  ;;  %v1733_v0 = vmul.f32 %v1652_v61, %v1652_v61  ;;  %v1655_v13 = vadd.f32 %v2580_v54, %v1654_v37 }
 0x2a0   : > { %v1700_v6 = vadd.f32 %v1699_v31, %v1698_v29  ;;  %v1736_v14 = vmul.f32 %v1663_v5, %v1663_v5  ;;  %v1760_v12 = vsel %vm1683_vm2, %v1735_v35, 0.0  ;;  %v1705_v58 = vsel %vm1683_vm2, %v1663_v5, 0.0 }
 0x2a1   : > { %v1756_v48 = vsel %vm1683_vm2, %v1733_v0, 0.0  ;;  %v1701_v62 = vsel %vm1683_vm2, %v1655_v13, 0.0  ;;  %v1734_v19 = vmul.f32 %v1655_v13, %v1655_v13 }
 0x2a2   : > { %v1757_v60 = vadd.f32 %v1756_v48, %v1755_v3  ;;  %v1702_v7 = vadd.f32 %v1701_v62, %v1700_v6  ;;  %v1762_v38 = vsel %vm1683_vm2, %v1736_v14, 0.0 }
 0x2a3   : > { %v1758_v11 = vsel %vm1683_vm2, %v1734_v19, 0.0 }
 0x2a4   : > { %v1704_v36 = vadd.f32 %v1703_v43, %v1702_v7  ;;  %v1759_v59 = vadd.f32 %v1758_v11, %v1757_v60 }
 0x2a6   : > { %v1761_v45 = vadd.f32 %v1760_v12, %v1759_v59  ;;  %v1706_v63 = vadd.f32 %v1705_v58, %v1704_v36 }
 0x2a8   : > { %v1763_v4 = vadd.f32 %v1762_v38, %v1761_v45 }
 0x2bc   : > { %v1893_v27 = vpop.f32.mrb[4].mxu1 }
 0x2bd   : > { %v1667_v49 = vpop.f32.mrb[5].mxu1  ;;  %v1676_v32 = vadd.f32 %v1893_v27, %v2580_v54 }
 0x2be   : > { %v1668_v28 = vadd.f32 %v2580_v54, %v1667_v49  ;;  %v1894_v1 = vpop.f32.mrb[6].mxu1 }
 0x2bf   : > { %v1670_v56 = vpop.f32.mrb[7].mxu1  ;;  %v1679_v47 = vadd.f32 %v1894_v1, %v2580_v54  ;;  %v1739_v53 = vmul.f32 %v1676_v32, %v1676_v32  ;;  %v1711_v44 = vsel %vm1683_vm2, %v1676_v32, 0.0 }
 0x2c0   : > { %v1707_v51 = vsel %vm1683_vm2, %v1668_v28, 0.0  ;;  %v1737_v18 = vmul.f32 %v1668_v28, %v1668_v28  ;;  %v1671_v39 = vadd.f32 %v2580_v54, %v1670_v56 }
 0x2c1   : > { %v1708_v20 = vadd.f32 %v1707_v51, %v1706_v63  ;;  %v1740_v50 = vmul.f32 %v1679_v47, %v1679_v47  ;;  %v1768_v33 = vsel %vm1683_vm2, %v1739_v53, 0.0  ;;  %v1713_v54 = vsel %vm1683_vm2, %v1679_v47, 0.0 }
 0x2c2   : > { %v1764_v8 = vsel %vm1683_vm2, %v1737_v18, 0.0  ;;  %v1709_v46 = vsel %vm1683_vm2, %v1671_v39, 0.0  ;;  %v1738_v21 = vmul.f32 %v1671_v39, %v1671_v39 }
 0x2c3   : > { %v1765_v22 = vadd.f32 %v1764_v8, %v1763_v4  ;;  %v1710_v15 = vadd.f32 %v1709_v46, %v1708_v20  ;;  %v1770_v23 = vsel %vm1683_vm2, %v1740_v50, 0.0 }
 0x2c4   : > { %v1766_v57 = vsel %vm1683_vm2, %v1738_v21, 0.0 }
 0x2c5   : > { %v1712_v24 = vadd.f32 %v1711_v44, %v1710_v15  ;;  %v1767_v16 = vadd.f32 %v1766_v57, %v1765_v22 }
 0x2c7   : > { %v1714_v30 = vadd.f32 %v1713_v54, %v1712_v24  ;;  %v1769_v2 = vadd.f32 %v1768_v33, %v1767_v16 }
 0x2c9   : > { %v1715_v42 = vrot.slane %v1714_v30, 4  ;;  %v1771_v41 = vadd.f32 %v1770_v23, %v1769_v2 }
 0x2cb   : > { %v1716_v17 = vadd.f32 %v1715_v42, %v1714_v30  ;;  %v1772_v10 = vrot.slane %v1771_v41, 4 }
 0x2cd   : > { %v1717_v40 = vrot.slane %v1716_v17, 2  ;;  %v1773_v29 = vadd.f32 %v1772_v10, %v1771_v41 }
 0x2cf   : > { %v1718_v26 = vadd.f32 %v1717_v40, %v1716_v17  ;;  %v1774_v9 = vrot.slane %v1773_v29, 2 }
 0x2d1   : > { %v1719_v3 = vrot.slane %v1718_v26, 1  ;;  %v1775_v52 = vadd.f32 %v1774_v9, %v1773_v29 }
 0x2d3   : > { %v1720_v25 = vadd.f32 %v1719_v3, %v1718_v26  ;;  %v1776_v61 = vrot.slane %v1775_v52, 1 }
 0x2d5   : > { %v1721_v37 = vadd.f32 %v1720_v25, %v1682_v55  ;;  %v1777_v31 = vadd.f32 %v1776_v61, %v1775_v52 }
 0x2d7   : > { %1723 = vst.msk [vmem:[#allocation2] sm:$0x1] %vm1722_vm3, %v1721_v37  ;;  %v1778_v0 = vadd.f32 %v1777_v31, %v1724_v34 }
 0x2d9   : > { %1779 = vst.msk [vmem:[#allocation2 + $0x1] sm:$0x1] %vm1722_vm3, %v1778_v0 }
 0x2e0   : > { %v1780_v5 = vld [vmem:[#allocation2] sm:$0x3] }
 0x2e1   : > { %1782 = vst.msk [vmem:[%s2649_s13] sm:$0x3] %vm1781_vm4, %v1780_v5 }
 0x2e2 PF: > { %s23_s25 = sadd.s32 1, %s1967_s25  }
 0x2e3   : > { %p20_p6 = scmp.ge.s32.totalorder %s23_s25, 6  }
 0x2e5   :  { %22 = sbr.rel (!%p20_p6) target bundleno = 1 (0x1), region = 108 }

// kernel: point_transformer_block.9
= control target key start
LH: loop header
LB: loop body
LE: loop exit
PB: predicated region body
PF: predicated region fallthrough
CT: control target
= control target key end

     0   :  { %s490_s18 = smov 0   ;;  %s525_s0 = inlined_call_operand.vmem [shape: f32[64,32], index: 0, kind: input, shape index: {}]   ;;  %s526_s1 = inlined_call_operand.vmem [shape: f32[64,32], index: 1, kind: input, shape index: {}]   ;;  %s527_s2 = inlined_call_operand.vmem [shape: bf16[32,32], index: 2, kind: input, shape index: {}]   ;;  %s528_s3 = inlined_call_operand.vmem [shape: f32[1,32], index: 3, kind: input, shape index: {}]   ;;  %s529_s4 = inlined_call_operand.vmem [shape: f32[1,32], index: 4, kind: input, shape index: {}]   ;;  %s530_s5 = inlined_call_operand.vmem [shape: f32[64,32], index: 5, kind: output, shape index: {}]  }
   0x1 LB: > { %s409_s19 = sadd.s32 4294967295, %s456_s18   ;;  %p413_p0 = scmp.ge.s32.totalorder %s456_s18, 1  ;;  %s456_s18 = sphi %s490_s18, %s15_s18  }
   0x2   : > { %p199_p1 = scmp.lt.s32.totalorder %s456_s18, 5 }
   0x4   : > { %p200_p2 = pnand %p413_p0, %p199_p1 }
   0x5   : > { %v448_v0 = vld [vmem:[%s527_s2] sm:$0xff] (!%p200_p2)   ;;  %v458_v1 = vmov (!%p200_p2), 0.0   ;;  %v449_v2 = vld [vmem:[%s527_s2 + $0x8] sm:$0xff] (!%p200_p2)   ;;  %vm459_vm0 = vmmov (!%p200_p2), 0   ;;  %s414_s24 = sshll.u32 (!%p200_p2), %s409_s19, 1  ;;  %vm270_vm1 = vcmask (!%p200_p2), 261120  }
   0x6   : > { %203 = sbr.rel (%p200_p2) target bundleno = 242 (0xf2), region = 40  ;;  %430 = vmatprep.subr.bf16.mxu0 (!%p200_p2), %v458_v1  ;;  %434 = vmatprep.mubr.msk.bf16.mxu0 (!%p200_p2), %vm459_vm0, %v458_v1  ;;  %p233_p3 = scmp.lt.s32.totalorder (!%p200_p2), %s414_s24, 7  ;;  %v423_v6 = vld [vmem:[%s528_s3] ss:$0 sm:$0xff] (!%p200_p2) }
   0x7   : > { %431 = vmatpush3.bf16.msra.mxu0 (!%p200_p2), %v448_v0  ;;  %v424_v8 = vld [vmem:[%s529_s4] ss:$0 sm:$0xff] (!%p200_p2) }
   0x8   : > { %432 = vmatprep.subr.bf16.mxu0 (!%p200_p2), %v458_v1 }
   0xb   : > { %433 = vmatpush3.bf16.msra.mxu0 (!%p200_p2), %v449_v2 }
   0xd   : > { %s532_s24 = smov (!%p233_p3, %s414_s24), 7 }
   0xe   : > { %s415_s25 = sshll.u32 %s532_s24, 3 }
   0xf   : > { %s236_s28 = scalar_lea.vmem %s525_s0, %s415_s25  ;;  %s242_s8 = scalar_lea.vmem %s526_s1, %s415_s25 }
  0x10   : > { %v251_v3 = vld [vmem:[%s236_s28] sm:$0xff]  ;;  %v252_v4 = vld [vmem:[%s236_s28 + $0x8] sm:$0xff]  ;;  %s248_s13 = scalar_lea.vmem %s530_s5, %s415_s25 }
  0x11   : > { %v253_v5 = vpack.c.bf16 %v252_v4, %v251_v3  ;;  %v333_v11 = vld [vmem:[%s242_s8] sm:$0xff]  ;;  %v334_v16 = vld [vmem:[%s242_s8 + $0x8] sm:$0xff] }
  0x13   : > { %435 = vmatmul.mubr.msk.bf16.vlgmr.msra.gmra.mrb[0].mxu0 %vm270_vm1, %v253_v5 }
  0xe6   : > { %v308_v7 = vpop.f32.mrb[0].mxu0 }
  0xe7   : > { %v322_v9 = vmul.f32 %v423_v6, %v308_v7  ;;  %v436_v10 = vpop.f32.mrb[1].mxu0 }
  0xe8   : > { %v311_v12 = vpop.f32.mrb[2].mxu0 }
  0xe9   : > { %v331_v13 = vadd.f32 %v424_v8, %v322_v9  ;;  %v323_v14 = vmul.f32 %v423_v6, %v311_v12  ;;  %v437_v15 = vpop.f32.mrb[3].mxu0 }
  0xeb   : > { %v335_v17 = vadd.f32 %v333_v11, %v331_v13  ;;  %v332_v18 = vadd.f32 %v424_v8, %v323_v14 }
  0xed   : > { %v337_v19 = vmax.f32 %v335_v17, 0.0  ;;  %v336_v20 = vadd.f32 %v334_v16, %v332_v18 }
  0xef   : > { %339 = vst.msk [vmem:[%s248_s13] sm:$0xff] %vm270_vm1, %v337_v19  ;;  %v338_v21 = vmax.f32 %v336_v20, 0.0 }
  0xf1   : > { %340 = vst.msk [vmem:[%s248_s13 + $0x8] sm:$0xff] %vm270_vm1, %v338_v21 }
  0xf2 PF: > { %s15_s18 = sadd.s32 1, %s456_s18  }
  0xf3   : > { %p12_p4 = scmp.ge.s32.totalorder %s15_s18, 6  }
  0xf5   :  { %14 = sbr.rel (!%p12_p4) target bundleno = 1 (0x1), region = 73 }

// kernel: point_transformer_block.8
= control target key start
LH: loop header
LB: loop body
LE: loop exit
PB: predicated region body
PF: predicated region fallthrough
CT: control target
= control target key end

     0   :  { %s3746_s27 = smov 0   ;;  %s5359_s0 = inlined_call_operand.vmem [shape: f32[64,8,3], index: 0, kind: input, shape index: {}]   ;;  %s5360_s1 = inlined_call_operand.vmem [shape: f32[64,8,32], index: 1, kind: input, shape index: {}]   ;;  %s5361_s2 = inlined_call_operand.vmem [shape: f32[64,8,32], index: 2, kind: input, shape index: {}]   ;;  %s5362_s3 = inlined_call_operand.vmem [shape: f32[64,32], index: 3, kind: input, shape index: {}]   ;;  %s5363_s4 = inlined_call_operand.vmem [shape: f32[3,3], index: 4, kind: input, shape index: {}]   ;;  %s5364_s5 = inlined_call_operand.vmem [shape: f32[1,3], index: 5, kind: input, shape index: {}]   ;;  %s5365_s6 = inlined_call_operand.vmem [shape: f32[1,3], index: 6, kind: input, shape index: {}]   ;;  %s5366_s7 = inlined_call_operand.vmem [shape: f32[1,3], index: 7, kind: input, shape index: {}]   ;;  %s5367_s8 = inlined_call_operand.vmem [shape: f32[3,32], index: 8, kind: input, shape index: {}]   ;;  %s5368_s9 = inlined_call_operand.vmem [shape: f32[1,32], index: 9, kind: input, shape index: {}]   ;;  %s5369_s10 = inlined_call_operand.vmem [shape: f32[1,32], index: 10, kind: input, shape index: {}]   ;;  %s5370_s11 = inlined_call_operand.vmem [shape: f32[1,32], index: 11, kind: input, shape index: {}]   ;;  %s5371_s12 = inlined_call_operand.vmem [shape: bf16[32,4], index: 12, kind: input, shape index: {}]   ;;  %s5372_s13 = inlined_call_operand.vmem [shape: f32[1,4], index: 13, kind: input, shape index: {}]   ;;  %s5373_s14 = inlined_call_operand.vmem [shape: f32[1,4], index: 14, kind: input, shape index: {}]   ;;  %s5374_s15 = inlined_call_operand.vmem [shape: f32[1,4], index: 15, kind: input, shape index: {}]   ;;  %s5375_s16 = inlined_call_operand.vmem [shape: f32[4,4], index: 16, kind: input, shape index: {}]   ;;  %s5376_s17 = inlined_call_operand.vmem [shape: f32[1,4], index: 17, kind: input, shape index: {}]   ;;  %s5377_s18 = inlined_call_operand.vmem [shape: f32[64,32], index: 18, kind: output, shape index: {}]  }
   0x1   :  { %5392 = sst [smem:[#allocation17_spill]] %s5359_s0 }
   0x2   :  { %5393 = sst [smem:[#allocation18_spill]] %s5360_s1 }
   0x3   :  { %5394 = sst [smem:[#allocation19_spill]] %s5361_s2 }
   0x4 LB: > { %s3419_s28 = sadd.s32 4294967295, %s3637_s27   ;;  %p3423_p0 = scmp.ge.s32.totalorder %s3637_s27, 1  ;;  %s3637_s27 = sphi %s3746_s27, %s28_s27  }
   0x5   : > { %p546_p1 = scmp.lt.s32.totalorder %s3637_s27, 5 }
   0x7   : > { %p547_p2 = pnand %p3423_p0, %p546_p1 }
   0x9   : > { %550 = sbr.rel (%p547_p2) target bundleno = 1250 (0x4e2), region = 92 }
  0x10   : > { %s3424_s29 = sshll.u32 %s3419_s28, 4  ;;  %v5382_v0 = vmov 1   ;;  %v5378_v1 = vmov 0   ;;  %s5395_s1 = sld [smem:[#allocation17_spill]]  ;;  %v5380_v12 = vmov 2   ;;  %v766_v43 = vlaneseq }
  0x11   : > { %3511 = vset.pattern.permute.xlu0 %v5382_v0  ;;  %3510 = vset.pattern.permute.xlu1 %v5378_v1  ;;  %p616_p3 = scmp.lt.s32.totalorder %s3424_s29, 63  ;;  %v680_v53 = vld [vmem:[%s5363_s4] sm:$0x7]  ;;  %s3430_s21 = sshll.u32 %s3419_s28, 1  ;;  %vm1727_vm0 = vcmask 261120   ;;  %vm2351_vm1 = vcmask 31744  }
  0x12   : > { %v3811_v46 = vshrl.u32 %v766_v43, 7  ;;  %p634_p4 = scmp.lt.s32.totalorder %s3430_s21, 7  ;;  %s5402_s0 = sld [smem:[#allocation18_spill]]  ;;  %vm3024_vm2 = vcmask 64512   ;;  %vm3041_vm3 = vcmask 97280   ;;  %vm3075_vm4 = vcmask 162816  }
  0x13   : > { %s5440_s29 = smov (!%p616_p3, %s3424_s29), 63  ;;  %s5412_s22 = sld [smem:[#allocation19_spill]]  ;;  %vm3058_vm5 = vcmask 130048   ;;  %vm3092_vm6 = vcmask 195584   ;;  %vm3109_vm7 = vcmask 228352   ;;  %vm3302_vm8 = vcmask 1041409  }
  0x14   : > { %s3758_s30 = sshll.u32 %s5440_s29, 3  ;;  %5396 = vst [vmem:[#allocation2_spill] sm:$0xff] %v3811_v46  ;;  %v3818_v49 = vsub.s32 0, %v3811_v46  ;;  %v3821_v50 = vsub.s32 1, %v3811_v46  ;;  %v3837_v56 = vsub.s32 2, %v3811_v46  ;;  %s5442_s21 = smov (!%p634_p4, %s3430_s21), 7 }
  0x15   : > { %s3431_s28 = sshll.u32 %s5442_s21, 3  ;;  %s3644_s26 = smov 4   ;;  %vm3304_vm9 = vcmask 1042434   ;;  %vm3306_vm10 = vcmask 1043459   ;;  %vm3308_vm11 = vcmask 1044484   ;;  %vm3310_vm12 = vcmask 1045509  }
  0x16   : > { %s3764_s20 = scalar_lea.vmem %s5395_s1, %s3758_s30  ;;  %5397 = vst [vmem:[#allocation3_spill] sm:$0xff] %v3818_v49  ;;  %5398 = vst [vmem:[#allocation4_spill] sm:$0xff] %v3821_v50  ;;  %v3831_v54 = vrot.slane %v680_v53, %v3818_v49  ;;  %v3834_v55 = vrot.slane %v680_v53, %v3821_v50  ;;  %v3844_v61 = vrot.slane %v680_v53, %v3837_v56  ;;  %s637_s23 = scalar_lea.vmem %s5362_s3, %s3431_s28  ;;  %vm3312_vm13 = vcmask 1046534  }
  0x17   : > { %v648_v2 = vld [vmem:[%s3764_s20 + $0x10] sm:$0xff]  ;;  %v646_v3 = vld [vmem:[%s3764_s20] sm:$0xff]  ;;  %v649_v4 = vld [vmem:[%s3764_s20 + $0x18] sm:$0xff]  ;;  %5399 = vst [vmem:[#allocation5_spill] sm:$0xff] %v3837_v56  ;;  %s3645_s29 = smov 20   ;;  %s3648_s1 = smov 28  }
  0x18   : > { %698 = vperm.xlu1 %3510, %v648_v2   ;;  %803 = vperm.xlu0 %3511, %v646_v3   ;;  %v651_v5 = vld [vmem:[%s3764_s20 + $0x28] sm:$0xff]  ;;  %v653_v6 = vld [vmem:[%s3764_s20 + $0x38] sm:$0xff]  ;;  %v650_v13 = vld [vmem:[%s3764_s20 + $0x20] sm:$0xff]  ;;  %s4096_s19 = scalar_lea.vmem %s5402_s0, %s3758_s30  ;;  %s3646_s0 = smov 24   ;;  %vm3314_vm14 = vcmask 1047559  }
  0x19   : > { %v655_v7 = vld [vmem:[%s3764_s20 + $0x48] sm:$0xff]  ;;  %v657_v8 = vld [vmem:[%s3764_s20 + $0x58] sm:$0xff]  ;;  %v652_v14 = vld [vmem:[%s3764_s20 + $0x30] sm:$0xff]  ;;  %s4248_s2 = scalar_lea.vmem %s5412_s22, %s3758_s30  ;;  %s3650_s22 = smov 16  }
  0x1a   : > { %v659_v9 = vld [vmem:[%s3764_s20 + $0x68] sm:$0xff]  ;;  %v661_v10 = vld [vmem:[%s3764_s20 + $0x78] sm:$0xff]  ;;  %v654_v15 = vld [vmem:[%s3764_s20 + $0x40] sm:$0xff] }
  0x1b   : > { %v647_v11 = vld [vmem:[%s3764_s20 + $0x8] sm:$0xff]  ;;  %v656_v16 = vld [vmem:[%s3764_s20 + $0x50] sm:$0xff]  ;;  %v658_v17 = vld [vmem:[%s3764_s20 + $0x60] sm:$0xff] }
  0x1c   : > { %703 = vperm.xlu1 %3510, %v649_v4   ;;  %815 = vperm.xlu0 %3511, %v649_v4   ;;  %v660_v18 = vld [vmem:[%s3764_s20 + $0x70] sm:$0xff]  ;;  %s3649_s20 = smov 12  }
  0x20   : > { %713 = vperm.xlu1 %3510, %v651_v5   ;;  %823 = vperm.xlu0 %3511, %v651_v5  }
  0x24   : > { %723 = vperm.xlu1 %3510, %v653_v6   ;;  %831 = vperm.xlu0 %3511, %v653_v6  }
  0x28   : > { %733 = vperm.xlu1 %3510, %v655_v7   ;;  %839 = vperm.xlu0 %3511, %v655_v7  }
  0x2c   : > { %743 = vperm.xlu1 %3510, %v657_v8   ;;  %847 = vperm.xlu0 %3511, %v657_v8  }
  0x30   : > { %753 = vperm.xlu1 %3510, %v659_v9   ;;  %855 = vperm.xlu0 %3511, %v659_v9  }
  0x34   : > { %763 = vperm.xlu1 %3510, %v661_v10   ;;  %863 = vperm.xlu0 %3511, %v661_v10  }
  0x38   : > { %3512 = vset.pattern.permute.xlu1 %v5382_v0  ;;  %3514 = vset.pattern.permute.xlu0 %v5380_v12 }
  0x39   : > { %807 = vperm.xlu1 %3512, %v647_v11   ;;  %907 = vperm.xlu0 %3514, %v647_v11  }
  0x3d   : > { %811 = vperm.xlu1 %3512, %v648_v2   ;;  %919 = vperm.xlu0 %3514, %v650_v13  }
  0x41   : > { %819 = vperm.xlu1 %3512, %v650_v13   ;;  %927 = vperm.xlu0 %3514, %v652_v14  }
  0x45   : > { %827 = vperm.xlu1 %3512, %v652_v14   ;;  %935 = vperm.xlu0 %3514, %v654_v15  }
  0x49   : > { %835 = vperm.xlu1 %3512, %v654_v15   ;;  %943 = vperm.xlu0 %3514, %v656_v16  }
  0x4d   : > { %843 = vperm.xlu1 %3512, %v656_v16   ;;  %951 = vperm.xlu0 %3514, %v658_v17  }
  0x51   : > { %851 = vperm.xlu1 %3512, %v658_v17   ;;  %959 = vperm.xlu0 %3514, %v660_v18  }
  0x55   : > { %859 = vperm.xlu1 %3512, %v660_v18   ;;  %3515 = vset.pattern.permute.xlu0 %v5378_v1 }
  0x56   : > { %688 = vperm.xlu0 %3515, %v646_v3  }
  0x59   : > { %3513 = vset.pattern.permute.xlu1 %v5380_v12 }
  0x5a   : > { %903 = vperm.xlu1 %3513, %v646_v3   ;;  %693 = vperm.xlu0 %3515, %v647_v11  }
  0x5e   : > { %911 = vperm.xlu1 %3513, %v648_v2   ;;  %708 = vperm.xlu0 %3515, %v650_v13   ;;  %v3858_v13 = vld [vmem:[%s5364_s5] ss:$0 sm:$0xff] }
  0x62   : > { %915 = vperm.xlu1 %3513, %v649_v4   ;;  %718 = vperm.xlu0 %3515, %v652_v14  }
  0x66   : > { %923 = vperm.xlu1 %3513, %v651_v5   ;;  %728 = vperm.xlu0 %3515, %v654_v15  }
  0x6a   : > { %931 = vperm.xlu1 %3513, %v653_v6   ;;  %738 = vperm.xlu0 %3515, %v656_v16  }
  0x6e   : > { %939 = vperm.xlu1 %3513, %v655_v7   ;;  %748 = vperm.xlu0 %3515, %v658_v17  }
  0x72   : > { %947 = vperm.xlu1 %3513, %v657_v8   ;;  %758 = vperm.xlu0 %3515, %v660_v18  }
  0x76   : > { %955 = vperm.xlu1 %3513, %v659_v9  }
  0x7a   : > { %963 = vperm.xlu1 %3513, %v661_v10  }
  0x7e   : > { %3516 = vset.pattern.permute.xlu1 %v5378_v1 }
  0x97   : > { %v699_v19 = vpop.permute.xlu1 %698  ;;  %v804_v20 = vpop.permute.xlu0 %803 }
  0x98   : > { %v870_v60 = vmul.f32 %v3834_v55, %v804_v20  ;;  %v772_v62 = vmul.f32 %v3831_v54, %v699_v19 }
  0x9b   : > { %v704_v21 = vpop.permute.xlu1 %703  ;;  %v816_v22 = vpop.permute.xlu0 %815 }
  0x9c   : > { %v773_v8 = vmul.f32 %v3831_v54, %v704_v21  ;;  %v873_v9 = vmul.f32 %v3834_v55, %v816_v22 }
  0x9f   : > { %v714_v23 = vpop.permute.xlu1 %713  ;;  %v824_v24 = vpop.permute.xlu0 %823 }
  0xa0   : > { %v775_v10 = vmul.f32 %v3831_v54, %v714_v23  ;;  %v875_v11 = vmul.f32 %v3834_v55, %v824_v24  ;;  %v3867_v23 = vld [vmem:[%s5365_s6] ss:$0 sm:$0xff] }
  0xa2   : > { %v891_v43 = vadd.f32 %v875_v11, %v775_v10 }
  0xa3   : > { %v724_v25 = vpop.permute.xlu1 %723  ;;  %v832_v26 = vpop.permute.xlu0 %831 }
  0xa4   : > { %v777_v17 = vmul.f32 %v3831_v54, %v724_v25  ;;  %v877_v18 = vmul.f32 %v3834_v55, %v832_v26  ;;  %v889_v25 = vadd.f32 %v873_v9, %v773_v8 }
  0xa7   : > { %v3787_v27 = vpop.permute.xlu1 %733  ;;  %v3789_v28 = vpop.permute.xlu0 %839 }
  0xab   : > { %v3791_v29 = vpop.permute.xlu1 %743  ;;  %v3793_v30 = vpop.permute.xlu0 %847 }
  0xac   : > { %v781_v9 = vmul.f32 %v3831_v54, %v3791_v29 }
  0xaf   : > { %v3795_v31 = vpop.permute.xlu1 %753  ;;  %v3797_v32 = vpop.permute.xlu0 %855 }
  0xb3   : > { %v3799_v33 = vpop.permute.xlu1 %763  ;;  %v3801_v34 = vpop.permute.xlu0 %863 }
  0xb8   : > { %v808_v35 = vpop.permute.xlu1 %807  ;;  %v908_v36 = vpop.permute.xlu0 %907 }
  0xb9   : > { %v871_v4 = vmul.f32 %v3834_v55, %v808_v35  ;;  %v971_v14 = vmul.f32 %v3844_v61, %v908_v36 }
  0xbc   : > { %v812_v37 = vpop.permute.xlu1 %811  ;;  %v920_v38 = vpop.permute.xlu0 %919 }
  0xbd   : > { %v872_v63 = vmul.f32 %v3834_v55, %v812_v37  ;;  %v974_v26 = vmul.f32 %v3844_v61, %v920_v38 }
  0xbf   : > { %v888_v19 = vadd.f32 %v872_v63, %v772_v62  ;;  %v893_v62 = vadd.f32 %v877_v18, %v777_v17  ;;  %v779_v63 = vmul.f32 %v3831_v54, %v3787_v27 }
  0xc0   : > { %v820_v39 = vpop.permute.xlu1 %819  ;;  %v3803_v40 = vpop.permute.xlu0 %927 }
  0xc1   : > { %v874_v20 = vmul.f32 %v3834_v55, %v820_v39  ;;  %v976_v27 = vmul.f32 %v3844_v61, %v3803_v40 }
  0xc4   : > { %v828_v41 = vpop.permute.xlu1 %827  ;;  %v3805_v42 = vpop.permute.xlu0 %935 }
  0xc5   : > { %v876_v38 = vmul.f32 %v3834_v55, %v828_v41 }
  0xc8   : > { %v3807_v44 = vpop.permute.xlu1 %835  ;;  %v3809_v45 = vpop.permute.xlu0 %943 }
  0xc9   : > { %v878_v17 = vmul.f32 %v3834_v55, %v3807_v44 }
  0xcc   : > { %v3813_v47 = vpop.permute.xlu1 %843  ;;  %v3815_v48 = vpop.permute.xlu0 %951 }
  0xd0   : > { %v3823_v51 = vpop.permute.xlu1 %851  ;;  %v3825_v52 = vpop.permute.xlu0 %959 }
  0xd4   : > { %v3839_v57 = vpop.permute.xlu1 %859 }
  0xd5   : > { %v689_v58 = vpop.permute.xlu0 %688 }
  0xd6   : > { %v770_v59 = vmul.f32 %v3831_v54, %v689_v58 }
  0xd8   : > { %v886_v5 = vadd.f32 %v870_v60, %v770_v59  ;;  %v3877_v59 = vld [vmem:[%s5366_s7] ss:$0 sm:$0xff] }
  0xd9   : > { %v904_v2 = vpop.permute.xlu1 %903  ;;  %v694_v3 = vpop.permute.xlu0 %693 }
  0xda   : > { %v970_v6 = vmul.f32 %v3844_v61, %v904_v2  ;;  %v771_v7 = vmul.f32 %v3831_v54, %v694_v3  ;;  %v879_v2 = vmul.f32 %v3834_v55, %v3789_v28 }
  0xdc   : > { %v986_v15 = vadd.f32 %v970_v6, %v886_v5  ;;  %v887_v16 = vadd.f32 %v871_v4, %v771_v7 }
  0xdd   : > { %v912_v21 = vpop.permute.xlu1 %911  ;;  %v709_v22 = vpop.permute.xlu0 %708 }
  0xde   : > { %v1008_v24 = vadd.f32 %v3858_v13, %v986_v15  ;;  %v987_v35 = vadd.f32 %v971_v14, %v887_v16  ;;  %v972_v36 = vmul.f32 %v3844_v61, %v912_v21  ;;  %v774_v37 = vmul.f32 %v3831_v54, %v709_v22 }
  0xdf   : > { %v881_v16 = vmul.f32 %v3834_v55, %v3793_v30 }
  0xe0   : > { %v1009_v39 = vadd.f32 %v3858_v13, %v987_v35  ;;  %v988_v53 = vadd.f32 %v972_v36, %v888_v19  ;;  %v890_v58 = vadd.f32 %v874_v20, %v774_v37  ;;  %v1030_v60 = vmul.f32 %v3867_v23, %v1008_v24 }
  0xe1   : > { %v916_v3 = vpop.permute.xlu1 %915  ;;  %v719_v4 = vpop.permute.xlu0 %718  ;;  %v978_v35 = vmul.f32 %v3844_v61, %v3805_v42  ;;  %v880_v42 = vmul.f32 %v3834_v55, %v3813_v47 }
  0xe2   : > { %v1010_v5 = vadd.f32 %v3858_v13, %v988_v53  ;;  %v990_v6 = vadd.f32 %v974_v26, %v890_v58  ;;  %v973_v7 = vmul.f32 %v3844_v61, %v916_v3  ;;  %v776_v8 = vmul.f32 %v3831_v54, %v719_v4 }
  0xe3   : > { %v1052_v10 = vadd.f32 %v3877_v59, %v1030_v60  ;;  %v1031_v28 = vmul.f32 %v3867_v23, %v1009_v39  ;;  %v895_v53 = vadd.f32 %v879_v2, %v779_v63  ;;  %v897_v58 = vadd.f32 %v881_v16, %v781_v9 }
  0xe4   : > { %v1012_v41 = vadd.f32 %v3858_v13, %v990_v6  ;;  %v989_v11 = vadd.f32 %v973_v7, %v889_v25  ;;  %v892_v14 = vadd.f32 %v876_v38, %v776_v8  ;;  %v1032_v15 = vmul.f32 %v3867_v23, %v1010_v5 }
  0xe5   : > { %v924_v29 = vpop.permute.xlu1 %923  ;;  %v729_v18 = vpop.permute.xlu0 %728  ;;  %v3900_v19 = vmax.f32 %v1052_v10, 0.0  ;;  %v1053_v40 = vadd.f32 %v3877_v59, %v1031_v28  ;;  %v980_v60 = vmul.f32 %v3844_v61, %v3809_v45  ;;  %v783_v10 = vmul.f32 %v3831_v54, %v3795_v31 }
  0xe6   : > { %v1011_v20 = vadd.f32 %v3858_v13, %v989_v11  ;;  %v992_v21 = vadd.f32 %v976_v27, %v892_v14  ;;  %v975_v22 = vmul.f32 %v3844_v61, %v924_v29  ;;  %v778_v24 = vmul.f32 %v3831_v54, %v729_v18 }
  0xe7   : > { %1086 = vperm.xlu0 %3515, %v3900_v19   ;;  %v3909_v30 = vmax.f32 %v1053_v40, 0.0  ;;  %v1054_v44 = vadd.f32 %v3877_v59, %v1032_v15  ;;  %v1034_v36 = vmul.f32 %v3867_v23, %v1012_v41  ;;  %v982_v28 = vmul.f32 %v3844_v61, %v3815_v48 }
  0xe8   : > { %v1014_v37 = vadd.f32 %v3858_v13, %v992_v21  ;;  %v991_v25 = vadd.f32 %v975_v22, %v891_v43  ;;  %v894_v26 = vadd.f32 %v878_v17, %v778_v24  ;;  %v1033_v39 = vmul.f32 %v3867_v23, %v1011_v20 }
  0xe9   : > { %1091 = vperm.xlu1 %3516, %v3909_v30   ;;  %v932_v38 = vpop.permute.xlu1 %931  ;;  %v739_v3 = vpop.permute.xlu0 %738  ;;  %v3923_v7 = vmax.f32 %v1054_v44, 0.0  ;;  %v1056_v45 = vadd.f32 %v3877_v59, %v1034_v36  ;;  %v882_v41 = vmul.f32 %v3834_v55, %v3823_v51  ;;  %v883_v24 = vmul.f32 %v3834_v55, %v3797_v32 }
  0xea   : > { %v1013_v4 = vadd.f32 %v3858_v13, %v991_v25  ;;  %v994_v5 = vadd.f32 %v978_v35, %v894_v26  ;;  %v977_v43 = vmul.f32 %v3844_v61, %v932_v38  ;;  %v780_v6 = vmul.f32 %v3831_v54, %v739_v3 }
  0xeb   : > { %v1055_v63 = vadd.f32 %v3877_v59, %v1033_v39  ;;  %v1036_v2 = vmul.f32 %v3867_v23, %v1014_v37  ;;  %v3943_v31 = vmax.f32 %v1056_v45, 0.0  ;;  %v984_v35 = vmul.f32 %v3844_v61, %v3825_v52 }
  0xec   : > { %v1016_v47 = vadd.f32 %v3858_v13, %v994_v5  ;;  %v993_v8 = vadd.f32 %v977_v43, %v893_v62  ;;  %v896_v9 = vadd.f32 %v880_v42, %v780_v6  ;;  %v1035_v27 = vmul.f32 %v3867_v23, %v1013_v4 }
  0xed   : > { %1096 = vperm.xlu1 %3516, %v3923_v7   ;;  %v940_v11 = vpop.permute.xlu1 %939  ;;  %v749_v14 = vpop.permute.xlu0 %748  ;;  %v3937_v15 = vmax.f32 %v1055_v63, 0.0  ;;  %v1058_v51 = vadd.f32 %v3877_v59, %v1036_v2  ;;  %v884_v44 = vmul.f32 %v3834_v55, %v3839_v57  ;;  %v899_v43 = vadd.f32 %v883_v24, %v783_v10 }
  0xee   : > { %v1015_v62 = vadd.f32 %v3858_v13, %v993_v8  ;;  %v996_v16 = vadd.f32 %v980_v60, %v896_v9  ;;  %v979_v17 = vmul.f32 %v3844_v61, %v940_v11  ;;  %v782_v29 = vmul.f32 %v3831_v54, %v749_v14 }
  0xef   : > { %1101 = vperm.xlu0 %3515, %v3937_v15   ;;  %v1057_v48 = vadd.f32 %v3877_v59, %v1035_v27  ;;  %v1038_v18 = vmul.f32 %v3867_v23, %v1016_v47  ;;  %v3963_v32 = vmax.f32 %v1058_v51, 0.0  ;;  %v785_v6 = vmul.f32 %v3831_v54, %v3799_v33 }
  0xf0   : > { %v1018_v40 = vadd.f32 %v3858_v13, %v996_v16  ;;  %v995_v20 = vadd.f32 %v979_v17, %v895_v53  ;;  %v898_v21 = vadd.f32 %v882_v41, %v782_v29  ;;  %v1037_v22 = vmul.f32 %v3867_v23, %v1015_v62 }
  0xf1   : > { %1106 = vperm.xlu1 %3516, %v3943_v31   ;;  %v948_v36 = vpop.permute.xlu1 %947  ;;  %v759_v37 = vpop.permute.xlu0 %758  ;;  %v3957_v25 = vmax.f32 %v1057_v48, 0.0  ;;  %v1060_v57 = vadd.f32 %v3877_v59, %v1038_v18  ;;  %v885_v63 = vmul.f32 %v3834_v55, %v3801_v34 }
  0xf2   : > { %v1017_v26 = vadd.f32 %v3858_v13, %v995_v20  ;;  %v998_v39 = vadd.f32 %v982_v28, %v898_v21  ;;  %v981_v53 = vmul.f32 %v3844_v61, %v948_v36  ;;  %v784_v60 = vmul.f32 %v3831_v54, %v759_v37 }
  0xf3   : > { %1111 = vperm.xlu0 %3515, %v3957_v25   ;;  %v1059_v52 = vadd.f32 %v3877_v59, %v1037_v22  ;;  %v1040_v42 = vmul.f32 %v3867_v23, %v1018_v40  ;;  %v1076_v27 = vmax.f32 %v1060_v57, 0.0  ;;  %v901_v11 = vadd.f32 %v885_v63, %v785_v6  ;;  %v678_v63 = vld [vmem:[%s637_s23] sm:$0xff] }
  0xf4   : > { %v1020_v38 = vadd.f32 %v3858_v13, %v998_v39  ;;  %v997_v3 = vadd.f32 %v981_v53, %v897_v58  ;;  %v900_v4 = vadd.f32 %v884_v44, %v784_v60  ;;  %v1039_v5 = vmul.f32 %v3867_v23, %v1017_v26 }
  0xf5   : > { %1116 = vperm.xlu1 %3516, %v3963_v32   ;;  %v956_v45 = vpop.permute.xlu1 %955  ;;  %v3975_v2 = vmax.f32 %v1059_v52, 0.0  ;;  %v1062_v33 = vadd.f32 %v3877_v59, %v1040_v42  ;;  %v3642_v57 = vmov 1966171168  }
  0xf6   : > { %v1019_v47 = vadd.f32 %v3858_v13, %v997_v3  ;;  %v1000_v8 = vadd.f32 %v984_v35, %v900_v4  ;;  %v983_v58 = vmul.f32 %v3844_v61, %v956_v45  ;;  %v1061_v9 = vadd.f32 %v3877_v59, %v1039_v5 }
  0xf7   : > { %1121 = vperm.xlu0 %3515, %v3975_v2   ;;  %v1042_v54 = vmul.f32 %v3867_v23, %v1020_v38  ;;  %v1078_v17 = vmax.f32 %v1062_v33, 0.0  ;;  %v1426_v42 = vunpack.c.l.s4 %v3642_v57 }
  0xf8   : > { %v1022_v34 = vadd.f32 %v3858_v13, %v1000_v8  ;;  %v999_v55 = vadd.f32 %v983_v58, %v899_v43  ;;  %v1077_v10 = vmax.f32 %v1061_v9, 0.0  ;;  %v1041_v28 = vmul.f32 %v3867_v23, %v1019_v47  ;;  %v679_v8 = vld [vmem:[%s637_s23 + $0x8] sm:$0xff]  ;;  %s643_s23 = scalar_lea.vmem %s5377_s18, %s3431_s28 }
  0xf9   : > { %1126 = vperm.xlu1 %3516, %v1076_v27   ;;  %v964_v41 = vpop.permute.xlu1 %963  ;;  %v1064_v29 = vadd.f32 %v3877_v59, %v1042_v54  ;;  %v1427_v4 = vunpack.c.0.s8 %v1426_v42  ;;  %v1424_v58 = vcombine.high %v678_v63, %v678_v63  ;;  %v1473_v9 = vcombine.high %v679_v8, %v679_v8 }
  0xfa   : > { %v1021_v14 = vadd.f32 %v3858_v13, %v999_v55  ;;  %v985_v62 = vmul.f32 %v3844_v61, %v964_v41  ;;  %v1063_v16 = vadd.f32 %v3877_v59, %v1041_v28  ;;  %v1044_v48 = vmul.f32 %v3867_v23, %v1022_v34 }
  0xfb   : > { %1131 = vperm.xlu0 %3515, %v1077_v10   ;;  %v1080_v22 = vmax.f32 %v1064_v29, 0.0  ;;  %v1430_v6 = vsub.s32 %v1427_v4, %v3811_v46  ;;  %v4148_v46 = vld [vmem:[%s4096_s19 + $0x38] sm:$0xff] }
  0xfc   : > { %v1001_v51 = vadd.f32 %v985_v62, %v901_v11  ;;  %v1079_v18 = vmax.f32 %v1063_v16, 0.0  ;;  %v1043_v40 = vmul.f32 %v3867_v23, %v1021_v14  ;;  %v1066_v61 = vadd.f32 %v3877_v59, %v1044_v48  ;;  %v684_v48 = vld [vmem:[%s5367_s8] sm:$0x7] }
  0xfd   : > { %1136 = vperm.xlu1 %3516, %v1078_v17   ;;  %v1431_v47 = vrot.slane %v678_v63, %v1430_v6  ;;  %v1438_v34 = vrot.slane %v1424_v58, %v1430_v6  ;;  %v1487_v55 = vrot.slane %v1473_v9, %v1430_v6  ;;  %v1480_v28 = vrot.slane %v679_v8, %v1430_v6  ;;  %v4114_v9 = vld [vmem:[%s4096_s19 + $0x18] sm:$0xff] }
  0xfe   : > { %v1023_v20 = vadd.f32 %v3858_v13, %v1001_v51  ;;  %v1065_v21 = vadd.f32 %v3877_v59, %v1043_v40  ;;  %v1082_v36 = vmax.f32 %v1066_v61, 0.0  ;;  %v3565_v13 = vld [vmem:[%s5371_s12] sm:$0xff]   ;;  %v4110_v8 = vrot.slane %v684_v48, %v3837_v56  ;;  %5405 = vst [vmem:[#allocation10_spill] sm:$0xff] %v4114_v9  ;;  %v4151_v56 = vld [vmem:[%s4096_s19 + $0x58] sm:$0xff] }
  0xff   : > { %1141 = vperm.xlu0 %3515, %v1079_v18   ;;  %3466 = vmatprep.subr.bf16.mxu0 %v3565_v13  ;;  %v1439_v54 = vcombine.high %v1431_v47, %v1431_v47  ;;  %v1440_v14 = vcombine.high %v1438_v34, %v1438_v34  ;;  %v1488_v62 = vcombine.high %v1480_v28, %v1480_v28 }
 0x100   : > { %v1081_v24 = vmax.f32 %v1065_v21, 0.0  ;;  %v1045_v35 = vmul.f32 %v3867_v23, %v1023_v20  ;;  %3486 = vmatprep.subr.bf16.mxu1 %v3565_v13  ;;  %3467 = vmatpush3.bf16.msra.mxu0 %v3565_v13  ;;  %v3566_v23 = vld [vmem:[%s5371_s12 + $0x8] sm:$0xff]   ;;  %v1489_v16 = vcombine.high %v1487_v55, %v1487_v55  ;;  %v1447_v29 = vrot.slane %v1431_v47, %v1430_v6  ;;  %v662_v47 = vld [vmem:[%s4096_s19] sm:$0xff] }
 0x101   : > { %1146 = vperm.xlu1 %3516, %v1080_v22   ;;  %3488 = vmatpush3.bf16.msra.mxu1 %v3565_v13  ;;  %v4081_v11 = vrot.slane %v1439_v54, %v1430_v6  ;;  %v1496_v51 = vrot.slane %v1480_v28, %v1430_v6  ;;  %v1468_v21 = vrot.slane %v1440_v14, %v1430_v6  ;;  %v670_v28 = vld [vmem:[%s4096_s19 + $0x40] sm:$0xff] }
 0x102   : > { %v1067_v44 = vadd.f32 %v3877_v59, %v1045_v35  ;;  %3468 = vmatprep.subr.bf16.mxu0 %v3566_v23  ;;  %3487 = vmatprep.subr.bf16.mxu1 %v3566_v23  ;;  %v1469_v20 = vcombine.high %v1447_v29, %v1447_v29  ;;  %v1454_v61 = vrot.slane %v1438_v34, %v1430_v6  ;;  %v663_v34 = vld [vmem:[%s4096_s19 + $0x8] sm:$0xff] }
 0x103   : > { %1151 = vperm.xlu0 %3515, %v1081_v24   ;;  %v1471_v40 = vcombine.high %v4081_v11, %v4081_v11  ;;  %v1517_v35 = vrot.slane %v1489_v16, %v1430_v6  ;;  %v1503_v13 = vrot.slane %v1487_v55, %v1430_v6  ;;  %v1525_v58 = vrot.slane %v1447_v29, %v3818_v49 }
 0x104   : > { %v1083_v37 = vmax.f32 %v1067_v44, 0.0  ;;  %3469 = vmatpush3.bf16.msra.mxu0 %v3566_v23  ;;  %v4099_v44 = vrot.slane %v684_v48, %v3818_v49  ;;  %v1470_v42 = vcombine.high %v1454_v61, %v1454_v61  ;;  %v1529_v55 = vrot.slane %v4081_v11, %v3818_v49 }
 0x105   : > { %1156 = vperm.xlu1 %3516, %v1082_v36   ;;  %3489 = vmatpush3.bf16.msra.mxu1 %v3566_v23  ;;  %v4104_v23 = vrot.slane %v684_v48, %v3821_v50  ;;  %v1521_v4 = vcombine.high %v1517_v35, %v1517_v35  ;;  %v1519_v54 = vcombine.high %v1503_v13, %v1503_v13 }
 0x106   : > { %v1557_v14 = vrot.slane %v1496_v51, %v3818_v49  ;;  %v4128_v16 = vrot.slane %v1469_v20, %v3818_v49  ;;  %v1541_v11 = vrot.slane %v1454_v61, %v3818_v49  ;;  %v1577_v61 = vrot.slane %v1517_v35, %v3818_v49 }
 0x107   : > { %1161 = vperm.xlu0 %3515, %v1083_v37   ;;  %v1573_v35 = vrot.slane %v1503_v13, %v3818_v49 }
 0x109   : > { %3517 = vset.pattern.permute.xlu1 %v5382_v0 }
 0x10a   : > { %1201 = vperm.xlu1 %3517, %v3900_v19  }
 0x10b   : > { %3518 = vset.pattern.permute.xlu0 %v5382_v0 }
 0x10c   : > { %1205 = vperm.xlu0 %3518, %v3909_v30  }
 0x10e   : > { %1209 = vperm.xlu1 %3517, %v3923_v7  }
 0x110   : > { %1217 = vperm.xlu0 %3518, %v3943_v31  }
 0x112   : > { %1213 = vperm.xlu1 %3517, %v3937_v15  }
 0x114   : > { %1225 = vperm.xlu0 %3518, %v3963_v32  }
 0x116   : > { %1221 = vperm.xlu1 %3517, %v3957_v25  }
 0x118   : > { %1233 = vperm.xlu0 %3518, %v1076_v27  }
 0x11a   : > { %1229 = vperm.xlu1 %3517, %v3975_v2  }
 0x11c   : > { %1241 = vperm.xlu0 %3518, %v1078_v17  }
 0x11e   : > { %1237 = vperm.xlu1 %3517, %v1077_v10  }
 0x120   : > { %1249 = vperm.xlu0 %3518, %v1080_v22  }
 0x122   : > { %1245 = vperm.xlu1 %3517, %v1079_v18  }
 0x124   : > { %1257 = vperm.xlu0 %3518, %v1082_v36  }
 0x126   : > { %1253 = vperm.xlu1 %3517, %v1081_v24  }
 0x128   : > { %3519 = vset.pattern.permute.xlu0 %v5380_v12 }
 0x129   : > { %1301 = vperm.xlu0 %3519, %v3900_v19  }
 0x12a   : > { %1261 = vperm.xlu1 %3517, %v1083_v37  }
 0x12d   : > { %1313 = vperm.xlu0 %3519, %v3937_v15  }
 0x12e   : > { %3520 = vset.pattern.permute.xlu1 %v5380_v12  ;;  %v667_v12 = vld [vmem:[%s4096_s19 + $0x28] sm:$0xff] }
 0x12f   : > { %1305 = vperm.xlu1 %3520, %v3909_v30  }
 0x131   : > { %1333 = vperm.xlu0 %3519, %v1076_v27  }
 0x133   : > { %1309 = vperm.xlu1 %3520, %v3923_v7  }
 0x135   : > { %1341 = vperm.xlu0 %3519, %v1078_v17  }
 0x137   : > { %1317 = vperm.xlu1 %3520, %v3943_v31  }
 0x139   : > { %1321 = vperm.xlu0 %3519, %v3957_v25  }
 0x13b   : > { %1337 = vperm.xlu1 %3520, %v1077_v10  }
 0x13d   : > { %1329 = vperm.xlu0 %3519, %v3975_v2  }
 0x13f   : > { %1345 = vperm.xlu1 %3520, %v1079_v18  }
 0x141   : > { %1353 = vperm.xlu0 %3519, %v1081_v24   ;;  %v1510_v24 = vrot.slane %v1488_v62, %v1430_v6  ;;  %v4117_v6 = vrot.slane %v1471_v40, %v3818_v49  ;;  %v4125_v62 = vld [vmem:[%s4096_s19 + $0x10] sm:$0xff] }
 0x142   : > { %v4136_v40 = vld [vmem:[%s4096_s19 + $0x50] sm:$0xff] }
 0x143   : > { %1325 = vperm.xlu1 %3520, %v3963_v32   ;;  %v1520_v57 = vcombine.high %v1510_v24, %v1510_v24  ;;  %5406 = vst [vmem:[#allocation11_spill] sm:$0xff] %v4117_v6  ;;  %v1561_v0 = vrot.slane %v1510_v24, %v3818_v49  ;;  %v4190_v6 = vld [vmem:[%s4096_s19 + $0x70] sm:$0xff] }
 0x144   : > { %5410 = vst [vmem:[#allocation15_spill] sm:$0xff] %v4190_v6 }
 0x145   : > { %1361 = vperm.xlu0 %3519, %v1083_v37   ;;  %v1472_v37 = vcombine.high %v1468_v21, %v1468_v21  ;;  %v4154_v50 = vrot.slane %v1520_v57, %v3818_v49  ;;  %v4171_v57 = vld [vmem:[%s4096_s19 + $0x30] sm:$0xff] }
 0x147   : > { %1349 = vperm.xlu1 %3520, %v1080_v22   ;;  %v1518_v22 = vcombine.high %v1496_v51, %v1496_v51  ;;  %v1545_v51 = vrot.slane %v1468_v21, %v3818_v49  ;;  %v4144_v20 = vrot.slane %v1472_v37, %v3818_v49  ;;  %v4161_v21 = vrot.slane %v1521_v4, %v3818_v49 }
 0x148   : > { %v4165_v37 = vsub.f32 %v662_v47, %v1525_v58  ;;  %v4182_v4 = vsub.f32 %v670_v28, %v1557_v14  ;;  %v3126_v47 = vld [vmem:[%s4248_s2] sm:$0xff] }
 0x149   : > { %3522 = vset.pattern.permute.xlu0 %v5378_v1  ;;  %v4131_v29 = vrot.slane %v1518_v22, %v3818_v49  ;;  %v671_v22 = vld [vmem:[%s4096_s19 + $0x48] sm:$0xff]  ;;  %v4196_v13 = vsub.f32 %v667_v12, %v1545_v51 }
 0x14b   : > { %1357 = vperm.xlu1 %3520, %v1082_v36  }
 0x14f   : > { %3521 = vset.pattern.permute.xlu1 %v5378_v1  ;;  %v666_v1 = vld [vmem:[%s4096_s19 + $0x20] sm:$0xff] }
 0x166   : > { %v4026_v19 = vpop.permute.xlu0 %1086 }
 0x168   : > { %v4024_v59 = vpop.permute.xlu1 %1091 }
 0x169   : > { %v1169_v51 = vmul.f32 %v4099_v44, %v4024_v59 }
 0x16c   : > { %v4028_v30 = vpop.permute.xlu1 %1096 }
 0x16e   : > { %v4030_v7 = vpop.permute.xlu0 %1101 }
 0x170   : > { %v4032_v15 = vpop.permute.xlu1 %1106 }
 0x172   : > { %v4034_v31 = vpop.permute.xlu0 %1111 }
 0x174   : > { %v4036_v25 = vpop.permute.xlu1 %1116 }
 0x176   : > { %v4038_v26 = vpop.permute.xlu0 %1121 }
 0x178   : > { %v4040_v39 = vpop.permute.xlu1 %1126 }
 0x17a   : > { %v4044_v53 = vpop.permute.xlu0 %1131 }
 0x17c   : > { %v4046_v60 = vpop.permute.xlu1 %1136 }
 0x17e   : > { %v4048_v32 = vpop.permute.xlu0 %1141 }
 0x180   : > { %v4050_v52 = vpop.permute.xlu1 %1146 }
 0x182   : > { %v4054_v38 = vpop.permute.xlu0 %1151 }
 0x183   : > { %v1181_v58 = vmul.f32 %v4099_v44, %v4054_v38 }
 0x184   : > { %v4056_v3 = vpop.permute.xlu1 %1156 }
 0x186   : > { %v4059_v5 = vpop.permute.xlu0 %1161 }
 0x189   : > { %v4066_v43 = vpop.permute.xlu1 %1201 }
 0x18b   : > { %v4069_v45 = vpop.permute.xlu0 %1205 }
 0x18c   : > { %v1269_v59 = vmul.f32 %v4104_v23, %v4069_v45  ;;  %v1179_v45 = vmul.f32 %v4099_v44, %v4048_v32  ;;  %v4274_v32 = vmul.f32 %v4099_v44, %v4059_v5 }
 0x18d   : > { %v4071_v2 = vpop.permute.xlu1 %1209 }
 0x18f   : > { %v4073_v27 = vpop.permute.xlu0 %1217 }
 0x191   : > { %v4075_v33 = vpop.permute.xlu1 %1213 }
 0x193   : > { %v4077_v10 = vpop.permute.xlu0 %1225 }
 0x195   : > { %v4079_v41 = vpop.permute.xlu1 %1221 }
 0x196   : > { %v1273_v38 = vmul.f32 %v4104_v23, %v4079_v41 }
 0x197   : > { %v4083_v17 = vpop.permute.xlu0 %1233 }
 0x198   : > { %5400 = vst [vmem:[#allocation6_spill] sm:$0xff] %v4083_v17  ;;  %v4180_v17 = vsub.f32 %v663_v34, %v1529_v55 }
 0x199   : > { %v4088_v18 = vpop.permute.xlu1 %1229 }
 0x19a   : > { %5401 = vst [vmem:[#allocation7_spill] sm:$0xff] %v4088_v18  ;;  %v4174_v18 = vld [vmem:[%s4096_s19 + $0x78] sm:$0xff] }
 0x19b   : > { %v4101_v36 = vpop.permute.xlu0 %1241 }
 0x19c   : > { %5403 = vst [vmem:[#allocation8_spill] sm:$0xff] %v4101_v36  ;;  %v675_v36 = vld [vmem:[%s4096_s19 + $0x68] sm:$0xff] }
 0x19d   : > { %v4106_v63 = vpop.permute.xlu1 %1237  ;;  %v4204_v28 = vsub.f32 %v675_v36, %v1577_v61  ;;  %v1173_v61 = vmul.f32 %v4099_v44, %v4034_v31  ;;  %v1270_v31 = vmul.f32 %v4104_v23, %v4071_v2  ;;  %v1180_v2 = vmul.f32 %v4099_v44, %v4050_v52 }
 0x19e   : > { %5404 = vst [vmem:[#allocation9_spill] sm:$0xff] %v4106_v63  ;;  %v674_v63 = vld [vmem:[%s4096_s19 + $0x60] sm:$0xff]  ;;  %v1285_v52 = vadd.f32 %v1269_v59, %v1169_v51  ;;  %s3647_s19 = smov 8  }
 0x19f   : > { %v4133_v48 = vpop.permute.xlu0 %1249 }
 0x1a0   : > { %5407 = vst [vmem:[#allocation12_spill] sm:$0xff] %v4133_v48  ;;  %v4158_v48 = vrot.slane %v1470_v42, %v3818_v49  ;;  %v4178_v42 = vrot.slane %v1519_v54, %v3818_v49  ;;  %v4198_v54 = vsub.f32 %v671_v22, %v1561_v0  ;;  %v1268_v0 = vmul.f32 %v4104_v23, %v4066_v43 }
 0x1a1   : > { %v4163_v24 = vpop.permute.xlu1 %1245  ;;  %v1170_v22 = vmul.f32 %v4099_v44, %v4028_v30  ;;  %v1172_v43 = vmul.f32 %v4099_v44, %v4032_v15  ;;  %v1176_v30 = vmul.f32 %v4099_v44, %v4040_v39  ;;  %v1178_v15 = vmul.f32 %v4099_v44, %v4046_v60  ;;  %v5414_v55 = vld [vmem:[#allocation7_spill] sm:$0xff] }
 0x1a2   : > { %5408 = vst [vmem:[#allocation13_spill] sm:$0xff] %v4163_v24  ;;  %5409 = vst [vmem:[#allocation14_spill] sm:$0xff] %v4178_v42  ;;  %v4194_v24 = vsub.f32 %v666_v1, %v1541_v11  ;;  %v1168_v1 = vmul.f32 %v4099_v44, %v4026_v19  ;;  %v4216_v11 = vsub.f32 %v674_v63, %v1573_v35 }
 0x1a3   : > { %v4192_v9 = vpop.permute.xlu0 %1257  ;;  %v1171_v19 = vmul.f32 %v4099_v44, %v4030_v7  ;;  %v1174_v63 = vmul.f32 %v4099_v44, %v4036_v25  ;;  %v1175_v35 = vmul.f32 %v4099_v44, %v4038_v26  ;;  %v1177_v7 = vmul.f32 %v4099_v44, %v4044_v53  ;;  %v5415_v51 = vld [vmem:[#allocation8_spill] sm:$0xff] }
 0x1a4   : > { %5411 = vst [vmem:[#allocation16_spill] sm:$0xff] %v4216_v11  ;;  %v1284_v25 = vadd.f32 %v1268_v0, %v1168_v1  ;;  %v1272_v26 = vmul.f32 %v4104_v23, %v4073_v27  ;;  %v1271_v39 = vmul.f32 %v4104_v23, %v4075_v33  ;;  %v1274_v1 = vmul.f32 %v4104_v23, %v4077_v10  ;;  %v4266_v27 = vld [vmem:[%s5368_s9] ss:$0 sm:$0xff] }
 0x1a5   : > { %v4214_v12 = vpop.permute.xlu1 %1253  ;;  %v4270_v33 = vmul.f32 %v4099_v44, %v4056_v3  ;;  %v5413_v10 = vld [vmem:[#allocation6_spill] sm:$0xff]  ;;  %v1275_v34 = vmul.f32 %v4104_v23, %v5414_v55  ;;  %v5416_v41 = vld [vmem:[#allocation9_spill] sm:$0xff] }
 0x1a6   : > { %v1276_v14 = vmul.f32 %v4104_v23, %v5413_v10  ;;  %v1288_v3 = vadd.f32 %v1272_v26, %v1172_v43  ;;  %v1287_v42 = vadd.f32 %v1271_v39, %v1171_v19  ;;  %v4285_v44 = vadd.f32 %v1274_v1, %v1174_v63  ;;  %v4296_v55 = vld [vmem:[%s5369_s10] ss:$0 sm:$0xff] }
 0x1a7   : > { %v1277_v59 = vmul.f32 %v4104_v23, %v5416_v41  ;;  %v1289_v39 = vadd.f32 %v1273_v38, %v1173_v61  ;;  %v4302_v1 = vadd.f32 %v1275_v34, %v1175_v35  ;;  %v1281_v61 = vmul.f32 %v4104_v23, %v4214_v12  ;;  %v3127_v35 = vld [vmem:[%s4248_s2 + $0x8] sm:$0xff] }
 0x1a8   : > { %v1302_v36 = vpop.permute.xlu0 %1301  ;;  %v5420_v38 = vld [vmem:[#allocation11_spill] sm:$0xff] }
 0x1a9   : > { %v1368_v53 = vmul.f32 %v4110_v8, %v1302_v36  ;;  %v1262_v60 = vpop.permute.xlu1 %1261  ;;  %v1286_v36 = vadd.f32 %v1270_v31, %v1170_v22  ;;  %v1278_v22 = vmul.f32 %v4104_v23, %v5415_v51  ;;  %v5417_v31 = vld [vmem:[#allocation12_spill] sm:$0xff]  ;;  %v1293_v34 = vadd.f32 %v1277_v59, %v1177_v7 }
 0x1aa   : > { %v1283_v7 = vmul.f32 %v4104_v23, %v1262_v60  ;;  %v4334_v59 = vmul.f32 %v4104_v23, %v4192_v9  ;;  %v4340_v60 = vadd.f32 %v1281_v61, %v1181_v58 }
 0x1ab   : > { %v1384_v0 = vadd.f32 %v1368_v53, %v1284_v25  ;;  %v1280_v25 = vmul.f32 %v4104_v23, %v5417_v31  ;;  %v1292_v53 = vadd.f32 %v1276_v14, %v1176_v30 }
 0x1ac   : > { %v1314_v49 = vpop.permute.xlu0 %1313 }
 0x1ad   : > { %v1406_v6 = vadd.f32 %v4266_v27, %v1384_v0  ;;  %v1371_v5 = vmul.f32 %v4110_v8, %v1314_v49  ;;  %v5418_v0 = vld [vmem:[#allocation13_spill] sm:$0xff]  ;;  %v4315_v14 = vadd.f32 %v1280_v25, %v1180_v2 }
 0x1ae   : > { %v1306_v19 = vpop.permute.xlu1 %1305  ;;  %v1279_v10 = vmul.f32 %v4104_v23, %v5418_v0 }
 0x1af   : > { %v1618_v49 = vadd.f32 %v4165_v37, %v1406_v6  ;;  %v4299_v43 = vadd.f32 %v3126_v47, %v1406_v6  ;;  %v1387_v63 = vadd.f32 %v1371_v5, %v1287_v42  ;;  %v1369_v26 = vmul.f32 %v4110_v8, %v1306_v19  ;;  %v4312_v37 = vld [vmem:[%s5370_s11] ss:$0 sm:$0xff]  ;;  %v3129_v42 = vld [vmem:[%s4248_s2 + $0x18] sm:$0xff] }
 0x1b0   : > { %v1334_v51 = vpop.permute.xlu0 %1333  ;;  %v1294_v47 = vadd.f32 %v1278_v22, %v1178_v15  ;;  %v4325_v0 = vadd.f32 %v1279_v10, %v1179_v45  ;;  %v3134_v15 = vld [vmem:[%s4248_s2 + $0x40] sm:$0xff] }
 0x1b1   : > { %v1409_v41 = vadd.f32 %v4266_v27, %v1387_v63  ;;  %v1385_v31 = vadd.f32 %v1369_v26, %v1285_v52  ;;  %v1376_v11 = vmul.f32 %v4110_v8, %v1334_v51  ;;  %v1641_v6 = vmul.f32 %v4296_v55, %v1618_v49  ;;  %v5419_v52 = vld [vmem:[#allocation10_spill] sm:$0xff] }
 0x1b2   : > { %v1310_v30 = vpop.permute.xlu1 %1309  ;;  %v5421_v5 = vsub.f32 %v5419_v52, %v5420_v38 }
 0x1b3   : > { %v1407_v49 = vadd.f32 %v4266_v27, %v1385_v31  ;;  %v1392_v63 = vadd.f32 %v1376_v11, %v1292_v53  ;;  %v1370_v26 = vmul.f32 %v4110_v8, %v1310_v30  ;;  %v1664_v22 = vadd.f32 %v4312_v37, %v1641_v6  ;;  %v3128_v6 = vld [vmem:[%s4248_s2 + $0x10] sm:$0xff] }
 0x1b4   : > { %v1621_v19 = vadd.f32 %v5421_v5, %v1409_v41  ;;  %v1342_v2 = vpop.permute.xlu0 %1341  ;;  %v4330_v12 = vadd.f32 %v3129_v42, %v1409_v41  ;;  %v4351_v42 = vadd.f32 %v1283_v7, %v4274_v32  ;;  %v3136_v30 = vld [vmem:[%s4248_s2 + $0x50] sm:$0xff] }
 0x1b5   : > { %v1619_v25 = vadd.f32 %v4180_v17, %v1407_v49  ;;  %v4337_v11 = vadd.f32 %v3127_v35, %v1407_v49  ;;  %v1414_v45 = vadd.f32 %v4266_v27, %v1392_v63  ;;  %v1386_v10 = vadd.f32 %v1370_v26, %v1286_v36 }
 0x1b6   : > { %v1644_v53 = vmul.f32 %v4296_v55, %v1621_v19  ;;  %v1378_v51 = vmul.f32 %v4110_v8, %v1342_v2  ;;  %v1318_v41 = vpop.permute.xlu1 %1317  ;;  %v1680_v36 = vmax.f32 %v1664_v22, 0.0  ;;  %v5422_v19 = vsub.f32 %v4125_v62, %v4128_v16 }
 0x1b7   : > { %v1626_v31 = vadd.f32 %v4182_v4, %v1414_v45  ;;  %v4345_v23 = vadd.f32 %v3134_v15, %v1414_v45  ;;  %v1372_v17 = vmul.f32 %v4110_v8, %v1318_v41  ;;  %v1642_v9 = vmul.f32 %v4296_v55, %v1619_v25 }
 0x1b8   : > { %v1408_v58 = vadd.f32 %v4266_v27, %v1386_v10  ;;  %v1394_v61 = vadd.f32 %v1378_v51, %v1294_v47  ;;  %v1322_v35 = vpop.permute.xlu0 %1321  ;;  %v1667_v47 = vadd.f32 %v4312_v37, %v1644_v53  ;;  %v5423_v62 = vsub.f32 %v4136_v40, %v4131_v29 }
 0x1b9   : > { %v1388_v52 = vadd.f32 %v1372_v17, %v1288_v3  ;;  %v1373_v38 = vmul.f32 %v4110_v8, %v1322_v35  ;;  %v1665_v4 = vadd.f32 %v4312_v37, %v1642_v9  ;;  %v1649_v5 = vmul.f32 %v4296_v55, %v1626_v31  ;;  %v3130_v31 = vld [vmem:[%s4248_s2 + $0x20] sm:$0xff]  ;;  %v3135_v9 = vld [vmem:[%s4248_s2 + $0x48] sm:$0xff] }
 0x1ba   : > { %v1620_v49 = vadd.f32 %v5422_v19, %v1408_v58  ;;  %v1416_v32 = vadd.f32 %v4266_v27, %v1394_v61  ;;  %v1338_v63 = vpop.permute.xlu1 %1337  ;;  %v4363_v26 = vadd.f32 %v3128_v6, %v1408_v58  ;;  %v1683_v58 = vmax.f32 %v1667_v47, 0.0 }
 0x1bb   : > { %v1410_v3 = vadd.f32 %v4266_v27, %v1388_v52  ;;  %v1389_v7 = vadd.f32 %v1373_v38, %v1289_v39  ;;  %v1377_v15 = vmul.f32 %v4110_v8, %v1338_v63  ;;  %v1681_v2 = vmax.f32 %v1665_v4, 0.0 }
 0x1bc   : > { %v1643_v22 = vmul.f32 %v4296_v55, %v1620_v49  ;;  %v1628_v16 = vadd.f32 %v5423_v62, %v1416_v32  ;;  %v4371_v25 = vadd.f32 %v3136_v30, %v1416_v32  ;;  %v1330_v45 = vpop.permute.xlu0 %1329  ;;  %v4374_v53 = vadd.f32 %v4312_v37, %v1649_v5  ;;  %v3137_v62 = vld [vmem:[%s4248_s2 + $0x58] sm:$0xff] }
 0x1bd   : > { %v1622_v10 = vadd.f32 %v4194_v24, %v1410_v3  ;;  %v4378_v51 = vadd.f32 %v4266_v27, %v1389_v7  ;;  %v1393_v39 = vadd.f32 %v1377_v15, %v1293_v34  ;;  %v1375_v41 = vmul.f32 %v4110_v8, %v1330_v45 }
 0x1be   : > { %v1651_v17 = vmul.f32 %v4296_v55, %v1628_v16  ;;  %v1346_v29 = vpop.permute.xlu1 %1345  ;;  %v1696_v40 = vpack.c.bf16 %v1681_v2, %v1680_v36  ;;  %v1666_v6 = vadd.f32 %v4312_v37, %v1643_v22  ;;  %v1688_v36 = vmax.f32 %v4374_v53, 0.0 }
 0x1bf   : > { %v1645_v61 = vmul.f32 %v4296_v55, %v1622_v10  ;;  %v1623_v24 = vadd.f32 %v4196_v13, %v4378_v51  ;;  %v1415_v35 = vadd.f32 %v4266_v27, %v1393_v39  ;;  %v1391_v34 = vadd.f32 %v1375_v41, %v4302_v1 }
 0x1c0   : > { %v1379_v30 = vmul.f32 %v4110_v8, %v1346_v29  ;;  %3470 = vmatprep.mubr.msk.bf16.mxu0 %vm1727_vm0, %v1696_v40  ;;  %v1354_v52 = vpop.permute.xlu0 %1353  ;;  %v1682_v38 = vmax.f32 %v1666_v6, 0.0  ;;  %v4393_v4 = vadd.f32 %v3130_v31, %v1410_v3  ;;  %v5424_v3 = vsub.f32 %v4148_v46, %v4144_v20 }
 0x1c1   : > { %v1646_v5 = vmul.f32 %v4296_v55, %v1623_v24  ;;  %v1627_v19 = vadd.f32 %v4198_v54, %v1415_v35  ;;  %v4397_v13 = vadd.f32 %v3135_v9, %v1415_v35  ;;  %v1413_v49 = vadd.f32 %v4266_v27, %v1391_v34 }
 0x1c2   : > { %v1395_v1 = vadd.f32 %v1379_v30, %v4325_v0  ;;  %v1381_v32 = vmul.f32 %v4110_v8, %v1354_v52  ;;  %v1326_v63 = vpop.permute.xlu1 %1325  ;;  %v1697_v47 = vpack.c.bf16 %v1683_v58, %v1682_v38  ;;  %v1668_v7 = vadd.f32 %v4312_v37, %v1645_v61 }
 0x1c3   : > { %v1625_v15 = vadd.f32 %v5424_v3, %v1413_v49  ;;  %v1374_v2 = vmul.f32 %v4110_v8, %v1326_v63  ;;  %v1669_v54 = vadd.f32 %v4312_v37, %v1646_v5  ;;  %v1650_v22 = vmul.f32 %v4296_v55, %v1627_v19  ;;  %v3133_v19 = vld [vmem:[%s4248_s2 + $0x38] sm:$0xff] }
 0x1c4   : > { %v1417_v0 = vadd.f32 %v4266_v27, %v1395_v1  ;;  %v1397_v16 = vadd.f32 %v1381_v32, %v4340_v60  ;;  %3471 = vmatmul.mubr.msk.bf16.vlgmr.msra.gmra.mrb[0].mxu0 %vm1727_vm0, %v1697_v47  ;;  %v1362_v45 = vpop.permute.xlu0 %1361  ;;  %v1684_v53 = vmax.f32 %v1668_v7, 0.0  ;;  %v1674_v10 = vadd.f32 %v4312_v37, %v1651_v17  ;;  %v3132_v17 = vld [vmem:[%s4248_s2 + $0x30] sm:$0xff]  ;;  %v3131_v1 = vld [vmem:[%s4248_s2 + $0x28] sm:$0xff] }
 0x1c5   : > { %v1648_v46 = vmul.f32 %v4296_v55, %v1625_v15  ;;  %v1390_v20 = vadd.f32 %v1374_v2, %v4285_v44  ;;  %v1383_v39 = vmul.f32 %v4110_v8, %v1362_v45  ;;  %v1685_v41 = vmax.f32 %v1669_v54, 0.0  ;;  %v3138_v2 = vld [vmem:[%s4248_s2 + $0x60] sm:$0xff]  ;;  %v3139_v54 = vld [vmem:[%s4248_s2 + $0x68] sm:$0xff]  ;;  %v3141_v45 = vld [vmem:[%s4248_s2 + $0x78] sm:$0xff] }
 0x1c6   : > { %v5425_v31 = vsub.f32 %v4151_v56, %v4154_v50  ;;  %v1419_v29 = vadd.f32 %v4266_v27, %v1397_v16  ;;  %v1350_v60 = vpop.permute.xlu1 %1349  ;;  %v1673_v40 = vadd.f32 %v4312_v37, %v1650_v22  ;;  %v4422_v6 = vadd.f32 %v3137_v62, %v1417_v0  ;;  %v5428_v62 = vld [vmem:[#allocation16_spill] sm:$0xff] }
 0x1c7   : > { %v1412_v58 = vadd.f32 %v4266_v27, %v1390_v20  ;;  %v1399_v44 = vadd.f32 %v1383_v39, %v4351_v42  ;;  %v1380_v61 = vmul.f32 %v4110_v8, %v1350_v60  ;;  %v1698_v24 = vpack.c.bf16 %v1685_v41, %v1684_v53  ;;  %v3140_v41 = vld [vmem:[%s4248_s2 + $0x70] sm:$0xff]  ;;  %v5430_v60 = vld [vmem:[#allocation14_spill] sm:$0xff] }
 0x1c8   : > { %v1629_v9 = vadd.f32 %v5425_v31, %v1417_v0  ;;  %v1631_v56 = vadd.f32 %v4204_v28, %v1419_v29  ;;  %v1689_v35 = vmax.f32 %v1673_v40, 0.0  ;;  %v1671_v34 = vadd.f32 %v4312_v37, %v1648_v46 }
 0x1c9   : > { %v5426_v30 = vsub.f32 %v4171_v57, %v4158_v48  ;;  %v1421_v38 = vadd.f32 %v4266_v27, %v1399_v44  ;;  %v1396_v42 = vadd.f32 %v1380_v61, %v4315_v14  ;;  %3474 = vmatprep.mubr.msk.bf16.mxu0 %vm1727_vm0, %v1698_v24  ;;  %v4437_v5 = vadd.f32 %v3132_v17, %v1412_v58 }
 0x1ca   : > { %v1652_v50 = vmul.f32 %v4296_v55, %v1629_v9  ;;  %v1298_v28 = vadd.f32 %v4334_v59, %v4270_v33  ;;  %v1654_v32 = vmul.f32 %v4296_v55, %v1631_v56  ;;  %v1358_v63 = vpop.permute.xlu1 %1357  ;;  %v1700_v48 = vpack.c.bf16 %v1689_v35, %v1688_v36  ;;  %v5429_v9 = vld [vmem:[#allocation15_spill] sm:$0xff] }
 0x1cb   : > { %v1624_v52 = vadd.f32 %v5426_v30, %v1412_v58  ;;  %v5427_v14 = vsub.f32 %v4174_v18, %v4161_v21  ;;  %v1418_v3 = vadd.f32 %v4266_v27, %v1396_v42  ;;  %v1382_v15 = vmul.f32 %v4110_v8, %v1358_v63  ;;  %v4494_v42 = vld [vmem:[%s5373_s14] ss:$0 sm:$0xff] }
 0x1cc   : > { %v1675_v57 = vadd.f32 %v4312_v37, %v1652_v50  ;;  %3478 = vmatprep.mubr.msk.bf16.mxu1 %vm1727_vm0, %v1700_v48  ;;  %v1690_v33 = vmax.f32 %v1674_v10, 0.0  ;;  %v4454_v36 = vadd.f32 %v3133_v19, %v1413_v49  ;;  %v4457_v22 = vadd.f32 %v3131_v1, %v4378_v51  ;;  %v4500_v1 = vld [vmem:[%s5374_s15] ss:$0 sm:$0xff] }
 0x1cd   : > { %v1647_v47 = vmul.f32 %v4296_v55, %v1624_v52  ;;  %v1633_v7 = vadd.f32 %v5427_v14, %v1421_v38  ;;  %v1630_v0 = vadd.f32 %v5428_v62, %v1418_v3  ;;  %v1398_v18 = vadd.f32 %v1382_v15, %v1298_v28 }
 0x1ce   : > { %v1691_v59 = vmax.f32 %v1675_v57, 0.0  ;;  %v1687_v16 = vmax.f32 %v1671_v34, 0.0  ;;  %v1677_v53 = vadd.f32 %v4312_v37, %v1654_v32  ;;  %v4463_v46 = vadd.f32 %v3138_v2, %v1418_v3 }
 0x1cf   : > { %v1670_v21 = vadd.f32 %v4312_v37, %v1647_v47  ;;  %v4465_v10 = vadd.f32 %v3139_v54, %v1419_v29  ;;  %v1656_v49 = vmul.f32 %v4296_v55, %v1633_v7  ;;  %v1653_v20 = vmul.f32 %v4296_v55, %v1630_v0 }
 0x1d0   : > { %v1701_v8 = vpack.c.bf16 %v1691_v59, %v1690_v33  ;;  %v1420_v51 = vadd.f32 %v4266_v27, %v1398_v18  ;;  %v4472_v31 = vadd.f32 %v3141_v45, %v1421_v38  ;;  %v5431_v40 = vsub.f32 %v5429_v9, %v5430_v60 }
 0x1d1   : > { %v1686_v39 = vmax.f32 %v1670_v21, 0.0  ;;  %v1676_v29 = vadd.f32 %v4312_v37, %v1653_v20  ;;  %v1693_v24 = vmax.f32 %v1677_v53, 0.0  ;;  %v1679_v50 = vadd.f32 %v4312_v37, %v1656_v49 }
 0x1d2   : > { %3479 = vmatmul.mubr.msk.bf16.vlgmr.msra.gmra.mrb[0].mxu1 %vm1727_vm0, %v1701_v8  ;;  %v1632_v17 = vadd.f32 %v5431_v40, %v1420_v51  ;;  %v4478_v44 = vadd.f32 %v3140_v41, %v1420_v51  ;;  %v5432_v7 = vmov 1  }
 0x1d3   : > { %v1699_v58 = vpack.c.bf16 %v1687_v16, %v1686_v39  ;;  %v1692_v27 = vmax.f32 %v1676_v29, 0.0  ;;  %v1695_v30 = vmax.f32 %v1679_v50, 0.0 }
 0x1d4   : > { %v1655_v61 = vmul.f32 %v4296_v55, %v1632_v17  ;;  %v4489_v55 = vld [vmem:[%s5372_s13] ss:$0 sm:$0xff] }
 0x1d5   : > { %3475 = vmatmul.mubr.msk.bf16.gmra.mrb[4].mxu0 %vm1727_vm0, %v1699_v58  ;;  %v1702_v56 = vpack.c.bf16 %v1693_v24, %v1692_v27 }
 0x1d6   : > { %v1678_v35 = vadd.f32 %v4312_v37, %v1655_v61 }
 0x1d7   : > { %3482 = vmatprep.mubr.msk.bf16.mxu1 %vm1727_vm0, %v1702_v56 }
 0x1d8   : > { %v1694_v34 = vmax.f32 %v1678_v35, 0.0 }
 0x1da   : > { %v1703_v52 = vpack.c.bf16 %v1695_v30, %v1694_v34  ;;  %v5433_v30 = vmov 2  }
 0x1dc   : > { %3483 = vmatmul.mubr.msk.bf16.gmra.mrb[4].mxu1 %vm1727_vm0, %v1703_v52 }
 0x297   : > { %v3472_v38 = vpop.f32.mrb[0].mxu0 }
 0x298   : > { %v1795_v37 = vadd.f32 %v3472_v38, %v4489_v55  ;;  %v1786_v19 = vpop.f32.mrb[1].mxu0 }
 0x299   : > { %v4502_v28 = vpop.f32.mrb[2].mxu0  ;;  %v1787_v61 = vadd.f32 %v4489_v55, %v1786_v19 }
 0x29a   : > { %v1858_v32 = vmul.f32 %v4494_v42, %v1795_v37  ;;  %v4505_v63 = vpop.f32.mrb[3].mxu0 }
 0x29b   : > { %v1856_v37 = vmul.f32 %v4494_v42, %v1787_v61 }
 0x29c   : > { %v1881_v48 = vadd.f32 %v4500_v1, %v1858_v32 }
 0x29e   : > { %v4508_v57 = vmax.f32 %v1881_v48, 0.0 }
 0x2a0   : > { %1925 = vperm.xlu1 %3521, %v4508_v57  }
 0x2a4   : > { %3523 = vset.pattern.permute.xlu1 %v5432_v7 }
 0x2a5   : > { %v3480_v47 = vpop.f32.mrb[0].mxu1  ;;  %2038 = vperm.xlu1 %3523, %v4508_v57  }
 0x2a6   : > { %v1827_v14 = vadd.f32 %v3480_v47, %v4489_v55  ;;  %v1818_v3 = vpop.f32.mrb[1].mxu1 }
 0x2a7   : > { %v4514_v15 = vpop.f32.mrb[2].mxu1  ;;  %v1819_v21 = vadd.f32 %v4489_v55, %v1818_v3 }
 0x2a8   : > { %v1866_v2 = vmul.f32 %v4494_v42, %v1827_v14  ;;  %v1821_v54 = vpop.f32.mrb[3].mxu1  ;;  %v3476_v33 = vpop.f32.mrb[4].mxu0 }
 0x2a9   : > { %v1822_v59 = vadd.f32 %v4489_v55, %v1821_v54  ;;  %v1811_v62 = vadd.f32 %v3476_v33, %v4489_v55  ;;  %v1802_v0 = vpop.f32.mrb[5].mxu0  ;;  %v1864_v17 = vmul.f32 %v4494_v42, %v1819_v21  ;;  %v5434_v21 = vmov 0  }
 0x2aa   : > { %v1889_v18 = vadd.f32 %v4500_v1, %v1866_v2  ;;  %v1803_v16 = vadd.f32 %v4489_v55, %v1802_v0  ;;  %v3477_v45 = vpop.f32.mrb[6].mxu0 }
 0x2ab   : > { %v1865_v8 = vmul.f32 %v4494_v42, %v1822_v59  ;;  %v1862_v53 = vmul.f32 %v4494_v42, %v1811_v62  ;;  %v1814_v49 = vadd.f32 %v3477_v45, %v4489_v55  ;;  %v1805_v20 = vpop.f32.mrb[7].mxu0  ;;  %v1887_v34 = vadd.f32 %v4500_v1, %v1864_v17 }
 0x2ac   : > { %v1905_v51 = vmax.f32 %v1889_v18, 0.0  ;;  %v1860_v39 = vmul.f32 %v4494_v42, %v1803_v16  ;;  %v1806_v41 = vadd.f32 %v4489_v55, %v1805_v20  ;;  %v1879_v62 = vadd.f32 %v4500_v1, %v1856_v37 }
 0x2ad   : > { %v4528_v9 = vadd.f32 %v4500_v1, %v1865_v8  ;;  %v4531_v60 = vadd.f32 %v4500_v1, %v1862_v53  ;;  %v1863_v40 = vmul.f32 %v4494_v42, %v1814_v49  ;;  %v1903_v54 = vmax.f32 %v1887_v34, 0.0 }
 0x2ae   : > { %v4536_v58 = vadd.f32 %v4500_v1, %v1860_v39  ;;  %v1861_v29 = vmul.f32 %v4494_v42, %v1806_v41  ;;  %2070 = vperm.xlu1 %3523, %v1905_v51   ;;  %1965 = vperm.xlu0 %3522, %v1905_v51   ;;  %v3643_v18 = vmov 3   ;;  %v1895_v45 = vmax.f32 %v1879_v62, 0.0 }
 0x2af   : > { %v4541_v27 = vadd.f32 %v4500_v1, %v1863_v40  ;;  %v3484_v50 = vpop.f32.mrb[4].mxu1  ;;  %v1798_v8 = vadd.f32 %v4502_v28, %v4489_v55  ;;  %v1830_v49 = vadd.f32 %v4514_v15, %v4489_v55  ;;  %v1790_v39 = vadd.f32 %v4489_v55, %v4505_v63 }
 0x2b0   : > { %v4544_v24 = vadd.f32 %v4500_v1, %v1861_v29  ;;  %v1843_v56 = vadd.f32 %v3484_v50, %v4489_v55  ;;  %v1834_v35 = vpop.f32.mrb[5].mxu1  ;;  %v1899_v63 = vmax.f32 %v4536_v58, 0.0 }
 0x2b1   : > { %v1835_v52 = vadd.f32 %v4489_v55, %v1834_v35  ;;  %v3485_v38 = vpop.f32.mrb[6].mxu1  ;;  %v1859_v53 = vmul.f32 %v4494_v42, %v1798_v8  ;;  %v1867_v20 = vmul.f32 %v4494_v42, %v1830_v49  ;;  %v1857_v41 = vmul.f32 %v4494_v42, %v1790_v39 }
 0x2b2   : > { %3524 = vset.pattern.permute.xlu1 %v5433_v30  ;;  %3525 = vset.pattern.permute.xlu0 %v5433_v30  ;;  %v1870_v19 = vmul.f32 %v4494_v42, %v1843_v56  ;;  %v1846_v32 = vadd.f32 %v3485_v38, %v4489_v55  ;;  %v1837_v48 = vpop.f32.mrb[7].mxu1  ;;  %v1900_v61 = vmax.f32 %v4544_v24, 0.0  ;;  %v1911_v56 = vld [vmem:[%s5375_s16] sm:$0xf]  ;;  %v5436_v24 = vld [vmem:[#allocation3_spill] sm:$0xff] }
 0x2b3   : > { %2138 = vperm.xlu1 %3524, %v4508_v57   ;;  %2170 = vperm.xlu0 %3525, %v1905_v51   ;;  %v1868_v47 = vmul.f32 %v4494_v42, %v1835_v52  ;;  %v1838_v14 = vadd.f32 %v4489_v55, %v1837_v48  ;;  %v1880_v40 = vadd.f32 %v4500_v1, %v1857_v41  ;;  %v1904_v55 = vmax.f32 %v4528_v9, 0.0  ;;  %v5435_v52 = vld [vmem:[#allocation4_spill] sm:$0xff] }
 0x2b4   : > { %v4558_v3 = vadd.f32 %v4500_v1, %v1870_v19  ;;  %v1871_v2 = vmul.f32 %v4494_v42, %v1846_v32  ;;  %v4632_v38 = vrot.slane %v1911_v56, %v5435_v52  ;;  %v4635_v37 = vrot.slane %v1911_v56, %v5436_v24  ;;  %v5438_v32 = vld [vmem:[#allocation2_spill] sm:$0xff] }
 0x2b5   : > { %v4562_v33 = vadd.f32 %v4500_v1, %v1868_v47  ;;  %v1869_v59 = vmul.f32 %v4494_v42, %v1838_v14  ;;  %v1896_v17 = vmax.f32 %v1880_v40, 0.0  ;;  %v1901_v42 = vmax.f32 %v4531_v60, 0.0 }
 0x2b6   : > { %v4567_v0 = vadd.f32 %v4500_v1, %v1871_v2  ;;  %v1902_v60 = vmax.f32 %v4541_v27, 0.0  ;;  %v2295_v48 = vsub.s32 3, %v5438_v32 }
 0x2b7   : > { %3526 = vset.pattern.permute.xlu1 %v3643_v18  ;;  %3528 = vset.pattern.permute.xlu0 %v5434_v21  ;;  %v4572_v16 = vadd.f32 %v4500_v1, %v1869_v59  ;;  %v1907_v9 = vmax.f32 %v4562_v33, 0.0 }
 0x2b8   : > { %2238 = vperm.xlu1 %3526, %v4508_v57   ;;  %1955 = vperm.xlu0 %3528, %v1903_v54   ;;  %v1882_v57 = vadd.f32 %v4500_v1, %v1859_v53  ;;  %v1910_v58 = vmax.f32 %v4567_v0, 0.0  ;;  %v4646_v33 = vrot.slane %v1911_v56, %v2295_v48  ;;  %v4655_v53 = vld [vmem:[%s5376_s17] ss:$0 sm:$0xff] }
 0x2b9   : > { %v1908_v50 = vmax.f32 %v4572_v16, 0.0 }
 0x2ba   : > { %v1898_v28 = vmax.f32 %v1882_v57, 0.0 }
 0x2bc   : > { %2270 = vperm.xlu1 %3526, %v1905_v51   ;;  %3529 = vset.pattern.permute.xlu0 %v5432_v7  ;;  %v1890_v51 = vadd.f32 %v4500_v1, %v1867_v20  ;;  %v1909_v1 = vmax.f32 %v4558_v3, 0.0 }
 0x2bd   : > { %2030 = vperm.xlu0 %3529, %v1895_v45  }
 0x2be   : > { %v1906_v15 = vmax.f32 %v1890_v51, 0.0 }
 0x2c0   : > { %3527 = vset.pattern.permute.xlu1 %v5434_v21 }
 0x2c1   : > { %1915 = vperm.xlu1 %3527, %v1895_v45   ;;  %3532 = vset.pattern.permute.xlu0 %v5433_v30 }
 0x2c2   : > { %2162 = vperm.xlu0 %3532, %v1903_v54  }
 0x2c5   : > { %3530 = vset.pattern.permute.xlu1 %v5432_v7 }
 0x2c6   : > { %2062 = vperm.xlu1 %3530, %v1903_v54   ;;  %3533 = vset.pattern.permute.xlu0 %v3643_v18 }
 0x2c7   : > { %2230 = vperm.xlu0 %3533, %v1895_v45  }
 0x2ca   : > { %3531 = vset.pattern.permute.xlu1 %v5433_v30 }
 0x2cb   : > { %2130 = vperm.xlu1 %3531, %v1895_v45   ;;  %3536 = vset.pattern.permute.xlu0 %v5432_v7 }
 0x2cc   : > { %2042 = vperm.xlu0 %3536, %v1898_v28  }
 0x2cf   : > { %3534 = vset.pattern.permute.xlu1 %v3643_v18 }
 0x2d0   : > { %2262 = vperm.xlu1 %3534, %v1903_v54   ;;  %2074 = vperm.xlu0 %3536, %v1906_v15  }
 0x2d4   : > { %3535 = vset.pattern.permute.xlu1 %v5434_v21  ;;  %3538 = vset.pattern.permute.xlu0 %v3643_v18 }
 0x2d5   : > { %1930 = vperm.xlu1 %3535, %v1898_v28   ;;  %2242 = vperm.xlu0 %3538, %v1898_v28  }
 0x2d9   : > { %1970 = vperm.xlu1 %3535, %v1906_v15   ;;  %2274 = vperm.xlu0 %3538, %v1906_v15  }
 0x2dd   : > { %3537 = vset.pattern.permute.xlu1 %v5433_v30  ;;  %3539 = vset.pattern.permute.xlu0 %v5434_v21 }
 0x2de   : > { %2142 = vperm.xlu1 %3537, %v1898_v28   ;;  %1920 = vperm.xlu0 %3539, %v1896_v17  }
 0x2e2   : > { %2174 = vperm.xlu1 %3537, %v1906_v15   ;;  %3542 = vset.pattern.permute.xlu0 %v5432_v7 }
 0x2e3   : > { %2066 = vperm.xlu0 %3542, %v1904_v55  }
 0x2e6   : > { %3540 = vset.pattern.permute.xlu1 %v5434_v21 }
 0x2e7   : > { %1960 = vperm.xlu1 %3540, %v1904_v55   ;;  %3543 = vset.pattern.permute.xlu0 %v5433_v30 }
 0x2e8   : > { %2134 = vperm.xlu0 %3543, %v1896_v17  }
 0x2eb   : > { %3541 = vset.pattern.permute.xlu1 %v5432_v7 }
 0x2ec   : > { %2034 = vperm.xlu1 %3541, %v1896_v17   ;;  %3546 = vset.pattern.permute.xlu0 %v3643_v18 }
 0x2ed   : > { %2266 = vperm.xlu0 %3546, %v1904_v55  }
 0x2f0   : > { %3544 = vset.pattern.permute.xlu1 %v5433_v30 }
 0x2f1   : > { %2166 = vperm.xlu1 %3544, %v1904_v55   ;;  %3547 = vset.pattern.permute.xlu0 %v5434_v21 }
 0x2f2   : > { %1945 = vperm.xlu0 %3547, %v1901_v42  }
 0x2f5   : > { %3545 = vset.pattern.permute.xlu1 %v3643_v18 }
 0x2f6   : > { %2234 = vperm.xlu1 %3545, %v1896_v17   ;;  %1985 = vperm.xlu0 %3547, %v1909_v1  }
 0x2fa   : > { %3548 = vset.pattern.permute.xlu1 %v5432_v7  ;;  %3549 = vset.pattern.permute.xlu0 %v5433_v30 }
 0x2fb   : > { %2054 = vperm.xlu1 %3548, %v1901_v42   ;;  %2154 = vperm.xlu0 %3549, %v1901_v42  }
 0x2ff   : > { %2086 = vperm.xlu1 %3548, %v1909_v1   ;;  %2186 = vperm.xlu0 %3549, %v1909_v1  }
 0x303   : > { %3550 = vset.pattern.permute.xlu1 %v3643_v18  ;;  %3551 = vset.pattern.permute.xlu0 %v5434_v21 }
 0x304   : > { %2254 = vperm.xlu1 %3550, %v1901_v42   ;;  %1935 = vperm.xlu0 %3551, %v1899_v63  }
 0x308   : > { %2286 = vperm.xlu1 %3550, %v1909_v1   ;;  %1975 = vperm.xlu0 %3551, %v1907_v9  }
 0x30c   : > { %3552 = vset.pattern.permute.xlu1 %v5432_v7  ;;  %3553 = vset.pattern.permute.xlu0 %v5433_v30 }
 0x30d   : > { %2046 = vperm.xlu1 %3552, %v1899_v63   ;;  %2146 = vperm.xlu0 %3553, %v1899_v63  }
 0x311   : > { %2078 = vperm.xlu1 %3552, %v1907_v9   ;;  %2178 = vperm.xlu0 %3553, %v1907_v9  }
 0x315   : > { %3554 = vset.pattern.permute.xlu1 %v3643_v18  ;;  %3556 = vset.pattern.permute.xlu0 %v5432_v7 }
 0x316   : > { %2246 = vperm.xlu1 %3554, %v1899_v63   ;;  %2058 = vperm.xlu0 %3556, %v1902_v60  }
 0x31a   : > { %2278 = vperm.xlu1 %3554, %v1907_v9   ;;  %2090 = vperm.xlu0 %3556, %v1910_v58  }
 0x31e   : > { %3555 = vset.pattern.permute.xlu1 %v5434_v21  ;;  %3558 = vset.pattern.permute.xlu0 %v3643_v18 }
 0x31f   : > { %1950 = vperm.xlu1 %3555, %v1902_v60   ;;  %2258 = vperm.xlu0 %3558, %v1902_v60   ;;  %v1926_v29 = vpop.permute.xlu1 %1925 }
 0x320   : > { %v1999_v2 = vmul.f32 %v4635_v37, %v1926_v29 }
 0x323   : > { %1990 = vperm.xlu1 %3555, %v1910_v58   ;;  %2290 = vperm.xlu0 %3558, %v1910_v58  }
 0x324   : > { %v2039_v27 = vpop.permute.xlu1 %2038 }
 0x325   : > { %v2099_v47 = vmul.f32 %v4632_v38, %v2039_v27 }
 0x327   : > { %3557 = vset.pattern.permute.xlu1 %v5433_v30  ;;  %3560 = vset.pattern.permute.xlu0 %v5432_v7  ;;  %v5437_v7 = vld [vmem:[#allocation5_spill] sm:$0xff]  ;;  %v2115_v59 = vadd.f32 %v2099_v47, %v1999_v2 }
 0x328   : > { %2158 = vperm.xlu1 %3557, %v1902_v60   ;;  %2050 = vperm.xlu0 %3560, %v1900_v61   ;;  %v4640_v19 = vrot.slane %v1911_v56, %v5437_v7 }
 0x32c   : > { %2190 = vperm.xlu1 %3557, %v1910_v58   ;;  %2082 = vperm.xlu0 %3560, %v1908_v50  }
 0x32d   : > { %v2071_v35 = vpop.permute.xlu1 %2070  ;;  %v1966_v34 = vpop.permute.xlu0 %1965 }
 0x32e   : > { %v2107_v62 = vmul.f32 %v4632_v38, %v2071_v35  ;;  %v2007_v0 = vmul.f32 %v4635_v37, %v1966_v34 }
 0x330   : > { %3559 = vset.pattern.permute.xlu1 %v5434_v21  ;;  %3562 = vset.pattern.permute.xlu0 %v3643_v18  ;;  %v2123_v49 = vadd.f32 %v2107_v62, %v2007_v0 }
 0x331   : > { %1940 = vperm.xlu1 %3559, %v1900_v61   ;;  %2250 = vperm.xlu0 %3562, %v1900_v61  }
 0x332   : > { %v2139_v14 = vpop.permute.xlu1 %2138  ;;  %v2171_v3 = vpop.permute.xlu0 %2170 }
 0x333   : > { %v2199_v54 = vmul.f32 %v4640_v19, %v2139_v14  ;;  %v2207_v45 = vmul.f32 %v4640_v19, %v2171_v3 }
 0x335   : > { %1980 = vperm.xlu1 %3559, %v1908_v50   ;;  %2282 = vperm.xlu0 %3562, %v1908_v50   ;;  %v2215_v16 = vadd.f32 %v2199_v54, %v2115_v59  ;;  %v2223_v28 = vadd.f32 %v2207_v45, %v2123_v49 }
 0x337   : > { %v2239_v18 = vpop.permute.xlu1 %2238  ;;  %v1956_v21 = vpop.permute.xlu0 %1955 }
 0x338   : > { %v2299_v8 = vmul.f32 %v4646_v33, %v2239_v18  ;;  %v2005_v32 = vmul.f32 %v4635_v37, %v1956_v21 }
 0x339   : > { %3561 = vset.pattern.permute.xlu1 %v5433_v30 }
 0x33a   : > { %v2315_v57 = vadd.f32 %v2299_v8, %v2215_v16  ;;  %2150 = vperm.xlu1 %3561, %v1900_v61  }
 0x33b   : > { %v2271_v20 = vpop.permute.xlu1 %2270 }
 0x33c   : > { %v2337_v51 = vadd.f32 %v4655_v53, %v2315_v57  ;;  %v2307_v15 = vmul.f32 %v4646_v33, %v2271_v20  ;;  %v2031_v39 = vpop.permute.xlu0 %2030 }
 0x33d   : > { %v2097_v7 = vmul.f32 %v4632_v38, %v2031_v39 }
 0x33e   : > { %v2366_v41 = vsel %vm2351_vm1, %v2337_v51, -inf  ;;  %v2323_v40 = vadd.f32 %v2307_v15, %v2223_v28  ;;  %2182 = vperm.xlu1 %3561, %v1908_v50  }
 0x33f   : > { %v2367_v17 = vrot.slane %v2366_v41, 4 }
 0x340   : > { %v2345_v55 = vadd.f32 %v4655_v53, %v2323_v40  ;;  %v1916_v42 = vpop.permute.xlu1 %1915 }
 0x341   : > { %v2368_v30 = vmax.f32 %v2366_v41, %v2367_v17  ;;  %v2163_v1 = vpop.permute.xlu0 %2162  ;;  %v1997_v34 = vmul.f32 %v4635_v37, %v1916_v42 }
 0x342   : > { %v2422_v63 = vsel %vm2351_vm1, %v2345_v55, -inf  ;;  %v2205_v45 = vmul.f32 %v4640_v19, %v2163_v1 }
 0x343   : > { %v2369_v9 = vrot.slane %v2368_v30, 2  ;;  %v2423_v60 = vrot.slane %v2422_v63, 4  ;;  %v2113_v3 = vadd.f32 %v2097_v7, %v1997_v34 }
 0x345   : > { %v2370_v58 = vmax.f32 %v2368_v30, %v2369_v9  ;;  %v2424_v29 = vmax.f32 %v2422_v63, %v2423_v60  ;;  %v2063_v61 = vpop.permute.xlu1 %2062 }
 0x346   : > { %v2231_v27 = vpop.permute.xlu0 %2230  ;;  %v2105_v50 = vmul.f32 %v4632_v38, %v2063_v61 }
 0x347   : > { %v2371_v56 = vrot.slane %v2370_v58, 1  ;;  %v2425_v35 = vrot.slane %v2424_v29, 2  ;;  %v2297_v18 = vmul.f32 %v4646_v33, %v2231_v27 }
 0x348   : > { %v2121_v59 = vadd.f32 %v2105_v50, %v2005_v32 }
 0x349   : > { %v2372_v52 = vmax.f32 %v2370_v58, %v2371_v56  ;;  %v2426_v24 = vmax.f32 %v2424_v29, %v2425_v35 }
 0x34a   : > { %v2131_v48 = vpop.permute.xlu1 %2130  ;;  %v2221_v20 = vadd.f32 %v2205_v45, %v2121_v59 }
 0x34b   : > { %v2466_v47 = vsub.f32 %v2337_v51, %v2372_v52  ;;  %v2427_v14 = vrot.slane %v2426_v24, 1  ;;  %v2197_v2 = vmul.f32 %v4640_v19, %v2131_v48  ;;  %v2043_v54 = vpop.permute.xlu0 %2042 }
 0x34c   : > { %v2100_v50 = vmul.f32 %v4632_v38, %v2043_v54 }
 0x34d   : > { %v2484_v62 = vmul.f32 1.442695, %v2466_v47  ;;  %v2428_v0 = vmax.f32 %v2426_v24, %v2427_v14  ;;  %v2213_v16 = vadd.f32 %v2197_v2, %v2113_v3 }
 0x34f   : > { %3567 = vpow2.f32 %v2484_v62  ;;  %v2474_v8 = vsub.f32 %v2345_v55, %v2428_v0  ;;  %v2313_v49 = vadd.f32 %v2297_v18, %v2213_v16  ;;  %v2263_v57 = vpop.permute.xlu1 %2262  ;;  %v2075_v21 = vpop.permute.xlu0 %2074 }
 0x350   : > { %v2305_v28 = vmul.f32 %v4646_v33, %v2263_v57 }
 0x351   : > { %v2500_v51 = vmul.f32 1.442695, %v2474_v8  ;;  %v2335_v15 = vadd.f32 %v4655_v53, %v2313_v49  ;;  %v2108_v8 = vmul.f32 %v4632_v38, %v2075_v21 }
 0x352   : > { %v2321_v39 = vadd.f32 %v2305_v28, %v2221_v20 }
 0x353   : > { %3569 = vpow2.f32 %v2500_v51  ;;  %v2352_v41 = vsel %vm2351_vm1, %v2335_v15, -inf }
 0x354   : > { %v2353_v40 = vrot.slane %v2352_v41, 4  ;;  %v2343_v17 = vadd.f32 %v4655_v53, %v2321_v39  ;;  %v1931_v42 = vpop.permute.xlu1 %1930  ;;  %v2243_v30 = vpop.permute.xlu0 %2242 }
 0x355   : > { %v2000_v27 = vmul.f32 %v4635_v37, %v1931_v42  ;;  %v2300_v49 = vmul.f32 %v4646_v33, %v2243_v30 }
 0x356   : > { %v2354_v1 = vmax.f32 %v2352_v41, %v2353_v40  ;;  %v2408_v55 = vsel %vm2351_vm1, %v2343_v17, -inf }
 0x357   : > { %v2409_v63 = vrot.slane %v2408_v55, 4  ;;  %v2116_v47 = vadd.f32 %v2100_v50, %v2000_v27 }
 0x358   : > { %v2355_v9 = vrot.slane %v2354_v1, 2  ;;  %v1971_v60 = vpop.permute.xlu1 %1970  ;;  %v2275_v58 = vpop.permute.xlu0 %2274 }
 0x359   : > { %v4675_v29 = vpop.eup %3567  ;;  %v2410_v61 = vmax.f32 %v2408_v55, %v2409_v63  ;;  %v2008_v62 = vmul.f32 %v4635_v37, %v1971_v60 }
 0x35a   : > { %v2526_v56 = vsel %vm2351_vm1, %v4675_v29, 0.0  ;;  %v2356_v35 = vmax.f32 %v2354_v1, %v2355_v9 }
 0x35b   : > { %v2527_v34 = vrot.slane %v2526_v56, 4  ;;  %v2411_v52 = vrot.slane %v2410_v61, 2  ;;  %v2124_v40 = vadd.f32 %v2108_v8, %v2008_v62 }
 0x35c   : > { %v2357_v24 = vrot.slane %v2356_v35, 1 }
 0x35d   : > { %v4681_v7 = vpop.eup %3569  ;;  %v2528_v32 = vadd.f32 %v2527_v34, %v2526_v56  ;;  %v2412_v48 = vmax.f32 %v2410_v61, %v2411_v52  ;;  %v2143_v14 = vpop.permute.xlu1 %2142 }
 0x35e   : > { %v1921_v3 = vpop.permute.xlu0 %1920  ;;  %v2582_v2 = vsel %vm2351_vm1, %v4681_v7, 0.0  ;;  %v2358_v59 = vmax.f32 %v2356_v35, %v2357_v24  ;;  %v2200_v0 = vmul.f32 %v4640_v19, %v2143_v14 }
 0x35f   : > { %v2529_v18 = vrot.slane %v2528_v32, 2  ;;  %v2583_v16 = vrot.slane %v2582_v2, 4  ;;  %v2413_v54 = vrot.slane %v2412_v48, 1 }
 0x360   : > { %v2464_v45 = vsub.f32 %v2335_v15, %v2358_v59  ;;  %v2216_v57 = vadd.f32 %v2200_v0, %v2116_v47  ;;  %v2308_v15 = vmul.f32 %v4646_v33, %v2275_v58 }
 0x361   : > { %v2530_v20 = vadd.f32 %v2529_v18, %v2528_v32  ;;  %v2584_v28 = vadd.f32 %v2583_v16, %v2582_v2  ;;  %v2414_v51 = vmax.f32 %v2412_v48, %v2413_v54  ;;  %v2175_v39 = vpop.permute.xlu1 %2174 }
 0x362   : > { %v2480_v41 = vmul.f32 1.442695, %v2464_v45  ;;  %v2316_v42 = vadd.f32 %v2300_v49, %v2216_v57  ;;  %v2208_v1 = vmul.f32 %v4640_v19, %v2175_v39  ;;  %v2067_v55 = vpop.permute.xlu0 %2066 }
 0x363   : > { %v2531_v63 = vrot.slane %v2530_v20, 1  ;;  %v2585_v9 = vrot.slane %v2584_v28, 2  ;;  %v2472_v60 = vsub.f32 %v2343_v17, %v2414_v51  ;;  %v2106_v8 = vmul.f32 %v4632_v38, %v2067_v55 }
 0x364   : > { %3571 = vpow2.f32 %v2480_v41  ;;  %v2338_v21 = vadd.f32 %v4655_v53, %v2316_v42  ;;  %v2224_v30 = vadd.f32 %v2208_v1, %v2124_v40 }
 0x365   : > { %v2532_v61 = vadd.f32 %v2531_v63, %v2530_v20  ;;  %v2586_v27 = vadd.f32 %v2585_v9, %v2584_v28  ;;  %v2496_v56 = vmul.f32 1.442695, %v2472_v60  ;;  %v1998_v20 = vmul.f32 %v4635_v37, %v1921_v3 }
 0x366   : > { %v2373_v35 = vsel %vm2351_vm1, %v2338_v21, -inf  ;;  %v2324_v34 = vadd.f32 %v2308_v15, %v2224_v30  ;;  %v1961_v50 = vpop.permute.xlu1 %1960 }
 0x367   : > { %3573 = vrcp.f32 %v2532_v61  ;;  %v2587_v52 = vrot.slane %v2586_v27, 1  ;;  %v2374_v24 = vrot.slane %v2373_v35, 4  ;;  %v2135_v32 = vpop.permute.xlu0 %2134  ;;  %v2006_v62 = vmul.f32 %v4635_v37, %v1961_v50 }
 0x368   : > { %3575 = vpow2.f32 %v2496_v56  ;;  %v2346_v17 = vadd.f32 %v4655_v53, %v2324_v34  ;;  %v2198_v61 = vmul.f32 %v4640_v19, %v2135_v32 }
 0x369   : > { %v2588_v48 = vadd.f32 %v2587_v52, %v2586_v27  ;;  %v2375_v47 = vmax.f32 %v2373_v35, %v2374_v24  ;;  %v2122_v39 = vadd.f32 %v2106_v8, %v2006_v62 }
 0x36a   : > { %v2429_v58 = vsel %vm2351_vm1, %v2346_v17, -inf }
 0x36b   : > { %3577 = vrcp.f32 %v2588_v48  ;;  %v2376_v14 = vrot.slane %v2375_v47, 2  ;;  %v2430_v2 = vrot.slane %v2429_v58, 4  ;;  %v2035_v59 = vpop.permute.xlu1 %2034 }
 0x36c   : > { %v2267_v0 = vpop.permute.xlu0 %2266  ;;  %v2098_v54 = vmul.f32 %v4632_v38, %v2035_v59 }
 0x36d   : > { %v2377_v18 = vmax.f32 %v2375_v47, %v2376_v14  ;;  %v2431_v16 = vmax.f32 %v2429_v58, %v2430_v2  ;;  %v2306_v3 = vmul.f32 %v4646_v33, %v2267_v0 }
 0x36e   : > { %v4697_v45 = vpop.eup %3571  ;;  %v2114_v63 = vadd.f32 %v2098_v54, %v1998_v20 }
 0x36f   : > { %v2512_v49 = vsel %vm2351_vm1, %v4697_v45, 0.0  ;;  %v2378_v57 = vrot.slane %v2377_v18, 1  ;;  %v2432_v28 = vrot.slane %v2431_v16, 2 }
 0x370   : > { %v2513_v51 = vrot.slane %v2512_v49, 4  ;;  %v2167_v41 = vpop.permute.xlu1 %2166  ;;  %v2214_v32 = vadd.f32 %v2198_v61, %v2114_v63 }
 0x371   : > { %v3574_v40 = vpop.eup %3573  ;;  %v2379_v42 = vmax.f32 %v2377_v18, %v2378_v57  ;;  %v2433_v1 = vmax.f32 %v2431_v16, %v2432_v28  ;;  %v2206_v9 = vmul.f32 %v4640_v19, %v2167_v41  ;;  %v1946_v60 = vpop.permute.xlu0 %1945 }
 0x372   : > { %v4704_v15 = vpop.eup %3575  ;;  %v4707_v55 = vmul.f32 %v3574_v40, %v4675_v29  ;;  %v2514_v30 = vadd.f32 %v2513_v51, %v2512_v49 }
 0x373   : > { %v2568_v27 = vsel %vm2351_vm1, %v4704_v15, 0.0  ;;  %v2467_v56 = vsub.f32 %v2338_v21, %v2379_v42  ;;  %v2434_v35 = vrot.slane %v2433_v1, 1  ;;  %v2222_v34 = vadd.f32 %v2206_v9, %v2122_v39 }
 0x374   : > { %v2515_v50 = vrot.slane %v2514_v30, 2  ;;  %v2569_v52 = vrot.slane %v2568_v27, 4  ;;  %2676 = vrot.lane.b32.xlu1 %v4707_v55, %s3644_s26 }
 0x375   : > { %v3578_v24 = vpop.eup %3577  ;;  %v2486_v29 = vmul.f32 1.442695, %v2467_v56  ;;  %v2435_v48 = vmax.f32 %v2433_v1, %v2434_v35  ;;  %v2322_v47 = vadd.f32 %v2306_v3, %v2222_v34  ;;  %v2235_v58 = vpop.permute.xlu1 %2234 }
 0x376   : > { %v1986_v14 = vpop.permute.xlu0 %1985  ;;  %v4716_v2 = vmul.f32 %v3578_v24, %v4681_v7  ;;  %v2516_v59 = vadd.f32 %v2515_v50, %v2514_v30  ;;  %v2570_v21 = vadd.f32 %v2569_v52, %v2568_v27  ;;  %v2298_v62 = vmul.f32 %v4646_v33, %v2235_v58 }
 0x377   : > { %3579 = vpow2.f32 %v2486_v29  ;;  %v2475_v0 = vsub.f32 %v2346_v17, %v2435_v48  ;;  %v4720_v18 = vadd.f32 %v4655_v53, %v2322_v47  ;;  %v2003_v30 = vmul.f32 %v4635_v37, %v1946_v60 }
 0x378   : > { %v2571_v16 = vrot.slane %v2570_v21, 2  ;;  %v2314_v54 = vadd.f32 %v2298_v62, %v2214_v32  ;;  %2884 = vrot.lane.b32.xlu0 %v4716_v2, %s3645_s29  ;;  %2692 = vrot.lane.b32.xlu1 %v4716_v2, %s3644_s26  ;;  %v2517_v49 = vrot.slane %v2516_v59, 1  ;;  %v2011_v24 = vmul.f32 %v4635_v37, %v1986_v14 }
 0x379   : > { %v2502_v7 = vmul.f32 1.442695, %v2475_v0  ;;  %v2415_v8 = vsel %vm2351_vm1, %v4720_v18, -inf }
 0x37a   : > { %v2572_v57 = vadd.f32 %v2571_v16, %v2570_v21  ;;  %v2416_v20 = vrot.slane %v2415_v8, 4  ;;  %v4729_v17 = vadd.f32 %v4655_v53, %v2314_v54  ;;  %v2055_v28 = vpop.permute.xlu1 %2054  ;;  %v2155_v51 = vpop.permute.xlu0 %2154  ;;  %v2518_v63 = vadd.f32 %v2517_v49, %v2516_v59 }
 0x37b   : > { %3581 = vpow2.f32 %v2502_v7  ;;  %v2103_v40 = vmul.f32 %v4632_v38, %v2055_v28  ;;  %v2203_v29 = vmul.f32 %v4640_v19, %v2155_v51 }
 0x37c   : > { %v2573_v39 = vrot.slane %v2572_v57, 1  ;;  %v2359_v41 = vsel %vm2351_vm1, %v4729_v17, -inf  ;;  %2932 = vrot.lane.b32.xlu0 %v4716_v2, %s3646_s0  ;;  %2724 = vrot.lane.b32.xlu1 %v4707_v55, %s3647_s19  ;;  %v2417_v42 = vmax.f32 %v2415_v8, %v2416_v20 }
 0x37d   : > { %v2360_v1 = vrot.slane %v2359_v41, 4  ;;  %v2119_v56 = vadd.f32 %v2103_v40, %v2003_v30 }
 0x37e   : > { %v2574_v9 = vadd.f32 %v2573_v39, %v2572_v57  ;;  %v2087_v61 = vpop.permute.xlu1 %2086  ;;  %v2187_v3 = vpop.permute.xlu0 %2186  ;;  %v2418_v50 = vrot.slane %v2417_v42, 2 }
 0x37f   : > { %v2361_v27 = vmax.f32 %v2359_v41, %v2360_v1  ;;  %v2111_v35 = vmul.f32 %v4632_v38, %v2087_v61  ;;  %v2219_v59 = vadd.f32 %v2203_v29, %v2119_v56  ;;  %v2211_v8 = vmul.f32 %v4640_v19, %v2187_v3 }
 0x380   : > { %3583 = vrcp.f32 %v2574_v9  ;;  %2980 = vrot.lane.b32.xlu0 %v4716_v2, %s3648_s1  ;;  %2740 = vrot.lane.b32.xlu1 %v4716_v2, %s3647_s19  ;;  %v2419_v54 = vmax.f32 %v2417_v42, %v2418_v50 }
 0x381   : > { %v4744_v34 = vpop.eup %3579  ;;  %v2362_v52 = vrot.slane %v2361_v27, 2  ;;  %3585 = vrcp.f32 %v2518_v63  ;;  %v2127_v21 = vadd.f32 %v2111_v35, %v2011_v24 }
 0x382   : > { %v2533_v60 = vsel %vm2351_vm1, %v4744_v34, 0.0  ;;  %v2420_v63 = vrot.slane %v2419_v54, 1 }
 0x383   : > { %v2534_v48 = vrot.slane %v2533_v60, 4  ;;  %v2363_v47 = vmax.f32 %v2361_v27, %v2362_v52  ;;  %v2255_v58 = vpop.permute.xlu1 %2254  ;;  %v1936_v32 = vpop.permute.xlu0 %1935  ;;  %v2227_v51 = vadd.f32 %v2211_v8, %v2127_v21 }
 0x384   : > { %v2303_v62 = vmul.f32 %v4646_v33, %v2255_v58  ;;  %2772 = vrot.lane.b32.xlu1 %v4707_v55, %s3649_s20 }
 0x385   : > { %v4753_v0 = vpop.eup %3581  ;;  %v2535_v16 = vadd.f32 %v2534_v48, %v2533_v60  ;;  %v2364_v7 = vrot.slane %v2363_v47, 1  ;;  %v2421_v48 = vmax.f32 %v2419_v54, %v2420_v63 }
 0x386   : > { %v2589_v14 = vsel %vm2351_vm1, %v4753_v0, 0.0  ;;  %v2319_v49 = vadd.f32 %v2303_v62, %v2219_v59 }
 0x387   : > { %v2536_v57 = vrot.slane %v2535_v16, 2  ;;  %v2590_v20 = vrot.slane %v2589_v14, 4  ;;  %v2287_v28 = vpop.permute.xlu1 %2286  ;;  %v1976_v40 = vpop.permute.xlu0 %1975  ;;  %v2365_v9 = vmax.f32 %v2363_v47, %v2364_v7 }
 0x388   : > { %v4759_v39 = vadd.f32 %v4655_v53, %v2319_v49  ;;  %v2311_v41 = vmul.f32 %v4646_v33, %v2287_v28  ;;  %2788 = vrot.lane.b32.xlu1 %v4716_v2, %s3649_s20 }
 0x389   : > { %v2537_v42 = vadd.f32 %v2536_v57, %v2535_v16  ;;  %v2591_v1 = vadd.f32 %v2590_v20, %v2589_v14  ;;  %v2465_v47 = vsub.f32 %v4729_v17, %v2365_v9  ;;  %v2473_v17 = vsub.f32 %v4720_v18, %v2421_v48 }
 0x38a   : > { %v3584_v30 = vpop.eup %3583  ;;  %v2394_v61 = vsel %vm2351_vm1, %v4759_v39, -inf  ;;  %v2327_v3 = vadd.f32 %v2311_v41, %v2227_v51  ;;  %v2009_v18 = vmul.f32 %v4635_v37, %v1976_v40 }
 0x38b   : > { %v4767_v27 = vmul.f32 %v3584_v30, %v4704_v15  ;;  %v2538_v56 = vrot.slane %v2537_v42, 1  ;;  %v2592_v35 = vrot.slane %v2591_v1, 2  ;;  %v3586_v50 = vpop.eup %3585  ;;  %v2395_v52 = vrot.slane %v2394_v61, 4 }
 0x38c   : > { %v4770_v60 = vadd.f32 %v4655_v53, %v2327_v3  ;;  %v2047_v24 = vpop.permute.xlu1 %2046  ;;  %2820 = vrot.lane.b32.xlu1 %v4707_v55, %s3650_s22  ;;  %v2147_v59 = vpop.permute.xlu0 %2146  ;;  %v4780_v21 = vmul.f32 %v3586_v50, %v4697_v45  ;;  %v2482_v54 = vmul.f32 1.442695, %v2465_v47  ;;  %v2001_v45 = vmul.f32 %v4635_v37, %v1936_v32 }
 0x38d   : > { %v2593_v29 = vadd.f32 %v2592_v35, %v2591_v1  ;;  %2880 = vrot.lane.b32.xlu0 %v4767_v27, %s3645_s29  ;;  %v2539_v15 = vadd.f32 %v2538_v56, %v2537_v42  ;;  %v2396_v16 = vmax.f32 %v2394_v61, %v2395_v52  ;;  %v2101_v14 = vmul.f32 %v4632_v38, %v2047_v24 }
 0x38e   : > { %v2450_v58 = vsel %vm2351_vm1, %v4770_v60, -inf  ;;  %v2498_v42 = vmul.f32 1.442695, %v2473_v17  ;;  %v2201_v32 = vmul.f32 %v4640_v19, %v2147_v59 }
 0x38f   : > { %v2594_v62 = vrot.slane %v2593_v29, 1  ;;  %v2451_v7 = vrot.slane %v2450_v58, 4  ;;  %3587 = vrcp.f32 %v2539_v15  ;;  %v2397_v57 = vrot.slane %v2396_v16, 2 }
 0x390   : > { %v2079_v8 = vpop.permute.xlu1 %2078  ;;  %2836 = vrot.lane.b32.xlu1 %v4716_v2, %s3650_s22  ;;  %v2117_v51 = vadd.f32 %v2101_v14, %v2001_v45  ;;  %v2179_v41 = vpop.permute.xlu0 %2178  ;;  %3589 = vpow2.f32 %v2482_v54 }
 0x391   : > { %2912 = vrot.lane.b32.xlu0 %v4780_v21, %s3646_s0  ;;  %v2595_v49 = vadd.f32 %v2594_v62, %v2593_v29  ;;  %v2109_v20 = vmul.f32 %v4632_v38, %v2079_v8  ;;  %v2452_v28 = vmax.f32 %v2450_v58, %v2451_v7  ;;  %v2398_v9 = vmax.f32 %v2396_v16, %v2397_v57 }
 0x392   : > { %v2217_v3 = vadd.f32 %v2201_v32, %v2117_v51  ;;  %v2209_v56 = vmul.f32 %v4640_v19, %v2179_v41 }
 0x393   : > { %3591 = vrcp.f32 %v2595_v49  ;;  %v2125_v30 = vadd.f32 %v2109_v20, %v2009_v18  ;;  %v2453_v61 = vrot.slane %v2452_v28, 2  ;;  %v2399_v52 = vrot.slane %v2398_v9, 1 }
 0x394   : > { %2868 = vrot.lane.b32.xlu1 %v4707_v55, %s3645_s29  ;;  %3593 = vpow2.f32 %v2498_v42 }
 0x395   : > { %2928 = vrot.lane.b32.xlu0 %v4767_v27, %s3646_s0  ;;  %v2247_v1 = vpop.permute.xlu1 %2246  ;;  %v2059_v50 = vpop.permute.xlu0 %2058  ;;  %v2225_v24 = vadd.f32 %v2209_v56, %v2125_v30  ;;  %v2454_v47 = vmax.f32 %v2452_v28, %v2453_v61  ;;  %v2400_v7 = vmax.f32 %v2398_v9, %v2399_v52 }
 0x396   : > { %v2301_v63 = vmul.f32 %v4646_v33, %v2247_v1  ;;  %v2104_v9 = vmul.f32 %v4632_v38, %v2059_v50 }
 0x397   : > { %v2455_v17 = vrot.slane %v2454_v47, 1  ;;  %v2470_v41 = vsub.f32 %v4759_v39, %v2400_v7 }
 0x398   : > { %2916 = vrot.lane.b32.xlu1 %v4707_v55, %s3646_s0  ;;  %v2317_v35 = vadd.f32 %v2301_v63, %v2217_v3 }
 0x399   : > { %2960 = vrot.lane.b32.xlu0 %v4780_v21, %s3648_s1  ;;  %v2279_v40 = vpop.permute.xlu1 %2278  ;;  %v3588_v48 = vpop.eup %3587  ;;  %v2456_v42 = vmax.f32 %v2454_v47, %v2455_v17  ;;  %v2492_v61 = vmul.f32 1.442695, %v2470_v41 }
 0x39a   : > { %v2309_v29 = vmul.f32 %v4646_v33, %v2279_v40  ;;  %v4808_v58 = vadd.f32 %v4655_v53, %v2317_v35  ;;  %v4810_v62 = vpop.eup %3589  ;;  %v4813_v16 = vmul.f32 %v3588_v48, %v4744_v34  ;;  %v2091_v54 = vpop.permute.xlu0 %2090 }
 0x39b   : > { %v2519_v34 = vsel %vm2351_vm1, %v4810_v62, 0.0  ;;  %v2478_v3 = vsub.f32 %v4770_v60, %v2456_v42  ;;  %v2112_v48 = vmul.f32 %v4632_v38, %v2091_v54  ;;  %3595 = vpow2.f32 %v2492_v61 }
 0x39c   : > { %2964 = vrot.lane.b32.xlu1 %v4707_v55, %s3648_s1  ;;  %v2325_v15 = vadd.f32 %v2309_v29, %v2225_v24  ;;  %v2380_v45 = vsel %vm2351_vm1, %v4808_v58, -inf  ;;  %v2520_v1 = vrot.slane %v2519_v34, 4 }
 0x39d   : > { %2976 = vrot.lane.b32.xlu0 %v4767_v27, %s3648_s1  ;;  %v3592_v8 = vpop.eup %3591  ;;  %v2381_v32 = vrot.slane %v2380_v45, 4 }
 0x39e   : > { %v1951_v59 = vpop.permute.xlu1 %1950  ;;  %v4816_v14 = vadd.f32 %v4655_v53, %v2325_v15  ;;  %v4828_v28 = vpop.eup %3593  ;;  %v4831_v51 = vmul.f32 %v3592_v8, %v4753_v0  ;;  %v2521_v24 = vadd.f32 %v2520_v1, %v2519_v34 }
 0x39f   : > { %v2004_v18 = vmul.f32 %v4635_v37, %v1951_v59  ;;  %v2575_v63 = vsel %vm2351_vm1, %v4828_v28, 0.0  ;;  %v2259_v30 = vpop.permute.xlu0 %2258  ;;  %v2382_v29 = vmax.f32 %v2380_v45, %v2381_v32  ;;  %v2508_v59 = vmul.f32 1.442695, %v2478_v3 }
 0x3a0   : > { %2672 = vrot.lane.b32.xlu1 %v4780_v21, %s3644_s26  ;;  %v2436_v49 = vsel %vm2351_vm1, %v4816_v14, -inf  ;;  %v2576_v52 = vrot.slane %v2575_v63, 4  ;;  %v2304_v47 = vmul.f32 %v4646_v33, %v2259_v30  ;;  %v2522_v54 = vrot.slane %v2521_v24, 2 }
 0x3a1   : > { %2678 = vrot.lane.b32.xlu0 %v4813_v16, %s3644_s26  ;;  %v2437_v57 = vrot.slane %v2436_v49, 4  ;;  %v2120_v56 = vadd.f32 %v2104_v9, %v2004_v18  ;;  %v2383_v45 = vrot.slane %v2382_v29, 2  ;;  %3597 = vpow2.f32 %v2508_v59 }
 0x3a2   : > { %v1991_v20 = vpop.permute.xlu1 %1990  ;;  %v2577_v34 = vadd.f32 %v2576_v52, %v2575_v63 }
 0x3a3   : > { %v2438_v0 = vmax.f32 %v2436_v49, %v2437_v57  ;;  %v2012_v40 = vmul.f32 %v4635_v37, %v1991_v20  ;;  %v2291_v8 = vpop.permute.xlu0 %2290  ;;  %v2384_v32 = vmax.f32 %v2382_v29, %v2383_v45 }
 0x3a4   : > { %2688 = vrot.lane.b32.xlu1 %v4767_v27, %s3644_s26  ;;  %v2312_v42 = vmul.f32 %v4646_v33, %v2291_v8  ;;  %v2578_v1 = vrot.slane %v2577_v34, 2 }
 0x3a5   : > { %2694 = vrot.lane.b32.xlu0 %v4831_v51, %s3644_s26  ;;  %v2439_v50 = vrot.slane %v2438_v0, 2  ;;  %v2128_v7 = vadd.f32 %v2112_v48, %v2012_v40 }
 0x3a6   : > { %v2579_v40 = vadd.f32 %v2578_v1, %v2577_v34 }
 0x3a7   : > { %v2159_v39 = vpop.permute.xlu1 %2158  ;;  %v2440_v57 = vmax.f32 %v2438_v0, %v2439_v50  ;;  %v2523_v0 = vadd.f32 %v2522_v54, %v2521_v24 }
 0x3a8   : > { %v2204_v35 = vmul.f32 %v4640_v19, %v2159_v39  ;;  %2720 = vrot.lane.b32.xlu1 %v4780_v21, %s3647_s19 }
 0x3a9   : > { %2726 = vrot.lane.b32.xlu0 %v4813_v16, %s3647_s19  ;;  %v2441_v30 = vrot.slane %v2440_v57, 1  ;;  %v2524_v24 = vrot.slane %v2523_v0, 1 }
 0x3aa   : > { %v2220_v60 = vadd.f32 %v2204_v35, %v2120_v56  ;;  %v4871_v56 = vpop.eup %3595  ;;  %v2385_v35 = vrot.slane %v2384_v32, 1 }
 0x3ab   : > { %v2191_v15 = vpop.permute.xlu1 %2190  ;;  %v2442_v50 = vmax.f32 %v2440_v57, %v2441_v30  ;;  %v2554_v8 = vsel %vm2351_vm1, %v4871_v56, 0.0  ;;  %v2525_v34 = vadd.f32 %v2524_v24, %v2523_v0 }
 0x3ac   : > { %v2320_v17 = vadd.f32 %v2304_v47, %v2220_v60  ;;  %v2212_v49 = vmul.f32 %v4640_v19, %v2191_v15  ;;  %2736 = vrot.lane.b32.xlu1 %v4767_v27, %s3647_s19  ;;  %v2051_v60 = vpop.permute.xlu0 %2050 }
 0x3ad   : > { %2742 = vrot.lane.b32.xlu0 %v4831_v51, %s3647_s19  ;;  %v2476_v45 = vsub.f32 %v4816_v14, %v2442_v50  ;;  %3599 = vrcp.f32 %v2525_v34 }
 0x3ae   : > { %v4857_v20 = vadd.f32 %v4655_v53, %v2320_v17  ;;  %v2228_v41 = vadd.f32 %v2212_v49, %v2128_v7  ;;  %v2580_v7 = vrot.slane %v2579_v40, 1  ;;  %v2386_v17 = vmax.f32 %v2384_v32, %v2385_v35  ;;  %v4883_v49 = vpop.eup %3597 }
 0x3af   : > { %v2610_v1 = vsel %vm2351_vm1, %v4883_v49, 0.0 }
 0x3b0   : > { %v2401_v18 = vsel %vm2351_vm1, %v4857_v20, -inf  ;;  %2768 = vrot.lane.b32.xlu1 %v4780_v21, %s3649_s20  ;;  %v2328_v9 = vadd.f32 %v2312_v42, %v2228_v41  ;;  %v1941_v61 = vpop.permute.xlu1 %1940  ;;  %v2555_v41 = vrot.slane %v2554_v8, 4  ;;  %v2468_v32 = vsub.f32 %v4808_v58, %v2386_v17  ;;  %v2083_v0 = vpop.permute.xlu0 %2082 }
 0x3b1   : > { %v2402_v63 = vrot.slane %v2401_v18, 4  ;;  %2774 = vrot.lane.b32.xlu0 %v4813_v16, %s3649_s20  ;;  %v2611_v35 = vrot.slane %v2610_v1, 4  ;;  %v2102_v58 = vmul.f32 %v4632_v38, %v2051_v60  ;;  %v2110_v34 = vmul.f32 %v4632_v38, %v2083_v0 }
 0x3b2   : > { %v4867_v3 = vadd.f32 %v4655_v53, %v2328_v9 }
 0x3b3   : > { %v2403_v39 = vmax.f32 %v2401_v18, %v2402_v63  ;;  %v2581_v18 = vadd.f32 %v2580_v7, %v2579_v40  ;;  %v2504_v63 = vmul.f32 1.442695, %v2476_v45  ;;  %v2488_v40 = vmul.f32 1.442695, %v2468_v32 }
 0x3b4   : > { %2784 = vrot.lane.b32.xlu1 %v4767_v27, %s3649_s20  ;;  %v2457_v29 = vsel %vm2351_vm1, %v4867_v3, -inf  ;;  %v1981_v59 = vpop.permute.xlu1 %1980 }
 0x3b5   : > { %v2404_v52 = vrot.slane %v2403_v39, 2  ;;  %2790 = vrot.lane.b32.xlu0 %v4831_v51, %s3649_s20  ;;  %v2458_v48 = vrot.slane %v2457_v29, 4  ;;  %3601 = vrcp.f32 %v2581_v18  ;;  %v2010_v60 = vmul.f32 %v4635_v37, %v1981_v59 }
 0x3b6   : > { %3603 = vpow2.f32 %v2504_v63 }
 0x3b7   : > { %v2405_v47 = vmax.f32 %v2403_v39, %v2404_v52  ;;  %v2459_v15 = vmax.f32 %v2457_v29, %v2458_v48  ;;  %v2556_v39 = vadd.f32 %v2555_v41, %v2554_v8  ;;  %v2002_v52 = vmul.f32 %v4635_v37, %v1941_v61  ;;  %v2251_v61 = vpop.permute.xlu0 %2250 }
 0x3b8   : > { %2816 = vrot.lane.b32.xlu1 %v4780_v21, %s3650_s22  ;;  %3605 = vpow2.f32 %v2488_v40  ;;  %v2126_v37 = vadd.f32 %v2110_v34, %v2010_v60 }
 0x3b9   : > { %2822 = vrot.lane.b32.xlu0 %v4813_v16, %s3650_s22  ;;  %v2406_v54 = vrot.slane %v2405_v47, 1  ;;  %v2460_v57 = vrot.slane %v2459_v15, 2  ;;  %v2151_v30 = vpop.permute.xlu1 %2150  ;;  %v2557_v48 = vrot.slane %v2556_v39, 2 }
 0x3ba   : > { %v2202_v50 = vmul.f32 %v4640_v19, %v2151_v30 }
 0x3bb   : > { %v2461_v42 = vmax.f32 %v2459_v15, %v2460_v57  ;;  %v2407_v9 = vmax.f32 %v2405_v47, %v2406_v54  ;;  %v2612_v47 = vadd.f32 %v2611_v35, %v2610_v1  ;;  %v2118_v15 = vadd.f32 %v2102_v58, %v2002_v52  ;;  %v3600_v54 = vpop.eup %3599 }
 0x3bc   : > { %2832 = vrot.lane.b32.xlu1 %v4767_v27, %s3650_s22  ;;  %v2558_v57 = vadd.f32 %v2557_v48, %v2556_v39  ;;  %v4915_v38 = vmul.f32 %v3600_v54, %v4810_v62 }
 0x3bd   : > { %2838 = vrot.lane.b32.xlu0 %v4831_v51, %s3650_s22  ;;  %v2462_v14 = vrot.slane %v2461_v42, 1  ;;  %v2471_v29 = vsub.f32 %v4857_v20, %v2407_v9  ;;  %v2183_v7 = vpop.permute.xlu1 %2182  ;;  %v2218_v17 = vadd.f32 %v2202_v50, %v2118_v15  ;;  %v2613_v41 = vrot.slane %v2612_v47, 2 }
 0x3be   : > { %v2210_v45 = vmul.f32 %v4640_v19, %v2183_v7  ;;  %v2559_v63 = vrot.slane %v2558_v57, 1 }
 0x3bf   : > { %v2463_v24 = vmax.f32 %v2461_v42, %v2462_v14  ;;  %v2494_v8 = vmul.f32 1.442695, %v2471_v29  ;;  %v2302_v42 = vmul.f32 %v4646_v33, %v2251_v61  ;;  %v3602_v1 = vpop.eup %3601  ;;  %v2614_v9 = vadd.f32 %v2613_v41, %v2612_v47 }
 0x3c0   : > { %2864 = vrot.lane.b32.xlu1 %v4780_v21, %s3645_s29  ;;  %v2226_v19 = vadd.f32 %v2210_v45, %v2126_v37  ;;  %v4917_v32 = vpop.eup %3603  ;;  %v4925_v0 = vmul.f32 %v3602_v1, %v4828_v28  ;;  %v2560_v52 = vadd.f32 %v2559_v63, %v2558_v57 }
 0x3c1   : > { %2870 = vrot.lane.b32.xlu0 %v4813_v16, %s3645_s29  ;;  %v2479_v20 = vsub.f32 %v4867_v3, %v2463_v24  ;;  %3607 = vpow2.f32 %v2494_v8  ;;  %v2283_v3 = vpop.permute.xlu0 %2282  ;;  %v2318_v18 = vadd.f32 %v2302_v42, %v2218_v17  ;;  %v2596_v39 = vsel %vm2351_vm1, %v4917_v32, 0.0 }
 0x3c2   : > { %v2310_v14 = vmul.f32 %v4646_v33, %v2283_v3  ;;  %v4930_v30 = vpop.eup %3605  ;;  %v2615_v40 = vrot.slane %v2614_v9, 1  ;;  %v2597_v28 = vrot.slane %v2596_v39, 4 }
 0x3c3   : > { %v2510_v59 = vmul.f32 1.442695, %v2479_v20  ;;  %v4928_v62 = vadd.f32 %v4655_v53, %v2318_v18  ;;  %v2540_v33 = vsel %vm2351_vm1, %v4930_v30, 0.0 }
 0x3c4   : > { %2918 = vrot.lane.b32.xlu1 %v4813_v16, %s3646_s0  ;;  %v2326_v35 = vadd.f32 %v2310_v14, %v2226_v19  ;;  %v2616_v50 = vadd.f32 %v2615_v40, %v2614_v9  ;;  %v2541_v48 = vrot.slane %v2540_v33, 4  ;;  %v2598_v15 = vadd.f32 %v2597_v28, %v2596_v39 }
 0x3c5   : > { %2886 = vrot.lane.b32.xlu0 %v4831_v51, %s3645_s29  ;;  %3609 = vpow2.f32 %v2510_v59  ;;  %v2387_v58 = vsel %vm2351_vm1, %v4928_v62, -inf }
 0x3c6   : > { %v4943_v29 = vadd.f32 %v4655_v53, %v2326_v35  ;;  %3611 = vrcp.f32 %v2560_v52  ;;  %v2388_v47 = vrot.slane %v2387_v58, 4  ;;  %v2542_v60 = vadd.f32 %v2541_v48, %v2540_v33 }
 0x3c7   : > { %3613 = vrcp.f32 %v2616_v50  ;;  %v2599_v20 = vrot.slane %v2598_v15, 2 }
 0x3c8   : > { %2966 = vrot.lane.b32.xlu1 %v4813_v16, %s3648_s1  ;;  %v2443_v53 = vsel %vm2351_vm1, %v4943_v29, -inf  ;;  %v2389_v8 = vmax.f32 %v2387_v58, %v2388_v47  ;;  %v2543_v54 = vrot.slane %v2542_v60, 2 }
 0x3c9   : > { %2934 = vrot.lane.b32.xlu0 %v4831_v51, %s3646_s0  ;;  %v2444_v34 = vrot.slane %v2443_v53, 4  ;;  %v2600_v42 = vadd.f32 %v2599_v20, %v2598_v15 }
 0x3ca   : > { %v2390_v57 = vrot.slane %v2389_v8, 2  ;;  %v2544_v1 = vadd.f32 %v2543_v54, %v2542_v60 }
 0x3cb   : > { %v4945_v24 = vpop.eup %3607  ;;  %v2445_v3 = vmax.f32 %v2443_v53, %v2444_v34  ;;  %v2601_v9 = vrot.slane %v2600_v42, 1 }
 0x3cc   : > { %2982 = vrot.lane.b32.xlu1 %v4831_v51, %s3648_s1  ;;  %v2561_v61 = vsel %vm2351_vm1, %v4945_v24, 0.0  ;;  %v2391_v19 = vmax.f32 %v2389_v8, %v2390_v57  ;;  %v2545_v40 = vrot.slane %v2544_v1, 1 }
 0x3cd   : > { %2674 = vrot.lane.b32.xlu0 %v4915_v38, %s3644_s26  ;;  %v2562_v17 = vrot.slane %v2561_v61, 4  ;;  %v2446_v35 = vrot.slane %v2445_v3, 2 }
 0x3ce   : > { %v2392_v33 = vrot.slane %v2391_v19, 1  ;;  %v2546_v47 = vadd.f32 %v2545_v40, %v2544_v1 }
 0x3cf   : > { %v4955_v7 = vpop.eup %3609  ;;  %v2563_v37 = vadd.f32 %v2562_v17, %v2561_v61  ;;  %v2447_v50 = vmax.f32 %v2445_v3, %v2446_v35 }
 0x3d0   : > { %2882 = vrot.lane.b32.xlu1 %v4925_v0, %s3645_s29  ;;  %v2617_v45 = vsel %vm2351_vm1, %v4955_v7, 0.0  ;;  %v3612_v41 = vpop.eup %3611  ;;  %v2393_v15 = vmax.f32 %v2391_v19, %v2392_v33 }
 0x3d1   : > { %2690 = vrot.lane.b32.xlu0 %v4925_v0, %s3644_s26  ;;  %v2618_v59 = vrot.slane %v2617_v45, 4  ;;  %v4970_v18 = vmul.f32 %v3612_v41, %v4871_v56  ;;  %v3614_v63 = vpop.eup %3613  ;;  %v2564_v14 = vrot.slane %v2563_v37, 2  ;;  %v2602_v56 = vadd.f32 %v2601_v9, %v2600_v42 }
 0x3d2   : > { %v4977_v52 = vmul.f32 %v3614_v63, %v4883_v49  ;;  %v2448_v53 = vrot.slane %v2447_v50, 1  ;;  %v2469_v8 = vsub.f32 %v4928_v62, %v2393_v15 }
 0x3d3   : > { %v2619_v39 = vadd.f32 %v2618_v59, %v2617_v45  ;;  %v2565_v28 = vadd.f32 %v2564_v14, %v2563_v37  ;;  %3615 = vrcp.f32 %v2602_v56 }
 0x3d4   : > { %2914 = vrot.lane.b32.xlu1 %v4915_v38, %s3646_s0  ;;  %3617 = vrcp.f32 %v2546_v47  ;;  %v2449_v34 = vmax.f32 %v2447_v50, %v2448_v53  ;;  %v2490_v57 = vmul.f32 1.442695, %v2469_v8 }
 0x3d5   : > { %2722 = vrot.lane.b32.xlu0 %v4915_v38, %s3647_s19  ;;  %v2620_v58 = vrot.slane %v2619_v39, 2  ;;  %v2566_v49 = vrot.slane %v2565_v28, 1 }
 0x3d6   : > { %v2477_v62 = vsub.f32 %v4943_v29, %v2449_v34 }
 0x3d7   : > { %v2621_v61 = vadd.f32 %v2620_v58, %v2619_v39  ;;  %v2567_v20 = vadd.f32 %v2566_v49, %v2565_v28 }
 0x3d8   : > { %2930 = vrot.lane.b32.xlu1 %v4925_v0, %s3646_s0  ;;  %v2506_v3 = vmul.f32 1.442695, %v2477_v62 }
 0x3d9   : > { %2738 = vrot.lane.b32.xlu0 %v4925_v0, %s3647_s19  ;;  %v2622_v17 = vrot.slane %v2621_v61, 1  ;;  %3619 = vrcp.f32 %v2567_v20 }
 0x3da   : > { %3621 = vpow2.f32 %v2490_v57 }
 0x3db   : > { %v2623_v41 = vadd.f32 %v2622_v17, %v2621_v61 }
 0x3dc   : > { %2962 = vrot.lane.b32.xlu1 %v4915_v38, %s3648_s1 }
 0x3dd   : > { %2770 = vrot.lane.b32.xlu0 %v4915_v38, %s3649_s20  ;;  %v3616_v37 = vpop.eup %3615  ;;  %3623 = vrcp.f32 %v2623_v41 }
 0x3de   : > { %v5002_v19 = vmul.f32 %v3616_v37, %v4917_v32  ;;  %v3618_v63 = vpop.eup %3617  ;;  %3625 = vpow2.f32 %v2506_v3 }
 0x3df   : > { %v5009_v9 = vmul.f32 %v3618_v63, %v4930_v30 }
 0x3e0   : > { %2978 = vrot.lane.b32.xlu1 %v4925_v0, %s3648_s1 }
 0x3e1   : > { %2786 = vrot.lane.b32.xlu0 %v4925_v0, %s3649_s20 }
 0x3e3   : > { %v3620_v39 = vpop.eup %3619 }
 0x3e4   : > { %2684 = vrot.lane.b32.xlu1 %v4970_v18, %s3644_s26  ;;  %v5015_v35 = vpop.eup %3621  ;;  %v5018_v40 = vmul.f32 %v3620_v39, %v4945_v24 }
 0x3e5   : > { %2818 = vrot.lane.b32.xlu0 %v4915_v38, %s3650_s22 }
 0x3e6   : > { %v4981_v48 = vpop.permute.xlu1 %2676 }
 0x3e7   : > { %v3624_v56 = vpop.eup %3623 }
 0x3e8   : > { %2700 = vrot.lane.b32.xlu1 %v4977_v52, %s3644_s26  ;;  %v5031_v50 = vmul.f32 %v3624_v56, %v4955_v7  ;;  %v5038_v49 = vpop.eup %3625 }
 0x3e9   : > { %2834 = vrot.lane.b32.xlu0 %v4925_v0, %s3650_s22  ;;  %v2603_v17 = vsel %vm2351_vm1, %v5038_v49, 0.0 }
 0x3ea   : > { %v2693_v60 = vpop.permute.xlu1 %2692  ;;  %v2885_v54 = vpop.permute.xlu0 %2884  ;;  %v2604_v62 = vrot.slane %v2603_v17, 4 }
 0x3eb   : > { %v3018_v30 = vsel %vm2351_vm1, %v4716_v2, %v2693_v60  ;;  %v2547_v2 = vsel %vm2351_vm1, %v5015_v35, 0.0  ;;  %v3010_v60 = vsel %vm2351_vm1, %v4707_v55, %v4981_v48 }
 0x3ec   : > { %2732 = vrot.lane.b32.xlu1 %v4970_v18, %s3647_s19  ;;  %v2548_v7 = vrot.slane %v2547_v2, 4  ;;  %v2605_v3 = vadd.f32 %v2604_v62, %v2603_v17 }
 0x3ed   : > { %2866 = vrot.lane.b32.xlu0 %v4915_v38, %s3645_s29 }
 0x3ee   : > { %v2725_v45 = vpop.permute.xlu1 %2724  ;;  %v2933_v59 = vpop.permute.xlu0 %2932  ;;  %v2549_v48 = vadd.f32 %v2548_v7, %v2547_v2 }
 0x3ef   : > { %v3027_v34 = vsel %vm3024_vm2, %v3010_v60, %v2725_v45 }
 0x3f0   : > { %2748 = vrot.lane.b32.xlu1 %v4977_v52, %s3647_s19 }
 0x3f1   : > { %2924 = vrot.lane.b32.xlu0 %v4970_v18, %s3646_s0 }
 0x3f2   : > { %v2741_v42 = vpop.permute.xlu1 %2740  ;;  %v2981_v14 = vpop.permute.xlu0 %2980 }
 0x3f3   : > { %v3035_v28 = vsel %vm3024_vm2, %v3018_v30, %v2741_v42 }
 0x3f4   : > { %2780 = vrot.lane.b32.xlu1 %v4970_v18, %s3649_s20 }
 0x3f5   : > { %2940 = vrot.lane.b32.xlu0 %v4977_v52, %s3646_s0 }
 0x3f6   : > { %v2773_v1 = vpop.permute.xlu1 %2772 }
 0x3f7   : > { %v3044_v41 = vsel %vm3041_vm3, %v3027_v34, %v2773_v1 }
 0x3f8   : > { %2796 = vrot.lane.b32.xlu1 %v4977_v52, %s3649_s20 }
 0x3f9   : > { %2888 = vrot.lane.b32.xlu0 %v5002_v19, %s3645_s29 }
 0x3fa   : > { %v2789_v29 = vpop.permute.xlu1 %2788 }
 0x3fb   : > { %v3052_v24 = vsel %vm3041_vm3, %v3035_v28, %v2789_v29 }
 0x3fc   : > { %2828 = vrot.lane.b32.xlu1 %v4970_v18, %s3650_s22 }
 0x3fd   : > { %2968 = vrot.lane.b32.xlu0 %v5009_v9, %s3648_s1 }
 0x3fe   : > { %v2821_v32 = vpop.permute.xlu1 %2820 }
 0x3ff   : > { %v5020_v33 = vpop.permute.xlu0 %2880  ;;  %v3061_v55 = vsel %vm3058_vm5, %v3044_v41, %v2821_v32  ;;  %v2606_v32 = vrot.slane %v2605_v3, 2 }
 0x400   : > { %2844 = vrot.lane.b32.xlu1 %v4977_v52, %s3650_s22 }
 0x401   : > { %2686 = vrot.lane.b32.xlu0 %v5018_v40, %s3644_s26 }
 0x402   : > { %v2837_v58 = vpop.permute.xlu1 %2836 }
 0x403   : > { %v3069_v47 = vsel %vm3058_vm5, %v3052_v24, %v2837_v58  ;;  %v5036_v15 = vpop.permute.xlu0 %2912  ;;  %v2607_v24 = vadd.f32 %v2606_v32, %v2605_v3 }
 0x404   : > { %v3086_v61 = vsel %vm3075_vm4, %v3069_v47, %v2885_v54  ;;  %2876 = vrot.lane.b32.xlu1 %v4970_v18, %s3645_s29 }
 0x405   : > { %v3103_v53 = vsel %vm3092_vm6, %v3086_v61, %v2933_v59  ;;  %2702 = vrot.lane.b32.xlu0 %v5031_v50, %s3644_s26  ;;  %v2550_v59 = vrot.slane %v2549_v48, 2  ;;  %v2608_v47 = vrot.slane %v2607_v24, 1 }
 0x406   : > { %v3120_v8 = vsel %vm3109_vm7, %v3103_v53, %v2981_v14  ;;  %v2869_v20 = vpop.permute.xlu1 %2868 }
 0x407   : > { %v5054_v54 = vmul.f32 %v4371_v25, %v3120_v8  ;;  %v5056_v57 = vpop.permute.xlu0 %2928  ;;  %v3078_v42 = vsel %vm3075_vm4, %v3061_v55, %v2869_v20  ;;  %v2551_v39 = vadd.f32 %v2550_v59, %v2549_v48  ;;  %v2609_v17 = vadd.f32 %v2608_v47, %v2607_v24 }
 0x408   : > { %2892 = vrot.lane.b32.xlu1 %v4977_v52, %s3645_s29 }
 0x409   : > { %2734 = vrot.lane.b32.xlu0 %v5018_v40, %s3647_s19  ;;  %v2552_v28 = vrot.slane %v2551_v39, 1 }
 0x40a   : > { %v2917_v45 = vpop.permute.xlu1 %2916 }
 0x40b   : > { %v3095_v25 = vsel %vm3092_vm6, %v3078_v42, %v2917_v45  ;;  %v5066_v37 = vpop.permute.xlu0 %2960  ;;  %v2553_v2 = vadd.f32 %v2552_v28, %v2551_v39 }
 0x40c   : > { %2972 = vrot.lane.b32.xlu1 %v4970_v18, %s3648_s1 }
 0x40d   : > { %2750 = vrot.lane.b32.xlu0 %v5031_v50, %s3647_s19  ;;  %3627 = vrcp.f32 %v2553_v2 }
 0x40e   : > { %v2965_v1 = vpop.permute.xlu1 %2964  ;;  %3629 = vrcp.f32 %v2609_v17 }
 0x40f   : > { %v3112_v63 = vsel %vm3109_vm7, %v3095_v25, %v2965_v1  ;;  %v5073_v29 = vpop.permute.xlu0 %2976 }
 0x410   : > { %v5076_v14 = vmul.f32 %v4363_v26, %v3112_v63  ;;  %2680 = vrot.lane.b32.xlu1 %v5009_v9, %s3644_s26 }
 0x411   : > { %2782 = vrot.lane.b32.xlu0 %v5018_v40, %s3649_s20 }
 0x412   : > { %v2673_v56 = vpop.permute.xlu1 %2672 }
 0x413   : > { %v2679_v30 = vpop.permute.xlu0 %2678  ;;  %v3008_v61 = vsel %vm2351_vm1, %v4780_v21, %v2673_v56 }
 0x414   : > { %2696 = vrot.lane.b32.xlu1 %v5002_v19, %s3644_s26  ;;  %v3011_v7 = vsel %vm2351_vm1, %v4813_v16, %v2679_v30 }
 0x415   : > { %2798 = vrot.lane.b32.xlu0 %v5031_v50, %s3649_s20 }
 0x416   : > { %v2689_v26 = vpop.permute.xlu1 %2688 }
 0x417   : > { %v2695_v58 = vpop.permute.xlu0 %2694  ;;  %v3016_v21 = vsel %vm2351_vm1, %v4767_v27, %v2689_v26  ;;  %v3628_v3 = vpop.eup %3627 }
 0x418   : > { %2728 = vrot.lane.b32.xlu1 %v5009_v9, %s3647_s19  ;;  %v3019_v16 = vsel %vm2351_vm1, %v4831_v51, %v2695_v58  ;;  %v5123_v39 = vmul.f32 %v3628_v3, %v5015_v35  ;;  %v3630_v30 = vpop.eup %3629 }
 0x419   : > { %2830 = vrot.lane.b32.xlu0 %v5018_v40, %s3650_s22  ;;  %v5132_v26 = vmul.f32 %v3630_v30, %v5038_v49 }
 0x41a   : > { %v2721_v53 = vpop.permute.xlu1 %2720 }
 0x41b   : > { %v3025_v60 = vsel %vm3024_vm2, %v3008_v61, %v2721_v53  ;;  %v2727_v8 = vpop.permute.xlu0 %2726 }
 0x41c   : > { %v3028_v20 = vsel %vm3024_vm2, %v3011_v7, %v2727_v8  ;;  %2744 = vrot.lane.b32.xlu1 %v5002_v19, %s3647_s19 }
 0x41d   : > { %2846 = vrot.lane.b32.xlu0 %v5031_v50, %s3650_s22 }
 0x41e   : > { %v2737_v34 = vpop.permute.xlu1 %2736 }
 0x41f   : > { %v3033_v41 = vsel %vm3024_vm2, %v3016_v21, %v2737_v34  ;;  %v2743_v55 = vpop.permute.xlu0 %2742 }
 0x420   : > { %v3036_v48 = vsel %vm3024_vm2, %v3019_v16, %v2743_v55  ;;  %2776 = vrot.lane.b32.xlu1 %v5009_v9, %s3649_s20 }
 0x421   : > { %2878 = vrot.lane.b32.xlu0 %v5018_v40, %s3645_s29 }
 0x422   : > { %v2769_v62 = vpop.permute.xlu1 %2768 }
 0x423   : > { %v3042_v42 = vsel %vm3041_vm3, %v3025_v60, %v2769_v62  ;;  %v2775_v27 = vpop.permute.xlu0 %2774 }
 0x424   : > { %v3045_v45 = vsel %vm3041_vm3, %v3028_v20, %v2775_v27  ;;  %2792 = vrot.lane.b32.xlu1 %v5002_v19, %s3649_s20 }
 0x425   : > { %2894 = vrot.lane.b32.xlu0 %v5031_v50, %s3645_s29 }
 0x426   : > { %v2785_v51 = vpop.permute.xlu1 %2784 }
 0x427   : > { %v3050_v25 = vsel %vm3041_vm3, %v3033_v41, %v2785_v51  ;;  %v2791_v59 = vpop.permute.xlu0 %2790 }
 0x428   : > { %v3053_v1 = vsel %vm3041_vm3, %v3036_v48, %v2791_v59  ;;  %2824 = vrot.lane.b32.xlu1 %v5009_v9, %s3650_s22 }
 0x429   : > { %2974 = vrot.lane.b32.xlu0 %v5018_v40, %s3648_s1 }
 0x42a   : > { %v2817_v63 = vpop.permute.xlu1 %2816 }
 0x42b   : > { %v3059_v32 = vsel %vm3058_vm5, %v3042_v42, %v2817_v63  ;;  %v2823_v56 = vpop.permute.xlu0 %2822 }
 0x42c   : > { %v3062_v28 = vsel %vm3058_vm5, %v3045_v45, %v2823_v56  ;;  %2840 = vrot.lane.b32.xlu1 %v5002_v19, %s3650_s22 }
 0x42d   : > { %2682 = vrot.lane.b32.xlu0 %v5123_v39, %s3644_s26 }
 0x42e   : > { %v2833_v24 = vpop.permute.xlu1 %2832 }
 0x42f   : > { %v3067_v58 = vsel %vm3058_vm5, %v3050_v25, %v2833_v24  ;;  %v2839_v35 = vpop.permute.xlu0 %2838  ;;  %v3244_v24 = vsel %vm1727_vm0, %v5054_v54, 0.0 }
 0x430   : > { %v3084_v2 = vsel %vm3075_vm4, %v3067_v58, %v5020_v33  ;;  %v3070_v47 = vsel %vm3058_vm5, %v3053_v1, %v2839_v35  ;;  %2872 = vrot.lane.b32.xlu1 %v5009_v9, %s3645_s29 }
 0x431   : > { %v3101_v61 = vsel %vm3092_vm6, %v3084_v2, %v5056_v57  ;;  %2698 = vrot.lane.b32.xlu0 %v5132_v26, %s3644_s26 }
 0x432   : > { %v3118_v49 = vsel %vm3109_vm7, %v3101_v61, %v5073_v29  ;;  %v2865_v53 = vpop.permute.xlu1 %2864 }
 0x433   : > { %v3166_v7 = vmul.f32 %v4345_v23, %v3118_v49  ;;  %v3076_v60 = vsel %vm3075_vm4, %v3059_v32, %v2865_v53  ;;  %v2871_v33 = vpop.permute.xlu0 %2870  ;;  %v3245_v49 = vrot.slane %v3244_v24, 4 }
 0x434   : > { %v3093_v8 = vsel %vm3092_vm6, %v3076_v60, %v5036_v15  ;;  %v3079_v20 = vsel %vm3075_vm4, %v3062_v28, %v2871_v33  ;;  %2920 = vrot.lane.b32.xlu1 %v5009_v9, %s3646_s0  ;;  %v3188_v33 = vsel %vm1727_vm0, %v5076_v14, 0.0 }
 0x435   : > { %v3110_v57 = vsel %vm3109_vm7, %v3093_v8, %v5066_v37  ;;  %2730 = vrot.lane.b32.xlu0 %v5123_v39, %s3647_s19  ;;  %v3230_v58 = vsel %vm1727_vm0, %v3166_v7, 0.0 }
 0x436   : > { %v3158_v29 = vmul.f32 %v4299_v43, %v3110_v57  ;;  %v2919_v23 = vpop.permute.xlu1 %2918  ;;  %v3231_v53 = vrot.slane %v3230_v58, 4 }
 0x437   : > { %v3096_v17 = vsel %vm3092_vm6, %v3079_v20, %v2919_v23  ;;  %v2887_v21 = vpop.permute.xlu0 %2886 }
 0x438   : > { %v3087_v34 = vsel %vm3075_vm4, %v3070_v47, %v2887_v21  ;;  %2936 = vrot.lane.b32.xlu1 %v5002_v19, %s3646_s0  ;;  %v3174_v60 = vsel %vm1727_vm0, %v3158_v29, 0.0  ;;  %v3189_v21 = vrot.slane %v3188_v33, 4 }
 0x439   : > { %2746 = vrot.lane.b32.xlu0 %v5132_v26, %s3647_s19  ;;  %v3175_v57 = vrot.slane %v3174_v60, 4 }
 0x43a   : > { %v2967_v15 = vpop.permute.xlu1 %2966 }
 0x43b   : > { %v3113_v37 = vsel %vm3109_vm7, %v3096_v17, %v2967_v15  ;;  %v2935_v16 = vpop.permute.xlu0 %2934  ;;  %v3246_v17 = vadd.f32 %v3245_v49, %v3244_v24 }
 0x43c   : > { %v3161_v41 = vmul.f32 %v4330_v12, %v3113_v37  ;;  %v3104_v43 = vsel %vm3092_vm6, %v3087_v34, %v2935_v16  ;;  %2984 = vrot.lane.b32.xlu1 %v5002_v19, %s3648_s1  ;;  %v3232_v34 = vadd.f32 %v3231_v53, %v3230_v58 }
 0x43d   : > { %2778 = vrot.lane.b32.xlu0 %v5123_v39, %s3649_s20 }
 0x43e   : > { %v2983_v55 = vpop.permute.xlu1 %2982  ;;  %v3195_v54 = vsel %vm1727_vm0, %v3161_v41, 0.0 }
 0x43f   : > { %v3121_v48 = vsel %vm3109_vm7, %v3104_v43, %v2983_v55  ;;  %v2675_v62 = vpop.permute.xlu0 %2674  ;;  %v3196_v29 = vrot.slane %v3195_v54, 4 }
 0x440   : > { %v3169_v42 = vmul.f32 %v4422_v6, %v3121_v48  ;;  %2926 = vrot.lane.b32.xlu1 %v5018_v40, %s3646_s0  ;;  %v3009_v51 = vsel %vm2351_vm1, %v4915_v38, %v2675_v62  ;;  %v3176_v62 = vadd.f32 %v3175_v57, %v3174_v60 }
 0x441   : > { %2794 = vrot.lane.b32.xlu0 %v5132_v26, %s3649_s20 }
 0x442   : > { %v2883_v12 = vpop.permute.xlu1 %2882  ;;  %v3251_v47 = vsel %vm1727_vm0, %v3169_v42, 0.0 }
 0x443   : > { %v2691_v27 = vpop.permute.xlu0 %2690  ;;  %v3252_v7 = vrot.slane %v3251_v47, 4 }
 0x444   : > { %2942 = vrot.lane.b32.xlu1 %v5031_v50, %s3646_s0  ;;  %v3017_v3 = vsel %vm2351_vm1, %v4925_v0, %v2691_v27  ;;  %v3247_v27 = vrot.slane %v3246_v17, 2 }
 0x445   : > { %2826 = vrot.lane.b32.xlu0 %v5123_v39, %s3650_s22  ;;  %v3253_v41 = vadd.f32 %v3252_v7, %v3251_v47 }
 0x446   : > { %v2915_v45 = vpop.permute.xlu1 %2914 }
 0x447   : > { %v2723_v25 = vpop.permute.xlu0 %2722 }
 0x448   : > { %v3026_v6 = vsel %vm3024_vm2, %v3009_v51, %v2723_v25  ;;  %2890 = vrot.lane.b32.xlu1 %v5132_v26, %s3645_s29  ;;  %v3190_v51 = vadd.f32 %v3189_v21, %v3188_v33  ;;  %v3233_v25 = vrot.slane %v3232_v34, 2 }
 0x449   : > { %2842 = vrot.lane.b32.xlu0 %v5132_v26, %s3650_s22 }
 0x44a   : > { %v2931_v59 = vpop.permute.xlu1 %2930  ;;  %v3191_v24 = vrot.slane %v3190_v51, 2  ;;  %v3234_v58 = vadd.f32 %v3233_v25, %v3232_v34 }
 0x44b   : > { %v2739_v1 = vpop.permute.xlu0 %2738 }
 0x44c   : > { %v3034_v63 = vsel %vm3024_vm2, %v3017_v3, %v2739_v1  ;;  %2938 = vrot.lane.b32.xlu1 %v5132_v26, %s3646_s0 }
 0x44d   : > { %2874 = vrot.lane.b32.xlu0 %v5123_v39, %s3645_s29 }
 0x44e   : > { %v2963_v38 = vpop.permute.xlu1 %2962 }
 0x44f   : > { %v2771_v32 = vpop.permute.xlu0 %2770 }
 0x450   : > { %v3043_v56 = vsel %vm3041_vm3, %v3026_v6, %v2771_v32  ;;  %2988 = vrot.lane.b32.xlu1 %v4977_v52, %s3648_s1  ;;  %v3254_v32 = vrot.slane %v3253_v41, 2 }
 0x451   : > { %2922 = vrot.lane.b32.xlu0 %v5123_v39, %s3646_s0 }
 0x452   : > { %v2979_v0 = vpop.permute.xlu1 %2978  ;;  %v3255_v49 = vadd.f32 %v3254_v32, %v3253_v41 }
 0x453   : > { %v2787_v30 = vpop.permute.xlu0 %2786 }
 0x454   : > { %v3051_v28 = vsel %vm3041_vm3, %v3034_v63, %v2787_v30  ;;  %v3256_v34 = vrot.slane %v3255_v49, 1 }
 0x455   : > { %2970 = vrot.lane.b32.xlu0 %v5123_v39, %s3648_s1 }
 0x456   : > { %v2685_v35 = vpop.permute.xlu1 %2684 }
 0x457   : > { %v2819_v2 = vpop.permute.xlu0 %2818  ;;  %v3014_v14 = vsel %vm2351_vm1, %v4970_v18, %v2685_v35  ;;  %v3197_v18 = vadd.f32 %v3196_v29, %v3195_v54  ;;  %v3235_v54 = vrot.slane %v3234_v58, 1 }
 0x458   : > { %v3060_v61 = vsel %vm3058_vm5, %v3043_v56, %v2819_v2  ;;  %v3248_v2 = vadd.f32 %v3247_v27, %v3246_v17 }
 0x459   : > { %2986 = vrot.lane.b32.xlu0 %v5132_v26, %s3648_s1  ;;  %v3236_v41 = vadd.f32 %v3235_v54, %v3234_v58 }
 0x45a   : > { %v2701_v8 = vpop.permute.xlu1 %2700 }
 0x45b   : > { %v2835_v20 = vpop.permute.xlu0 %2834 }
 0x45c   : > { %v3068_v23 = vsel %vm3058_vm5, %v3051_v28, %v2835_v20  ;;  %v3177_v28 = vrot.slane %v3176_v62, 2  ;;  %v3249_v20 = vrot.slane %v3248_v2, 1 }
 0x45d   : > { %v3085_v15 = vsel %vm3075_vm4, %v3068_v23, %v2883_v12  ;;  %2990 = vrot.lane.b32.xlu0 %v5031_v50, %s3648_s1 }
 0x45e   : > { %v3102_v37 = vsel %vm3092_vm6, %v3085_v15, %v2931_v59  ;;  %v2733_v16 = vpop.permute.xlu1 %2732  ;;  %v3022_v59 = vsel %vm2351_vm1, %v4977_v52, %v2701_v8  ;;  %v3198_v52 = vrot.slane %v3197_v18, 2  ;;  %v3178_v33 = vadd.f32 %v3177_v28, %v3176_v62 }
 0x45f   : > { %v3119_v43 = vsel %vm3109_vm7, %v3102_v37, %v2979_v0  ;;  %v3031_v55 = vsel %vm3024_vm2, %v3014_v14, %v2733_v16  ;;  %v2867_v48 = vpop.permute.xlu0 %2866  ;;  %v3192_v8 = vadd.f32 %v3191_v24, %v3190_v51 }
 0x460   : > { %v3167_v42 = vmul.f32 %v4397_v13, %v3119_v43  ;;  %v3077_v12 = vsel %vm3075_vm4, %v3060_v61, %v2867_v48  ;;  %v3199_v57 = vadd.f32 %v3198_v52, %v3197_v18  ;;  %v3179_v14 = vrot.slane %v3178_v33, 1 }
 0x461   : > { %v3094_v6 = vsel %vm3092_vm6, %v3077_v12, %v2915_v45  ;;  %v3193_v16 = vrot.slane %v3192_v8, 1  ;;  %v3257_v12 = vadd.f32 %v3256_v34, %v3255_v49 }
 0x462   : > { %v3237_v3 = vsel %vm1727_vm0, %v3167_v42, 0.0  ;;  %v3111_v1 = vsel %vm3109_vm7, %v3094_v6, %v2963_v38  ;;  %v2749_v63 = vpop.permute.xlu1 %2748  ;;  %v3200_v48 = vrot.slane %v3199_v57, 1  ;;  %v3180_v6 = vadd.f32 %v3179_v14, %v3178_v33 }
 0x463   : > { %v3238_v56 = vrot.slane %v3237_v3, 4  ;;  %v3159_v13 = vmul.f32 %v4337_v11, %v3111_v1  ;;  %v3039_v0 = vsel %vm3024_vm2, %v3022_v59, %v2749_v63  ;;  %v2925_v30 = vpop.permute.xlu0 %2924 }
 0x464   : > { %v3201_v63 = vadd.f32 %v3200_v48, %v3199_v57 }
 0x465   : > { %v3239_v45 = vadd.f32 %v3238_v56, %v3237_v3  ;;  %v3181_v35 = vsel %vm1727_vm0, %v3159_v13, 0.0  ;;  %v3194_v3 = vadd.f32 %v3193_v16, %v3192_v8 }
 0x466   : > { %v3182_v47 = vrot.slane %v3181_v35, 4  ;;  %v2781_v61 = vpop.permute.xlu1 %2780 }
 0x467   : > { %v3240_v38 = vrot.slane %v3239_v45, 2  ;;  %v3048_v53 = vsel %vm3041_vm3, %v3031_v55, %v2781_v61  ;;  %v2941_v60 = vpop.permute.xlu0 %2940  ;;  %v3250_v55 = vadd.f32 %v3249_v20, %v3248_v2 }
 0x468   : > { %v3183_v11 = vadd.f32 %v3182_v47, %v3181_v35 }
 0x469   : > { %v3241_v7 = vadd.f32 %v3240_v38, %v3239_v45 }
 0x46a   : > { %v3184_v23 = vrot.slane %v3183_v11, 2  ;;  %v2797_v21 = vpop.permute.xlu1 %2796 }
 0x46b   : > { %v3242_v15 = vrot.slane %v3241_v7, 1  ;;  %v3056_v17 = vsel %vm3041_vm3, %v3039_v0, %v2797_v21  ;;  %v5235_v29 = vpop.permute.xlu0 %2888 }
 0x46c   : > { %v3185_v37 = vadd.f32 %v3184_v23, %v3183_v11 }
 0x46d   : > { %v3243_v43 = vadd.f32 %v3242_v15, %v3241_v7 }
 0x46e   : > { %v3186_v62 = vrot.slane %v3185_v37, 1  ;;  %v2829_v42 = vpop.permute.xlu1 %2828 }
 0x46f   : > { %v3065_v27 = vsel %vm3058_vm5, %v3048_v53, %v2829_v42  ;;  %v2969_v51 = vpop.permute.xlu0 %2968  ;;  %v3316_v25 = vsel %vm3302_vm8, %v3243_v43, %v3236_v41 }
 0x470   : > { %v3187_v18 = vadd.f32 %v3186_v62, %v3185_v37  ;;  %v3317_v59 = vsel %vm3304_vm9, %v3250_v55, %v3316_v25 }
 0x471   : > { %v5241_v1 = vsel %vm3306_vm10, %v3257_v12, %v3317_v59 }
 0x472   : > { %v3303_v32 = vsel %vm3302_vm8, %v3187_v18, %v3180_v6  ;;  %v2845_v56 = vpop.permute.xlu1 %2844 }
 0x473   : > { %v3073_v13 = vsel %vm3058_vm5, %v3056_v17, %v2845_v56  ;;  %v2687_v0 = vpop.permute.xlu0 %2686  ;;  %v3305_v28 = vsel %vm3304_vm9, %v3194_v3, %v3303_v32 }
 0x474   : > { %v5247_v24 = vsel %vm3306_vm10, %v3201_v63, %v3305_v28  ;;  %v3015_v47 = vsel %vm2351_vm1, %v5018_v40, %v2687_v0 }
 0x476   : > { %v2877_v58 = vpop.permute.xlu1 %2876 }
 0x477   : > { %v3082_v45 = vsel %vm3075_vm4, %v3065_v27, %v2877_v58  ;;  %v2703_v35 = vpop.permute.xlu0 %2702 }
 0x478   : > { %v3099_v2 = vsel %vm3092_vm6, %v3082_v45, %v2925_v30  ;;  %v3023_v11 = vsel %vm2351_vm1, %v5031_v50, %v2703_v35 }
 0x47a   : > { %v2893_v52 = vpop.permute.xlu1 %2892 }
 0x47b   : > { %v3090_v61 = vsel %vm3075_vm4, %v3073_v13, %v2893_v52  ;;  %v2735_v49 = vpop.permute.xlu0 %2734 }
 0x47c   : > { %v3032_v38 = vsel %vm3024_vm2, %v3015_v47, %v2735_v49  ;;  %v5256_v53 = vsel %vm3092_vm6, %v3090_v61, %v2941_v60 }
 0x47e   : > { %v2973_v33 = vpop.permute.xlu1 %2972 }
 0x47f   : > { %v3116_v8 = vsel %vm3109_vm7, %v3099_v2, %v2973_v33  ;;  %v2751_v54 = vpop.permute.xlu0 %2750 }
 0x480   : > { %v5262_v30 = vmul.f32 %v4437_v5, %v3116_v8  ;;  %v3040_v40 = vsel %vm3024_vm2, %v3023_v11, %v2751_v54 }
 0x482   : > { %v2681_v7 = vpop.permute.xlu1 %2680 }
 0x483   : > { %v2783_v20 = vpop.permute.xlu0 %2782  ;;  %v3012_v62 = vsel %vm2351_vm1, %v5009_v9, %v2681_v7 }
 0x484   : > { %v3049_v57 = vsel %vm3041_vm3, %v3032_v38, %v2783_v20 }
 0x486   : > { %v2697_v23 = vpop.permute.xlu1 %2696 }
 0x487   : > { %v2799_v21 = vpop.permute.xlu0 %2798  ;;  %v3020_v3 = vsel %vm2351_vm1, %v5002_v19, %v2697_v23 }
 0x488   : > { %v5267_v60 = vsel %vm3041_vm3, %v3040_v40, %v2799_v21 }
 0x48a   : > { %v2729_v34 = vpop.permute.xlu1 %2728 }
 0x48b   : > { %v2831_v15 = vpop.permute.xlu0 %2830  ;;  %v3029_v12 = vsel %vm3024_vm2, %v3012_v62, %v2729_v34 }
 0x48c   : > { %v3066_v33 = vsel %vm3058_vm5, %v3049_v57, %v2831_v15 }
 0x48e   : > { %v2745_v50 = vpop.permute.xlu1 %2744 }
 0x48f   : > { %v5269_v17 = vpop.permute.xlu0 %2846  ;;  %v3037_v56 = vsel %vm3024_vm2, %v3020_v3, %v2745_v50 }
 0x492   : > { %v2777_v14 = vpop.permute.xlu1 %2776 }
 0x493   : > { %v2879_v37 = vpop.permute.xlu0 %2878  ;;  %v3046_v25 = vsel %vm3041_vm3, %v3029_v12, %v2777_v14 }
 0x494   : > { %v3083_v11 = vsel %vm3075_vm4, %v3066_v33, %v2879_v37 }
 0x496   : > { %v2793_v5 = vpop.permute.xlu1 %2792 }
 0x497   : > { %v5271_v16 = vpop.permute.xlu0 %2894  ;;  %v3054_v13 = vsel %vm3041_vm3, %v3037_v56, %v2793_v5 }
 0x49a   : > { %v2825_v41 = vpop.permute.xlu1 %2824 }
 0x49b   : > { %v2975_v43 = vpop.permute.xlu0 %2974  ;;  %v3063_v6 = vsel %vm3058_vm5, %v3046_v25, %v2825_v41 }
 0x49e   : > { %v2841_v55 = vpop.permute.xlu1 %2840 }
 0x49f   : > { %v2683_v48 = vpop.permute.xlu0 %2682  ;;  %v3071_v28 = vsel %vm3058_vm5, %v3054_v13, %v2841_v55 }
 0x4a0   : > { %v3088_v19 = vsel %vm3075_vm4, %v3071_v28, %v5235_v29 }
 0x4a2   : > { %v2873_v42 = vpop.permute.xlu1 %2872 }
 0x4a3   : > { %v2699_v27 = vpop.permute.xlu0 %2698  ;;  %v3080_v18 = vsel %vm3075_vm4, %v3063_v6, %v2873_v42 }
 0x4a6   : > { %v2921_v59 = vpop.permute.xlu1 %2920 }
 0x4a7   : > { %v3097_v63 = vsel %vm3092_vm6, %v3080_v18, %v2921_v59  ;;  %v2731_v32 = vpop.permute.xlu0 %2730  ;;  %v3013_v18 = vsel %vm2351_vm1, %v5123_v39, %v2683_v48 }
 0x4a8   : > { %v3114_v9 = vsel %vm3109_vm7, %v3097_v63, %v2969_v51  ;;  %v3030_v3 = vsel %vm3024_vm2, %v3013_v18, %v2731_v32 }
 0x4a9   : > { %v3162_v0 = vmul.f32 %v4393_v4, %v3114_v9 }
 0x4aa   : > { %v2937_v58 = vpop.permute.xlu1 %2936 }
 0x4ab   : > { %v3202_v45 = vsel %vm1727_vm0, %v3162_v0, 0.0  ;;  %v2747_v35 = vpop.permute.xlu0 %2746  ;;  %v3105_v47 = vsel %vm3092_vm6, %v3088_v19, %v2937_v58 }
 0x4ac   : > { %v3203_v2 = vrot.slane %v3202_v45, 4 }
 0x4ae   : > { %v3204_v52 = vadd.f32 %v3203_v2, %v3202_v45  ;;  %v2985_v61 = vpop.permute.xlu1 %2984 }
 0x4af   : > { %v3122_v51 = vsel %vm3109_vm7, %v3105_v47, %v2985_v61  ;;  %v2779_v49 = vpop.permute.xlu0 %2778 }
 0x4b0   : > { %v3205_v38 = vrot.slane %v3204_v52, 2  ;;  %v3170_v4 = vmul.f32 %v4463_v46, %v3122_v51  ;;  %v3047_v9 = vsel %vm3041_vm3, %v3030_v3, %v2779_v49 }
 0x4b2   : > { %v3206_v8 = vadd.f32 %v3205_v38, %v3204_v52  ;;  %v3258_v54 = vsel %vm1727_vm0, %v3170_v4, 0.0  ;;  %v2927_v40 = vpop.permute.xlu1 %2926 }
 0x4b3   : > { %v3259_v7 = vrot.slane %v3258_v54, 4  ;;  %v3100_v29 = vsel %vm3092_vm6, %v3083_v11, %v2927_v40  ;;  %v2795_v20 = vpop.permute.xlu0 %2794  ;;  %v3074_v11 = vsel %vm3058_vm5, %v5267_v60, %v5269_v17 }
 0x4b4   : > { %v3207_v23 = vrot.slane %v3206_v8, 1  ;;  %v3117_v21 = vsel %vm3109_vm7, %v3100_v29, %v2975_v43 }
 0x4b5   : > { %v3260_v34 = vadd.f32 %v3259_v7, %v3258_v54  ;;  %v3165_v50 = vmul.f32 %v4454_v36, %v3117_v21  ;;  %v3216_v36 = vsel %vm1727_vm0, %v5262_v30, 0.0 }
 0x4b6   : > { %v3208_v46 = vadd.f32 %v3207_v23, %v3206_v8  ;;  %v2943_v14 = vpop.permute.xlu1 %2942  ;;  %v3217_v59 = vrot.slane %v3216_v36, 4 }
 0x4b7   : > { %v3261_v57 = vrot.slane %v3260_v34, 2  ;;  %v2827_v15 = vpop.permute.xlu0 %2826  ;;  %v3223_v6 = vsel %vm1727_vm0, %v3165_v50, 0.0 }
 0x4b8   : > { %v5300_v37 = vsel %vm3308_vm11, %v3208_v46, %v5247_v24  ;;  %v3224_v13 = vrot.slane %v3223_v6, 4  ;;  %v3064_v39 = vsel %vm3058_vm5, %v3047_v9, %v2827_v15 }
 0x4b9   : > { %v3262_v5 = vadd.f32 %v3261_v57, %v3260_v34 }
 0x4ba   : > { %v2891_v41 = vpop.permute.xlu1 %2890  ;;  %v3225_v2 = vadd.f32 %v3224_v13, %v3223_v6 }
 0x4bb   : > { %v3263_v55 = vrot.slane %v3262_v5, 1  ;;  %v2843_v62 = vpop.permute.xlu0 %2842 }
 0x4bc   : > { %v3226_v38 = vrot.slane %v3225_v2, 2 }
 0x4bd   : > { %v3264_v42 = vadd.f32 %v3263_v55, %v3262_v5 }
 0x4be   : > { %v2939_v12 = vpop.permute.xlu1 %2938  ;;  %v3227_v21 = vadd.f32 %v3226_v38, %v3225_v2 }
 0x4bf   : > { %v5303_v25 = vsel %vm3308_vm11, %v3264_v42, %v5241_v1  ;;  %v2875_v43 = vpop.permute.xlu0 %2874  ;;  %v3021_v1 = vsel %vm2351_vm1, %v5132_v26, %v2699_v27 }
 0x4c0   : > { %v3038_v0 = vsel %vm3024_vm2, %v3021_v1, %v2747_v35  ;;  %v3081_v32 = vsel %vm3075_vm4, %v3064_v39, %v2875_v43  ;;  %v3228_v5 = vrot.slane %v3227_v21, 1 }
 0x4c1   : > { %v3055_v48 = vsel %vm3041_vm3, %v3038_v0, %v2795_v20 }
 0x4c2   : > { %v2989_v24 = vpop.permute.xlu1 %2988  ;;  %v3072_v58 = vsel %vm3058_vm5, %v3055_v48, %v2843_v62 }
 0x4c3   : > { %v3124_v63 = vsel %vm3109_vm7, %v5256_v53, %v2989_v24  ;;  %v2923_v56 = vpop.permute.xlu0 %2922  ;;  %v3218_v53 = vadd.f32 %v3217_v59, %v3216_v36  ;;  %v3089_v19 = vsel %vm3075_vm4, %v3072_v58, %v2891_v41 }
 0x4c4   : > { %v3172_v30 = vmul.f32 %v4478_v44, %v3124_v63  ;;  %v3098_v26 = vsel %vm3092_vm6, %v3081_v32, %v2923_v56  ;;  %v3106_v47 = vsel %vm3092_vm6, %v3089_v19, %v2939_v12 }
 0x4c5   : > { %v3219_v52 = vrot.slane %v3218_v53, 2 }
 0x4c6   : > { %v3272_v28 = vsel %vm1727_vm0, %v3172_v30, 0.0 }
 0x4c7   : > { %v3273_v45 = vrot.slane %v3272_v28, 4  ;;  %v2971_v27 = vpop.permute.xlu0 %2970  ;;  %v3220_v40 = vadd.f32 %v3219_v52, %v3218_v53 }
 0x4c8   : > { %v3115_v44 = vsel %vm3109_vm7, %v3098_v26, %v2971_v27 }
 0x4c9   : > { %v3163_v35 = vmul.f32 %v4457_v22, %v3115_v44  ;;  %v3274_v61 = vadd.f32 %v3273_v45, %v3272_v28  ;;  %v3091_v22 = vsel %vm3075_vm4, %v3074_v11, %v5271_v16  ;;  %v3221_v57 = vrot.slane %v3220_v40, 1 }
 0x4ca   : > { %v3108_v7 = vsel %vm3092_vm6, %v3091_v22, %v2943_v14 }
 0x4cb   : > { %v3209_v51 = vsel %vm1727_vm0, %v3163_v35, 0.0  ;;  %v2987_v49 = vpop.permute.xlu0 %2986  ;;  %v3275_v29 = vrot.slane %v3274_v61, 2  ;;  %v3222_v43 = vadd.f32 %v3221_v57, %v3220_v40 }
 0x4cc   : > { %v3210_v4 = vrot.slane %v3209_v51, 4  ;;  %v3123_v33 = vsel %vm3109_vm7, %v3106_v47, %v2987_v49 }
 0x4cd   : > { %v3171_v8 = vmul.f32 %v4465_v10, %v3123_v33  ;;  %v3276_v16 = vadd.f32 %v3275_v29, %v3274_v61 }
 0x4ce   : > { %v3211_v54 = vadd.f32 %v3210_v4, %v3209_v51 }
 0x4cf   : > { %v3265_v20 = vsel %vm1727_vm0, %v3171_v8, 0.0  ;;  %v2991_v23 = vpop.permute.xlu0 %2990  ;;  %v3277_v36 = vrot.slane %v3276_v16, 1 }
 0x4d0   : > { %v3212_v34 = vrot.slane %v3211_v54, 2  ;;  %v3266_v50 = vrot.slane %v3265_v20, 4  ;;  %v3125_v46 = vsel %vm3109_vm7, %v3108_v7, %v2991_v23 }
 0x4d1   : > { %v3173_v60 = vmul.f32 %v4472_v31, %v3125_v46  ;;  %v3229_v31 = vadd.f32 %v3228_v5, %v3227_v21  ;;  %v3278_v1 = vadd.f32 %v3277_v36, %v3276_v16 }
 0x4d2   : > { %v3213_v17 = vadd.f32 %v3212_v34, %v3211_v54  ;;  %v3267_v10 = vadd.f32 %v3266_v50, %v3265_v20 }
 0x4d3   : > { %v3279_v15 = vsel %vm1727_vm0, %v3173_v60, 0.0 }
 0x4d4   : > { %v3214_v14 = vrot.slane %v3213_v17, 1  ;;  %v3268_v41 = vrot.slane %v3267_v10, 2  ;;  %v3280_v55 = vrot.slane %v3279_v15, 4 }
 0x4d6   : > { %v3215_v62 = vadd.f32 %v3214_v14, %v3213_v17  ;;  %v3269_v42 = vadd.f32 %v3268_v41, %v3267_v10  ;;  %v3281_v12 = vadd.f32 %v3280_v55, %v3279_v15 }
 0x4d8   : > { %v3311_v6 = vsel %vm3310_vm12, %v3215_v62, %v5300_v37  ;;  %v3270_v18 = vrot.slane %v3269_v42, 1  ;;  %v3282_v24 = vrot.slane %v3281_v12, 2 }
 0x4d9   : > { %v3313_v59 = vsel %vm3312_vm13, %v3222_v43, %v3311_v6 }
 0x4da   : > { %v3271_v3 = vadd.f32 %v3270_v18, %v3269_v42  ;;  %v3315_v63 = vsel %vm3314_vm14, %v3229_v31, %v3313_v59  ;;  %v3283_v56 = vadd.f32 %v3282_v24, %v3281_v12 }
 0x4db   : > { %3325 = vst.msk [vmem:[%s643_s23] sm:$0xff] %vm1727_vm0, %v3315_v63 }
 0x4dc   : > { %v3320_v9 = vsel %vm3310_vm12, %v3271_v3, %v5303_v25  ;;  %v3284_v13 = vrot.slane %v3283_v56, 1 }
 0x4dd   : > { %v3321_v30 = vsel %vm3312_vm13, %v3278_v1, %v3320_v9 }
 0x4de   : > { %v3285_v0 = vadd.f32 %v3284_v13, %v3283_v56 }
 0x4e0   : > { %v3322_v37 = vsel %vm3314_vm14, %v3285_v0, %v3321_v30 }
 0x4e1   : > { %3326 = vst.msk [vmem:[%s643_s23 + $0x8] sm:$0xff] %vm1727_vm0, %v3322_v37 }
 0x4e2 PF: > { %s28_s27 = sadd.s32 1, %s3637_s27  }
 0x4e3   : > { %p25_p5 = scmp.ge.s32.totalorder %s28_s27, 6  }
 0x4e5   :  { %27 = sbr.rel (!%p25_p5) target bundleno = 4 (0x4), region = 131 }

</bundles_post_ra>
